<compile_context>
chip_gen: v5e
topology: v5e:2x2
jax: 0.10.0
libtpu: 0.0.40
codegen_flags: <defaults>
</compile_context>

<pallas_src>
import functools

import jax
import jax.numpy as jnp
from jax.experimental import pallas as pl
from jax.experimental.pallas import tpu as pltpu

C = 256            # hidden channels
LAG = 6            # time lags (input length)
STOPS = 5          # number of stops (output size)
LP1 = LAG // 2     # length after MaxPool1d(2)            -> 3
LP2 = LP1 - 1      # length after MaxPool1d(2, stride=1)  -> 2
OUT_PAD = 128      # lane-dense padded output width (sliced back to STOPS outside)


def conv_kernel(x_ref, w1_ref, b1_ref, w2_ref, b2_ref, w3_ref, b3_ref,
                wd1_ref, bd1_ref, wd2_ref, bd2_ref, wd3_ref, bd3_ref, o_ref):
    f32 = jnp.float32
    bf16 = jnp.bfloat16

    x = x_ref[...]                                               # (TB, 6)  bf16

    # ---- Conv1d(1, 256, k=3, pad=1) + ReLU: all 6 positions in ONE matmul ----
    # W1big's output-column blocks are ordered [pos0, pos2, pos4, pos1, pos3, pos5]
    # so MaxPool1d(2) is a single lane-aligned max of the two 768-wide halves.
    h1 = jnp.maximum(
        jnp.dot(x, w1_ref[...], preferred_element_type=f32) + b1_ref[...], 0.0)
    p1 = jnp.maximum(h1[:, :LP1 * C], h1[:, LP1 * C:]).astype(bf16)   # (TB, 768)

    # ---- Conv1d(256, 256, k=3, pad=1) + ReLU, one (TB,768)x(768,768) matmul each ----
    h2 = jnp.maximum(
        jnp.dot(p1, w2_ref[...], preferred_element_type=f32) + b2_ref[...],
        0.0).astype(bf16)                                        # (TB, 768)
    h3 = jnp.maximum(
        jnp.dot(h2, w3_ref[...], preferred_element_type=f32) + b3_ref[...],
        0.0)                                                     # (TB, 768) f32

    # ---- MaxPool1d(kernel=2, stride=1): positions [0,1] and [1,2] -> (TB, 512) ----
    # (The module's trailing ReLU is a no-op on already-ReLU'd values.)
    q = jnp.maximum(h3[:, :LP2 * C], h3[:, C:]).astype(bf16)     # [q0 | q1]

    # ---- Dense head (PyTorch NCL flatten order c*2+l folded into wd1 layout) ----
    d1 = jnp.maximum(
        jnp.dot(q, wd1_ref[...], preferred_element_type=f32) + bd1_ref[...],
        0.0).astype(bf16)
    d2 = jnp.maximum(
        jnp.dot(d1, wd2_ref[...], preferred_element_type=f32) + bd2_ref[...],
        0.0).astype(bf16)
    out = jnp.dot(d2, wd3_ref[...], preferred_element_type=f32) + bd3_ref[...]
    o_ref[...] = out.astype(o_ref.dtype)                         # (TB, 128)


def make_params(key):
    """Deterministic params in PyTorch layouts (synthetic init, not a checkpoint)."""
    ks = jax.random.split(key, 12)
    n = jax.random.normal
    W1 = n(ks[0], (C, 1, 3), jnp.float32) / jnp.sqrt(3.0)
    B1 = n(ks[1], (C,), jnp.float32) * 0.1
    W2 = n(ks[2], (C, C, 3), jnp.float32) / jnp.sqrt(3.0 * C)
    B2 = n(ks[3], (C,), jnp.float32) * 0.1
    W3 = n(ks[4], (C, C, 3), jnp.float32) / jnp.sqrt(3.0 * C)
    B3 = n(ks[5], (C,), jnp.float32) * 0.1
    Wd1 = n(ks[6], (C, 2 * C), jnp.float32) / jnp.sqrt(2.0 * C)
    Bd1 = n(ks[7], (C,), jnp.float32) * 0.1
    Wd2 = n(ks[8], (C, C), jnp.float32) / jnp.sqrt(1.0 * C)
    Bd2 = n(ks[9], (C,), jnp.float32) * 0.1
    Wd3 = n(ks[10], (STOPS, C), jnp.float32) / jnp.sqrt(1.0 * C)
    Bd3 = n(ks[11], (STOPS,), jnp.float32) * 0.1
    return dict(W1=W1, B1=B1, W2=W2, B2=B2, W3=W3, B3=B3,
                Wd1=Wd1, Bd1=Bd1, Wd2=Wd2, Bd2=Bd2, Wd3=Wd3, Bd3=Bd3)


def prepare_params(p, compute_dtype=jnp.bfloat16):
    """One-time glue: fold each conv / pool / flatten layout into weight slabs.

    Call this ONCE per parameter set; the returned tuple is what the forward
    consumes (keeps the per-call path free of layout shuffling).
    """
    f32 = jnp.float32
    cd = compute_dtype
    zcc = jnp.zeros((C, C), f32)
    bias_row = lambda v: v.reshape(1, -1).astype(f32)

    # conv1 -> (6, 6C) slab; output column order [0,2,4,1,3,5] so MaxPool1d(2)
    # is max of the two contiguous 768-wide halves.
    w1 = jnp.transpose(p["W1"][:, 0, :], (1, 0)).astype(f32)        # (3, C) [k, cout]
    cols = []
    for l in (0, 2, 4, 1, 3, 5):
        col = jnp.zeros((LAG, C), f32)
        for k in range(3):
            src = l + k - 1
            if 0 <= src < LAG:
                col = col.at[src].set(w1[k])
        cols.append(col)
    w1big = jnp.concatenate(cols, axis=1)                           # (6, 6C)

    def conv_slab(W):                                               # W: (Cout, Cin, 3)
        w = jnp.transpose(W, (2, 1, 0)).astype(f32)                 # (3, Cin, Cout)
        rows = []
        for i in range(LP1):                                        # input position
            blk = []
            for l in range(LP1):                                    # output position
                k = i - l + 1                                       # tap index
                blk.append(w[k] if 0 <= k < 3 else zcc)
            rows.append(jnp.concatenate(blk, axis=1))
        return jnp.concatenate(rows, axis=0)                        # (3C, 3C)

    w2big = conv_slab(p["W2"])
    w3big = conv_slab(p["W3"])

    # PyTorch flattens (B, C, 2) -> (B, 2C) with flat index c*2 + l => (l, c, o) rows.
    wd1 = jnp.transpose(p["Wd1"].reshape(C, C, 2), (2, 1, 0)).reshape(2 * C, C)
    wd2 = p["Wd2"].T                                                # (C, C)
    wd3 = jnp.zeros((C, OUT_PAD), f32).at[:, :STOPS].set(p["Wd3"].T.astype(f32))
    bd3 = jnp.zeros((1, OUT_PAD), f32).at[:, :STOPS].set(p["Bd3"][None, :])

    return (w1big.astype(cd), jnp.tile(bias_row(p["B1"]), (1, LAG)),
            w2big.astype(cd), jnp.tile(bias_row(p["B2"]), (1, LP1)),
            w3big.astype(cd), jnp.tile(bias_row(p["B3"]), (1, LP1)),
            wd1.astype(cd), bias_row(p["Bd1"]),
            wd2.astype(cd), bias_row(p["Bd2"]),
            wd3.astype(cd), bd3)


def _default_tile(batch):
    """Batch-tile: fill MXU rows, but don't pad tiny batches up to 256."""
    try:
        kind = jax.devices()[0].device_kind.lower()
    except Exception:                                               # pragma: no cover
        kind = ""
    # v7x: smaller VMEM, 2 TCs -> smaller tile; v5e/v6e: fill the MXU rows.
    tb_max = 128 if "v7" in kind else 256
    b8 = ((batch + 7) // 8) * 8                                     # sublane multiple
    return min(tb_max, b8)


@functools.partial(jax.jit, static_argnames=("tb",))
def _conv_forward_padded(x, kparams, tb):
    """x: (Bp, LAG) bf16 with Bp % tb == 0 -> (Bp, OUT_PAD) f32."""
    Bp = x.shape[0]
    n_tiles = Bp // tb

    def const_spec(a):                 # constant index_map => DMA'd to VMEM once
        nd = a.ndim
        return pl.BlockSpec(a.shape, lambda i, _nd=nd: (0,) * _nd)

    in_specs = [pl.BlockSpec((tb, LAG), lambda i: (i, 0))] + \
               [const_spec(a) for a in kparams]
    out_specs = pl.BlockSpec((tb, OUT_PAD), lambda i: (i, 0))

    f = pl.pallas_call(
        conv_kernel,
        out_shape=jax.ShapeDtypeStruct((Bp, OUT_PAD), jnp.float32),
        grid_spec=pltpu.PrefetchScalarGridSpec(
            num_scalar_prefetch=0,
            grid=(n_tiles,),
            in_specs=in_specs,
            out_specs=out_specs),
        compiler_params=pltpu.CompilerParams(
            dimension_semantics=("parallel",)),
    )
    return f(x, *kparams)


def conv_forward(inputs, kparams, tb=None):
    """inputs: (B, lag, stops) float32 -> (B, stops)  (PyTorch NCL semantics)."""
    B = inputs.shape[0]
    if tb is None:
        tb = _default_tile(B)
    n_tiles = pl.cdiv(B, tb)
    Bp = n_tiles * tb

    # forward() only uses bystop[0] = inputs[:, :, 0:1]; activations in bf16.
    x = inputs[:, :, 0].astype(jnp.bfloat16)                        # (B, LAG)
    if Bp != B:
        x = jnp.pad(x, ((0, Bp - B), (0, 0)))

    out = _conv_forward_padded(x, tuple(kparams), tb)
    return out[:B, :STOPS]


def ref_forward(inputs, p):
    """Independent pure-JAX f32 re-implementation of the PyTorch forward (NCL)."""
    x = inputs[:, :, 0][:, None, :]                                 # (B, 1, LAG)

    def conv1d(h, w, b):
        y = jax.lax.conv_general_dilated(
            h, w, window_strides=(1,), padding=[(1, 1)],
            dimension_numbers=("NCH", "OIH", "NCH"),
            precision=jax.lax.Precision.HIGHEST)
        return y + b[None, :, None]

    h = jax.nn.relu(conv1d(x, p["W1"], p["B1"]))                    # (B, C, 6)
    Bsz = h.shape[0]
    h = h.reshape(Bsz, C, LP1, 2).max(axis=-1)                      # MaxPool1d(2)
    h = jax.nn.relu(conv1d(h, p["W2"], p["B2"]))
    h = jax.nn.relu(conv1d(h, p["W3"], p["B3"]))
    h = jnp.maximum(h[:, :, :-1], h[:, :, 1:])                      # MaxPool1d(2, s=1)
    h = jax.nn.relu(h)
    flat = h.reshape(Bsz, 2 * C)                                    # C-major flatten
    d = jax.nn.relu(flat @ p["Wd1"].T + p["Bd1"])
    d = jax.nn.relu(d @ p["Wd2"].T + p["Bd2"])
    return d @ p["Wd3"].T + p["Bd3"]


if __name__ == "__main__":
    key = jax.random.PRNGKey(0)
    k_x, k_p = jax.random.split(key)
    B = 64                                     # small batch; tile adapts (no 256-pad)
    inputs = jax.random.normal(k_x, (B, LAG, STOPS), jnp.float32)
    params = make_params(k_p)
    kparams = prepare_params(params)           # layout glue done exactly once

    out = jax.block_until_ready(conv_forward(inputs, kparams))
    ref = jax.block_until_ready(ref_forward(inputs, params))

    assert out.shape == (B, STOPS)
    max_diff = jnp.max(jnp.abs(out - ref))
    assert jnp.allclose(out, ref, rtol=2e-2, atol=2e-2), \
        f"max abs diff {max_diff}"
    print("KERNEL_OK")
</pallas_src>

<mosaic_0001>
module attributes {stable_mosaic.version = 11 : i64} {
  func.func @conv_kernel(%arg0: i32, %arg1: memref<64x6xbf16, #tpu.memory_space<vmem>>, %arg2: memref<6x1536xbf16, #tpu.memory_space<vmem>>, %arg3: memref<1x1536xf32, #tpu.memory_space<vmem>>, %arg4: memref<768x768xbf16, #tpu.memory_space<vmem>>, %arg5: memref<1x768xf32, #tpu.memory_space<vmem>>, %arg6: memref<768x768xbf16, #tpu.memory_space<vmem>>, %arg7: memref<1x768xf32, #tpu.memory_space<vmem>>, %arg8: memref<512x256xbf16, #tpu.memory_space<vmem>>, %arg9: memref<1x256xf32, #tpu.memory_space<vmem>>, %arg10: memref<256x256xbf16, #tpu.memory_space<vmem>>, %arg11: memref<1x256xf32, #tpu.memory_space<vmem>>, %arg12: memref<256x128xbf16, #tpu.memory_space<vmem>>, %arg13: memref<1x128xf32, #tpu.memory_space<vmem>>, %arg14: memref<64x128xf32, #tpu.memory_space<vmem>>) attributes {dimension_semantics = [#tpu.dimension_semantics<parallel>], iteration_bounds = array<i64: 1>, scalar_prefetch = 0 : i64, scratch_operands = 0 : i64, tpu.core_type = #tpu.core_type<tc>, window_params = [{transform_indices = @transform_0, window_bounds = array<i64: 64, 6>}, {pipeline_mode = #tpu.pipeline_mode<synchronous>, transform_indices = @transform_1, window_bounds = array<i64: 6, 1536>}, {pipeline_mode = #tpu.pipeline_mode<synchronous>, transform_indices = @transform_2, window_bounds = array<i64: 1, 1536>}, {pipeline_mode = #tpu.pipeline_mode<synchronous>, transform_indices = @transform_3, window_bounds = array<i64: 768, 768>}, {pipeline_mode = #tpu.pipeline_mode<synchronous>, transform_indices = @transform_4, window_bounds = array<i64: 1, 768>}, {pipeline_mode = #tpu.pipeline_mode<synchronous>, transform_indices = @transform_5, window_bounds = array<i64: 768, 768>}, {pipeline_mode = #tpu.pipeline_mode<synchronous>, transform_indices = @transform_6, window_bounds = array<i64: 1, 768>}, {pipeline_mode = #tpu.pipeline_mode<synchronous>, transform_indices = @transform_7, window_bounds = array<i64: 512, 256>}, {pipeline_mode = #tpu.pipeline_mode<synchronous>, transform_indices = @transform_8, window_bounds = array<i64: 1, 256>}, {pipeline_mode = #tpu.pipeline_mode<synchronous>, transform_indices = @transform_9, window_bounds = array<i64: 256, 256>}, {pipeline_mode = #tpu.pipeline_mode<synchronous>, transform_indices = @transform_10, window_bounds = array<i64: 1, 256>}, {pipeline_mode = #tpu.pipeline_mode<synchronous>, transform_indices = @transform_11, window_bounds = array<i64: 256, 128>}, {pipeline_mode = #tpu.pipeline_mode<synchronous>, transform_indices = @transform_12, window_bounds = array<i64: 1, 128>}, {transform_indices = @transform_13, window_bounds = array<i64: 64, 128>}]} {
    %c0 = arith.constant 0 : index
    %c0_0 = arith.constant 0 : index
    %0 = vector.load %arg1[%c0, %c0_0] : memref<64x6xbf16, #tpu.memory_space<vmem>>, vector<64x6xbf16>
    %c0_1 = arith.constant 0 : index
    %c0_2 = arith.constant 0 : index
    %1 = vector.load %arg2[%c0_1, %c0_2] : memref<6x1536xbf16, #tpu.memory_space<vmem>>, vector<6x1536xbf16>
    %cst = arith.constant dense<0.000000e+00> : vector<64x1536xf32>
    %2 = tpu.matmul %0, %1, %cst {dimension_numbers = #tpu.dot_dimension_numbers<[1], [0], [0], [1], [0, 0, 1, 1], [], []>} : vector<64x6xbf16>, vector<6x1536xbf16>, vector<64x1536xf32> -> vector<64x1536xf32>
    %c0_3 = arith.constant 0 : index
    %c0_4 = arith.constant 0 : index
    %3 = vector.load %arg3[%c0_3, %c0_4] : memref<1x1536xf32, #tpu.memory_space<vmem>>, vector<1x1536xf32>
    %4 = vector.broadcast %3 : vector<1x1536xf32> to vector<64x1536xf32>
    %5 = arith.addf %2, %4 : vector<64x1536xf32>
    %cst_5 = arith.constant 0.000000e+00 : f32
    %6 = vector.broadcast %cst_5 : f32 to vector<64x1536xf32>
    %7 = arith.maximumf %5, %6 : vector<64x1536xf32>
    %8 = vector.extract_strided_slice %7 {offsets = [0, 0], sizes = [64, 768], strides = [1, 1]} : vector<64x1536xf32> to vector<64x768xf32>
    %9 = vector.extract_strided_slice %7 {offsets = [0, 768], sizes = [64, 768], strides = [1, 1]} : vector<64x1536xf32> to vector<64x768xf32>
    %10 = arith.maximumf %8, %9 : vector<64x768xf32>
    %11 = arith.truncf %10 : vector<64x768xf32> to vector<64x768xbf16>
    %c0_6 = arith.constant 0 : index
    %c0_7 = arith.constant 0 : index
    %12 = vector.load %arg4[%c0_6, %c0_7] : memref<768x768xbf16, #tpu.memory_space<vmem>>, vector<768x768xbf16>
    %cst_8 = arith.constant dense<0.000000e+00> : vector<64x768xf32>
    %13 = tpu.matmul %11, %12, %cst_8 {dimension_numbers = #tpu.dot_dimension_numbers<[1], [0], [0], [1], [0, 0, 1, 1], [], []>} : vector<64x768xbf16>, vector<768x768xbf16>, vector<64x768xf32> -> vector<64x768xf32>
    %c0_9 = arith.constant 0 : index
    %c0_10 = arith.constant 0 : index
    %14 = vector.load %arg5[%c0_9, %c0_10] : memref<1x768xf32, #tpu.memory_space<vmem>>, vector<1x768xf32>
    %15 = vector.broadcast %14 : vector<1x768xf32> to vector<64x768xf32>
    %16 = arith.addf %13, %15 : vector<64x768xf32>
    %cst_11 = arith.constant 0.000000e+00 : f32
    %17 = vector.broadcast %cst_11 : f32 to vector<64x768xf32>
    %18 = arith.maximumf %16, %17 : vector<64x768xf32>
    %19 = arith.truncf %18 : vector<64x768xf32> to vector<64x768xbf16>
    %c0_12 = arith.constant 0 : index
    %c0_13 = arith.constant 0 : index
    %20 = vector.load %arg6[%c0_12, %c0_13] : memref<768x768xbf16, #tpu.memory_space<vmem>>, vector<768x768xbf16>
    %cst_14 = arith.constant dense<0.000000e+00> : vector<64x768xf32>
    %21 = tpu.matmul %19, %20, %cst_14 {dimension_numbers = #tpu.dot_dimension_numbers<[1], [0], [0], [1], [0, 0, 1, 1], [], []>} : vector<64x768xbf16>, vector<768x768xbf16>, vector<64x768xf32> -> vector<64x768xf32>
    %c0_15 = arith.constant 0 : index
    %c0_16 = arith.constant 0 : index
    %22 = vector.load %arg7[%c0_15, %c0_16] : memref<1x768xf32, #tpu.memory_space<vmem>>, vector<1x768xf32>
    %23 = vector.broadcast %22 : vector<1x768xf32> to vector<64x768xf32>
    %24 = arith.addf %21, %23 : vector<64x768xf32>
    %cst_17 = arith.constant 0.000000e+00 : f32
    %25 = vector.broadcast %cst_17 : f32 to vector<64x768xf32>
    %26 = arith.maximumf %24, %25 : vector<64x768xf32>
    %27 = vector.extract_strided_slice %26 {offsets = [0, 0], sizes = [64, 512], strides = [1, 1]} : vector<64x768xf32> to vector<64x512xf32>
    %28 = vector.extract_strided_slice %26 {offsets = [0, 256], sizes = [64, 512], strides = [1, 1]} : vector<64x768xf32> to vector<64x512xf32>
    %29 = arith.maximumf %27, %28 : vector<64x512xf32>
    %30 = arith.truncf %29 : vector<64x512xf32> to vector<64x512xbf16>
    %c0_18 = arith.constant 0 : index
    %c0_19 = arith.constant 0 : index
    %31 = vector.load %arg8[%c0_18, %c0_19] : memref<512x256xbf16, #tpu.memory_space<vmem>>, vector<512x256xbf16>
    %cst_20 = arith.constant dense<0.000000e+00> : vector<64x256xf32>
    %32 = tpu.matmul %30, %31, %cst_20 {dimension_numbers = #tpu.dot_dimension_numbers<[1], [0], [0], [1], [0, 0, 1, 1], [], []>} : vector<64x512xbf16>, vector<512x256xbf16>, vector<64x256xf32> -> vector<64x256xf32>
    %c0_21 = arith.constant 0 : index
    %c0_22 = arith.constant 0 : index
    %33 = vector.load %arg9[%c0_21, %c0_22] : memref<1x256xf32, #tpu.memory_space<vmem>>, vector<1x256xf32>
    %34 = vector.broadcast %33 : vector<1x256xf32> to vector<64x256xf32>
    %35 = arith.addf %32, %34 : vector<64x256xf32>
    %cst_23 = arith.constant 0.000000e+00 : f32
    %36 = vector.broadcast %cst_23 : f32 to vector<64x256xf32>
    %37 = arith.maximumf %35, %36 : vector<64x256xf32>
    %38 = arith.truncf %37 : vector<64x256xf32> to vector<64x256xbf16>
    %c0_24 = arith.constant 0 : index
    %c0_25 = arith.constant 0 : index
    %39 = vector.load %arg10[%c0_24, %c0_25] : memref<256x256xbf16, #tpu.memory_space<vmem>>, vector<256x256xbf16>
    %cst_26 = arith.constant dense<0.000000e+00> : vector<64x256xf32>
    %40 = tpu.matmul %38, %39, %cst_26 {dimension_numbers = #tpu.dot_dimension_numbers<[1], [0], [0], [1], [0, 0, 1, 1], [], []>} : vector<64x256xbf16>, vector<256x256xbf16>, vector<64x256xf32> -> vector<64x256xf32>
    %c0_27 = arith.constant 0 : index
    %c0_28 = arith.constant 0 : index
    %41 = vector.load %arg11[%c0_27, %c0_28] : memref<1x256xf32, #tpu.memory_space<vmem>>, vector<1x256xf32>
    %42 = vector.broadcast %41 : vector<1x256xf32> to vector<64x256xf32>
    %43 = arith.addf %40, %42 : vector<64x256xf32>
    %cst_29 = arith.constant 0.000000e+00 : f32
    %44 = vector.broadcast %cst_29 : f32 to vector<64x256xf32>
    %45 = arith.maximumf %43, %44 : vector<64x256xf32>
    %46 = arith.truncf %45 : vector<64x256xf32> to vector<64x256xbf16>
    %c0_30 = arith.constant 0 : index
    %c0_31 = arith.constant 0 : index
    %47 = vector.load %arg12[%c0_30, %c0_31] : memref<256x128xbf16, #tpu.memory_space<vmem>>, vector<256x128xbf16>
    %cst_32 = arith.constant dense<0.000000e+00> : vector<64x128xf32>
    %48 = tpu.matmul %46, %47, %cst_32 {dimension_numbers = #tpu.dot_dimension_numbers<[1], [0], [0], [1], [0, 0, 1, 1], [], []>} : vector<64x256xbf16>, vector<256x128xbf16>, vector<64x128xf32> -> vector<64x128xf32>
    %c0_33 = arith.constant 0 : index
    %c0_34 = arith.constant 0 : index
    %49 = vector.load %arg13[%c0_33, %c0_34] : memref<1x128xf32, #tpu.memory_space<vmem>>, vector<1x128xf32>
    %50 = vector.broadcast %49 : vector<1x128xf32> to vector<64x128xf32>
    %51 = arith.addf %48, %50 : vector<64x128xf32>
    %c0_35 = arith.constant 0 : index
    %c0_36 = arith.constant 0 : index
    %52 = vector.load %arg14[%c0_35, %c0_36] : memref<64x128xf32, #tpu.memory_space<vmem>>, vector<64x128xf32>
    tpu.vector_store %arg14[%c0_35, %c0_36], %51 {strides = array<i32>} : memref<64x128xf32, #tpu.memory_space<vmem>>, vector<64x128xf32>,
    return
  }
  func.func @transform_0(%arg0: i32) -> (i32, i32) {
    %c0_i32 = arith.constant 0 : i32
    %c0_i32_0 = arith.constant 0 : i32
    return %arg0, %c0_i32 : i32, i32
  }
  func.func @transform_1(%arg0: i32) -> (i32, i32) {
    %c0_i32 = arith.constant 0 : i32
    %c0_i32_0 = arith.constant 0 : i32
    %c0_i32_1 = arith.constant 0 : i32
    return %c0_i32, %c0_i32_0 : i32, i32
  }
  func.func @transform_2(%arg0: i32) -> (i32, i32) {
    %c0_i32 = arith.constant 0 : i32
    %c0_i32_0 = arith.constant 0 : i32
    %c0_i32_1 = arith.constant 0 : i32
    return %c0_i32, %c0_i32_0 : i32, i32
  }
  func.func @transform_3(%arg0: i32) -> (i32, i32) {
    %c0_i32 = arith.constant 0 : i32
    %c0_i32_0 = arith.constant 0 : i32
    %c0_i32_1 = arith.constant 0 : i32
    return %c0_i32, %c0_i32_0 : i32, i32
  }
  func.func @transform_4(%arg0: i32) -> (i32, i32) {
    %c0_i32 = arith.constant 0 : i32
    %c0_i32_0 = arith.constant 0 : i32
    %c0_i32_1 = arith.constant 0 : i32
    return %c0_i32, %c0_i32_0 : i32, i32
  }
  func.func @transform_5(%arg0: i32) -> (i32, i32) {
    %c0_i32 = arith.constant 0 : i32
    %c0_i32_0 = arith.constant 0 : i32
    %c0_i32_1 = arith.constant 0 : i32
    return %c0_i32, %c0_i32_0 : i32, i32
  }
  func.func @transform_6(%arg0: i32) -> (i32, i32) {
    %c0_i32 = arith.constant 0 : i32
    %c0_i32_0 = arith.constant 0 : i32
    %c0_i32_1 = arith.constant 0 : i32
    return %c0_i32, %c0_i32_0 : i32, i32
  }
  func.func @transform_7(%arg0: i32) -> (i32, i32) {
    %c0_i32 = arith.constant 0 : i32
    %c0_i32_0 = arith.constant 0 : i32
    %c0_i32_1 = arith.constant 0 : i32
    return %c0_i32, %c0_i32_0 : i32, i32
  }
  func.func @transform_8(%arg0: i32) -> (i32, i32) {
    %c0_i32 = arith.constant 0 : i32
    %c0_i32_0 = arith.constant 0 : i32
    %c0_i32_1 = arith.constant 0 : i32
    return %c0_i32, %c0_i32_0 : i32, i32
  }
  func.func @transform_9(%arg0: i32) -> (i32, i32) {
    %c0_i32 = arith.constant 0 : i32
    %c0_i32_0 = arith.constant 0 : i32
    %c0_i32_1 = arith.constant 0 : i32
    return %c0_i32, %c0_i32_0 : i32, i32
  }
  func.func @transform_10(%arg0: i32) -> (i32, i32) {
    %c0_i32 = arith.constant 0 : i32
    %c0_i32_0 = arith.constant 0 : i32
    %c0_i32_1 = arith.constant 0 : i32
    return %c0_i32, %c0_i32_0 : i32, i32
  }
  func.func @transform_11(%arg0: i32) -> (i32, i32) {
    %c0_i32 = arith.constant 0 : i32
    %c0_i32_0 = arith.constant 0 : i32
    %c0_i32_1 = arith.constant 0 : i32
    return %c0_i32, %c0_i32_0 : i32, i32
  }
  func.func @transform_12(%arg0: i32) -> (i32, i32) {
    %c0_i32 = arith.constant 0 : i32
    %c0_i32_0 = arith.constant 0 : i32
    %c0_i32_1 = arith.constant 0 : i32
    return %c0_i32, %c0_i32_0 : i32, i32
  }
  func.func @transform_13(%arg0: i32) -> (i32, i32) {
    %c0_i32 = arith.constant 0 : i32
    %c0_i32_0 = arith.constant 0 : i32
    return %arg0, %c0_i32 : i32, i32
  }
}

</mosaic_0001>

<bundles_post_ra>
// kernel: _conv_forward_padded.1
= control target key start
LH: loop header
LB: loop body
LE: loop exit
PB: predicated region body
PF: predicated region fallthrough
CT: control target
= control target key end

     0   :  { %18 = vsyncpa [#allocation3], 0  ;;  %s13553_s0 = inlined_call_operand.vmem [shape: bf16[64,6], index: 0, kind: input, shape index: {}]   ;;  %s13554_s1 = inlined_call_operand.hbm [shape: bf16[6,1536], index: 1, kind: input, shape index: {}]   ;;  %s13555_s2 = inlined_call_operand.hbm [shape: f32[1,1536], index: 2, kind: input, shape index: {}]   ;;  %s13556_s3 = inlined_call_operand.hbm [shape: bf16[768,768], index: 3, kind: input, shape index: {}]   ;;  %s13557_s4 = inlined_call_operand.hbm [shape: f32[1,768], index: 4, kind: input, shape index: {}]   ;;  %s13558_s5 = inlined_call_operand.hbm [shape: bf16[768,768], index: 5, kind: input, shape index: {}]   ;;  %s13559_s6 = inlined_call_operand.hbm [shape: f32[1,768], index: 6, kind: input, shape index: {}]   ;;  %s13560_s7 = inlined_call_operand.hbm [shape: bf16[512,256], index: 7, kind: input, shape index: {}]   ;;  %s13561_s8 = inlined_call_operand.hbm [shape: f32[1,256], index: 8, kind: input, shape index: {}]   ;;  %s13562_s9 = inlined_call_operand.hbm [shape: bf16[256,256], index: 9, kind: input, shape index: {}]   ;;  %s13563_s10 = inlined_call_operand.hbm [shape: f32[1,256], index: 10, kind: input, shape index: {}]   ;;  %s13564_s11 = inlined_call_operand.hbm [shape: bf16[256,128], index: 11, kind: input, shape index: {}]   ;;  %s13565_s12 = inlined_call_operand.hbm [shape: f32[1,128], index: 12, kind: input, shape index: {}]   ;;  %s13566_s13 = inlined_call_operand.hbm [shape: f32[64,128], index: 13, kind: output, shape index: {}]  }
   0x1   :  { %19 = vsyncpa [#allocation6], 0 }
   0x2   :  { %20 = vsyncpa [#allocation9], 0 }
   0x3   :  { %21 = vsyncpa [#allocation12], 0 }
   0x4   :  { %22 = vsyncpa [#allocation15], 0 }
   0x5   :  { %23 = vsyncpa [#allocation18], 0 }
   0x6   :  { %24 = vsyncpa [#allocation21], 0  ;;  %s44_s27 = sshll.u32 %s13555_s2, 4  ;;  %s45_s27 = int_to_ptr.hbm [resolvable:$true] %s44_s27 }
   0x7   :  { %25 = vsyncpa [#allocation4], 0  ;;  %s11686_s28 = smov [#allocation5]   ;;  %s68_s15 = sshll.u32 %s13557_s4, 4  ;;  %s69_s15 = int_to_ptr.hbm [resolvable:$true] %s68_s15 }
   0x8   :  { %s46_s29 = sshll.u32 %s11686_s28, 4  ;;  %s11687_s16 = smov [#allocation8]   ;;  %s47_s29 = int_to_ptr.vmem [resolvable:$true] %s46_s29 }
   0x9   :  { %49 = dma.hbm_to_vmem [thread:$0]  %s45_s27, 192, %s47_s29, [#allocation6]  }
   0xa   :  { %s70_s17 = sshll.u32 %s11687_s16, 4  ;;  %s92_s20 = sshll.u32 %s13559_s6, 4  ;;  %s71_s17 = int_to_ptr.vmem [resolvable:$true] %s70_s17  ;;  %s93_s20 = int_to_ptr.hbm [resolvable:$true] %s92_s20 }
   0xb   :  { %73 = dma.hbm_to_vmem [thread:$0]  %s69_s15, 96, %s71_s17, [#allocation9]  }
   0xc   :  { %s116_s22 = sshll.u32 %s13561_s8, 4  ;;  %s11688_s23 = smov [#allocation11]   ;;  %s117_s22 = int_to_ptr.hbm [resolvable:$true] %s116_s22 }
   0xd   :  { %s94_s24 = sshll.u32 %s11688_s23, 4  ;;  %s11689_s4 = smov [#allocation14]   ;;  %s95_s24 = int_to_ptr.vmem [resolvable:$true] %s94_s24 }
   0xe   :  { %97 = dma.hbm_to_vmem [thread:$0]  %s93_s20, 96, %s95_s24, [#allocation12]  }
   0xf   :  { %s118_s25 = sshll.u32 %s11689_s4, 4  ;;  %s140_s28 = sshll.u32 %s13563_s10, 4  ;;  %s119_s25 = int_to_ptr.vmem [resolvable:$true] %s118_s25  ;;  %s141_s28 = int_to_ptr.hbm [resolvable:$true] %s140_s28 }
  0x10   :  { %121 = dma.hbm_to_vmem [thread:$0]  %s117_s22, 32, %s119_s25, [#allocation15]  }
  0x11   :  { %s33_s30 = sshll.u32 %s13554_s1, 4  ;;  %s11690_s14 = smov [#allocation17]   ;;  %s34_s30 = int_to_ptr.hbm [resolvable:$true] %s33_s30 }
  0x12   :  { %s142_s8 = sshll.u32 %s11690_s14, 4  ;;  %s11691_s15 = smov [#allocation2]   ;;  %s143_s8 = int_to_ptr.vmem [resolvable:$true] %s142_s8 }
  0x13   :  { %145 = dma.hbm_to_vmem [thread:$0]  %s141_s28, 32, %s143_s8, [#allocation18]  }
  0x14   :  { %s35_s16 = sshll.u32 %s11691_s15, 4  ;;  %s54_s19 = sshll.u32 %s13556_s3, 4  ;;  %s36_s16 = int_to_ptr.vmem [resolvable:$true] %s35_s16  ;;  %s55_s19 = int_to_ptr.hbm [resolvable:$true] %s54_s19 }
  0x15   :  { %38 = dma.hbm_to_vmem [thread:$0]  %s34_s30, 768, %s36_s16, [#allocation3]  }
  0x16   :  { %s11692_s10 = smov [#allocation7]   ;;  %s78_s1 = sshll.u32 %s13558_s5, 4  ;;  %s79_s1 = int_to_ptr.hbm [resolvable:$true] %s78_s1 }
  0x17   :  { %s56_s20 = sshll.u32 %s11692_s10, 4  ;;  %s11693_s22 = smov 384   ;;  %s57_s20 = int_to_ptr.vmem [resolvable:$true] %s56_s20 }
  0x18   :  { %s11694_s23 = smov 24   ;;  %s11695_s24 = smov [#allocation10]  }
  0x19   :  { %62 = dma.hbm_to_vmem [thread:$0]  %s55_s19, 36864, %s57_s20, [#allocation6], %s11693_s22, %s11693_s22, %s11694_s23  }
  0x1a   :  { %s80_s4 = sshll.u32 %s11695_s24, 4  ;;  %s102_s3 = sshll.u32 %s13560_s7, 4  ;;  %s81_s4 = int_to_ptr.vmem [resolvable:$true] %s80_s4  ;;  %s103_s3 = int_to_ptr.hbm [resolvable:$true] %s102_s3 }
  0x1b   :  { %86 = dma.hbm_to_vmem [thread:$0]  %s79_s1, 36864, %s81_s4, [#allocation9], %s11693_s22, %s11693_s22, %s11694_s23  }
  0x1c   :  { %s11696_s27 = smov [#allocation13]   ;;  %s126_s5 = sshll.u32 %s13562_s9, 4  ;;  %s127_s5 = int_to_ptr.hbm [resolvable:$true] %s126_s5 }
  0x1d   :  { %s104_s28 = sshll.u32 %s11696_s27, 4  ;;  %s11697_s30 = smov 128   ;;  %s105_s28 = int_to_ptr.vmem [resolvable:$true] %s104_s28 }
  0x1e   :  { %s11698_s14 = smov 8   ;;  %s11699_s8 = smov [#allocation16]  }
  0x1f   :  { %110 = dma.hbm_to_vmem [thread:$0]  %s103_s3, 8192, %s105_s28, [#allocation12], %s11697_s30, %s11697_s30, %s11698_s14  }
  0x20   :  { %s128_s15 = sshll.u32 %s11699_s8, 4  ;;  %s150_s17 = sshll.u32 %s13564_s11, 4  ;;  %s129_s15 = int_to_ptr.vmem [resolvable:$true] %s128_s15  ;;  %s151_s17 = int_to_ptr.hbm [resolvable:$true] %s150_s17 }
  0x21   :  { %134 = dma.hbm_to_vmem [thread:$0]  %s127_s5, 4096, %s129_s15, [#allocation15], %s11697_s30, %s11697_s30, %s11698_s14  }
  0x22   :  { %s11700_s9 = smov [#allocation19]   ;;  %s164_s20 = sshll.u32 %s13565_s12, 4  ;;  %s165_s20 = int_to_ptr.hbm [resolvable:$true] %s164_s20 }
  0x23   :  { %s152_s18 = sshll.u32 %s11700_s9, 4  ;;  %s11701_s2 = smov 64   ;;  %s153_s18 = int_to_ptr.vmem [resolvable:$true] %s152_s18 }
  0x24   :  { %s11702_s21 = smov 4   ;;  %s11703_s1 = smov [#allocation20]  }
  0x25   :  { %158 = dma.hbm_to_vmem [thread:$0]  %s151_s17, 2048, %s153_s18, [#allocation18], %s11701_s2, %s11701_s2, %s11702_s21  }
  0x26   :  { %s166_s22 = sshll.u32 %s11703_s1, 4  ;;  %s167_s22 = int_to_ptr.vmem [resolvable:$true] %s166_s22 }
  0x27   :  { %169 = dma.hbm_to_vmem [thread:$0]  %s165_s20, 16, %s167_s22, [#allocation21]  }
  0x28   :  { %11670 = dma.done.wait [#allocation3], 768  }
  0x29   :  { %11671 = vsyncadd [#allocation3], 4294966528 }
  0x2a   :  { %11672 = dma.done.wait [#allocation6], 37056  }
  0x2b   :  { %11673 = vsyncadd [#allocation6], 4294930240 }
  0x2c   :  { %11674 = dma.done.wait [#allocation9], 36960  }
  0x2d   :  { %11675 = vsyncadd [#allocation9], 4294930336 }
  0x2e   :  { %11676 = dma.done.wait [#allocation12], 8288  }
  0x2f   :  { %11677 = vsyncadd [#allocation12], 4294959008 }
  0x30   :  { %11678 = dma.done.wait [#allocation15], 4128  }
  0x31   :  { %11679 = vsyncadd [#allocation15], 4294963168 }
  0x32   :  { %11680 = dma.done.wait [#allocation18], 2080  }
  0x33   :  { %11681 = vsyncadd [#allocation18], 4294965216 }
  0x34   :  { %11682 = dma.done.wait [#allocation21], 16  }
  0x35   :  { %11683 = vsyncadd [#allocation21], 4294967280  ;;  %v227_v0 = vld [vmem:[#allocation2] sm:$0x77]  ;;  %vm324_vm0 = vcmask 1042432   ;;  %v11827_v18 = vld [vmem:[%s13553_s0 + $0x10] sm:$0xff] }
  0x36   :  { %v287_v1 = vunpack.c.l.b16 %v227_v0  ;;  %v288_v2 = vunpack.c.h.b16 %v227_v0  ;;  %v228_v3 = vld [vmem:[#allocation2 + $0x8] sm:$0x77]  ;;  %v229_v4 = vld [vmem:[#allocation2 + $0x10] sm:$0x77]  ;;  %v11822_v17 = vld [vmem:[%s13553_s0] sm:$0xff]  ;;  %vm311_vm1 = vcmask 48128  }
  0x37   :  { %v289_v5 = vunpack.c.l.b16 %v228_v3  ;;  %v290_v6 = vunpack.c.h.b16 %v228_v3  ;;  %v291_v7 = vunpack.c.l.b16 %v229_v4  ;;  %v292_v8 = vunpack.c.h.b16 %v229_v4  ;;  %v230_v23 = vld [vmem:[#allocation2 + $0x18] sm:$0x77]  ;;  %v231_v24 = vld [vmem:[#allocation2 + $0x20] sm:$0x77]  ;;  %v11848_v37 = vld [vmem:[%s13553_s0 + $0x8] sm:$0xff]  ;;  %s7805_s29 = sshll.u32 %s13566_s13, 4  ;;  %s7806_s29 = int_to_ptr.hbm [resolvable:$true] %s7805_s29 }
  0x38   :  { %v299_v9 = vpack.c.b16 %v287_v1, %v287_v1  ;;  %v300_v10 = vpack.c.b16 %v288_v2, %v288_v2  ;;  %v293_v25 = vunpack.c.l.b16 %v230_v23  ;;  %v294_v26 = vunpack.c.h.b16 %v230_v23  ;;  %v11853_v38 = vld [vmem:[%s13553_s0 + $0x18] sm:$0xff]  ;;  %v232_v39 = vld [vmem:[#allocation2 + $0x28] sm:$0x77]  ;;  %v10785_v57 = vld [vmem:[#allocation7 + $0x464] sm:$0xf0]  ;;  %s11704_s0 = smov [#allocation22]  }
  0x39   :  { %v301_v11 = vpack.c.b16 %v289_v5, %v289_v5  ;;  %v302_v12 = vpack.c.b16 %v290_v6, %v290_v6  ;;  %v303_v13 = vpack.c.b16 %v291_v7, %v291_v7  ;;  %v304_v14 = vpack.c.b16 %v292_v8, %v292_v8  ;;  %v8442_v56 = vld [vmem:[#allocation7 + $0x450] sm:$0xf]  ;;  %v10689_v0 = vld [vmem:[#allocation7 + $0x164] sm:$0xf0]  ;;  %v8418_v8 = vld [vmem:[#allocation7 + $0x420] sm:$0xf] }
  0x3a   :  { %v326_v15 = vsel %vm324_vm0, %v299_v9, 0  ;;  %v329_v16 = vsel %vm324_vm0, %v300_v10, 0  ;;  %v295_v27 = vunpack.c.l.b16 %v231_v24  ;;  %v296_v28 = vunpack.c.h.b16 %v231_v24  ;;  %v8058_v63 = vld [vmem:[#allocation7 + $0x150] sm:$0xf]  ;;  %v10833_v3 = vld [vmem:[#allocation7 + $0x5e4] sm:$0xf0] }
  0x3b   :  { %368 = vmatpush.bf16.msra.mxu0 %v326_v15  ;;  %11332 = vmatpush.bf16.msra.mxu2 %v326_v15  ;;  %v332_v19 = vsel %vm324_vm0, %v301_v11, 0  ;;  %v335_v20 = vsel %vm324_vm0, %v302_v12, 0  ;;  %v338_v21 = vsel %vm324_vm0, %v303_v13, 0  ;;  %v341_v22 = vsel %vm324_vm0, %v304_v14, 0  ;;  %v8634_v2 = vld [vmem:[#allocation7 + $0x5d0] sm:$0xf] }
  0x3c   :  { %397 = vmatpush.bf16.msra.mxu1 %v329_v16  ;;  %11333 = vmatpush.bf16.msra.mxu3 %v329_v16  ;;  %v305_v29 = vpack.c.b16 %v293_v25, %v293_v25  ;;  %v306_v30 = vpack.c.b16 %v294_v26, %v294_v26  ;;  %v307_v31 = vpack.c.b16 %v295_v27, %v295_v27  ;;  %v297_v40 = vunpack.c.l.b16 %v232_v39  ;;  %v8250_v5 = vld [vmem:[#allocation7 + $0x2d0] sm:$0xf]  ;;  %v10737_v6 = vld [vmem:[#allocation7 + $0x2e4] sm:$0xf0]  ;;  %v10779_v9 = vld [vmem:[#allocation7 + $0x434] sm:$0xf0] }
  0x3d   :  { %v308_v32 = vpack.c.b16 %v296_v28, %v296_v28  ;;  %v298_v41 = vunpack.c.h.b16 %v232_v39  ;;  %v8443_v58 = vor.u32 %v10785_v57, %v8442_v56  ;;  %v8059_v1 = vor.u32 %v10689_v0, %v8058_v63  ;;  %v8034_v15 = vld [vmem:[#allocation7 + $0x120] sm:$0xf]  ;;  %v10683_v16 = vld [vmem:[#allocation7 + $0x134] sm:$0xf0]  ;;  %v8394_v26 = vld [vmem:[#allocation7 + $0x3f0] sm:$0xf] }
  0x3e   :  { %7840 = vmatmul.msk.bf16.vlgmr.msra.gmra.mxu0 %vm311_vm1, %v11822_v17  ;;  %7842 = vmatmul.msk.bf16.vlgmr.msra.gmra.mxu2 %vm311_vm1, %v11827_v18  ;;  %v344_v33 = vsel %vm324_vm0, %v305_v29, 0  ;;  %v347_v34 = vsel %vm324_vm0, %v306_v30, 0  ;;  %v350_v35 = vsel %vm324_vm0, %v307_v31, 0  ;;  %v309_v42 = vpack.c.b16 %v297_v40, %v297_v40  ;;  %v8226_v23 = vld [vmem:[#allocation7 + $0x2a0] sm:$0xf]  ;;  %s7803_s27 = sshll.u32 %s11704_s0, 4  ;;  %s7804_s27 = int_to_ptr.vmem [resolvable:$true] %s7803_s27 }
  0x3f   :  { %426 = vmatpush.bf16.msrb.mxu2 %v332_v19  ;;  %7844 = vmatmul.msk.bf16.vlgmr.msra.gmra.mxu1 %vm311_vm1, %v11822_v17  ;;  %v353_v36 = vsel %vm324_vm0, %v308_v32, 0  ;;  %v310_v43 = vpack.c.b16 %v298_v41, %v298_v41  ;;  %v8635_v4 = vor.u32 %v10833_v3, %v8634_v2  ;;  %v8251_v7 = vor.u32 %v10737_v6, %v8250_v5  ;;  %v10731_v24 = vld [vmem:[#allocation7 + $0x2b4] sm:$0xf0]  ;;  %v10773_v27 = vld [vmem:[#allocation7 + $0x404] sm:$0xf0] }
  0x40   :  { %455 = vmatpush.bf16.msrb.mxu3 %v335_v20  ;;  %484 = vmatpush.bf16.msrb.mxu0 %v338_v21  ;;  %v356_v44 = vsel %vm324_vm0, %v309_v42, 0  ;;  %v8419_v11 = vor.u32 %v10779_v9, %v8418_v8  ;;  %v8035_v19 = vor.u32 %v10683_v16, %v8034_v15  ;;  %v8610_v20 = vld [vmem:[#allocation7 + $0x5a0] sm:$0xf]  ;;  %v10827_v21 = vld [vmem:[#allocation7 + $0x5b4] sm:$0xf0]  ;;  %v8227_v25 = vor.u32 %v10731_v24, %v8226_v23 }
  0x41   :  { %7846 = vmatmul.msk.bf16.vlgmr.msra.gmra.mxu3 %vm311_vm1, %v11827_v18  ;;  %513 = vmatpush.bf16.msrb.mxu1 %v341_v22  ;;  %v359_v45 = vsel %vm324_vm0, %v310_v43, 0  ;;  %v8611_v22 = vor.u32 %v10827_v21, %v8610_v20  ;;  %v8395_v29 = vor.u32 %v10773_v27, %v8394_v26  ;;  %v8202_v40 = vld [vmem:[#allocation7 + $0x270] sm:$0xf]  ;;  %v10725_v41 = vld [vmem:[#allocation7 + $0x284] sm:$0xf0] }
  0x42   :  { %v8203_v42 = vor.u32 %v10725_v41, %v8202_v40  ;;  %v8370_v43 = vld [vmem:[#allocation7 + $0x3c0] sm:$0xf]  ;;  %v8346_v9 = vld [vmem:[#allocation7 + $0x390] sm:$0xf] }
  0x43   :  { %542 = vmatpush.bf16.msra.mxu2 %v344_v33  ;;  %v10677_v33 = vld [vmem:[#allocation7 + $0x104] sm:$0xf0]  ;;  %v7986_v0 = vld [vmem:[#allocation7 + $0xc0] sm:$0xf]  ;;  %v8538_v24 = vld [vmem:[#allocation7 + $0x510] sm:$0xf] }
  0x44   :  { %571 = vmatpush.bf16.msra.mxu3 %v347_v34  ;;  %600 = vmatpush.bf16.msra.mxu0 %v350_v35  ;;  %v8586_v35 = vld [vmem:[#allocation7 + $0x570] sm:$0xf]  ;;  %v8562_v3 = vld [vmem:[#allocation7 + $0x540] sm:$0xf] }
  0x45   :  { %629 = vmatpush.bf16.msra.mxu1 %v353_v36  ;;  %v10821_v36 = vld [vmem:[#allocation7 + $0x584] sm:$0xf0]  ;;  %v8178_v6 = vld [vmem:[#allocation7 + $0x240] sm:$0xf]  ;;  %v8154_v27 = vld [vmem:[#allocation7 + $0x210] sm:$0xf] }
  0x46   :  { %v8587_v39 = vor.u32 %v10821_v36, %v8586_v35 }
  0x4e   :  { %7841 = vmatmul.msk.bf16.gmra.mxu0 %vm311_vm1, %v11848_v37  ;;  %7843 = vmatmul.msk.bf16.gmra.mxu2 %vm311_vm1, %v11853_v38 }
  0x4f   :  { %7845 = vmatmul.msk.bf16.gmra.mxu1 %vm311_vm1, %v11848_v37 }
  0x51   :  { %7847 = vmatmul.msk.bf16.gmra.mxu3 %vm311_vm1, %v11853_v38 }
  0x5e   :  { %7848 = vmatmul.msk.bf16.vlgmr.msrb.gmra.mxu2 %vm311_vm1, %v11822_v17  ;;  %7856 = vmatmul.msk.bf16.vlgmr.msrb.gmra.mxu0 %vm311_vm1, %v11822_v17 }
  0x5f   :  { %7860 = vmatmul.msk.bf16.vlgmr.msrb.gmra.mxu1 %vm311_vm1, %v11822_v17  ;;  %658 = vmatpush.bf16.msrb.mxu2 %v356_v44  ;;  %v10767_v44 = vld [vmem:[#allocation7 + $0x3d4] sm:$0xf0] }
  0x60   :  { %2619 = vmatpush.bf16.msrb.mxu0 %v8059_v1  ;;  %2648 = vmatpush.bf16.msrb.mxu1 %v8251_v7  ;;  %v8371_v56 = vor.u32 %v10767_v44, %v8370_v43  ;;  %v10671_v1 = vld [vmem:[#allocation7 + $0xd4] sm:$0xf0] }
  0x61   :  { %7852 = vmatmul.msk.bf16.vlgmr.msrb.gmra.mxu3 %vm311_vm1, %v11822_v17  ;;  %v7987_v2 = vor.u32 %v10671_v1, %v7986_v0  ;;  %v10719_v7 = vld [vmem:[#allocation7 + $0x254] sm:$0xf0] }
  0x62   :  { %687 = vmatpush.bf16.msrb.mxu3 %v359_v45  ;;  %v8179_v8 = vor.u32 %v10719_v7, %v8178_v6  ;;  %v10659_v43 = vld [vmem:[#allocation7 + $0x74] sm:$0xf0] }
  0x63   :  { %v10803_v0 = vld [vmem:[#allocation7 + $0x4f4] sm:$0xf0] }
  0x64   :  { %2620 = vmatpush.bf16.msrb.mxu0 %v8035_v19  ;;  %2649 = vmatpush.bf16.msrb.mxu1 %v8227_v25  ;;  %v10809_v25 = vld [vmem:[#allocation7 + $0x524] sm:$0xf0] }
  0x65   :  { %v8539_v26 = vor.u32 %v10809_v25, %v8538_v24  ;;  %v10653_v24 = vld [vmem:[#allocation7 + $0x44] sm:$0xf0] }
  0x68   :  { %2650 = vmatpush.bf16.msrb.mxu1 %v8203_v42  ;;  %v7938_v42 = vld [vmem:[#allocation7 + $0x60] sm:$0xf] }
  0x69   :  { %v7939_v44 = vor.u32 %v10659_v43, %v7938_v42  ;;  %v10791_v42 = vld [vmem:[#allocation7 + $0x494] sm:$0xf0] }
  0x6c   :  { %2651 = vmatpush.bf16.msrb.mxu1 %v8179_v8  ;;  %v10749_v8 = vld [vmem:[#allocation7 + $0x344] sm:$0xf0] }
  0x6e   :  { %7849 = vmatmul.msk.bf16.gmra.mxu2 %vm311_vm1, %v11848_v37  ;;  %7857 = vmatmul.msk.bf16.gmra.mxu0 %vm311_vm1, %v11848_v37 }
  0x6f   :  { %7861 = vmatmul.msk.bf16.gmra.mxu1 %vm311_vm1, %v11848_v37 }
  0x71   :  { %7853 = vmatmul.msk.bf16.gmra.mxu3 %vm311_vm1, %v11848_v37 }
  0x7e   :  { %7850 = vmatmul.msk.bf16.gmra.mxu2 %vm311_vm1, %v11827_v18  ;;  %7858 = vmatmul.msk.bf16.gmra.mxu0 %vm311_vm1, %v11827_v18 }
  0x7f   :  { %7862 = vmatmul.msk.bf16.gmra.mxu1 %vm311_vm1, %v11827_v18 }
  0x81   :  { %7854 = vmatmul.msk.bf16.gmra.mxu3 %vm311_vm1, %v11827_v18 }
  0x8e   :  { %7851 = vmatmul.msk.bf16.gmra.mxu2 %vm311_vm1, %v11853_v38  ;;  %7859 = vmatmul.msk.bf16.gmra.mxu0 %vm311_vm1, %v11853_v38 }
  0x8f   :  { %7863 = vmatmul.msk.bf16.gmra.mxu1 %vm311_vm1, %v11853_v38 }
  0x91   :  { %7855 = vmatmul.msk.bf16.gmra.mxu3 %vm311_vm1, %v11853_v38 }
  0x9e   :  { %7864 = vmatmul.msk.bf16.vlgmr.msra.gmra.mxu2 %vm311_vm1, %v11822_v17  ;;  %7872 = vmatmul.msk.bf16.vlgmr.msra.gmra.mxu0 %vm311_vm1, %v11822_v17 }
  0x9f   :  { %7876 = vmatmul.msk.bf16.vlgmr.msra.gmra.mxu1 %vm311_vm1, %v11822_v17  ;;  %2677 = vmatpush.bf16.msra.mxu2 %v8443_v58 }
  0xa1   :  { %7868 = vmatmul.msk.bf16.vlgmr.msra.gmra.mxu3 %vm311_vm1, %v11822_v17 }
  0xa2   :  { %2706 = vmatpush.bf16.msra.mxu3 %v8635_v4  ;;  %v10815_v4 = vld [vmem:[#allocation7 + $0x554] sm:$0xf0] }
  0xa3   :  { %2678 = vmatpush.bf16.msra.mxu2 %v8419_v11  ;;  %v8563_v5 = vor.u32 %v10815_v4, %v8562_v3  ;;  %v10761_v11 = vld [vmem:[#allocation7 + $0x3a4] sm:$0xf0]  ;;  %v8130_v3 = vld [vmem:[#allocation7 + $0x1e0] sm:$0xf]  ;;  %v10707_v4 = vld [vmem:[#allocation7 + $0x1f4] sm:$0xf0] }
  0xa4   :  { %v8347_v16 = vor.u32 %v10761_v11, %v8346_v9  ;;  %v8131_v7 = vor.u32 %v10707_v4, %v8130_v3  ;;  %v7890_v3 = vld [vmem:[#allocation7] sm:$0xf]  ;;  %v10647_v4 = vld [vmem:[#allocation7 + $0x14] sm:$0xf0] }
  0xa6   :  { %2707 = vmatpush.bf16.msra.mxu3 %v8611_v22  ;;  %v10665_v22 = vld [vmem:[#allocation7 + $0xa4] sm:$0xf0] }
  0xa7   :  { %2679 = vmatpush.bf16.msra.mxu2 %v8395_v29  ;;  %v10713_v29 = vld [vmem:[#allocation7 + $0x224] sm:$0xf0] }
  0xaa   :  { %2708 = vmatpush.bf16.msra.mxu3 %v8587_v39 }
  0xab   :  { %2680 = vmatpush.bf16.msra.mxu2 %v8371_v56  ;;  %v8514_v56 = vld [vmem:[#allocation7 + $0x4e0] sm:$0xf] }
  0xac   :  { %v8515_v1 = vor.u32 %v10803_v0, %v8514_v56 }
  0xae   :  { %7865 = vmatmul.msk.bf16.gmra.mxu2 %vm311_vm1, %v11848_v37  ;;  %7873 = vmatmul.msk.bf16.gmra.mxu0 %vm311_vm1, %v11848_v37 }
  0xaf   :  { %7877 = vmatmul.msk.bf16.gmra.mxu1 %vm311_vm1, %v11848_v37  ;;  %2709 = vmatpush.bf16.msra.mxu3 %v8563_v5  ;;  %v8298_v5 = vld [vmem:[#allocation7 + $0x330] sm:$0xf] }
  0xb0   :  { %2681 = vmatpush.bf16.msra.mxu2 %v8347_v16  ;;  %v8299_v11 = vor.u32 %v10749_v8, %v8298_v5  ;;  %v8490_v16 = vld [vmem:[#allocation7 + $0x4b0] sm:$0xf]  ;;  %v7891_v5 = vor.u32 %v10647_v4, %v7890_v3  ;;  %v10695_v8 = vld [vmem:[#allocation7 + $0x194] sm:$0xf0] }
  0xb1   :  { %7869 = vmatmul.msk.bf16.gmra.mxu3 %vm311_vm1, %v11848_v37  ;;  %v9018_v4 = vld [vmem:[#allocation7 + $0x8d0] sm:$0xf] }
  0xb3   :  { %2710 = vmatpush.bf16.msra.mxu3 %v8539_v26  ;;  %v8274_v26 = vld [vmem:[#allocation7 + $0x300] sm:$0xf] }
  0xb7   :  { %2711 = vmatpush.bf16.msra.mxu3 %v8515_v1 }
  0xbb   :  { %v11913_v46 = vpop.f32.mrf.mxu0 }
  0xbc   :  { %v11915_v47 = vpop.f32.mrf.mxu1 }
  0xbe   :  { %7866 = vmatmul.msk.bf16.gmra.mxu2 %vm311_vm1, %v11827_v18  ;;  %7874 = vmatmul.msk.bf16.gmra.mxu0 %vm311_vm1, %v11827_v18 }
  0xbf   :  { %7878 = vmatmul.msk.bf16.gmra.mxu1 %vm311_vm1, %v11827_v18 }
  0xc1   :  { %7870 = vmatmul.msk.bf16.gmra.mxu3 %vm311_vm1, %v11827_v18  ;;  %v11925_v48 = vpop.f32.mrf.mxu2 }
  0xc3   :  { %v11929_v50 = vpop.f32.mrf.mxu0 }
  0xc4   :  { %v11927_v49 = vpop.f32.mrf.mxu3  ;;  %v11931_v51 = vpop.f32.mrf.mxu1 }
  0xc9   :  { %v11933_v52 = vpop.f32.mrf.mxu2 }
  0xcb   :  { %v11937_v54 = vpop.f32.mrf.mxu0 }
  0xcc   :  { %v11935_v53 = vpop.f32.mrf.mxu3  ;;  %v11939_v55 = vpop.f32.mrf.mxu1 }
  0xce   :  { %7867 = vmatmul.msk.bf16.gmra.mxu2 %vm311_vm1, %v11853_v38  ;;  %7875 = vmatmul.msk.bf16.gmra.mxu0 %vm311_vm1, %v11853_v38 }
  0xcf   :  { %7879 = vmatmul.msk.bf16.gmra.mxu1 %vm311_vm1, %v11853_v38 }
  0xd1   :  { %7871 = vmatmul.msk.bf16.gmra.mxu3 %vm311_vm1, %v11853_v38  ;;  %v11949_v59 = vpop.f32.mrf.mxu2 }
  0xd3   :  { %v11953_v61 = vpop.f32.mrf.mxu0 }
  0xd4   :  { %v11951_v60 = vpop.f32.mrf.mxu3  ;;  %v11955_v62 = vpop.f32.mrf.mxu1 }
  0xd9   :  { %v11957_v10 = vpop.f32.mrf.mxu2 }
  0xdb   :  { %v11961_v13 = vpop.f32.mrf.mxu0 }
  0xdc   :  { %v11959_v12 = vpop.f32.mrf.mxu3  ;;  %13598 = vst [vmem:[#allocation31_spill] sm:$0xff] %v11961_v13  ;;  %v11963_v14 = vpop.f32.mrf.mxu1 }
  0xdd   :  { %13599 = vst [vmem:[#allocation32_spill] sm:$0xff] %v11963_v14 }
  0xde   :  { %7880 = vmatmul.msk.bf16.vlgmr.msrb.gmra.mxu2 %vm311_vm1, %v11822_v17 }
  0xe1   :  { %7884 = vmatmul.msk.bf16.vlgmr.msrb.gmra.mxu3 %vm311_vm1, %v11822_v17  ;;  %v11969_v28 = vpop.f32.mrf.mxu2  ;;  %v8010_v17 = vld [vmem:[#allocation7 + $0xf0] sm:$0xf] }
  0xe2   :  { %v8011_v34 = vor.u32 %v10677_v33, %v8010_v17  ;;  %v8155_v17 = vor.u32 %v10713_v29, %v8154_v27  ;;  %v8322_v33 = vld [vmem:[#allocation7 + $0x360] sm:$0xf]  ;;  %v10743_v27 = vld [vmem:[#allocation7 + $0x314] sm:$0xf0] }
  0xe3   :  { %v11973_v31 = vpop.f32.mrf.mxu0  ;;  %v8466_v29 = vld [vmem:[#allocation7 + $0x480] sm:$0xf] }
  0xe4   :  { %v11971_v30 = vpop.f32.mrf.mxu3  ;;  %13600 = vst [vmem:[#allocation33_spill] sm:$0xff] %v11973_v31  ;;  %v11975_v32 = vpop.f32.mrf.mxu1  ;;  %2621 = vmatpush.bf16.msrb.mxu0 %v8011_v34  ;;  %v10755_v34 = vld [vmem:[#allocation7 + $0x374] sm:$0xf0]  ;;  %2652 = vmatpush.bf16.msrb.mxu1 %v8155_v17  ;;  %v8467_v56 = vor.u32 %v10791_v42, %v8466_v29  ;;  %v10881_v29 = vld [vmem:[#allocation7 + $0x764] sm:$0xf0] }
  0xe5   :  { %13601 = vst [vmem:[#allocation34_spill] sm:$0xff] %v11975_v32  ;;  %v8323_v36 = vor.u32 %v10755_v34, %v8322_v33  ;;  %v8106_v33 = vld [vmem:[#allocation7 + $0x1b0] sm:$0xf]  ;;  %v10701_v34 = vld [vmem:[#allocation7 + $0x1c4] sm:$0xf0] }
  0xe6   :  { %v12039_v42 = vld [vmem:[#allocation5 + $0x8] sm:$0xf] }
  0xe7   :  { %2682 = vmatpush.bf16.msra.mxu2 %v8323_v36  ;;  %v8275_v36 = vor.u32 %v10743_v27, %v8274_v26  ;;  %v8826_v27 = vld [vmem:[#allocation7 + $0x750] sm:$0xf]  ;;  %13614 = vst [vmem:[#allocation47_spill] sm:$0xff] %v12039_v42 }
  0xe8   :  { %2622 = vmatpush.bf16.msrb.mxu0 %v7987_v2  ;;  %2653 = vmatpush.bf16.msrb.mxu1 %v8131_v7  ;;  %v8082_v7 = vld [vmem:[#allocation7 + $0x180] sm:$0xf] }
  0xe9   :  { %v11977_v45 = vpop.f32.mrf.mxu2 }
  0xeb   :  { %v11981_v58 = vpop.f32.mrf.mxu0  ;;  %2683 = vmatpush.bf16.msra.mxu2 %v8299_v11  ;;  %v8083_v11 = vor.u32 %v10695_v8, %v8082_v7  ;;  %v10680_v7 = vld [vmem:[#allocation7 + $0x124] sm:$0xf]  ;;  %v12043_v8 = vld [vmem:[#allocation5] sm:$0xff] }
  0xec   :  { %v11979_v57 = vpop.f32.mrf.mxu3  ;;  %13602 = vst [vmem:[#allocation35_spill] sm:$0xff] %v11981_v58  ;;  %v11983_v63 = vpop.f32.mrf.mxu1  ;;  %v8012_v58 = vld [vmem:[#allocation7 + $0x108] sm:$0xf0] }
  0xed   :  { %13603 = vst [vmem:[#allocation36_spill] sm:$0xff] %v11983_v63 }
  0xee   :  { %7881 = vmatmul.msk.bf16.gmra.mxu2 %vm311_vm1, %v11848_v37  ;;  %13615 = vst [vmem:[#allocation48_spill] sm:$0xff] %v12043_v8 }
  0xef   :  { %2684 = vmatpush.bf16.msra.mxu2 %v8275_v36 }
  0xf1   :  { %7885 = vmatmul.msk.bf16.gmra.mxu3 %vm311_vm1, %v11848_v37  ;;  %v11989_v15 = vpop.f32.mrf.mxu2  ;;  %v7962_v37 = vld [vmem:[#allocation7 + $0x90] sm:$0xf] }
  0xf2   :  { %v7963_v23 = vor.u32 %v10665_v22, %v7962_v37  ;;  %v10797_v37 = vld [vmem:[#allocation7 + $0x4c4] sm:$0xf0] }
  0xf3   :  { %v11993_v20 = vpop.f32.mrf.mxu0 }
  0xf4   :  { %v11991_v19 = vpop.f32.mrf.mxu3  ;;  %13604 = vst [vmem:[#allocation37_spill] sm:$0xff] %v11993_v20  ;;  %v11995_v21 = vpop.f32.mrf.mxu1  ;;  %2623 = vmatpush.bf16.msrb.mxu0 %v7963_v23  ;;  %v7914_v23 = vld [vmem:[#allocation7 + $0x30] sm:$0xf]  ;;  %v10674_v20 = vld [vmem:[#allocation7 + $0xf4] sm:$0xf] }
  0xf5   :  { %13605 = vst [vmem:[#allocation38_spill] sm:$0xff] %v11995_v21  ;;  %v7915_v25 = vor.u32 %v10653_v24, %v7914_v23  ;;  %v12075_v21 = vperm.slane %v12043_v8, 1 }
  0xf8   :  { %2624 = vmatpush.bf16.msrb.mxu0 %v7939_v44  ;;  %v8107_v44 = vor.u32 %v10701_v34, %v8106_v33  ;;  %v8827_v33 = vor.u32 %v10881_v29, %v8826_v27  ;;  %v10734_v34 = vld [vmem:[#allocation7 + $0x2d4] sm:$0xf]  ;;  %v12049_v27 = vperm.slane %v12043_v8, 2  ;;  %v12052_v29 = vperm.slane %v12043_v8, 3 }
  0xf9   :  { %v11997_v35 = vpop.f32.mrf.mxu2 }
  0xfa   :  { %2654 = vmatpush.bf16.msrb.mxu1 %v8107_v44 }
  0xfb   :  { %v12001_v40 = vpop.f32.mrf.mxu0 }
  0xfc   :  { %v11999_v39 = vpop.f32.mrf.mxu3  ;;  %13606 = vst [vmem:[#allocation39_spill] sm:$0xff] %v12001_v40  ;;  %v12003_v41 = vpop.f32.mrf.mxu1  ;;  %2625 = vmatpush.bf16.msrb.mxu0 %v7915_v25  ;;  %v10923_v40 = vld [vmem:[#allocation7 + $0x8b4] sm:$0xf0] }
  0xfd   :  { %13607 = vst [vmem:[#allocation40_spill] sm:$0xff] %v12003_v41  ;;  %v8228_v41 = vld [vmem:[#allocation7 + $0x2b8] sm:$0xf0] }
  0xfe   :  { %7882 = vmatmul.msk.bf16.gmra.mxu2 %vm311_vm1, %v11827_v18  ;;  %2655 = vmatpush.bf16.msrb.mxu1 %v8083_v11  ;;  %v12046_v11 = vperm.slane %v12039_v42, 0 }
 0x100   :  { %2626 = vmatpush.bf16.msrb.mxu0 %v7891_v5  ;;  %v10929_v5 = vld [vmem:[#allocation7 + $0x8e4] sm:$0xf0] }
 0x101   :  { %7886 = vmatmul.msk.bf16.gmra.mxu3 %vm311_vm1, %v11827_v18  ;;  %v12009_v2 = vpop.f32.mrf.mxu2  ;;  %v8491_v18 = vor.u32 %v10797_v37, %v8490_v16  ;;  %v10686_v37 = vld [vmem:[#allocation7 + $0x154] sm:$0xf] }
 0x103   :  { %v12013_v9 = vpop.f32.mrf.mxu0  ;;  %2712 = vmatpush.bf16.msra.mxu3 %v8491_v18  ;;  %v8060_v18 = vld [vmem:[#allocation7 + $0x168] sm:$0xf0] }
 0x104   :  { %v12011_v6 = vpop.f32.mrf.mxu3  ;;  %13608 = vst [vmem:[#allocation41_spill] sm:$0xff] %v12013_v9  ;;  %v12015_v22 = vpop.f32.mrf.mxu1  ;;  %v8063_v24 = vor.u32 %v10686_v37, %v8060_v18  ;;  %2735 = vmatpush.bf16.msra.mxu0 %v8827_v33  ;;  %v9019_v18 = vor.u32 %v10929_v5, %v9018_v4  ;;  %v12055_v33 = vperm.slane %v12039_v42, 1  ;;  %v12062_v4 = vperm.slane %v12043_v8, 6  ;;  %v8994_v9 = vld [vmem:[#allocation7 + $0x8a0] sm:$0xf] }
 0x105   :  { %13609 = vst [vmem:[#allocation42_spill] sm:$0xff] %v12015_v22  ;;  %v12065_v5 = vperm.slane %v12043_v8, 7  ;;  %v8995_v63 = vor.u32 %v10923_v40, %v8994_v9 }
 0x106   :  { %2793 = vmatpush.bf16.msrb.mxu2 %v8063_v24  ;;  %v8036_v24 = vld [vmem:[#allocation7 + $0x138] sm:$0xf0]  ;;  %2764 = vmatpush.bf16.msra.mxu1 %v9019_v18 }
 0x107   :  { %2713 = vmatpush.bf16.msra.mxu3 %v8467_v56 }
 0x109   :  { %v12017_v17 = vpop.f32.mrf.mxu2 }
 0x10a   :  { %2765 = vmatpush.bf16.msra.mxu1 %v8995_v63 }
 0x10b   :  { %v12021_v0 = vpop.f32.mrf.mxu0 }
 0x10c   :  { %v12019_v43 = vpop.f32.mrf.mxu3  ;;  %13610 = vst [vmem:[#allocation43_spill] sm:$0xff] %v12021_v0  ;;  %v12023_v1 = vpop.f32.mrf.mxu1 }
 0x10d   :  { %13611 = vst [vmem:[#allocation44_spill] sm:$0xff] %v12023_v1  ;;  %v458_v1 = vadd.f32 %v11971_v30, %v12052_v29 }
 0x10e   :  { %7883 = vmatmul.msk.bf16.gmra.mxu2 %vm311_vm1, %v11853_v38 }
 0x10f   :  { %v712_v31 = vmax.f32 %v458_v1, 0.0  ;;  %v8778_v1 = vld [vmem:[#allocation7 + $0x6f0] sm:$0xf] }
 0x111   :  { %7887 = vmatmul.msk.bf16.gmra.mxu3 %vm311_vm1, %v11853_v38  ;;  %v12029_v16 = vpop.f32.mrf.mxu2  ;;  %v8252_v38 = vld [vmem:[#allocation7 + $0x2e8] sm:$0xf0] }
 0x112   :  { %v8255_v44 = vor.u32 %v10734_v34, %v8252_v38  ;;  %v8039_v34 = vor.u32 %v10680_v7, %v8036_v24  ;;  %v12058_v38 = vperm.slane %v12043_v8, 0  ;;  %v8802_v24 = vld [vmem:[#allocation7 + $0x720] sm:$0xf] }
 0x113   :  { %v12033_v25 = vpop.f32.mrf.mxu0 }
 0x114   :  { %v12031_v23 = vpop.f32.mrf.mxu3  ;;  %13612 = vst [vmem:[#allocation45_spill] sm:$0xff] %v12033_v25  ;;  %v12035_v26 = vpop.f32.mrf.mxu1  ;;  %2822 = vmatpush.bf16.msrb.mxu3 %v8255_v44  ;;  %2794 = vmatpush.bf16.msrb.mxu2 %v8039_v34  ;;  %v10875_v34 = vld [vmem:[#allocation7 + $0x734] sm:$0xf0]  ;;  %v10728_v25 = vld [vmem:[#allocation7 + $0x2a4] sm:$0xf]  ;;  %v371_v9 = vadd.f32 %v11913_v46, %v12058_v38  ;;  %v373_v63 = vadd.f32 %v11929_v50, %v12058_v38 }
 0x115   :  { %13613 = vst [vmem:[#allocation46_spill] sm:$0xff] %v12035_v26  ;;  %v429_v26 = vadd.f32 %v11969_v28, %v12049_v27  ;;  %v8803_v22 = vor.u32 %v10875_v34, %v8802_v24  ;;  %v460_v28 = vadd.f32 %v11979_v57, %v12052_v29  ;;  %v8015_v24 = vor.u32 %v10674_v20, %v8012_v58 }
 0x116   :  { %v400_v58 = vadd.f32 %v11915_v47, %v12075_v21 }
 0x117   :  { %2736 = vmatpush.bf16.msra.mxu0 %v8803_v22  ;;  %v711_v34 = vmax.f32 %v429_v26, 0.0  ;;  %v724_v20 = vmax.f32 %v460_v28, 0.0 }
 0x118   :  { %2795 = vmatpush.bf16.msrb.mxu2 %v8015_v24 }
 0x119   :  { %v12037_v36 = vpop.f32.mrf.mxu2 }
 0x11b   :  { %v602_v3 = vpop.f32.mrf.mxu0 }
 0x11c   :  { %v12041_v56 = vpop.f32.mrf.mxu3  ;;  %v631_v37 = vpop.f32.mrf.mxu1  ;;  %v603_v44 = vadd.f32 %v602_v3, %v12046_v11  ;;  %v431_v3 = vadd.f32 %v11977_v45, %v12049_v27 }
 0x11d   :  { %v632_v7 = vadd.f32 %v631_v37, %v12055_v33  ;;  %v8231_v37 = vor.u32 %v10728_v25, %v8228_v41  ;;  %v10869_v25 = vld [vmem:[#allocation7 + $0x704] sm:$0xf0] }
 0x11e   :  { %v717_v32 = vmax.f32 %v603_v44, 0.0  ;;  %v723_v42 = vmax.f32 %v431_v3, 0.0 }
 0x11f   :  { %v718_v13 = vmax.f32 %v632_v7, 0.0  ;;  %2823 = vmatpush.bf16.msrb.mxu3 %v8231_v37  ;;  %v8779_v7 = vor.u32 %v10869_v25, %v8778_v1  ;;  %v710_v1 = vmax.f32 %v400_v58, 0.0  ;;  %v463_v58 = vadd.f32 %v11991_v19, %v12052_v29 }
 0x120   :  { %v807_v26 = vmax.f32 %v711_v34, %v717_v32  ;;  %v8970_v34 = vld [vmem:[#allocation7 + $0x870] sm:$0xf]  ;;  %v465_v19 = vadd.f32 %v11999_v39, %v12052_v29 }
 0x121   :  { %v544_v18 = vpop.f32.mrf.mxu2  ;;  %v808_v3 = vmax.f32 %v712_v31, %v718_v13  ;;  %2737 = vmatpush.bf16.msra.mxu0 %v8779_v7  ;;  %v10668_v13 = vld [vmem:[#allocation7 + $0xc4] sm:$0xf]  ;;  %v709_v31 = vmax.f32 %v371_v9, 0.0 }
 0x122   :  { %v545_v57 = vadd.f32 %v544_v18, %v12062_v4  ;;  %v10722_v18 = vld [vmem:[#allocation7 + $0x274] sm:$0xf] }
 0x123   :  { %v604_v30 = vpop.f32.mrf.mxu0 }
 0x124   :  { %v573_v0 = vpop.f32.mrf.mxu3  ;;  %v605_v14 = vadd.f32 %v604_v30, %v12046_v11  ;;  %v633_v45 = vpop.f32.mrf.mxu1  ;;  %v715_v47 = vmax.f32 %v545_v57, 0.0 }
 0x125   :  { %v634_v8 = vadd.f32 %v633_v45, %v12055_v33  ;;  %v574_v40 = vadd.f32 %v573_v0, %v12065_v5  ;;  %v8204_v0 = vld [vmem:[#allocation7 + $0x288] sm:$0xf0] }
 0x126   :  { %v729_v41 = vmax.f32 %v605_v14, 0.0  ;;  %v402_v14 = vadd.f32 %v11931_v51, %v12075_v21  ;;  %v8207_v37 = vor.u32 %v10722_v18, %v8204_v0  ;;  %v10917_v51 = vld [vmem:[#allocation7 + $0x884] sm:$0xf0]  ;;  %v805_v7 = vmax.f32 %v709_v31, %v715_v47  ;;  %v8754_v47 = vld [vmem:[#allocation7 + $0x6c0] sm:$0xf] }
 0x127   :  { %v730_v22 = vmax.f32 %v634_v8, 0.0  ;;  %v716_v28 = vmax.f32 %v574_v40, 0.0  ;;  %v8971_v40 = vor.u32 %v10917_v51, %v8970_v34  ;;  %v8180_v34 = vld [vmem:[#allocation7 + $0x258] sm:$0xf0]  ;;  %v10911_v51 = vld [vmem:[#allocation7 + $0x854] sm:$0xf0] }
 0x128   :  { %v813_v44 = vmax.f32 %v723_v42, %v729_v41  ;;  %2824 = vmatpush.bf16.msrb.mxu3 %v8207_v37  ;;  %v721_v41 = vmax.f32 %v373_v63, 0.0  ;;  %v722_v25 = vmax.f32 %v402_v14, 0.0 }
 0x129   :  { %v814_v46 = vmax.f32 %v724_v20, %v730_v22  ;;  %v546_v30 = vpop.f32.mrf.mxu2  ;;  %v7988_v22 = vld [vmem:[#allocation7 + $0xd8] sm:$0xf0]  ;;  %2766 = vmatpush.bf16.msra.mxu1 %v8971_v40  ;;  %v806_v0 = vmax.f32 %v710_v1, %v716_v28  ;;  %v10716_v28 = vld [vmem:[#allocation7 + $0x244] sm:$0xf] }
 0x12a   :  { %v12091_v8 = vpack.c.bf16 %v813_v44, %v807_v26  ;;  %v547_v45 = vadd.f32 %v546_v30, %v12062_v4  ;;  %v7991_v44 = vor.u32 %v10668_v13, %v7988_v22  ;;  %v8183_v31 = vor.u32 %v10716_v28, %v8180_v34  ;;  %v10710_v34 = vld [vmem:[#allocation7 + $0x214] sm:$0xf] }
 0x12b   :  { %v12094_v50 = vpack.c.bf16 %v814_v46, %v808_v3  ;;  %v607_v42 = vpop.f32.mrf.mxu0  ;;  %v434_v46 = vadd.f32 %v11989_v15, %v12049_v27  ;;  %v8946_v15 = vld [vmem:[#allocation7 + $0x840] sm:$0xf]  ;;  %v378_v28 = vadd.f32 %v11953_v61, %v12058_v38 }
 0x12c   :  { %v575_v24 = vpop.f32.mrf.mxu3  ;;  %v727_v20 = vmax.f32 %v547_v45, 0.0  ;;  %v636_v57 = vpop.f32.mrf.mxu1  ;;  %2685 = vmatmul.bf16.vlgmr.msra.gmra.mxu2 %v12091_v8  ;;  %v608_v63 = vadd.f32 %v607_v42, %v12046_v11  ;;  %v10863_v45 = vld [vmem:[#allocation7 + $0x6d4] sm:$0xf0]  ;;  %2825 = vmatpush.bf16.msrb.mxu3 %v8183_v31 }
 0x12d   :  { %v576_v32 = vadd.f32 %v575_v24, %v12065_v5  ;;  %2714 = vmatmul.bf16.vlgmr.msra.gmra.mxu3 %v12094_v50  ;;  %2796 = vmatpush.bf16.msrb.mxu2 %v7991_v44  ;;  %v637_v30 = vadd.f32 %v636_v57, %v12055_v33  ;;  %v436_v24 = vadd.f32 %v11997_v35, %v12049_v27  ;;  %v7964_v57 = vld [vmem:[#allocation7 + $0xa8] sm:$0xf0] }
 0x12e   :  { %v811_v18 = vmax.f32 %v721_v41, %v727_v20  ;;  %v8755_v42 = vor.u32 %v10863_v45, %v8754_v47  ;;  %v8947_v41 = vor.u32 %v10911_v51, %v8946_v15  ;;  %v10662_v20 = vld [vmem:[#allocation7 + $0x94] sm:$0xf]  ;;  %v741_v40 = vmax.f32 %v608_v63, 0.0  ;;  %v10857_v45 = vld [vmem:[#allocation7 + $0x6a4] sm:$0xf0] }
 0x12f   :  { %v728_v26 = vmax.f32 %v576_v32, 0.0  ;;  %v7967_v1 = vor.u32 %v10662_v20, %v7964_v57  ;;  %v742_v44 = vmax.f32 %v637_v30, 0.0  ;;  %v747_v39 = vmax.f32 %v436_v24, 0.0  ;;  %v8730_v30 = vld [vmem:[#allocation7 + $0x690] sm:$0xf] }
 0x130   :  { %v12099_v9 = vpack.c.bf16 %v811_v18, %v805_v7  ;;  %2738 = vmatpush.bf16.msra.mxu0 %v8755_v42  ;;  %2767 = vmatpush.bf16.msra.mxu1 %v8947_v41  ;;  %v376_v63 = vadd.f32 %v11937_v54, %v12058_v38  ;;  %v405_v47 = vadd.f32 %v11939_v55, %v12075_v21 }
 0x131   :  { %v812_v3 = vmax.f32 %v722_v25, %v728_v26  ;;  %v549_v37 = vpop.f32.mrf.mxu2  ;;  %v735_v25 = vmax.f32 %v434_v46, 0.0  ;;  %v736_v26 = vmax.f32 %v463_v58, 0.0  ;;  %2797 = vmatpush.bf16.msrb.mxu2 %v7967_v1  ;;  %v748_v46 = vmax.f32 %v465_v19, 0.0  ;;  %v10656_v1 = vld [vmem:[#allocation7 + $0x64] sm:$0xf] }
 0x132   :  { %2627 = vmatmul.bf16.vlgmr.msrb.gmra.mxu0 %v12099_v9  ;;  %v550_v18 = vadd.f32 %v549_v37, %v12062_v4  ;;  %v8731_v37 = vor.u32 %v10857_v45, %v8730_v30  ;;  %v407_v15 = vadd.f32 %v11955_v62, %v12075_v21  ;;  %v10905_v62 = vld [vmem:[#allocation7 + $0x824] sm:$0xf0] }
 0x133   :  { %v12106_v14 = vpack.c.bf16 %v812_v3, %v806_v0  ;;  %v609_v13 = vpop.f32.mrf.mxu0  ;;  %v819_v24 = vmax.f32 %v735_v25, %v741_v40  ;;  %v820_v51 = vmax.f32 %v736_v26, %v742_v44  ;;  %v733_v25 = vmax.f32 %v376_v63, 0.0  ;;  %v10704_v63 = vld [vmem:[#allocation7 + $0x1e4] sm:$0xf] }
 0x134   :  { %v578_v32 = vpop.f32.mrf.mxu3  ;;  %v610_v35 = vadd.f32 %v609_v13, %v12046_v11  ;;  %v638_v22 = vpop.f32.mrf.mxu1  ;;  %v739_v55 = vmax.f32 %v550_v18, 0.0  ;;  %2739 = vmatpush.bf16.msra.mxu0 %v8731_v37  ;;  %v745_v26 = vmax.f32 %v378_v28, 0.0  ;;  %v7940_v18 = vld [vmem:[#allocation7 + $0x78] sm:$0xf0] }
 0x135   :  { %2656 = vmatmul.bf16.vlgmr.msrb.gmra.mxu1 %v12106_v14  ;;  %v639_v7 = vadd.f32 %v638_v22, %v12055_v33  ;;  %v579_v0 = vadd.f32 %v578_v32, %v12065_v5  ;;  %v8156_v32 = vld [vmem:[#allocation7 + $0x228] sm:$0xf0]  ;;  %v8922_v22 = vld [vmem:[#allocation7 + $0x810] sm:$0xf]  ;;  %v8132_v28 = vld [vmem:[#allocation7 + $0x1f8] sm:$0xf0] }
 0x136   :  { %v753_v3 = vmax.f32 %v610_v35, 0.0  ;;  %v8159_v31 = vor.u32 %v10710_v34, %v8156_v32  ;;  %v817_v30 = vmax.f32 %v733_v25, %v739_v55  ;;  %v8135_v32 = vor.u32 %v10704_v63, %v8132_v28  ;;  %v10851_v55 = vld [vmem:[#allocation7 + $0x674] sm:$0xf0] }
 0x137   :  { %v754_v58 = vmax.f32 %v639_v7, 0.0  ;;  %v740_v19 = vmax.f32 %v579_v0, 0.0  ;;  %v734_v0 = vmax.f32 %v405_v47, 0.0  ;;  %v439_v47 = vadd.f32 %v12009_v2, %v12049_v27 }
 0x138   :  { %v825_v42 = vmax.f32 %v747_v39, %v753_v3  ;;  %2826 = vmatpush.bf16.msrb.mxu3 %v8159_v31  ;;  %v8923_v39 = vor.u32 %v10905_v62, %v8922_v22  ;;  %v746_v3 = vmax.f32 %v407_v15, 0.0  ;;  %v468_v15 = vadd.f32 %v12011_v6, %v12052_v29  ;;  %v8706_v31 = vld [vmem:[#allocation7 + $0x660] sm:$0xf]  ;;  %v10899_v6 = vld [vmem:[#allocation7 + $0x7f4] sm:$0xf0] }
 0x139   :  { %v826_v54 = vmax.f32 %v748_v46, %v754_v58  ;;  %v551_v13 = vpop.f32.mrf.mxu2  ;;  %v7943_v58 = vor.u32 %v10656_v1, %v7940_v18  ;;  %v8707_v2 = vor.u32 %v10851_v55, %v8706_v31  ;;  %v7916_v22 = vld [vmem:[#allocation7 + $0x48] sm:$0xf0]  ;;  %v410_v63 = vadd.f32 %v11927_v49, %v12075_v21  ;;  %v8874_v55 = vld [vmem:[#allocation7 + $0x7b0] sm:$0xf] }
 0x13a   :  { %v12127_v41 = vpack.c.bf16 %v825_v42, %v819_v24  ;;  %v552_v20 = vadd.f32 %v551_v13, %v12062_v4  ;;  %2768 = vmatpush.bf16.msra.mxu1 %v8923_v39  ;;  %v818_v24 = vmax.f32 %v734_v0, %v740_v19  ;;  %v8898_v19 = vld [vmem:[#allocation7 + $0x7e0] sm:$0xf]  ;;  %v381_v0 = vadd.f32 %v11925_v48, %v12058_v38  ;;  %v8682_v48 = vld [vmem:[#allocation7 + $0x630] sm:$0xf] }
 0x13b   :  { %v12130_v61 = vpack.c.bf16 %v826_v54, %v820_v51  ;;  %v612_v35 = vpop.f32.mrf.mxu0  ;;  %2798 = vmatpush.bf16.msrb.mxu2 %v7943_v58  ;;  %v8899_v25 = vor.u32 %v10899_v6, %v8898_v19  ;;  %2740 = vmatpush.bf16.msra.mxu0 %v8707_v2  ;;  %v10893_v19 = vld [vmem:[#allocation7 + $0x7c4] sm:$0xf0] }
 0x13c   :  { %v580_v57 = vpop.f32.mrf.mxu3  ;;  %v751_v44 = vmax.f32 %v552_v20, 0.0  ;;  %v641_v7 = vpop.f32.mrf.mxu1  ;;  %2690 = vmatmul.bf16.gmra.mxu2 %v12127_v41  ;;  %v613_v34 = vadd.f32 %v612_v35, %v12046_v11  ;;  %v441_v20 = vadd.f32 %v12017_v17, %v12049_v27  ;;  %2827 = vmatpush.bf16.msrb.mxu3 %v8135_v32  ;;  %v10650_v35 = vld [vmem:[#allocation7 + $0x34] sm:$0xf] }
 0x13d   :  { %v581_v40 = vadd.f32 %v580_v57, %v12065_v5  ;;  %2719 = vmatmul.bf16.gmra.mxu3 %v12130_v61  ;;  %v642_v54 = vadd.f32 %v641_v7, %v12055_v33  ;;  %v470_v57 = vadd.f32 %v12019_v43, %v12052_v29  ;;  %v10698_v17 = vld [vmem:[#allocation7 + $0x1b4] sm:$0xf] }
 0x13e   :  { %v823_v45 = vmax.f32 %v745_v26, %v751_v44  ;;  %v7919_v26 = vor.u32 %v10650_v35, %v7916_v22  ;;  %v8108_v44 = vld [vmem:[#allocation7 + $0x1c8] sm:$0xf0]  ;;  %v765_v7 = vmax.f32 %v613_v34, 0.0  ;;  %2769 = vmatpush.bf16.msra.mxu1 %v8899_v25  ;;  %v8875_v35 = vor.u32 %v10893_v19, %v8874_v55  ;;  %v10692_v22 = vld [vmem:[#allocation7 + $0x184] sm:$0xf] }
 0x13f   :  { %v752_v46 = vmax.f32 %v581_v40, 0.0  ;;  %v8111_v18 = vor.u32 %v10698_v17, %v8108_v44  ;;  %v444_v55 = vadd.f32 %v12029_v16, %v12049_v27 }
 0x140   :  { %v12135_v37 = vpack.c.bf16 %v823_v45, %v817_v30  ;;  %2799 = vmatpush.bf16.msrb.mxu2 %v7919_v26  ;;  %v760_v30 = vmax.f32 %v468_v15, 0.0  ;;  %v771_v45 = vmax.f32 %v441_v20, 0.0  ;;  %v10644_v20 = vld [vmem:[#allocation7 + $0x4] sm:$0xf] }
 0x141   :  { %v824_v42 = vmax.f32 %v746_v3, %v752_v46  ;;  %v554_v13 = vpop.f32.mrf.mxu2  ;;  %v759_v3 = vmax.f32 %v439_v47, 0.0  ;;  %v766_v46 = vmax.f32 %v642_v54, 0.0  ;;  %2828 = vmatpush.bf16.msrb.mxu3 %v8111_v18  ;;  %v10845_v47 = vld [vmem:[#allocation7 + $0x644] sm:$0xf0]  ;;  %v383_v54 = vadd.f32 %v11933_v52, %v12058_v38 }
 0x142   :  { %2632 = vmatmul.bf16.gmra.mxu0 %v12135_v37  ;;  %v12151_v62 = vadd.f32 %v554_v13, %v12062_v4  ;;  %v8683_v15 = vor.u32 %v10845_v47, %v8682_v48  ;;  %2770 = vmatpush.bf16.msra.mxu1 %v8875_v35  ;;  %v758_v18 = vmax.f32 %v410_v63, 0.0  ;;  %v8850_v47 = vld [vmem:[#allocation7 + $0x780] sm:$0xf]  ;;  %v475_v35 = vadd.f32 %v12041_v56, %v12052_v29 }
 0x143   :  { %v12142_v51 = vpack.c.bf16 %v824_v42, %v818_v24  ;;  %v614_v1 = vpop.f32.mrf.mxu0  ;;  %v772_v24 = vmax.f32 %v470_v57, 0.0  ;;  %v831_v13 = vmax.f32 %v759_v3, %v765_v7  ;;  %v412_v57 = vadd.f32 %v11935_v53, %v12075_v21 }
 0x144   :  { %v583_v40 = vpop.f32.mrf.mxu3  ;;  %v615_v43 = vadd.f32 %v614_v1, %v12046_v11  ;;  %v643_v39 = vpop.f32.mrf.mxu1  ;;  %v763_v28 = vmax.f32 %v12151_v62, 0.0  ;;  %v832_v49 = vmax.f32 %v760_v30, %v766_v46  ;;  %v8084_v62 = vld [vmem:[#allocation7 + $0x198] sm:$0xf0]  ;;  %2741 = vmatpush.bf16.msra.mxu0 %v8683_v15  ;;  %v769_v3 = vmax.f32 %v383_v54, 0.0 }
 0x145   :  { %2661 = vmatmul.bf16.gmra.mxu1 %v12142_v51  ;;  %v644_v58 = vadd.f32 %v643_v39, %v12055_v33  ;;  %v584_v34 = vadd.f32 %v583_v40, %v12065_v5  ;;  %v7892_v40 = vld [vmem:[#allocation7 + $0x18] sm:$0xf0]  ;;  %v8087_v17 = vor.u32 %v10692_v22, %v8084_v62  ;;  %v757_v39 = vmax.f32 %v381_v0, 0.0 }
 0x146   :  { %v777_v42 = vmax.f32 %v615_v43, 0.0  ;;  %v7895_v26 = vor.u32 %v10644_v20, %v7892_v40  ;;  %v770_v30 = vmax.f32 %v412_v57, 0.0  ;;  %v10878_v57 = vld [vmem:[#allocation7 + $0x754] sm:$0xf] }
 0x147   :  { %v778_v32 = vmax.f32 %v644_v58, 0.0  ;;  %v764_v44 = vmax.f32 %v584_v34, 0.0  ;;  %2829 = vmatpush.bf16.msrb.mxu3 %v8087_v17  ;;  %v829_v34 = vmax.f32 %v757_v39, %v763_v28 }
 0x148   :  { %v837_v31 = vmax.f32 %v771_v45, %v777_v42  ;;  %2800 = vmatpush.bf16.msrb.mxu2 %v7895_v26  ;;  %v10839_v42 = vld [vmem:[#allocation7 + $0x614] sm:$0xf0] }
 0x149   :  { %v838_v2 = vmax.f32 %v772_v24, %v778_v32  ;;  %v556_v6 = vpop.f32.mrf.mxu2  ;;  %v8658_v24 = vld [vmem:[#allocation7 + $0x600] sm:$0xf]  ;;  %v830_v0 = vmax.f32 %v758_v18, %v764_v44  ;;  %v796_v44 = vmax.f32 %v475_v35, 0.0 }
 0x14a   :  { %v12166_v1 = vpack.c.bf16 %v837_v31, %v831_v13  ;;  %v557_v52 = vadd.f32 %v556_v6, %v12062_v4  ;;  %v8659_v48 = vor.u32 %v10839_v42, %v8658_v24  ;;  %v10887_v13 = vld [vmem:[#allocation7 + $0x794] sm:$0xf0]  ;;  %v446_v6 = vadd.f32 %v12037_v36, %v12049_v27  ;;  %v9020_v24 = vld [vmem:[#allocation7 + $0x8e8] sm:$0xf0]  ;;  %v10830_v42 = vld [vmem:[#allocation7 + $0x5d4] sm:$0xf] }
 0x14b   :  { %v12169_v7 = vpack.c.bf16 %v838_v2, %v832_v49  ;;  %v617_v43 = vpop.f32.mrf.mxu0  ;;  %v8851_v54 = vor.u32 %v10887_v13, %v8850_v47  ;;  %v8828_v49 = vld [vmem:[#allocation7 + $0x768] sm:$0xf0]  ;;  %v473_v2 = vadd.f32 %v12031_v23, %v12052_v29  ;;  %v386_v23 = vadd.f32 %v11949_v59, %v12058_v38 }
 0x14c   :  { %v585_v25 = vpop.f32.mrf.mxu3  ;;  %v775_v46 = vmax.f32 %v557_v52, 0.0  ;;  %v646_v58 = vpop.f32.mrf.mxu1  ;;  %2695 = vmatmul.bf16.gmra.mxu2 %v12166_v1  ;;  %v618_v15 = vadd.f32 %v617_v43, %v12046_v11  ;;  %2742 = vmatpush.bf16.msra.mxu0 %v8659_v48  ;;  %v8831_v16 = vor.u32 %v10878_v57, %v8828_v49  ;;  %v783_v36 = vmax.f32 %v444_v55, 0.0  ;;  %v8636_v13 = vld [vmem:[#allocation7 + $0x5e8] sm:$0xf0] }
 0x14d   :  { %v586_v53 = vadd.f32 %v585_v25, %v12065_v5  ;;  %2724 = vmatmul.bf16.gmra.mxu3 %v12169_v7  ;;  %v647_v20 = vadd.f32 %v646_v58, %v12055_v33  ;;  %2771 = vmatpush.bf16.msra.mxu1 %v8851_v54  ;;  %v784_v29 = vmax.f32 %v473_v2, 0.0  ;;  %v795_v17 = vmax.f32 %v446_v6, 0.0 }
 0x14e   :  { %v835_v32 = vmax.f32 %v769_v3, %v775_v46  ;;  %v789_v52 = vmax.f32 %v618_v15, 0.0  ;;  %2909 = vmatpush.bf16.msra.mxu2 %v8831_v16  ;;  %v415_v43 = vadd.f32 %v11951_v60, %v12075_v21  ;;  %v10782_v3 = vld [vmem:[#allocation7 + $0x454] sm:$0xf]  ;;  %v8444_v46 = vld [vmem:[#allocation7 + $0x468] sm:$0xf0]  ;;  %v388_v59 = vadd.f32 %v11957_v10, %v12058_v38 }
 0x14f   :  { %v776_v45 = vmax.f32 %v586_v53, 0.0  ;;  %v790_v27 = vmax.f32 %v647_v20, 0.0  ;;  %v8639_v15 = vor.u32 %v10830_v42, %v8636_v13  ;;  %v8396_v42 = vld [vmem:[#allocation7 + $0x408] sm:$0xf0] }
 0x150   :  { %v12174_v31 = vpack.c.bf16 %v835_v32, %v829_v34  ;;  %v843_v58 = vmax.f32 %v783_v36, %v789_v52  ;;  %v417_v34 = vadd.f32 %v11959_v12, %v12075_v21  ;;  %v781_v21 = vmax.f32 %v386_v23, 0.0  ;;  %v10776_v23 = vld [vmem:[#allocation7 + $0x424] sm:$0xf]  ;;  %v8420_v36 = vld [vmem:[#allocation7 + $0x438] sm:$0xf0] }
 0x151   :  { %v836_v63 = vmax.f32 %v770_v30, %v776_v45  ;;  %v559_v28 = vpop.f32.mrf.mxu2  ;;  %v8447_v45 = vor.u32 %v10782_v3, %v8444_v46  ;;  %v844_v32 = vmax.f32 %v784_v29, %v790_v27  ;;  %v793_v57 = vmax.f32 %v388_v59, 0.0  ;;  %2880 = vmatpush.bf16.msrb.mxu1 %v8639_v15  ;;  %v10920_v27 = vld [vmem:[#allocation7 + $0x8a4] sm:$0xf]  ;;  %v8780_v3 = vld [vmem:[#allocation7 + $0x708] sm:$0xf0]  ;;  %v13617_v46 = vld [vmem:[#allocation48_spill] sm:$0xff] }
 0x152   :  { %2637 = vmatmul.bf16.gmra.mxu0 %v12174_v31  ;;  %v560_v22 = vadd.f32 %v559_v28, %v12062_v4  ;;  %v782_v2 = vmax.f32 %v415_v43, 0.0  ;;  %v794_v6 = vmax.f32 %v417_v34, 0.0  ;;  %v8423_v29 = vor.u32 %v10776_v23, %v8420_v36  ;;  %v10914_v34 = vld [vmem:[#allocation7 + $0x874] sm:$0xf] }
 0x153   :  { %v12179_v19 = vpack.c.bf16 %v836_v63, %v830_v0  ;;  %v619_v62 = vpop.f32.mrf.mxu0  ;;  %v10872_v0 = vld [vmem:[#allocation7 + $0x724] sm:$0xf]  ;;  %v8804_v63 = vld [vmem:[#allocation7 + $0x738] sm:$0xf0]  ;;  %2851 = vmatpush.bf16.msrb.mxu0 %v8447_v45  ;;  %v12223_v59 = vperm.slane %v13617_v46, 4 }
 0x154   :  { %v588_v40 = vpop.f32.mrf.mxu3  ;;  %v620_v25 = vadd.f32 %v619_v62, %v12046_v11  ;;  %v648_v26 = vpop.f32.mrf.mxu1  ;;  %v787_v39 = vmax.f32 %v560_v22, 0.0  ;;  %v8807_v55 = vor.u32 %v10872_v0, %v8804_v63  ;;  %v8972_v0 = vld [vmem:[#allocation7 + $0x888] sm:$0xf0]  ;;  %v10818_v63 = vld [vmem:[#allocation7 + $0x574] sm:$0xf] }
 0x155   :  { %2666 = vmatmul.bf16.gmra.mxu1 %v12179_v19  ;;  %v649_v56 = vadd.f32 %v648_v26, %v12055_v33  ;;  %v589_v18 = vadd.f32 %v588_v40, %v12065_v5  ;;  %v10926_v33 = vld [vmem:[#allocation7 + $0x8d4] sm:$0xf] }
 0x156   :  { %v801_v53 = vmax.f32 %v620_v25, 0.0  ;;  %v9023_v47 = vor.u32 %v10926_v33, %v9020_v24  ;;  %2910 = vmatpush.bf16.msra.mxu2 %v8807_v55  ;;  %v10770_v24 = vld [vmem:[#allocation7 + $0x3f4] sm:$0xf]  ;;  %v13621_v55 = vld [vmem:[#allocation34_spill] sm:$0xff] }
 0x157   :  { %v802_v11 = vmax.f32 %v649_v56, 0.0  ;;  %v788_v20 = vmax.f32 %v589_v18, 0.0  ;;  %2852 = vmatpush.bf16.msrb.mxu0 %v8423_v29  ;;  %v8399_v13 = vor.u32 %v10770_v24, %v8396_v42  ;;  %v8948_v24 = vld [vmem:[#allocation7 + $0x858] sm:$0xf0]  ;;  %v10812_v42 = vld [vmem:[#allocation7 + $0x544] sm:$0xf] }
 0x158   :  { %v849_v30 = vmax.f32 %v795_v17, %v801_v53  ;;  %2938 = vmatpush.bf16.msra.mxu3 %v9023_v47  ;;  %v8996_v17 = vld [vmem:[#allocation7 + $0x8b8] sm:$0xf0] }
 0x159   :  { %v850_v60 = vmax.f32 %v796_v44, %v802_v11  ;;  %v561_v48 = vpop.f32.mrf.mxu2  ;;  %v842_v16 = vmax.f32 %v782_v2, %v788_v20  ;;  %v10824_v44 = vld [vmem:[#allocation7 + $0x5a4] sm:$0xf]  ;;  %v8612_v53 = vld [vmem:[#allocation7 + $0x5b8] sm:$0xf0]  ;;  %v10866_v11 = vld [vmem:[#allocation7 + $0x6f4] sm:$0xf] }
 0x15a   :  { %v12202_v54 = vpack.c.bf16 %v849_v30, %v843_v58  ;;  %v562_v10 = vadd.f32 %v561_v48, %v12062_v4  ;;  %v841_v4 = vmax.f32 %v781_v21, %v787_v39  ;;  %v8999_v39 = vor.u32 %v10920_v27, %v8996_v17  ;;  %v13619_v48 = vld [vmem:[#allocation33_spill] sm:$0xff]  ;;  %v8756_v2 = vld [vmem:[#allocation7 + $0x6d8] sm:$0xf0] }
 0x15b   :  { %v12205_v28 = vpack.c.bf16 %v850_v60, %v844_v32  ;;  %v8615_v18 = vor.u32 %v10824_v44, %v8612_v53  ;;  %v8783_v58 = vor.u32 %v10866_v11, %v8780_v3  ;;  %v12226_v30 = vperm.slane %v13617_v46, 5  ;;  %v13618_v32 = vld [vmem:[#allocation31_spill] sm:$0xff]  ;;  %2853 = vmatpush.bf16.msrb.mxu0 %v8399_v13  ;;  %v10764_v3 = vld [vmem:[#allocation7 + $0x3c4] sm:$0xf]  ;;  %v8372_v46 = vld [vmem:[#allocation7 + $0x3d8] sm:$0xf0] }
 0x15c   :  { %v590_v38 = vpop.f32.mrf.mxu3  ;;  %v799_v49 = vmax.f32 %v562_v10, 0.0  ;;  %2700 = vmatmul.bf16.gmra.mxu2 %v12202_v54  ;;  %2939 = vmatpush.bf16.msra.mxu3 %v8999_v39  ;;  %v487_v60 = vadd.f32 %v13618_v32, %v12223_v59  ;;  %v489_v47 = vadd.f32 %v13619_v48, %v12223_v59  ;;  %v8588_v10 = vld [vmem:[#allocation7 + $0x588] sm:$0xf0]  ;;  %v8975_v21 = vor.u32 %v10914_v34, %v8972_v0  ;;  %v8564_v34 = vld [vmem:[#allocation7 + $0x558] sm:$0xf0] }
 0x15d   :  { %v591_v12 = vadd.f32 %v590_v38, %v12065_v5  ;;  %2729 = vmatmul.bf16.gmra.mxu3 %v12205_v28  ;;  %v13616_v5 = vld [vmem:[#allocation47_spill] sm:$0xff]  ;;  %2881 = vmatpush.bf16.msrb.mxu1 %v8615_v18  ;;  %v13620_v38 = vld [vmem:[#allocation32_spill] sm:$0xff]  ;;  %v518_v20 = vadd.f32 %v13621_v55, %v12226_v30 }
 0x15e   :  { %v847_v40 = vmax.f32 %v793_v57, %v799_v49  ;;  %v12213_v52 = vperm.slane %v13616_v5, 2  ;;  %v12219_v43 = vperm.slane %v13616_v5, 3  ;;  %2911 = vmatpush.bf16.msra.mxu2 %v8783_v58  ;;  %v516_v15 = vadd.f32 %v13620_v38, %v12226_v30  ;;  %v10860_v49 = vld [vmem:[#allocation7 + $0x6c4] sm:$0xf]  ;;  %v10854_v48 = vld [vmem:[#allocation7 + $0x694] sm:$0xf] }
 0x15f   :  { %v800_v35 = vmax.f32 %v591_v12, 0.0  ;;  %v8591_v57 = vor.u32 %v10818_v63, %v8588_v10  ;;  %v713_v5 = vmax.f32 %v487_v60, 0.0  ;;  %v726_v27 = vmax.f32 %v518_v20, 0.0  ;;  %v10908_v58 = vld [vmem:[#allocation7 + $0x844] sm:$0xf]  ;;  %v13622_v55 = vld [vmem:[#allocation35_spill] sm:$0xff] }
 0x160   :  { %v12210_v62 = vpack.c.bf16 %v847_v40, %v841_v4  ;;  %v8759_v40 = vor.u32 %v10860_v49, %v8756_v2  ;;  %2940 = vmatpush.bf16.msra.mxu3 %v8975_v21  ;;  %v714_v36 = vmax.f32 %v516_v15, 0.0  ;;  %v8951_v32 = vor.u32 %v10908_v58, %v8948_v24  ;;  %v10758_v10 = vld [vmem:[#allocation7 + $0x394] sm:$0xf]  ;;  %v8348_v38 = vld [vmem:[#allocation7 + $0x3a8] sm:$0xf0] }
 0x161   :  { %v848_v22 = vmax.f32 %v794_v6, %v800_v35  ;;  %v660_v26 = vpop.f32.mrf.mxu2  ;;  %2882 = vmatpush.bf16.msrb.mxu1 %v8591_v57  ;;  %v8567_v60 = vor.u32 %v10812_v42, %v8564_v34  ;;  %v10902_v15 = vld [vmem:[#allocation7 + $0x814] sm:$0xf]  ;;  %v492_v20 = vadd.f32 %v13622_v55, %v12223_v59  ;;  %v8351_v57 = vor.u32 %v10758_v10, %v8348_v38  ;;  %v8924_v49 = vld [vmem:[#allocation7 + $0x828] sm:$0xf0]  ;;  %v10752_v10 = vld [vmem:[#allocation7 + $0x364] sm:$0xf] }
 0x162   :  { %2642 = vmatmul.bf16.gmra.mxu0 %v12210_v62  ;;  %v661_v45 = vadd.f32 %v660_v26, %v12213_v52  ;;  %v725_v26 = vmax.f32 %v489_v47, 0.0  ;;  %2912 = vmatpush.bf16.msra.mxu2 %v8759_v40  ;;  %v8732_v47 = vld [vmem:[#allocation7 + $0x6a8] sm:$0xf0]  ;;  %v10806_v2 = vld [vmem:[#allocation7 + $0x514] sm:$0xf] }
 0x163   :  { %v12215_v25 = vpack.c.bf16 %v848_v22, %v842_v16  ;;  %v8735_v13 = vor.u32 %v10854_v48, %v8732_v47  ;;  %v13625_v40 = vld [vmem:[#allocation38_spill] sm:$0xff]  ;;  %v8900_v48 = vld [vmem:[#allocation7 + $0x7f8] sm:$0xf0] }
 0x164   :  { %v689_v56 = vpop.f32.mrf.mxu3  ;;  %v719_v6 = vmax.f32 %v661_v45, 0.0  ;;  %2941 = vmatpush.bf16.msra.mxu3 %v8951_v32  ;;  %v8324_v38 = vld [vmem:[#allocation7 + $0x378] sm:$0xf0] }
 0x165   :  { %2671 = vmatmul.bf16.gmra.mxu1 %v12215_v25  ;;  %v690_v33 = vadd.f32 %v689_v56, %v12219_v43 }
 0x166   :  { %v809_v29 = vmax.f32 %v713_v5, %v719_v6  ;;  %2883 = vmatpush.bf16.msrb.mxu1 %v8567_v60  ;;  %2913 = vmatpush.bf16.msra.mxu2 %v8735_v13  ;;  %v8540_v6 = vld [vmem:[#allocation7 + $0x528] sm:$0xf0]  ;;  %v8927_v5 = vor.u32 %v10902_v15, %v8924_v49  ;;  %v10896_v60 = vld [vmem:[#allocation7 + $0x7e4] sm:$0xf] }
 0x167   :  { %v720_v16 = vmax.f32 %v690_v33, 0.0  ;;  %v8375_v33 = vor.u32 %v10764_v3, %v8372_v46  ;;  %v8903_v13 = vor.u32 %v10896_v60, %v8900_v48  ;;  %v10800_v15 = vld [vmem:[#allocation7 + $0x4e4] sm:$0xf]  ;;  %v13628_v60 = vld [vmem:[#allocation40_spill] sm:$0xff] }
 0x168   :  { %2942 = vmatpush.bf16.msra.mxu3 %v8927_v5  ;;  %v526_v48 = vadd.f32 %v13628_v60, %v12226_v30  ;;  %v8258_v60 = vld [vmem:[#allocation7 + $0x2d8] sm:$0xf] }
 0x169   :  { %v662_v12 = vpop.f32.mrf.mxu2  ;;  %v810_v44 = vmax.f32 %v714_v36, %v720_v16  ;;  %2854 = vmatpush.bf16.msrb.mxu0 %v8375_v33  ;;  %v523_v16 = vadd.f32 %v13625_v40, %v12226_v30  ;;  %v8708_v36 = vld [vmem:[#allocation7 + $0x678] sm:$0xf0] }
 0x16a   :  { %v663_v35 = vadd.f32 %v662_v12, %v12213_v52  ;;  %v13623_v12 = vld [vmem:[#allocation37_spill] sm:$0xff] }
 0x16b   :  { %v494_v21 = vadd.f32 %v13623_v12, %v12223_v59  ;;  %v8516_v12 = vld [vmem:[#allocation7 + $0x4f8] sm:$0xf0] }
 0x16c   :  { %v691_v4 = vpop.f32.mrf.mxu3  ;;  %v731_v23 = vmax.f32 %v663_v35, 0.0  ;;  %2801 = vmatmul.bf16.vlgmr.msrb.gmra.mxu2 %v12099_v9  ;;  %v13624_v35 = vld [vmem:[#allocation36_spill] sm:$0xff]  ;;  %2943 = vmatpush.bf16.msra.mxu3 %v8903_v13  ;;  %v8519_v49 = vor.u32 %v10800_v15, %v8516_v12  ;;  %v13629_v13 = vld [vmem:[#allocation42_spill] sm:$0xff] }
 0x16d   :  { %v692_v22 = vadd.f32 %v691_v4, %v12219_v43  ;;  %2830 = vmatmul.bf16.vlgmr.msrb.gmra.mxu3 %v12106_v14  ;;  %v521_v4 = vadd.f32 %v13624_v35, %v12226_v30  ;;  %2855 = vmatpush.bf16.msrb.mxu0 %v8351_v57  ;;  %v749_v3 = vmax.f32 %v494_v21, 0.0  ;;  %v10842_v21 = vld [vmem:[#allocation7 + $0x634] sm:$0xf]  ;;  %v8684_v57 = vld [vmem:[#allocation7 + $0x648] sm:$0xf0] }
 0x16e   :  { %v815_v17 = vmax.f32 %v725_v26, %v731_v23  ;;  %v8543_v26 = vor.u32 %v10806_v2, %v8540_v6  ;;  %v10848_v23 = vld [vmem:[#allocation7 + $0x664] sm:$0xf]  ;;  %v8687_v2 = vor.u32 %v10842_v21, %v8684_v57  ;;  %v10746_v6 = vld [vmem:[#allocation7 + $0x334] sm:$0xf]  ;;  %v8300_v35 = vld [vmem:[#allocation7 + $0x348] sm:$0xf0] }
 0x16f   :  { %v732_v56 = vmax.f32 %v692_v22, 0.0  ;;  %v738_v58 = vmax.f32 %v521_v4, 0.0  ;;  %v10890_v4 = vld [vmem:[#allocation7 + $0x7b4] sm:$0xf]  ;;  %v8303_v40 = vor.u32 %v10746_v6, %v8300_v35  ;;  %v762_v6 = vmax.f32 %v526_v48, 0.0 }
 0x170   :  { %v12242_v39 = vpack.c.bf16 %v815_v17, %v809_v29  ;;  %v8711_v17 = vor.u32 %v10848_v23, %v8708_v36  ;;  %2884 = vmatpush.bf16.msrb.mxu1 %v8543_v26  ;;  %v8492_v26 = vld [vmem:[#allocation7 + $0x4c8] sm:$0xf0]  ;;  %v10836_v23 = vld [vmem:[#allocation7 + $0x604] sm:$0xf]  ;;  %v10738_v48 = vld [vmem:[#allocation7 + $0x2ec] sm:$0xf0] }
 0x171   :  { %v816_v53 = vmax.f32 %v726_v27, %v732_v56  ;;  %v665_v11 = vpop.f32.mrf.mxu2 }
 0x172   :  { %2743 = vmatmul.bf16.vlgmr.msra.gmra.mxu0 %v12242_v39  ;;  %v666_v0 = vadd.f32 %v665_v11, %v12213_v52  ;;  %v737_v11 = vmax.f32 %v492_v20, 0.0  ;;  %2914 = vmatpush.bf16.msra.mxu2 %v8711_v17  ;;  %v8327_v20 = vor.u32 %v10752_v10, %v8324_v38  ;;  %v8852_v17 = vld [vmem:[#allocation7 + $0x798] sm:$0xf0] }
 0x173   :  { %v12244_v18 = vpack.c.bf16 %v816_v53, %v810_v44 }
 0x174   :  { %v694_v45 = vpop.f32.mrf.mxu3  ;;  %v743_v27 = vmax.f32 %v666_v0, 0.0  ;;  %2856 = vmatpush.bf16.msrb.mxu0 %v8327_v20  ;;  %2885 = vmatpush.bf16.msrb.mxu1 %v8519_v49 }
 0x175   :  { %2772 = vmatmul.bf16.vlgmr.msra.gmra.mxu1 %v12244_v18  ;;  %v695_v63 = vadd.f32 %v694_v45, %v12219_v43  ;;  %v750_v45 = vmax.f32 %v523_v16, 0.0  ;;  %v8876_v16 = vld [vmem:[#allocation7 + $0x7c8] sm:$0xf0] }
 0x176   :  { %v821_v24 = vmax.f32 %v737_v11, %v743_v27  ;;  %2915 = vmatpush.bf16.msra.mxu2 %v8687_v2  ;;  %v8879_v5 = vor.u32 %v10890_v4, %v8876_v16 }
 0x177   :  { %v744_v44 = vmax.f32 %v695_v63, 0.0 }
 0x178   :  { %2944 = vmatpush.bf16.msra.mxu3 %v8879_v5  ;;  %2857 = vmatpush.bf16.msrb.mxu0 %v8303_v40 }
 0x179   :  { %v667_v22 = vpop.f32.mrf.mxu2  ;;  %v822_v34 = vmax.f32 %v738_v58, %v744_v44  ;;  %v10788_v58 = vld [vmem:[#allocation7 + $0x484] sm:$0xf] }
 0x17a   :  { %v668_v56 = vadd.f32 %v667_v22, %v12213_v52  ;;  %v10794_v22 = vld [vmem:[#allocation7 + $0x4b4] sm:$0xf] }
 0x17b   :  { %v8495_v27 = vor.u32 %v10794_v22, %v8492_v26 }
 0x17c   :  { %v696_v29 = vpop.f32.mrf.mxu3  ;;  %v755_v46 = vmax.f32 %v668_v56, 0.0  ;;  %2806 = vmatmul.bf16.gmra.mxu2 %v12135_v37  ;;  %v8660_v56 = vld [vmem:[#allocation7 + $0x618] sm:$0xf0] }
 0x17d   :  { %v697_v53 = vadd.f32 %v696_v29, %v12219_v43  ;;  %2835 = vmatmul.bf16.gmra.mxu3 %v12142_v51  ;;  %v10884_v29 = vld [vmem:[#allocation7 + $0x784] sm:$0xf]  ;;  %2886 = vmatpush.bf16.msrb.mxu1 %v8495_v27 }
 0x17e   :  { %v827_v42 = vmax.f32 %v749_v3, %v755_v46  ;;  %v8855_v11 = vor.u32 %v10884_v29, %v8852_v17  ;;  %v10740_v3 = vld [vmem:[#allocation7 + $0x304] sm:$0xf]  ;;  %v8276_v46 = vld [vmem:[#allocation7 + $0x318] sm:$0xf0]  ;;  %v8450_v29 = vld [vmem:[#allocation7 + $0x458] sm:$0xf] }
 0x17f   :  { %v756_v33 = vmax.f32 %v697_v53, 0.0  ;;  %v8663_v53 = vor.u32 %v10836_v23, %v8660_v56  ;;  %v10786_v17 = vld [vmem:[#allocation7 + $0x46c] sm:$0xf0] }
 0x180   :  { %v12262_v47 = vpack.c.bf16 %v827_v42, %v821_v24  ;;  %v13627_v24 = vld [vmem:[#allocation41_spill] sm:$0xff]  ;;  %2945 = vmatpush.bf16.msra.mxu3 %v8855_v11  ;;  %v8451_v11 = vor.u32 %v10786_v17, %v8450_v29 }
 0x181   :  { %v828_v32 = vmax.f32 %v750_v45, %v756_v33  ;;  %v670_v63 = vpop.f32.mrf.mxu2  ;;  %v13626_v45 = vld [vmem:[#allocation39_spill] sm:$0xff]  ;;  %v499_v42 = vadd.f32 %v13627_v24, %v12223_v59  ;;  %2916 = vmatpush.bf16.msra.mxu2 %v8663_v53  ;;  %v13631_v24 = vld [vmem:[#allocation45_spill] sm:$0xff] }
 0x182   :  { %2748 = vmatmul.bf16.gmra.mxu0 %v12262_v47  ;;  %v671_v36 = vadd.f32 %v670_v63, %v12213_v52  ;;  %v497_v33 = vadd.f32 %v13626_v45, %v12223_v59  ;;  %v528_v63 = vadd.f32 %v13629_v13, %v12226_v30  ;;  %v13630_v45 = vld [vmem:[#allocation43_spill] sm:$0xff]  ;;  %v13632_v13 = vld [vmem:[#allocation44_spill] sm:$0xff]  ;;  %v8618_v29 = vld [vmem:[#allocation7 + $0x5a8] sm:$0xf] }
 0x183   :  { %v12264_v0 = vpack.c.bf16 %v828_v32, %v822_v34  ;;  %v8279_v34 = vor.u32 %v10740_v3, %v8276_v46  ;;  %v8468_v32 = vld [vmem:[#allocation7 + $0x498] sm:$0xf0]  ;;  %v773_v49 = vmax.f32 %v499_v42, 0.0  ;;  %v10690_v3 = vld [vmem:[#allocation7 + $0x16c] sm:$0xf0]  ;;  %v504_v42 = vadd.f32 %v13631_v24, %v12223_v59 }
 0x184   :  { %v699_v55 = vpop.f32.mrf.mxu3  ;;  %v8471_v38 = vor.u32 %v10788_v58, %v8468_v32  ;;  %v767_v15 = vmax.f32 %v671_v36, 0.0  ;;  %v761_v57 = vmax.f32 %v497_v33, 0.0  ;;  %v774_v35 = vmax.f32 %v528_v63, 0.0  ;;  %v8642_v46 = vld [vmem:[#allocation7 + $0x5d8] sm:$0xf] }
 0x185   :  { %2777 = vmatmul.bf16.gmra.mxu1 %v12264_v0  ;;  %v700_v44 = vadd.f32 %v699_v55, %v12219_v43  ;;  %2858 = vmatpush.bf16.msrb.mxu0 %v8279_v34  ;;  %v10834_v58 = vld [vmem:[#allocation7 + $0x5ec] sm:$0xf0]  ;;  %v502_v33 = vadd.f32 %v13630_v45, %v12223_v59  ;;  %v531_v63 = vadd.f32 %v13632_v13, %v12226_v30  ;;  %v10828_v17 = vld [vmem:[#allocation7 + $0x5bc] sm:$0xf0] }
 0x186   :  { %2887 = vmatpush.bf16.msrb.mxu1 %v8471_v38  ;;  %v833_v40 = vmax.f32 %v761_v57, %v767_v15  ;;  %v8643_v32 = vor.u32 %v10834_v58, %v8642_v46  ;;  %3025 = vmatpush.bf16.msrb.mxu2 %v8451_v11  ;;  %v8619_v11 = vor.u32 %v10828_v17, %v8618_v29  ;;  %v10732_v46 = vld [vmem:[#allocation7 + $0x2bc] sm:$0xf0]  ;;  %v10774_v24 = vld [vmem:[#allocation7 + $0x40c] sm:$0xf0]  ;;  %v8354_v17 = vld [vmem:[#allocation7 + $0x398] sm:$0xf] }
 0x187   :  { %v768_v12 = vmax.f32 %v700_v44, 0.0  ;;  %v8066_v44 = vld [vmem:[#allocation7 + $0x158] sm:$0xf] }
 0x188   :  { %v8067_v34 = vor.u32 %v10690_v3, %v8066_v44  ;;  %3054 = vmatpush.bf16.msrb.mxu3 %v8643_v32  ;;  %v8234_v3 = vld [vmem:[#allocation7 + $0x2a8] sm:$0xf]  ;;  %v10678_v32 = vld [vmem:[#allocation7 + $0x10c] sm:$0xf0] }
 0x189   :  { %v672_v10 = vpop.f32.mrf.mxu2  ;;  %v834_v22 = vmax.f32 %v762_v6, %v768_v12  ;;  %v8235_v45 = vor.u32 %v10732_v46, %v8234_v3 }
 0x18a   :  { %v673_v55 = vadd.f32 %v672_v10, %v12213_v52  ;;  %v13633_v10 = vld [vmem:[#allocation46_spill] sm:$0xff]  ;;  %2967 = vmatpush.bf16.msra.mxu0 %v8067_v34 }
 0x18b   :  { %v533_v38 = vadd.f32 %v13633_v10, %v12226_v30  ;;  %v8210_v10 = vld [vmem:[#allocation7 + $0x278] sm:$0xf] }
 0x18c   :  { %v701_v20 = vpop.f32.mrf.mxu3  ;;  %v779_v2 = vmax.f32 %v673_v55, 0.0  ;;  %2811 = vmatmul.bf16.gmra.mxu2 %v12174_v31  ;;  %v8259_v55 = vor.u32 %v10738_v48, %v8258_v60  ;;  %3055 = vmatpush.bf16.msrb.mxu3 %v8619_v11  ;;  %v8594_v60 = vld [vmem:[#allocation7 + $0x578] sm:$0xf]  ;;  %v10822_v48 = vld [vmem:[#allocation7 + $0x58c] sm:$0xf0] }
 0x18d   :  { %v702_v21 = vadd.f32 %v701_v20, %v12219_v43  ;;  %2840 = vmatmul.bf16.gmra.mxu3 %v12179_v19  ;;  %v798_v30 = vmax.f32 %v533_v38, 0.0  ;;  %v10726_v38 = vld [vmem:[#allocation7 + $0x28c] sm:$0xf0]  ;;  %v7970_v11 = vld [vmem:[#allocation7 + $0x98] sm:$0xf] }
 0x18e   :  { %v839_v16 = vmax.f32 %v773_v49, %v779_v2  ;;  %2996 = vmatpush.bf16.msra.mxu1 %v8259_v55  ;;  %v785_v49 = vmax.f32 %v502_v33, 0.0  ;;  %v797_v2 = vmax.f32 %v504_v42, 0.0  ;;  %v8402_v33 = vld [vmem:[#allocation7 + $0x3f8] sm:$0xf]  ;;  %v8211_v55 = vor.u32 %v10726_v38, %v8210_v10  ;;  %v10714_v10 = vld [vmem:[#allocation7 + $0x22c] sm:$0xf0] }
 0x18f   :  { %v780_v4 = vmax.f32 %v702_v21, 0.0  ;;  %v8018_v42 = vld [vmem:[#allocation7 + $0xf8] sm:$0xf]  ;;  %v8403_v34 = vor.u32 %v10774_v24, %v8402_v33  ;;  %v10666_v33 = vld [vmem:[#allocation7 + $0xac] sm:$0xf0] }
 0x190   :  { %v12282_v26 = vpack.c.bf16 %v839_v16, %v833_v40  ;;  %v8019_v13 = vor.u32 %v10678_v32, %v8018_v42  ;;  %v8546_v24 = vld [vmem:[#allocation7 + $0x518] sm:$0xf]  ;;  %v10810_v42 = vld [vmem:[#allocation7 + $0x52c] sm:$0xf0] }
 0x191   :  { %v840_v5 = vmax.f32 %v774_v35, %v780_v4  ;;  %v675_v36 = vpop.f32.mrf.mxu2  ;;  %v786_v35 = vmax.f32 %v531_v63, 0.0  ;;  %v8595_v63 = vor.u32 %v10822_v48, %v8594_v60  ;;  %v7971_v48 = vor.u32 %v10666_v33, %v7970_v11  ;;  %v10750_v11 = vld [vmem:[#allocation7 + $0x34c] sm:$0xf0] }
 0x192   :  { %2753 = vmatmul.bf16.gmra.mxu0 %v12282_v26  ;;  %v676_v56 = vadd.f32 %v675_v36, %v12213_v52  ;;  %2997 = vmatpush.bf16.msra.mxu1 %v8235_v45  ;;  %v10798_v33 = vld [vmem:[#allocation7 + $0x4cc] sm:$0xf0] }
 0x193   :  { %v12284_v23 = vpack.c.bf16 %v840_v5, %v834_v22  ;;  %v10780_v22 = vld [vmem:[#allocation7 + $0x43c] sm:$0xf0]  ;;  %v8042_v5 = vld [vmem:[#allocation7 + $0x128] sm:$0xf]  ;;  %3056 = vmatpush.bf16.msrb.mxu3 %v8595_v63  ;;  %v8162_v63 = vld [vmem:[#allocation7 + $0x218] sm:$0xf] }
 0x194   :  { %v704_v27 = vpop.f32.mrf.mxu3  ;;  %v791_v20 = vmax.f32 %v676_v56, 0.0  ;;  %v8163_v38 = vor.u32 %v10714_v10, %v8162_v63  ;;  %v10702_v10 = vld [vmem:[#allocation7 + $0x1cc] sm:$0xf0] }
 0x195   :  { %2782 = vmatmul.bf16.gmra.mxu1 %v12284_v23  ;;  %v705_v53 = vadd.f32 %v704_v27, %v12219_v43 }
 0x196   :  { %v845_v40 = vmax.f32 %v785_v49, %v791_v20  ;;  %2998 = vmatpush.bf16.msra.mxu1 %v8211_v55 }
 0x197   :  { %v792_v59 = vmax.f32 %v705_v53, 0.0 }
 0x199   :  { %v677_v15 = vpop.f32.mrf.mxu2  ;;  %v846_v36 = vmax.f32 %v786_v35, %v792_v59  ;;  %v7994_v59 = vld [vmem:[#allocation7 + $0xc8] sm:$0xf] }
 0x19a   :  { %v678_v12 = vadd.f32 %v677_v15, %v12213_v52  ;;  %v8426_v52 = vld [vmem:[#allocation7 + $0x428] sm:$0xf]  ;;  %v12308_v15 = vld [vmem:[#allocation8] sm:$0x3f] }
 0x19b   :  { %v8427_v56 = vor.u32 %v10780_v22, %v8426_v52  ;;  %v12312_v20 = vperm.slane %v12308_v15, 0  ;;  %v8570_v35 = vld [vmem:[#allocation7 + $0x548] sm:$0xf] }
 0x19c   :  { %v706_v21 = vpop.f32.mrf.mxu3  ;;  %v803_v6 = vmax.f32 %v678_v12, 0.0  ;;  %2816 = vmatmul.bf16.gmra.mxu2 %v12210_v62  ;;  %v8378_v12 = vld [vmem:[#allocation7 + $0x3c8] sm:$0xf] }
 0x19d   :  { %v707_v57 = vadd.f32 %v706_v21, %v12219_v43  ;;  %2845 = vmatmul.bf16.gmra.mxu3 %v12215_v25  ;;  %v10684_v43 = vld [vmem:[#allocation7 + $0x13c] sm:$0xf0]  ;;  %3026 = vmatpush.bf16.msrb.mxu2 %v8427_v56 }
 0x19e   :  { %v851_v16 = vmax.f32 %v797_v2, %v803_v6  ;;  %v8043_v53 = vor.u32 %v10684_v43, %v8042_v5  ;;  %v10768_v21 = vld [vmem:[#allocation7 + $0x3dc] sm:$0xf0]  ;;  %v8186_v5 = vld [vmem:[#allocation7 + $0x248] sm:$0xf] }
 0x19f   :  { %v804_v4 = vmax.f32 %v707_v57, 0.0  ;;  %v8379_v2 = vor.u32 %v10768_v21, %v8378_v12  ;;  %v10672_v6 = vld [vmem:[#allocation7 + $0xdc] sm:$0xf0] }
 0x1a0   :  { %v12302_v44 = vpack.c.bf16 %v851_v16, %v845_v40  ;;  %2968 = vmatpush.bf16.msra.mxu0 %v8043_v53  ;;  %v7995_v52 = vor.u32 %v10672_v6, %v7994_v59  ;;  %v10762_v53 = vld [vmem:[#allocation7 + $0x3ac] sm:$0xf0]  ;;  %v8330_v59 = vld [vmem:[#allocation7 + $0x368] sm:$0xf] }
 0x1a1   :  { %v852_v27 = vmax.f32 %v798_v30, %v804_v4  ;;  %3027 = vmatpush.bf16.msrb.mxu2 %v8403_v34  ;;  %v10816_v30 = vld [vmem:[#allocation7 + $0x55c] sm:$0xf0]  ;;  %v8355_v45 = vor.u32 %v10762_v53, %v8354_v17  ;;  %v8306_v53 = vld [vmem:[#allocation7 + $0x338] sm:$0xf] }
 0x1a2   :  { %2758 = vmatmul.bf16.gmra.mxu0 %v12302_v44  ;;  %v8571_v22 = vor.u32 %v10816_v30, %v8570_v35  ;;  %v10660_v30 = vld [vmem:[#allocation7 + $0x7c] sm:$0xf0] }
 0x1a3   :  { %v12304_v58 = vpack.c.bf16 %v852_v27, %v846_v36  ;;  %v10720_v36 = vld [vmem:[#allocation7 + $0x25c] sm:$0xf0] }
 0x1a4   :  { %2969 = vmatpush.bf16.msra.mxu0 %v8019_v13  ;;  %v8187_v27 = vor.u32 %v10720_v36, %v8186_v5  ;;  %3057 = vmatpush.bf16.msrb.mxu3 %v8571_v22  ;;  %v8547_v13 = vor.u32 %v10810_v42, %v8546_v24 }
 0x1a5   :  { %2787 = vmatmul.bf16.gmra.mxu1 %v12304_v58  ;;  %3028 = vmatpush.bf16.msrb.mxu2 %v8379_v2 }
 0x1a6   :  { %2999 = vmatpush.bf16.msra.mxu1 %v8187_v27  ;;  %v8138_v27 = vld [vmem:[#allocation7 + $0x1e8] sm:$0xf] }
 0x1a8   :  { %2970 = vmatpush.bf16.msra.mxu0 %v7995_v52  ;;  %3058 = vmatpush.bf16.msrb.mxu3 %v8547_v13 }
 0x1a9   :  { %3029 = vmatpush.bf16.msrb.mxu2 %v8355_v45  ;;  %v8307_v45 = vor.u32 %v10750_v11, %v8306_v53 }
 0x1aa   :  { %3000 = vmatpush.bf16.msra.mxu1 %v8163_v38  ;;  %v8282_v38 = vld [vmem:[#allocation7 + $0x308] sm:$0xf] }
 0x1ac   :  { %2917 = vmatmul.bf16.vlgmr.msra.gmra.mxu2 %v12242_v39  ;;  %2971 = vmatpush.bf16.msra.mxu0 %v7971_v48 }
 0x1ad   :  { %2946 = vmatmul.bf16.vlgmr.msra.gmra.mxu3 %v12244_v18 }
 0x1af   :  { %v2628_v57 = vpop.f32.mrf.mxu0  ;;  %v2686_v49 = vpop.f32.mrf.mxu2 }
 0x1b0   :  { %v2629_v4 = vadd.f32 %v2628_v57, %v12312_v20  ;;  %v2715_v16 = vpop.f32.mrf.mxu3  ;;  %v10756_v57 = vld [vmem:[#allocation7 + $0x37c] sm:$0xf0] }
 0x1b1   :  { %v8331_v35 = vor.u32 %v10756_v57, %v8330_v59 }
 0x1b2   :  { %v2657_v40 = vpop.f32.mrf.mxu1  ;;  %2859 = vmatmul.bf16.vlgmr.msrb.gmra.mxu0 %v12091_v8 }
 0x1b3   :  { %v2658_v56 = vadd.f32 %v2657_v40, %v2629_v4  ;;  %v8522_v4 = vld [vmem:[#allocation7 + $0x4e8] sm:$0xf]  ;;  %v10804_v40 = vld [vmem:[#allocation7 + $0x4fc] sm:$0xf0]  ;;  %3030 = vmatpush.bf16.msrb.mxu2 %v8331_v35 }
 0x1b4   :  { %v8523_v36 = vor.u32 %v10804_v40, %v8522_v4  ;;  %v10792_v35 = vld [vmem:[#allocation7 + $0x49c] sm:$0xf0] }
 0x1b5   :  { %2888 = vmatmul.bf16.vlgmr.msrb.gmra.mxu1 %v12094_v50  ;;  %v2687_v43 = vadd.f32 %v2686_v49, %v2658_v56  ;;  %v7946_v49 = vld [vmem:[#allocation7 + $0x68] sm:$0xf]  ;;  %v10708_v56 = vld [vmem:[#allocation7 + $0x1fc] sm:$0xf0] }
 0x1b6   :  { %v7947_v5 = vor.u32 %v10660_v30, %v7946_v49  ;;  %3059 = vmatpush.bf16.msrb.mxu3 %v8523_v36 }
 0x1b7   :  { %v12318_v29 = vadd.f32 %v2715_v16, %v2687_v43  ;;  %v2630_v3 = vpop.f32.mrf.mxu0  ;;  %v2688_v46 = vpop.f32.mrf.mxu2  ;;  %v8139_v43 = vor.u32 %v10708_v56, %v8138_v27  ;;  %3031 = vmatpush.bf16.msrb.mxu2 %v8307_v45  ;;  %v10696_v27 = vld [vmem:[#allocation7 + $0x19c] sm:$0xf0] }
 0x1b8   :  { %v2631_v34 = vadd.f32 %v2630_v3, %v12312_v20  ;;  %v2717_v60 = vpop.f32.mrf.mxu3  ;;  %2972 = vmatpush.bf16.msra.mxu0 %v7947_v5  ;;  %v8498_v3 = vld [vmem:[#allocation7 + $0x4b8] sm:$0xf] }
 0x1b9   :  { %3001 = vmatpush.bf16.msra.mxu1 %v8139_v43  ;;  %v8499_v24 = vor.u32 %v10798_v33, %v8498_v3  ;;  %v10687_v33 = vld [vmem:[#allocation7 + $0x15c] sm:$0xf] }
 0x1ba   :  { %v2659_v32 = vpop.f32.mrf.mxu1 }
 0x1bb   :  { %v2660_v55 = vadd.f32 %v2659_v32, %v2631_v34  ;;  %v7922_v34 = vld [vmem:[#allocation7 + $0x38] sm:$0xf]  ;;  %v10654_v32 = vld [vmem:[#allocation7 + $0x4c] sm:$0xf0]  ;;  %3060 = vmatpush.bf16.msrb.mxu3 %v8499_v24  ;;  %v8068_v24 = vld [vmem:[#allocation7 + $0x170] sm:$0xf0] }
 0x1bc   :  { %2922 = vmatmul.bf16.gmra.mxu2 %v12262_v47  ;;  %v7923_v63 = vor.u32 %v10654_v32, %v7922_v34  ;;  %v8834_v34 = vld [vmem:[#allocation7 + $0x758] sm:$0xf]  ;;  %v8071_v32 = vor.u32 %v10687_v33, %v8068_v24  ;;  %v9002_v24 = vld [vmem:[#allocation7 + $0x8a8] sm:$0xf] }
 0x1bd   :  { %v2689_v12 = vadd.f32 %v2688_v46, %v2660_v55  ;;  %2951 = vmatmul.bf16.gmra.mxu3 %v12264_v0  ;;  %v10744_v55 = vld [vmem:[#allocation7 + $0x31c] sm:$0xf0] }
 0x1be   :  { %2973 = vmatpush.bf16.msra.mxu0 %v7923_v63 }
 0x1bf   :  { %v12323_v21 = vadd.f32 %v2717_v60, %v2689_v12  ;;  %v2633_v2 = vpop.f32.mrf.mxu0  ;;  %v2691_v6 = vpop.f32.mrf.mxu2  ;;  %v8114_v60 = vld [vmem:[#allocation7 + $0x1b8] sm:$0xf] }
 0x1c0   :  { %v2634_v16 = vadd.f32 %v2633_v2, %v12312_v20  ;;  %v2720_v22 = vpop.f32.mrf.mxu3  ;;  %v8115_v49 = vor.u32 %v10702_v10, %v8114_v60  ;;  %v8283_v2 = vor.u32 %v10744_v55, %v8282_v38  ;;  %v10882_v60 = vld [vmem:[#allocation7 + $0x76c] sm:$0xf0]  ;;  %v9026_v55 = vld [vmem:[#allocation7 + $0x8d8] sm:$0xf] }
 0x1c1   :  { %v8835_v10 = vor.u32 %v10882_v60, %v8834_v34  ;;  %v10924_v34 = vld [vmem:[#allocation7 + $0x8bc] sm:$0xf0] }
 0x1c2   :  { %v2662_v52 = vpop.f32.mrf.mxu1  ;;  %2864 = vmatmul.bf16.gmra.mxu0 %v12127_v41  ;;  %3002 = vmatpush.bf16.msra.mxu1 %v8115_v49 }
 0x1c3   :  { %v2663_v17 = vadd.f32 %v2662_v52, %v2634_v16  ;;  %3032 = vmatpush.bf16.msrb.mxu2 %v8283_v2  ;;  %v7898_v16 = vld [vmem:[#allocation7 + $0x8] sm:$0xf]  ;;  %v10648_v52 = vld [vmem:[#allocation7 + $0x1c] sm:$0xf0] }
 0x1c4   :  { %v7899_v36 = vor.u32 %v10648_v52, %v7898_v16  ;;  %v10681_v16 = vld [vmem:[#allocation7 + $0x12c] sm:$0xf]  ;;  %v8044_v52 = vld [vmem:[#allocation7 + $0x140] sm:$0xf0] }
 0x1c5   :  { %2893 = vmatmul.bf16.gmra.mxu1 %v12130_v61  ;;  %v2692_v46 = vadd.f32 %v2691_v6, %v2663_v17  ;;  %v8474_v6 = vld [vmem:[#allocation7 + $0x488] sm:$0xf] }
 0x1c6   :  { %v8475_v30 = vor.u32 %v10792_v35, %v8474_v6  ;;  %2974 = vmatpush.bf16.msra.mxu0 %v7899_v36 }
 0x1c7   :  { %v12328_v42 = vadd.f32 %v2720_v22, %v2692_v46  ;;  %v2635_v48 = vpop.f32.mrf.mxu0  ;;  %v2693_v13 = vpop.f32.mrf.mxu2  ;;  %v8090_v22 = vld [vmem:[#allocation7 + $0x188] sm:$0xf]  ;;  %3141 = vmatpush.bf16.msra.mxu2 %v8071_v32  ;;  %v9003_v32 = vor.u32 %v10924_v34, %v9002_v24  ;;  %v10864_v24 = vld [vmem:[#allocation7 + $0x6dc] sm:$0xf0]  ;;  %v10717_v34 = vld [vmem:[#allocation7 + $0x24c] sm:$0xf] }
 0x1c8   :  { %v2636_v12 = vadd.f32 %v2635_v48, %v12312_v20  ;;  %v2722_v57 = vpop.f32.mrf.mxu3  ;;  %3061 = vmatpush.bf16.msrb.mxu3 %v8475_v30  ;;  %v8091_v17 = vor.u32 %v10696_v27, %v8090_v22  ;;  %v10735_v48 = vld [vmem:[#allocation7 + $0x2dc] sm:$0xf]  ;;  %v8810_v22 = vld [vmem:[#allocation7 + $0x728] sm:$0xf] }
 0x1ca   :  { %v2664_v59 = vpop.f32.mrf.mxu1  ;;  %3003 = vmatpush.bf16.msra.mxu1 %v8091_v17  ;;  %3083 = vmatpush.bf16.msrb.mxu0 %v8835_v10  ;;  %v10729_v17 = vld [vmem:[#allocation7 + $0x2ac] sm:$0xf]  ;;  %v8020_v10 = vld [vmem:[#allocation7 + $0x110] sm:$0xf0] }
 0x1cb   :  { %v2665_v4 = vadd.f32 %v2664_v59, %v2636_v12  ;;  %v10930_v12 = vld [vmem:[#allocation7 + $0x8ec] sm:$0xf0] }
 0x1cc   :  { %2927 = vmatmul.bf16.gmra.mxu2 %v12282_v26  ;;  %v9027_v49 = vor.u32 %v10930_v12, %v9026_v55  ;;  %v10870_v12 = vld [vmem:[#allocation7 + $0x70c] sm:$0xf0] }
 0x1cd   :  { %v2694_v40 = vadd.f32 %v2693_v13, %v2665_v4  ;;  %2956 = vmatmul.bf16.gmra.mxu3 %v12284_v23  ;;  %v8260_v13 = vld [vmem:[#allocation7 + $0x2f0] sm:$0xf0] }
 0x1ce   :  { %v8263_v38 = vor.u32 %v10735_v48, %v8260_v13  ;;  %3112 = vmatpush.bf16.msrb.mxu1 %v9027_v49  ;;  %v10675_v13 = vld [vmem:[#allocation7 + $0xfc] sm:$0xf] }
 0x1cf   :  { %v12333_v5 = vadd.f32 %v2722_v57, %v2694_v40  ;;  %v2638_v56 = vpop.f32.mrf.mxu0  ;;  %v2696_v43 = vpop.f32.mrf.mxu2  ;;  %v8023_v55 = vor.u32 %v10675_v13, %v8020_v10 }
 0x1d0   :  { %v2639_v53 = vadd.f32 %v2638_v56, %v12312_v20  ;;  %v2725_v3 = vpop.f32.mrf.mxu3  ;;  %3170 = vmatpush.bf16.msra.mxu3 %v8263_v38  ;;  %v8047_v56 = vor.u32 %v10681_v16, %v8044_v52  ;;  %v8786_v38 = vld [vmem:[#allocation7 + $0x6f8] sm:$0xf] }
 0x1d2   :  { %v2667_v11 = vpop.f32.mrf.mxu1  ;;  %2869 = vmatmul.bf16.gmra.mxu0 %v12166_v1  ;;  %3142 = vmatpush.bf16.msra.mxu2 %v8047_v56 }
 0x1d3   :  { %v2668_v46 = vadd.f32 %v2667_v11, %v2639_v53  ;;  %v8236_v53 = vld [vmem:[#allocation7 + $0x2c0] sm:$0xf0]  ;;  %3113 = vmatpush.bf16.msrb.mxu1 %v9003_v32 }
 0x1d4   :  { %v8239_v33 = vor.u32 %v10729_v17, %v8236_v53  ;;  %v12353_v17 = vperm.slane %v12308_v15, 1  ;;  %v8188_v32 = vld [vmem:[#allocation7 + $0x260] sm:$0xf0] }
 0x1d5   :  { %2898 = vmatmul.bf16.gmra.mxu1 %v12169_v7  ;;  %v2697_v45 = vadd.f32 %v2696_v43, %v2668_v46  ;;  %v10876_v43 = vld [vmem:[#allocation7 + $0x73c] sm:$0xf0] }
 0x1d6   :  { %3171 = vmatpush.bf16.msra.mxu3 %v8239_v33  ;;  %3143 = vmatpush.bf16.msra.mxu2 %v8023_v55  ;;  %v8954_v55 = vld [vmem:[#allocation7 + $0x848] sm:$0xf] }
 0x1d7   :  { %v12338_v63 = vadd.f32 %v2725_v3, %v2697_v45  ;;  %v2640_v59 = vpop.f32.mrf.mxu0  ;;  %v2698_v57 = vpop.f32.mrf.mxu2  ;;  %v8811_v45 = vor.u32 %v10876_v43, %v8810_v22 }
 0x1d8   :  { %v2641_v2 = vadd.f32 %v2640_v59, %v12312_v20  ;;  %v2727_v35 = vpop.f32.mrf.mxu3  ;;  %v10723_v59 = vld [vmem:[#allocation7 + $0x27c] sm:$0xf] }
 0x1d9   :  { %3084 = vmatpush.bf16.msrb.mxu0 %v8811_v45 }
 0x1da   :  { %v2669_v6 = vpop.f32.mrf.mxu1 }
 0x1db   :  { %v2670_v30 = vadd.f32 %v2669_v6, %v2641_v2  ;;  %v8787_v2 = vor.u32 %v10870_v12, %v8786_v38  ;;  %v8191_v38 = vor.u32 %v10717_v34, %v8188_v32  ;;  %v10912_v12 = vld [vmem:[#allocation7 + $0x85c] sm:$0xf0] }
 0x1dc   :  { %2932 = vmatmul.bf16.gmra.mxu2 %v12302_v44 }
 0x1dd   :  { %v2699_v4 = vadd.f32 %v2698_v57, %v2670_v30  ;;  %2961 = vmatmul.bf16.gmra.mxu3 %v12304_v58  ;;  %v8212_v57 = vld [vmem:[#allocation7 + $0x290] sm:$0xf0]  ;;  %v10918_v30 = vld [vmem:[#allocation7 + $0x88c] sm:$0xf0]  ;;  %3085 = vmatpush.bf16.msrb.mxu0 %v8787_v2 }
 0x1de   :  { %v8215_v6 = vor.u32 %v10723_v59, %v8212_v57  ;;  %v8955_v59 = vor.u32 %v10912_v12, %v8954_v55  ;;  %v10852_v12 = vld [vmem:[#allocation7 + $0x67c] sm:$0xf0] }
 0x1df   :  { %v12343_v40 = vadd.f32 %v2727_v35, %v2699_v4  ;;  %v2643_v36 = vpop.f32.mrf.mxu0  ;;  %v2701_v27 = vpop.f32.mrf.mxu2  ;;  %v8978_v35 = vld [vmem:[#allocation7 + $0x878] sm:$0xf] }
 0x1e0   :  { %v2644_v11 = vadd.f32 %v2643_v36, %v12312_v20  ;;  %v2730_v46 = vpop.f32.mrf.mxu3  ;;  %v8979_v52 = vor.u32 %v10918_v30, %v8978_v35  ;;  %3172 = vmatpush.bf16.msra.mxu3 %v8215_v6  ;;  %v7972_v6 = vld [vmem:[#allocation7 + $0xb0] sm:$0xf0]  ;;  %v8738_v30 = vld [vmem:[#allocation7 + $0x698] sm:$0xf] }
 0x1e2   :  { %v2672_v3 = vpop.f32.mrf.mxu1  ;;  %2874 = vmatmul.bf16.gmra.mxu0 %v12202_v54  ;;  %3114 = vmatpush.bf16.msrb.mxu1 %v8979_v52 }
 0x1e3   :  { %v2673_v60 = vadd.f32 %v2672_v3, %v2644_v11  ;;  %v10669_v11 = vld [vmem:[#allocation7 + $0xcc] sm:$0xf]  ;;  %v7996_v3 = vld [vmem:[#allocation7 + $0xe0] sm:$0xf0] }
 0x1e4   :  { %v7999_v33 = vor.u32 %v10669_v11, %v7996_v3  ;;  %3173 = vmatpush.bf16.msra.mxu3 %v8191_v38 }
 0x1e5   :  { %2903 = vmatmul.bf16.gmra.mxu1 %v12205_v28  ;;  %v2702_v48 = vadd.f32 %v2701_v27, %v2673_v60 }
 0x1e6   :  { %3144 = vmatpush.bf16.msra.mxu2 %v7999_v33  ;;  %3115 = vmatpush.bf16.msrb.mxu1 %v8955_v59  ;;  %v10705_v59 = vld [vmem:[#allocation7 + $0x1ec] sm:$0xf] }
 0x1e7   :  { %v12348_v49 = vadd.f32 %v2730_v46, %v2702_v48  ;;  %v2645_v4 = vpop.f32.mrf.mxu0  ;;  %v2703_v16 = vpop.f32.mrf.mxu2  ;;  %v8762_v46 = vld [vmem:[#allocation7 + $0x6c8] sm:$0xf] }
 0x1e8   :  { %v2646_v22 = vadd.f32 %v2645_v4, %v12312_v20  ;;  %v2732_v27 = vpop.f32.mrf.mxu3  ;;  %v8763_v10 = vor.u32 %v10864_v24, %v8762_v46  ;;  %v10858_v4 = vld [vmem:[#allocation7 + $0x6ac] sm:$0xf0] }
 0x1e9   :  { %v8739_v52 = vor.u32 %v10858_v4, %v8738_v30 }
 0x1ea   :  { %v2674_v36 = vpop.f32.mrf.mxu1  ;;  %3086 = vmatpush.bf16.msrb.mxu0 %v8763_v10 }
 0x1eb   :  { %v2675_v56 = vadd.f32 %v2674_v36, %v2646_v22  ;;  %v8164_v22 = vld [vmem:[#allocation7 + $0x230] sm:$0xf0]  ;;  %v8930_v36 = vld [vmem:[#allocation7 + $0x818] sm:$0xf] }
 0x1ec   :  { %3033 = vmatmul.bf16.vlgmr.msrb.gmra.mxu2 %v12091_v8 }
 0x1ed   :  { %v2704_v43 = vadd.f32 %v2703_v16, %v2675_v56  ;;  %3062 = vmatmul.bf16.vlgmr.msrb.gmra.mxu3 %v12094_v50  ;;  %v10711_v16 = vld [vmem:[#allocation7 + $0x21c] sm:$0xf] }
 0x1ee   :  { %v8167_v11 = vor.u32 %v10711_v16, %v8164_v22  ;;  %3087 = vmatpush.bf16.msrb.mxu0 %v8739_v52  ;;  %v8906_v52 = vld [vmem:[#allocation7 + $0x7e8] sm:$0xf]  ;;  %v10900_v22 = vld [vmem:[#allocation7 + $0x7fc] sm:$0xf0] }
 0x1ef   :  { %v12356_v53 = vadd.f32 %v2732_v27, %v2704_v43  ;;  %v2744_v20 = vpop.f32.mrf.mxu0  ;;  %v2802_v45 = vpop.f32.mrf.mxu2  ;;  %v10906_v27 = vld [vmem:[#allocation7 + $0x82c] sm:$0xf0] }
 0x1f0   :  { %v2745_v60 = vadd.f32 %v2744_v20, %v12318_v29  ;;  %v2803_v13 = vadd.f32 %v2802_v45, %v12353_v17  ;;  %v2831_v15 = vpop.f32.mrf.mxu3  ;;  %v10663_v29 = vld [vmem:[#allocation7 + $0x9c] sm:$0xf]  ;;  %v8931_v3 = vor.u32 %v10906_v27, %v8930_v36  ;;  %3174 = vmatpush.bf16.msra.mxu3 %v8167_v11  ;;  %v8907_v36 = vor.u32 %v10900_v22, %v8906_v52 }
 0x1f1   :  { %v7975_v35 = vor.u32 %v10663_v29, %v7972_v6  ;;  %v8140_v29 = vld [vmem:[#allocation7 + $0x200] sm:$0xf0]  ;;  %v10699_v11 = vld [vmem:[#allocation7 + $0x1bc] sm:$0xf] }
 0x1f2   :  { %v2773_v48 = vpop.f32.mrf.mxu1  ;;  %v12360_v2 = vadd.f32 %v2831_v15, %v2803_v13  ;;  %2975 = vmatmul.bf16.vlgmr.msra.gmra.mxu0 %v12099_v9  ;;  %3116 = vmatpush.bf16.msrb.mxu1 %v8931_v3  ;;  %v10657_v13 = vld [vmem:[#allocation7 + $0x6c] sm:$0xf]  ;;  %v8714_v15 = vld [vmem:[#allocation7 + $0x668] sm:$0xf]  ;;  %v8143_v16 = vor.u32 %v10705_v59, %v8140_v29 }
 0x1f3   :  { %v2774_v57 = vadd.f32 %v2773_v48, %v2745_v60  ;;  %3145 = vmatpush.bf16.msra.mxu2 %v7975_v35  ;;  %v8715_v4 = vor.u32 %v10852_v12, %v8714_v15 }
 0x1f4   :  { %3175 = vmatpush.bf16.msra.mxu3 %v8143_v16 }
 0x1f5   :  { %3004 = vmatmul.bf16.vlgmr.msra.gmra.mxu1 %v12106_v14  ;;  %v3663_v32 = vmax.f32 %v2774_v57, 0.0  ;;  %3088 = vmatpush.bf16.msrb.mxu0 %v8715_v4 }
 0x1f6   :  { %3117 = vmatpush.bf16.msrb.mxu1 %v8907_v36  ;;  %v10840_v36 = vld [vmem:[#allocation7 + $0x61c] sm:$0xf0] }
 0x1f7   :  { %v2746_v56 = vpop.f32.mrf.mxu0  ;;  %v2804_v43 = vpop.f32.mrf.mxu2 }
 0x1f8   :  { %v2747_v46 = vadd.f32 %v2746_v56, %v12323_v21  ;;  %v2805_v45 = vadd.f32 %v2804_v43, %v12353_v17  ;;  %v2833_v33 = vpop.f32.mrf.mxu3  ;;  %v7948_v21 = vld [vmem:[#allocation7 + $0x80] sm:$0xf0]  ;;  %v7924_v43 = vld [vmem:[#allocation7 + $0x50] sm:$0xf0] }
 0x1f9   :  { %v7951_v55 = vor.u32 %v10657_v13, %v7948_v21 }
 0x1fa   :  { %v2775_v20 = vpop.f32.mrf.mxu1  ;;  %v12366_v34 = vadd.f32 %v2833_v33, %v2805_v45  ;;  %v8116_v33 = vld [vmem:[#allocation7 + $0x1d0] sm:$0xf0] }
 0x1fb   :  { %v2776_v24 = vadd.f32 %v2775_v20, %v2747_v46  ;;  %3146 = vmatpush.bf16.msra.mxu2 %v7951_v55  ;;  %v8690_v46 = vld [vmem:[#allocation7 + $0x638] sm:$0xf]  ;;  %v10846_v20 = vld [vmem:[#allocation7 + $0x64c] sm:$0xf0]  ;;  %v10693_v55 = vld [vmem:[#allocation7 + $0x18c] sm:$0xf] }
 0x1fc   :  { %3038 = vmatmul.bf16.gmra.mxu2 %v12127_v41  ;;  %v8691_v45 = vor.u32 %v10846_v20, %v8690_v46 }
 0x1fd   :  { %v3669_v60 = vmax.f32 %v2776_v24, 0.0  ;;  %3067 = vmatmul.bf16.gmra.mxu3 %v12130_v61  ;;  %v8882_v24 = vld [vmem:[#allocation7 + $0x7b8] sm:$0xf] }
 0x1fe   :  { %3089 = vmatpush.bf16.msrb.mxu0 %v8691_v45 }
 0x1ff   :  { %v12370_v48 = vpack.c.bf16 %v3669_v60, %v3663_v32  ;;  %v2749_v10 = vpop.f32.mrf.mxu0  ;;  %v2807_v38 = vpop.f32.mrf.mxu2  ;;  %v10894_v32 = vld [vmem:[#allocation7 + $0x7cc] sm:$0xf0]  ;;  %v8119_v60 = vor.u32 %v10699_v11, %v8116_v33 }
 0x200   :  { %v2750_v6 = vadd.f32 %v2749_v10, %v12328_v42  ;;  %v2808_v57 = vadd.f32 %v2807_v38, %v12353_v17  ;;  %v2836_v30 = vpop.f32.mrf.mxu3  ;;  %v10651_v42 = vld [vmem:[#allocation7 + $0x3c] sm:$0xf]  ;;  %v8883_v13 = vor.u32 %v10894_v32, %v8882_v24  ;;  %v10645_v10 = vld [vmem:[#allocation7 + $0xc] sm:$0xf]  ;;  %v7900_v38 = vld [vmem:[#allocation7 + $0x20] sm:$0xf0] }
 0x201   :  { %v7927_v3 = vor.u32 %v10651_v42, %v7924_v43  ;;  %3176 = vmatpush.bf16.msra.mxu3 %v8119_v60  ;;  %v8858_v42 = vld [vmem:[#allocation7 + $0x788] sm:$0xf] }
 0x202   :  { %v2778_v35 = vpop.f32.mrf.mxu1  ;;  %v12374_v56 = vadd.f32 %v2836_v30, %v2808_v57  ;;  %2980 = vmatmul.bf16.gmra.mxu0 %v12135_v37  ;;  %3118 = vmatpush.bf16.msrb.mxu1 %v8883_v13  ;;  %v8092_v57 = vld [vmem:[#allocation7 + $0x1a0] sm:$0xf0] }
 0x203   :  { %v2779_v27 = vadd.f32 %v2778_v35, %v2750_v6  ;;  %3147 = vmatpush.bf16.msra.mxu2 %v7927_v3  ;;  %v7903_v35 = vor.u32 %v10645_v10, %v7900_v38  ;;  %v8095_v30 = vor.u32 %v10693_v55, %v8092_v57  ;;  %v10888_v3 = vld [vmem:[#allocation7 + $0x79c] sm:$0xf0]  ;;  %v10927_v57 = vld [vmem:[#allocation7 + $0x8dc] sm:$0xf] }
 0x204   :  { %v8859_v45 = vor.u32 %v10888_v3, %v8858_v42  ;;  %v8644_v42 = vld [vmem:[#allocation7 + $0x5f0] sm:$0xf0] }
 0x205   :  { %3009 = vmatmul.bf16.gmra.mxu1 %v12142_v51  ;;  %v3675_v52 = vmax.f32 %v2779_v27, 0.0  ;;  %3177 = vmatpush.bf16.msra.mxu3 %v8095_v30  ;;  %v9028_v30 = vld [vmem:[#allocation7 + $0x8f0] sm:$0xf0] }
 0x206   :  { %3119 = vmatpush.bf16.msrb.mxu1 %v8859_v45 }
 0x207   :  { %v2751_v21 = vpop.f32.mrf.mxu0  ;;  %v2809_v15 = vpop.f32.mrf.mxu2  ;;  %3148 = vmatpush.bf16.msra.mxu2 %v7903_v35  ;;  %v8452_v35 = vld [vmem:[#allocation7 + $0x470] sm:$0xf0] }
 0x208   :  { %v2752_v12 = vadd.f32 %v2751_v21, %v12333_v5  ;;  %v2810_v29 = vadd.f32 %v2809_v15, %v12353_v17  ;;  %v2838_v6 = vpop.f32.mrf.mxu3  ;;  %v8666_v5 = vld [vmem:[#allocation7 + $0x608] sm:$0xf] }
 0x209   :  { %v8667_v11 = vor.u32 %v10840_v36, %v8666_v5  ;;  %v9031_v5 = vor.u32 %v10927_v57, %v9028_v30  ;;  %v10831_v36 = vld [vmem:[#allocation7 + $0x5dc] sm:$0xf] }
 0x20a   :  { %v2780_v59 = vpop.f32.mrf.mxu1  ;;  %v12380_v16 = vadd.f32 %v2838_v6, %v2810_v29  ;;  %v10783_v29 = vld [vmem:[#allocation7 + $0x45c] sm:$0xf] }
 0x20b   :  { %v2781_v4 = vadd.f32 %v2780_v59, %v2752_v12  ;;  %3090 = vmatpush.bf16.msrb.mxu0 %v8667_v11  ;;  %v10879_v12 = vld [vmem:[#allocation7 + $0x75c] sm:$0xf]  ;;  %v8836_v59 = vld [vmem:[#allocation7 + $0x770] sm:$0xf0]  ;;  %3286 = vmatpush.bf16.msrb.mxu3 %v9031_v5 }
 0x20c   :  { %3043 = vmatmul.bf16.gmra.mxu2 %v12166_v1  ;;  %v8839_v6 = vor.u32 %v10879_v12, %v8836_v59  ;;  %v10921_v12 = vld [vmem:[#allocation7 + $0x8ac] sm:$0xf]  ;;  %v9004_v59 = vld [vmem:[#allocation7 + $0x8c0] sm:$0xf0] }
 0x20d   :  { %v3681_v22 = vmax.f32 %v2781_v4, 0.0  ;;  %3072 = vmatmul.bf16.gmra.mxu3 %v12169_v7 }
 0x20e   :  { %3257 = vmatpush.bf16.msrb.mxu2 %v8839_v6  ;;  %v10825_v6 = vld [vmem:[#allocation7 + $0x5ac] sm:$0xf] }
 0x20f   :  { %v12384_v43 = vpack.c.bf16 %v3681_v22, %v3675_v52  ;;  %v2754_v46 = vpop.f32.mrf.mxu0  ;;  %v2812_v20 = vpop.f32.mrf.mxu2  ;;  %v8455_v22 = vor.u32 %v10783_v29, %v8452_v35  ;;  %v8620_v35 = vld [vmem:[#allocation7 + $0x5c0] sm:$0xf0] }
 0x210   :  { %v2755_v33 = vadd.f32 %v2754_v46, %v12338_v63  ;;  %v2813_v27 = vadd.f32 %v2812_v20, %v12353_v17  ;;  %v2841_v32 = vpop.f32.mrf.mxu3  ;;  %v8623_v57 = vor.u32 %v10825_v6, %v8620_v35 }
 0x211   :  { %3199 = vmatpush.bf16.msra.mxu0 %v8455_v22 }
 0x212   :  { %v2783_v24 = vpop.f32.mrf.mxu1  ;;  %v12388_v13 = vadd.f32 %v2841_v32, %v2813_v27  ;;  %2985 = vmatmul.bf16.gmra.mxu0 %v12174_v31 }
 0x213   :  { %v2784_v60 = vadd.f32 %v2783_v24, %v2755_v33 }
 0x215   :  { %3014 = vmatmul.bf16.gmra.mxu1 %v12179_v19  ;;  %v3687_v11 = vmax.f32 %v2784_v60, 0.0 }
 0x217   :  { %v2756_v21 = vpop.f32.mrf.mxu0  ;;  %v2814_v15 = vpop.f32.mrf.mxu2 }
 0x218   :  { %v2757_v10 = vadd.f32 %v2756_v21, %v12343_v40  ;;  %v2815_v63 = vadd.f32 %v2814_v15, %v12353_v17  ;;  %v2843_v55 = vpop.f32.mrf.mxu3  ;;  %v8647_v40 = vor.u32 %v10831_v36, %v8644_v42  ;;  %v10873_v15 = vld [vmem:[#allocation7 + $0x72c] sm:$0xf] }
 0x21a   :  { %v2785_v38 = vpop.f32.mrf.mxu1  ;;  %v12394_v52 = vadd.f32 %v2843_v55, %v2815_v63  ;;  %3228 = vmatpush.bf16.msra.mxu1 %v8647_v40  ;;  %v8428_v55 = vld [vmem:[#allocation7 + $0x440] sm:$0xf0]  ;;  %v10867_v40 = vld [vmem:[#allocation7 + $0x6fc] sm:$0xf] }
 0x21b   :  { %v2786_v4 = vadd.f32 %v2785_v38, %v2757_v10  ;;  %v8812_v10 = vld [vmem:[#allocation7 + $0x740] sm:$0xf0]  ;;  %v10777_v38 = vld [vmem:[#allocation7 + $0x42c] sm:$0xf] }
 0x21c   :  { %3048 = vmatmul.bf16.gmra.mxu2 %v12202_v54  ;;  %v8815_v63 = vor.u32 %v10873_v15, %v8812_v10  ;;  %v8431_v29 = vor.u32 %v10777_v38, %v8428_v55  ;;  %v10819_v38 = vld [vmem:[#allocation7 + $0x57c] sm:$0xf] }
 0x21d   :  { %v3693_v3 = vmax.f32 %v2786_v4, 0.0  ;;  %3077 = vmatmul.bf16.gmra.mxu3 %v12205_v28 }
 0x21e   :  { %3258 = vmatpush.bf16.msrb.mxu2 %v8815_v63  ;;  %3200 = vmatpush.bf16.msra.mxu0 %v8431_v29  ;;  %v8596_v63 = vld [vmem:[#allocation7 + $0x590] sm:$0xf0] }
 0x21f   :  { %v12398_v46 = vpack.c.bf16 %v3693_v3, %v3687_v11  ;;  %v2759_v20 = vpop.f32.mrf.mxu0  ;;  %v2817_v45 = vpop.f32.mrf.mxu2  ;;  %3229 = vmatpush.bf16.msra.mxu1 %v8623_v57  ;;  %v8788_v11 = vld [vmem:[#allocation7 + $0x710] sm:$0xf0]  ;;  %v10771_v3 = vld [vmem:[#allocation7 + $0x3fc] sm:$0xf] }
 0x220   :  { %v2760_v33 = vadd.f32 %v2759_v20, %v12348_v49  ;;  %v2818_v27 = vadd.f32 %v2817_v45, %v12353_v17  ;;  %v2846_v32 = vpop.f32.mrf.mxu3  ;;  %v9007_v49 = vor.u32 %v10921_v12, %v9004_v59  ;;  %v8791_v20 = vor.u32 %v10867_v40, %v8788_v11  ;;  %v8404_v45 = vld [vmem:[#allocation7 + $0x410] sm:$0xf0] }
 0x221   :  { %v8407_v15 = vor.u32 %v10771_v3, %v8404_v45  ;;  %v8572_v45 = vld [vmem:[#allocation7 + $0x560] sm:$0xf0] }
 0x222   :  { %v2788_v24 = vpop.f32.mrf.mxu1  ;;  %v12402_v60 = vadd.f32 %v2846_v32, %v2818_v27  ;;  %2990 = vmatmul.bf16.gmra.mxu0 %v12210_v62  ;;  %3287 = vmatpush.bf16.msrb.mxu3 %v9007_v49 }
 0x223   :  { %v2789_v21 = vadd.f32 %v2788_v24, %v2760_v33  ;;  %v10915_v33 = vld [vmem:[#allocation7 + $0x87c] sm:$0xf]  ;;  %v8980_v24 = vld [vmem:[#allocation7 + $0x890] sm:$0xf0]  ;;  %3259 = vmatpush.bf16.msrb.mxu2 %v8791_v20  ;;  %3201 = vmatpush.bf16.msra.mxu0 %v8407_v15  ;;  %v10813_v20 = vld [vmem:[#allocation7 + $0x54c] sm:$0xf] }
 0x224   :  { %v8983_v10 = vor.u32 %v10915_v33, %v8980_v24 }
 0x225   :  { %3019 = vmatmul.bf16.gmra.mxu1 %v12215_v25  ;;  %v3699_v55 = vmax.f32 %v2789_v21, 0.0  ;;  %v10861_v21 = vld [vmem:[#allocation7 + $0x6cc] sm:$0xf] }
 0x226   :  { %3288 = vmatpush.bf16.msrb.mxu3 %v8983_v10 }
 0x227   :  { %v2761_v30 = vpop.f32.mrf.mxu0  ;;  %v2819_v4 = vpop.f32.mrf.mxu2 }
 0x228   :  { %v2762_v22 = vadd.f32 %v2761_v30, %v12356_v53  ;;  %v2820_v36 = vadd.f32 %v2819_v4, %v12353_v17  ;;  %v2848_v42 = vpop.f32.mrf.mxu3  ;;  %v8599_v53 = vor.u32 %v10819_v38, %v8596_v63  ;;  %v8764_v30 = vld [vmem:[#allocation7 + $0x6e0] sm:$0xf0]  ;;  %v10765_v4 = vld [vmem:[#allocation7 + $0x3cc] sm:$0xf]  ;;  %v10855_v63 = vld [vmem:[#allocation7 + $0x69c] sm:$0xf] }
 0x22a   :  { %v2790_v5 = vpop.f32.mrf.mxu1  ;;  %v12408_v32 = vadd.f32 %v2848_v42, %v2820_v36  ;;  %3230 = vmatpush.bf16.msra.mxu1 %v8599_v53  ;;  %v10909_v36 = vld [vmem:[#allocation7 + $0x84c] sm:$0xf]  ;;  %v8956_v42 = vld [vmem:[#allocation7 + $0x860] sm:$0xf0]  ;;  %v8740_v53 = vld [vmem:[#allocation7 + $0x6b0] sm:$0xf0] }
 0x22b   :  { %v2791_v27 = vadd.f32 %v2790_v5, %v2762_v22  ;;  %v8767_v22 = vor.u32 %v10861_v21, %v8764_v30  ;;  %v8380_v5 = vld [vmem:[#allocation7 + $0x3e0] sm:$0xf0]  ;;  %v8959_v3 = vor.u32 %v10909_v36, %v8956_v42  ;;  %v10807_v21 = vld [vmem:[#allocation7 + $0x51c] sm:$0xf]  ;;  %v10849_v42 = vld [vmem:[#allocation7 + $0x66c] sm:$0xf] }
 0x22c   :  { %3149 = vmatmul.bf16.vlgmr.msra.gmra.mxu2 %v12099_v9  ;;  %v8383_v11 = vor.u32 %v10765_v4, %v8380_v5 }
 0x22d   :  { %v3705_v12 = vmax.f32 %v2791_v27, 0.0  ;;  %3178 = vmatmul.bf16.vlgmr.msra.gmra.mxu3 %v12106_v14  ;;  %3260 = vmatpush.bf16.msrb.mxu2 %v8767_v22 }
 0x22e   :  { %3202 = vmatpush.bf16.msra.mxu0 %v8383_v11  ;;  %3289 = vmatpush.bf16.msrb.mxu3 %v8959_v3  ;;  %v10897_v11 = vld [vmem:[#allocation7 + $0x7ec] sm:$0xf] }
 0x22f   :  { %v12412_v17 = vpack.c.bf16 %v3705_v12, %v3699_v55  ;;  %v2860_v59 = vpop.f32.mrf.mxu0  ;;  %v2918_v29 = vpop.f32.mrf.mxu2  ;;  %v8743_v55 = vor.u32 %v10855_v63, %v8740_v53  ;;  %v10759_v12 = vld [vmem:[#allocation7 + $0x39c] sm:$0xf] }
 0x230   :  { %v2861_v49 = vadd.f32 %v2860_v59, %v12360_v2  ;;  %v2947_v35 = vpop.f32.mrf.mxu3  ;;  %v8575_v2 = vor.u32 %v10813_v20, %v8572_v45  ;;  %v8356_v59 = vld [vmem:[#allocation7 + $0x3b0] sm:$0xf0] }
 0x231   :  { %3261 = vmatpush.bf16.msrb.mxu2 %v8743_v55  ;;  %v8332_v55 = vld [vmem:[#allocation7 + $0x380] sm:$0xf0] }
 0x232   :  { %v2889_v6 = vpop.f32.mrf.mxu1  ;;  %3091 = vmatmul.bf16.vlgmr.msrb.gmra.mxu0 %v12242_v39  ;;  %3231 = vmatpush.bf16.msra.mxu1 %v8575_v2 }
 0x233   :  { %v2890_v57 = vadd.f32 %v2889_v6, %v2861_v49  ;;  %v8359_v6 = vor.u32 %v10759_v12, %v8356_v59  ;;  %v10801_v12 = vld [vmem:[#allocation7 + $0x4ec] sm:$0xf]  ;;  %v8524_v59 = vld [vmem:[#allocation7 + $0x500] sm:$0xf0] }
 0x235   :  { %3120 = vmatmul.bf16.vlgmr.msrb.gmra.mxu1 %v12244_v18  ;;  %v2919_v40 = vadd.f32 %v2918_v29, %v2890_v57  ;;  %v10903_v29 = vld [vmem:[#allocation7 + $0x81c] sm:$0xf]  ;;  %v8932_v57 = vld [vmem:[#allocation7 + $0x830] sm:$0xf0]  ;;  %3203 = vmatpush.bf16.msra.mxu0 %v8359_v6  ;;  %v8527_v6 = vor.u32 %v10801_v12, %v8524_v59  ;;  %v10789_v59 = vld [vmem:[#allocation7 + $0x48c] sm:$0xf] }
 0x236   :  { %v8935_v30 = vor.u32 %v10903_v29, %v8932_v57  ;;  %v8692_v29 = vld [vmem:[#allocation7 + $0x650] sm:$0xf0] }
 0x237   :  { %v2948_v33 = vadd.f32 %v2947_v35, %v2919_v40  ;;  %v2862_v24 = vpop.f32.mrf.mxu0  ;;  %v2920_v27 = vpop.f32.mrf.mxu2  ;;  %v8548_v35 = vld [vmem:[#allocation7 + $0x530] sm:$0xf0]  ;;  %v8716_v40 = vld [vmem:[#allocation7 + $0x680] sm:$0xf0] }
 0x238   :  { %v2863_v15 = vadd.f32 %v2862_v24, %v12366_v34  ;;  %v2949_v38 = vpop.f32.mrf.mxu3  ;;  %v8551_v4 = vor.u32 %v10807_v21, %v8548_v35  ;;  %3290 = vmatpush.bf16.msrb.mxu3 %v8935_v30  ;;  %v10891_v21 = vld [vmem:[#allocation7 + $0x7bc] sm:$0xf]  ;;  %v8884_v35 = vld [vmem:[#allocation7 + $0x7d0] sm:$0xf0] }
 0x239   :  { %v3664_v3 = vmax.f32 %v2948_v33, 0.0  ;;  %v8887_v30 = vor.u32 %v10891_v21, %v8884_v35 }
 0x23a   :  { %v2891_v10 = vpop.f32.mrf.mxu1  ;;  %3232 = vmatpush.bf16.msra.mxu1 %v8551_v4 }
 0x23b   :  { %v2892_v49 = vadd.f32 %v2891_v10, %v2863_v15  ;;  %v8908_v15 = vld [vmem:[#allocation7 + $0x800] sm:$0xf0] }
 0x23c   :  { %3154 = vmatmul.bf16.gmra.mxu2 %v12135_v37  ;;  %v8911_v10 = vor.u32 %v10897_v11, %v8908_v15  ;;  %v10795_v15 = vld [vmem:[#allocation7 + $0x4bc] sm:$0xf] }
 0x23d   :  { %v2921_v22 = vadd.f32 %v2920_v27, %v2892_v49  ;;  %3183 = vmatmul.bf16.gmra.mxu3 %v12142_v51  ;;  %v8719_v27 = vor.u32 %v10849_v42, %v8716_v40  ;;  %v8668_v42 = vld [vmem:[#allocation7 + $0x620] sm:$0xf0]  ;;  %v10885_v40 = vld [vmem:[#allocation7 + $0x78c] sm:$0xf] }
 0x23e   :  { %3291 = vmatpush.bf16.msrb.mxu3 %v8911_v10  ;;  %3233 = vmatpush.bf16.msra.mxu1 %v8527_v6  ;;  %v8500_v10 = vld [vmem:[#allocation7 + $0x4d0] sm:$0xf0] }
 0x23f   :  { %v2950_v34 = vadd.f32 %v2949_v38, %v2921_v22  ;;  %v2865_v5 = vpop.f32.mrf.mxu0  ;;  %v2923_v36 = vpop.f32.mrf.mxu2  ;;  %3262 = vmatpush.bf16.msrb.mxu2 %v8719_v27  ;;  %v10753_v38 = vld [vmem:[#allocation7 + $0x36c] sm:$0xf] }
 0x240   :  { %v2866_v45 = vadd.f32 %v2865_v5, %v12374_v56  ;;  %v2952_v24 = vpop.f32.mrf.mxu3  ;;  %v8335_v33 = vor.u32 %v10753_v38, %v8332_v55  ;;  %v10843_v56 = vld [vmem:[#allocation7 + $0x63c] sm:$0xf]  ;;  %v10837_v5 = vld [vmem:[#allocation7 + $0x60c] sm:$0xf]  ;;  %v8503_v38 = vor.u32 %v10795_v15, %v8500_v10  ;;  %v8650_v15 = vld [vmem:[#allocation7 + $0x5e0] sm:$0xf] }
 0x241   :  { %v3670_v20 = vmax.f32 %v2950_v34, 0.0  ;;  %v8695_v57 = vor.u32 %v10843_v56, %v8692_v29  ;;  %v10835_v10 = vld [vmem:[#allocation7 + $0x5f4] sm:$0xf0] }
 0x242   :  { %v2894_v2 = vpop.f32.mrf.mxu1  ;;  %3096 = vmatmul.bf16.gmra.mxu0 %v12262_v47  ;;  %3292 = vmatpush.bf16.msrb.mxu3 %v8887_v30 }
 0x243   :  { %v12421_v63 = vpack.c.bf16 %v3670_v20, %v3664_v3  ;;  %v2895_v53 = vadd.f32 %v2894_v2, %v2866_v45  ;;  %3204 = vmatpush.bf16.msra.mxu0 %v8335_v33  ;;  %3263 = vmatpush.bf16.msrb.mxu2 %v8695_v57  ;;  %v8308_v45 = vld [vmem:[#allocation7 + $0x350] sm:$0xf0]  ;;  %v8671_v2 = vor.u32 %v10837_v5, %v8668_v42  ;;  %v8284_v33 = vld [vmem:[#allocation7 + $0x320] sm:$0xf0] }
 0x244   :  { %3234 = vmatpush.bf16.msra.mxu1 %v8503_v38 }
 0x245   :  { %3125 = vmatmul.bf16.gmra.mxu1 %v12264_v0  ;;  %v2924_v49 = vadd.f32 %v2923_v36, %v2895_v53  ;;  %v10747_v36 = vld [vmem:[#allocation7 + $0x33c] sm:$0xf]  ;;  %v8860_v53 = vld [vmem:[#allocation7 + $0x7a0] sm:$0xf0] }
 0x246   :  { %v8311_v27 = vor.u32 %v10747_v36, %v8308_v45  ;;  %v8863_v55 = vor.u32 %v10885_v40, %v8860_v53  ;;  %v10787_v36 = vld [vmem:[#allocation7 + $0x474] sm:$0xf0]  ;;  %v8074_v45 = vld [vmem:[#allocation7 + $0x160] sm:$0xf] }
 0x247   :  { %v2953_v4 = vadd.f32 %v2952_v24, %v2924_v49  ;;  %v2867_v22 = vpop.f32.mrf.mxu0  ;;  %v2925_v34 = vpop.f32.mrf.mxu2  ;;  %3264 = vmatpush.bf16.msrb.mxu2 %v8671_v2  ;;  %v8476_v49 = vld [vmem:[#allocation7 + $0x4a0] sm:$0xf0] }
 0x248   :  { %v2868_v11 = vadd.f32 %v2867_v22, %v12380_v16  ;;  %v2954_v20 = vpop.f32.mrf.mxu3  ;;  %3205 = vmatpush.bf16.msra.mxu0 %v8311_v27  ;;  %v10741_v16 = vld [vmem:[#allocation7 + $0x30c] sm:$0xf]  ;;  %3293 = vmatpush.bf16.msrb.mxu3 %v8863_v55  ;;  %v8479_v21 = vor.u32 %v10789_v59, %v8476_v49 }
 0x249   :  { %v8287_v29 = vor.u32 %v10741_v16, %v8284_v33  ;;  %v3676_v35 = vmax.f32 %v2953_v4, 0.0  ;;  %v8266_v16 = vld [vmem:[#allocation7 + $0x2e0] sm:$0xf]  ;;  %v10739_v33 = vld [vmem:[#allocation7 + $0x2f4] sm:$0xf0] }
 0x24a   :  { %v2896_v3 = vpop.f32.mrf.mxu1  ;;  %3235 = vmatpush.bf16.msra.mxu1 %v8479_v21  ;;  %v8267_v59 = vor.u32 %v10739_v33, %v8266_v16  ;;  %v8050_v21 = vld [vmem:[#allocation7 + $0x130] sm:$0xf] }
 0x24b   :  { %v2897_v24 = vadd.f32 %v2896_v3, %v2868_v11 }
 0x24c   :  { %3159 = vmatmul.bf16.gmra.mxu2 %v12174_v31  ;;  %3206 = vmatpush.bf16.msra.mxu0 %v8287_v29 }
 0x24d   :  { %v2926_v12 = vadd.f32 %v2925_v34, %v2897_v24  ;;  %3188 = vmatmul.bf16.gmra.mxu3 %v12179_v19 }
 0x24e   :  { %3344 = vmatpush.bf16.msrb.mxu1 %v8267_v59  ;;  %v10679_v59 = vld [vmem:[#allocation7 + $0x114] sm:$0xf0] }
 0x24f   :  { %v2955_v56 = vadd.f32 %v2954_v20, %v2926_v12  ;;  %v2870_v6 = vpop.f32.mrf.mxu0  ;;  %v2928_v57 = vpop.f32.mrf.mxu2  ;;  %v8458_v20 = vld [vmem:[#allocation7 + $0x460] sm:$0xf]  ;;  %v8651_v12 = vor.u32 %v10835_v10, %v8650_v15 }
 0x250   :  { %v2871_v22 = vadd.f32 %v2870_v6, %v12388_v13  ;;  %v2957_v5 = vpop.f32.mrf.mxu3  ;;  %v8459_v27 = vor.u32 %v10787_v36, %v8458_v20  ;;  %v10691_v13 = vld [vmem:[#allocation7 + $0x174] sm:$0xf0] }
 0x251   :  { %v3682_v30 = vmax.f32 %v2955_v56, 0.0  ;;  %v8075_v55 = vor.u32 %v10691_v13, %v8074_v45  ;;  %3402 = vmatpush.bf16.msra.mxu3 %v8651_v12 }
 0x252   :  { %v2899_v34 = vpop.f32.mrf.mxu1  ;;  %3101 = vmatmul.bf16.gmra.mxu0 %v12282_v26  ;;  %3373 = vmatpush.bf16.msra.mxu2 %v8459_v27  ;;  %v10733_v27 = vld [vmem:[#allocation7 + $0x2c4] sm:$0xf0] }
 0x253   :  { %v12429_v42 = vpack.c.bf16 %v3682_v30, %v3676_v35  ;;  %v2900_v40 = vadd.f32 %v2899_v34, %v2871_v22  ;;  %3315 = vmatpush.bf16.msrb.mxu0 %v8075_v55  ;;  %v10685_v34 = vld [vmem:[#allocation7 + $0x144] sm:$0xf0]  ;;  %v8026_v55 = vld [vmem:[#allocation7 + $0x100] sm:$0xf] }
 0x255   :  { %3130 = vmatmul.bf16.gmra.mxu1 %v12284_v23  ;;  %v2929_v11 = vadd.f32 %v2928_v57, %v2900_v40  ;;  %v10781_v57 = vld [vmem:[#allocation7 + $0x444] sm:$0xf0] }
 0x256   :  { %v10829_v40 = vld [vmem:[#allocation7 + $0x5c4] sm:$0xf0] }
 0x257   :  { %v2958_v3 = vadd.f32 %v2957_v5, %v2929_v11  ;;  %v2872_v4 = vpop.f32.mrf.mxu0  ;;  %v2930_v2 = vpop.f32.mrf.mxu2  ;;  %v8626_v5 = vld [vmem:[#allocation7 + $0x5b0] sm:$0xf] }
 0x258   :  { %v2873_v53 = vadd.f32 %v2872_v4, %v12394_v52  ;;  %v2959_v38 = vpop.f32.mrf.mxu3  ;;  %v8434_v52 = vld [vmem:[#allocation7 + $0x430] sm:$0xf]  ;;  %v8051_v4 = vor.u32 %v10685_v34, %v8050_v21 }
 0x259   :  { %v3688_v49 = vmax.f32 %v2958_v3, 0.0  ;;  %v8435_v22 = vor.u32 %v10781_v57, %v8434_v52  ;;  %v8242_v3 = vld [vmem:[#allocation7 + $0x2b0] sm:$0xf]  ;;  %v8027_v57 = vor.u32 %v10679_v59, %v8026_v55  ;;  %v10721_v59 = vld [vmem:[#allocation7 + $0x264] sm:$0xf0] }
 0x25a   :  { %v2901_v24 = vpop.f32.mrf.mxu1  ;;  %v8243_v13 = vor.u32 %v10733_v27, %v8242_v3  ;;  %3316 = vmatpush.bf16.msrb.mxu0 %v8051_v4  ;;  %v8002_v4 = vld [vmem:[#allocation7 + $0xd0] sm:$0xf] }
 0x25b   :  { %v2902_v56 = vadd.f32 %v2901_v24, %v2873_v53  ;;  %3374 = vmatpush.bf16.msra.mxu2 %v8435_v22  ;;  %v8410_v24 = vld [vmem:[#allocation7 + $0x400] sm:$0xf]  ;;  %v10727_v22 = vld [vmem:[#allocation7 + $0x294] sm:$0xf0] }
 0x25c   :  { %3164 = vmatmul.bf16.gmra.mxu2 %v12210_v62  ;;  %3345 = vmatpush.bf16.msrb.mxu1 %v8243_v13  ;;  %v10673_v13 = vld [vmem:[#allocation7 + $0xe4] sm:$0xf0] }
 0x25d   :  { %v2931_v29 = vadd.f32 %v2930_v2, %v2902_v56  ;;  %3193 = vmatmul.bf16.gmra.mxu3 %v12215_v25  ;;  %v8627_v2 = vor.u32 %v10829_v40, %v8626_v5  ;;  %v8602_v56 = vld [vmem:[#allocation7 + $0x580] sm:$0xf] }
 0x25e   :  { %3317 = vmatpush.bf16.msrb.mxu0 %v8027_v57  ;;  %v12443_v40 = vld [vmem:[#allocation8] sm:$0x3f] }
 0x25f   :  { %v2960_v6 = vadd.f32 %v2959_v38, %v2931_v29  ;;  %v2875_v35 = vpop.f32.mrf.mxu0  ;;  %v2933_v30 = vpop.f32.mrf.mxu2  ;;  %3403 = vmatpush.bf16.msra.mxu3 %v8627_v2  ;;  %v10775_v38 = vld [vmem:[#allocation7 + $0x414] sm:$0xf0]  ;;  %v8362_v57 = vld [vmem:[#allocation7 + $0x3a0] sm:$0xf] }
 0x260   :  { %v2876_v20 = vadd.f32 %v2875_v35, %v12402_v60  ;;  %v2962_v45 = vpop.f32.mrf.mxu3  ;;  %v8411_v33 = vor.u32 %v10775_v38, %v8410_v24  ;;  %v10823_v29 = vld [vmem:[#allocation7 + $0x594] sm:$0xf0]  ;;  %v8218_v35 = vld [vmem:[#allocation7 + $0x280] sm:$0xf] }
 0x261   :  { %v3694_v11 = vmax.f32 %v2960_v6, 0.0  ;;  %v8603_v21 = vor.u32 %v10823_v29, %v8602_v56 }
 0x262   :  { %v2904_v36 = vpop.f32.mrf.mxu1  ;;  %3106 = vmatmul.bf16.gmra.mxu0 %v12302_v44  ;;  %3375 = vmatpush.bf16.msra.mxu2 %v8411_v33 }
 0x263   :  { %v12437_v15 = vpack.c.bf16 %v3694_v11, %v3688_v49  ;;  %v2905_v10 = vadd.f32 %v2904_v36, %v2876_v20  ;;  %3404 = vmatpush.bf16.msra.mxu3 %v8603_v21  ;;  %v12446_v11 = vperm.slane %v12443_v40, 2  ;;  %v8386_v36 = vld [vmem:[#allocation7 + $0x3d0] sm:$0xf]  ;;  %v10763_v21 = vld [vmem:[#allocation7 + $0x3b4] sm:$0xf0] }
 0x265   :  { %3135 = vmatmul.bf16.gmra.mxu1 %v12304_v58  ;;  %v2934_v53 = vadd.f32 %v2933_v30, %v2905_v10  ;;  %v8219_v30 = vor.u32 %v10727_v22, %v8218_v35  ;;  %v8578_v10 = vld [vmem:[#allocation7 + $0x550] sm:$0xf]  ;;  %v7978_v35 = vld [vmem:[#allocation7 + $0xa0] sm:$0xf] }
 0x267   :  { %v2963_v60 = vadd.f32 %v2962_v45, %v2934_v53  ;;  %v2877_v12 = vpop.f32.mrf.mxu0  ;;  %v2935_v16 = vpop.f32.mrf.mxu2  ;;  %3346 = vmatpush.bf16.msrb.mxu1 %v8219_v30  ;;  %v10769_v45 = vld [vmem:[#allocation7 + $0x3e4] sm:$0xf0] }
 0x268   :  { %v2878_v49 = vadd.f32 %v2877_v12, %v12408_v32  ;;  %v2964_v52 = vpop.f32.mrf.mxu3  ;;  %v8387_v27 = vor.u32 %v10769_v45, %v8386_v36  ;;  %v10817_v53 = vld [vmem:[#allocation7 + $0x564] sm:$0xf0] }
 0x269   :  { %v3700_v32 = vmax.f32 %v2963_v60, 0.0  ;;  %v8579_v33 = vor.u32 %v10817_v53, %v8578_v10  ;;  %v8194_v60 = vld [vmem:[#allocation7 + $0x250] sm:$0xf] }
 0x26a   :  { %v2906_v6 = vpop.f32.mrf.mxu1  ;;  %3376 = vmatpush.bf16.msra.mxu2 %v8387_v27  ;;  %v8195_v56 = vor.u32 %v10721_v59, %v8194_v60 }
 0x26b   :  { %v2907_v34 = vadd.f32 %v2906_v6, %v2878_v49  ;;  %3405 = vmatpush.bf16.msra.mxu3 %v8579_v33 }
 0x26c   :  { %3265 = vmatmul.bf16.vlgmr.msrb.gmra.mxu2 %v12242_v39  ;;  %3347 = vmatpush.bf16.msrb.mxu1 %v8195_v56  ;;  %v10661_v56 = vld [vmem:[#allocation7 + $0x84] sm:$0xf0] }
 0x26d   :  { %v2936_v5 = vadd.f32 %v2935_v16, %v2907_v34  ;;  %3294 = vmatmul.bf16.vlgmr.msrb.gmra.mxu3 %v12244_v18  ;;  %v8003_v16 = vor.u32 %v10673_v13, %v8002_v4  ;;  %v8363_v34 = vor.u32 %v10763_v21, %v8362_v57  ;;  %v8170_v13 = vld [vmem:[#allocation7 + $0x220] sm:$0xf] }
 0x26f   :  { %v2965_v20 = vadd.f32 %v2964_v52, %v2936_v5  ;;  %v2976_v2 = vpop.f32.mrf.mxu0  ;;  %v3034_v3 = vpop.f32.mrf.mxu2  ;;  %3318 = vmatpush.bf16.msrb.mxu0 %v8003_v16  ;;  %v10667_v5 = vld [vmem:[#allocation7 + $0xb4] sm:$0xf0]  ;;  %3377 = vmatpush.bf16.msra.mxu2 %v8363_v34  ;;  %v7954_v16 = vld [vmem:[#allocation7 + $0x70] sm:$0xf] }
 0x270   :  { %v2977_v38 = vadd.f32 %v2976_v2, %v12446_v11  ;;  %v3063_v12 = vpop.f32.mrf.mxu3  ;;  %v7979_v2 = vor.u32 %v10667_v5, %v7978_v35  ;;  %v8146_v34 = vld [vmem:[#allocation7 + $0x1f0] sm:$0xf]  ;;  %v10709_v5 = vld [vmem:[#allocation7 + $0x204] sm:$0xf0] }
 0x271   :  { %v3706_v24 = vmax.f32 %v2965_v20, 0.0  ;;  %v10811_v20 = vld [vmem:[#allocation7 + $0x534] sm:$0xf0] }
 0x272   :  { %v3005_v55 = vpop.f32.mrf.mxu1  ;;  %3207 = vmatmul.bf16.vlgmr.msra.gmra.mxu0 %v12091_v8 }
 0x273   :  { %v12450_v29 = vpack.c.bf16 %v3706_v24, %v3700_v32  ;;  %v3006_v49 = vadd.f32 %v3005_v55, %v2977_v38  ;;  %v8554_v32 = vld [vmem:[#allocation7 + $0x520] sm:$0xf]  ;;  %3319 = vmatpush.bf16.msrb.mxu0 %v7979_v2  ;;  %v8338_v55 = vld [vmem:[#allocation7 + $0x370] sm:$0xf] }
 0x274   :  { %v8555_v27 = vor.u32 %v10811_v20, %v8554_v32  ;;  %v8147_v32 = vor.u32 %v10709_v5, %v8146_v34 }
 0x275   :  { %13634 = vst [vmem:[#allocation47_spill] sm:$0xff] %v12450_v29  ;;  %3236 = vmatmul.bf16.vlgmr.msra.gmra.mxu1 %v12094_v50  ;;  %v3035_v6 = vadd.f32 %v3034_v3, %v3006_v49  ;;  %v10715_v3 = vld [vmem:[#allocation7 + $0x234] sm:$0xf0]  ;;  %v8530_v49 = vld [vmem:[#allocation7 + $0x4f0] sm:$0xf] }
 0x276   :  { %v8171_v10 = vor.u32 %v10715_v3, %v8170_v13  ;;  %3406 = vmatpush.bf16.msra.mxu3 %v8555_v27  ;;  %v10799_v13 = vld [vmem:[#allocation7 + $0x4d4] sm:$0xf0] }
 0x277   :  { %v12454_v52 = vadd.f32 %v3063_v12, %v3035_v6  ;;  %v2978_v22 = vpop.f32.mrf.mxu0  ;;  %v3036_v30 = vpop.f32.mrf.mxu2  ;;  %v10757_v12 = vld [vmem:[#allocation7 + $0x384] sm:$0xf0] }
 0x278   :  { %v2979_v36 = vadd.f32 %v2978_v22, %v12446_v11  ;;  %v3065_v4 = vpop.f32.mrf.mxu3  ;;  %3348 = vmatpush.bf16.msrb.mxu1 %v8171_v10  ;;  %v8339_v59 = vor.u32 %v10757_v12, %v8338_v55  ;;  %v10805_v6 = vld [vmem:[#allocation7 + $0x504] sm:$0xf0]  ;;  %v7955_v22 = vor.u32 %v10661_v56, %v7954_v16  ;;  %v8122_v55 = vld [vmem:[#allocation7 + $0x1c0] sm:$0xf]  ;;  %v8290_v56 = vld [vmem:[#allocation7 + $0x310] sm:$0xf] }
 0x27a   :  { %v3007_v45 = vpop.f32.mrf.mxu1  ;;  %3378 = vmatpush.bf16.msra.mxu2 %v8339_v59  ;;  %3320 = vmatpush.bf16.msrb.mxu0 %v7955_v22  ;;  %v10703_v59 = vld [vmem:[#allocation7 + $0x1d4] sm:$0xf0] }
 0x27b   :  { %v3008_v53 = vadd.f32 %v3007_v45, %v2979_v36  ;;  %v8314_v36 = vld [vmem:[#allocation7 + $0x340] sm:$0xf]  ;;  %v10751_v45 = vld [vmem:[#allocation7 + $0x354] sm:$0xf0] }
 0x27c   :  { %3270 = vmatmul.bf16.gmra.mxu2 %v12262_v47  ;;  %3349 = vmatpush.bf16.msrb.mxu1 %v8147_v32  ;;  %v8315_v27 = vor.u32 %v10751_v45, %v8314_v36  ;;  %v10649_v36 = vld [vmem:[#allocation7 + $0x24] sm:$0xf0]  ;;  %v8098_v45 = vld [vmem:[#allocation7 + $0x190] sm:$0xf] }
 0x27d   :  { %v3037_v24 = vadd.f32 %v3036_v30, %v3008_v53  ;;  %3299 = vmatmul.bf16.gmra.mxu3 %v12264_v0  ;;  %v8531_v30 = vor.u32 %v10805_v6, %v8530_v49  ;;  %v7930_v53 = vld [vmem:[#allocation7 + $0x40] sm:$0xf]  ;;  %v10745_v49 = vld [vmem:[#allocation7 + $0x324] sm:$0xf0] }
 0x27e   :  { %3379 = vmatpush.bf16.msra.mxu2 %v8315_v27  ;;  %v8291_v22 = vor.u32 %v10745_v49, %v8290_v56  ;;  %v10697_v27 = vld [vmem:[#allocation7 + $0x1a4] sm:$0xf0]  ;;  %v8076_v56 = vld [vmem:[#allocation7 + $0x178] sm:$0xf0]  ;;  %v8842_v49 = vld [vmem:[#allocation7 + $0x760] sm:$0xf] }
 0x27f   :  { %v12459_v38 = vadd.f32 %v3065_v4, %v3037_v24  ;;  %v2981_v33 = vpop.f32.mrf.mxu0  ;;  %v3039_v60 = vpop.f32.mrf.mxu2  ;;  %3407 = vmatpush.bf16.msra.mxu3 %v8531_v30  ;;  %v8506_v4 = vld [vmem:[#allocation7 + $0x4c0] sm:$0xf]  ;;  %v10655_v24 = vld [vmem:[#allocation7 + $0x54] sm:$0xf0]  ;;  %v8482_v30 = vld [vmem:[#allocation7 + $0x490] sm:$0xf] }
 0x280   :  { %v2982_v57 = vadd.f32 %v2981_v33, %v12446_v11  ;;  %v3068_v35 = vpop.f32.mrf.mxu3  ;;  %v8507_v3 = vor.u32 %v10799_v13, %v8506_v4  ;;  %v7931_v33 = vor.u32 %v10655_v24, %v7930_v53  ;;  %v8099_v53 = vor.u32 %v10697_v27, %v8098_v45 }
 0x282   :  { %v3010_v21 = vpop.f32.mrf.mxu1  ;;  %3212 = vmatmul.bf16.gmra.mxu0 %v12127_v41  ;;  %3380 = vmatpush.bf16.msra.mxu2 %v8291_v22 }
 0x283   :  { %v3011_v20 = vadd.f32 %v3010_v21, %v2982_v57  ;;  %3408 = vmatpush.bf16.msra.mxu3 %v8507_v3  ;;  %v8123_v21 = vor.u32 %v10703_v59, %v8122_v55  ;;  %3321 = vmatpush.bf16.msrb.mxu0 %v7931_v33  ;;  %v10688_v59 = vld [vmem:[#allocation7 + $0x164] sm:$0xf] }
 0x285   :  { %3241 = vmatmul.bf16.gmra.mxu1 %v12130_v61  ;;  %v3040_v2 = vadd.f32 %v3039_v60, %v3011_v20  ;;  %v7906_v20 = vld [vmem:[#allocation7 + $0x10] sm:$0xf] }
 0x286   :  { %3350 = vmatpush.bf16.msrb.mxu1 %v8123_v21  ;;  %v8268_v21 = vld [vmem:[#allocation7 + $0x2f8] sm:$0xf0] }
 0x287   :  { %v12464_v10 = vadd.f32 %v3068_v35, %v3040_v2  ;;  %v2983_v12 = vpop.f32.mrf.mxu0  ;;  %v3041_v16 = vpop.f32.mrf.mxu2  ;;  %v10793_v35 = vld [vmem:[#allocation7 + $0x4a4] sm:$0xf0]  ;;  %v7907_v2 = vor.u32 %v10649_v36, %v7906_v20 }
 0x288   :  { %v2984_v6 = vadd.f32 %v2983_v12, %v12446_v11  ;;  %v3070_v57 = vpop.f32.mrf.mxu3  ;;  %v8483_v34 = vor.u32 %v10793_v35, %v8482_v30 }
 0x289   :  { %3322 = vmatpush.bf16.msrb.mxu0 %v7907_v2 }
 0x28a   :  { %v3012_v60 = vpop.f32.mrf.mxu1  ;;  %3409 = vmatpush.bf16.msra.mxu3 %v8483_v34  ;;  %3351 = vmatpush.bf16.msrb.mxu1 %v8099_v53  ;;  %v9034_v34 = vld [vmem:[#allocation7 + $0x8e0] sm:$0xf] }
 0x28b   :  { %v3013_v5 = vadd.f32 %v3012_v60, %v2984_v6  ;;  %v8079_v6 = vor.u32 %v10688_v59, %v8076_v56  ;;  %v10883_v60 = vld [vmem:[#allocation7 + $0x774] sm:$0xf0]  ;;  %v10877_v56 = vld [vmem:[#allocation7 + $0x744] sm:$0xf0] }
 0x28c   :  { %3275 = vmatmul.bf16.gmra.mxu2 %v12282_v26  ;;  %v8843_v30 = vor.u32 %v10883_v60, %v8842_v49  ;;  %v10730_v49 = vld [vmem:[#allocation7 + $0x2b4] sm:$0xf] }
 0x28d   :  { %v3042_v32 = vadd.f32 %v3041_v16, %v3013_v5  ;;  %3304 = vmatmul.bf16.gmra.mxu3 %v12284_v23  ;;  %v10931_v5 = vld [vmem:[#allocation7 + $0x8f4] sm:$0xf0]  ;;  %3489 = vmatpush.bf16.msrb.mxu2 %v8079_v6  ;;  %v8244_v6 = vld [vmem:[#allocation7 + $0x2c8] sm:$0xf0] }
 0x28e   :  { %v9035_v36 = vor.u32 %v10931_v5, %v9034_v34  ;;  %3431 = vmatpush.bf16.msra.mxu0 %v8843_v30  ;;  %v9010_v34 = vld [vmem:[#allocation7 + $0x8b0] sm:$0xf]  ;;  %v10925_v5 = vld [vmem:[#allocation7 + $0x8c4] sm:$0xf0] }
 0x28f   :  { %v12469_v4 = vadd.f32 %v3070_v57, %v3042_v32  ;;  %v2986_v13 = vpop.f32.mrf.mxu0  ;;  %v3044_v3 = vpop.f32.mrf.mxu2  ;;  %v10736_v57 = vld [vmem:[#allocation7 + $0x2e4] sm:$0xf] }
 0x290   :  { %v2987_v24 = vadd.f32 %v2986_v13, %v12446_v11  ;;  %v3073_v12 = vpop.f32.mrf.mxu3  ;;  %v8271_v35 = vor.u32 %v10736_v57, %v8268_v21  ;;  %3460 = vmatpush.bf16.msra.mxu1 %v9035_v36 }
 0x292   :  { %v3015_v55 = vpop.f32.mrf.mxu1  ;;  %3217 = vmatmul.bf16.gmra.mxu0 %v12166_v1  ;;  %3518 = vmatpush.bf16.msrb.mxu3 %v8271_v35  ;;  %v8247_v35 = vor.u32 %v10730_v49, %v8244_v6  ;;  %v10919_v49 = vld [vmem:[#allocation7 + $0x894] sm:$0xf0] }
 0x293   :  { %v3016_v16 = vadd.f32 %v3015_v55, %v2987_v24  ;;  %v10682_v24 = vld [vmem:[#allocation7 + $0x134] sm:$0xf]  ;;  %v8052_v55 = vld [vmem:[#allocation7 + $0x148] sm:$0xf0] }
 0x294   :  { %v8055_v59 = vor.u32 %v10682_v24, %v8052_v55  ;;  %v10724_v24 = vld [vmem:[#allocation7 + $0x284] sm:$0xf]  ;;  %v8220_v55 = vld [vmem:[#allocation7 + $0x298] sm:$0xf0] }
 0x295   :  { %3246 = vmatmul.bf16.gmra.mxu1 %v12169_v7  ;;  %v3045_v33 = vadd.f32 %v3044_v3, %v3016_v16 }
 0x296   :  { %3490 = vmatpush.bf16.msrb.mxu2 %v8055_v59  ;;  %3519 = vmatpush.bf16.msrb.mxu3 %v8247_v35  ;;  %v8223_v59 = vor.u32 %v10724_v24, %v8220_v55  ;;  %v8196_v24 = vld [vmem:[#allocation7 + $0x268] sm:$0xf0] }
 0x297   :  { %v12474_v22 = vadd.f32 %v3073_v12, %v3045_v33  ;;  %v2988_v32 = vpop.f32.mrf.mxu0  ;;  %v3046_v20 = vpop.f32.mrf.mxu2  ;;  %v8818_v12 = vld [vmem:[#allocation7 + $0x730] sm:$0xf] }
 0x298   :  { %v2989_v45 = vadd.f32 %v2988_v32, %v12446_v11  ;;  %v3075_v27 = vpop.f32.mrf.mxu3  ;;  %v8819_v30 = vor.u32 %v10877_v56, %v8818_v12  ;;  %v9011_v32 = vor.u32 %v10925_v5, %v9010_v34  ;;  %v8986_v56 = vld [vmem:[#allocation7 + $0x880] sm:$0xf] }
 0x29a   :  { %v3017_v2 = vpop.f32.mrf.mxu1  ;;  %3432 = vmatpush.bf16.msra.mxu0 %v8819_v30  ;;  %3461 = vmatpush.bf16.msra.mxu1 %v9011_v32 }
 0x29b   :  { %v3018_v13 = vadd.f32 %v3017_v2, %v2989_v45  ;;  %v10676_v45 = vld [vmem:[#allocation7 + $0x104] sm:$0xf]  ;;  %v8028_v2 = vld [vmem:[#allocation7 + $0x118] sm:$0xf0]  ;;  %3520 = vmatpush.bf16.msrb.mxu3 %v8223_v59 }
 0x29c   :  { %3280 = vmatmul.bf16.gmra.mxu2 %v12302_v44 }
 0x29d   :  { %v3047_v3 = vadd.f32 %v3046_v20, %v3018_v13  ;;  %3309 = vmatmul.bf16.gmra.mxu3 %v12304_v58  ;;  %v8031_v13 = vor.u32 %v10676_v45, %v8028_v2  ;;  %v8770_v45 = vld [vmem:[#allocation7 + $0x6d0] sm:$0xf] }
 0x29f   :  { %v12479_v53 = vadd.f32 %v3075_v27, %v3047_v3  ;;  %v2991_v16 = vpop.f32.mrf.mxu0  ;;  %v3049_v33 = vpop.f32.mrf.mxu2  ;;  %v8794_v27 = vld [vmem:[#allocation7 + $0x700] sm:$0xf]  ;;  %v10871_v3 = vld [vmem:[#allocation7 + $0x714] sm:$0xf0]  ;;  %3491 = vmatpush.bf16.msrb.mxu2 %v8031_v13  ;;  %v10865_v13 = vld [vmem:[#allocation7 + $0x6e4] sm:$0xf0] }
 0x2a0   :  { %v2992_v60 = vadd.f32 %v2991_v16, %v12446_v11  ;;  %v3078_v21 = vpop.f32.mrf.mxu3  ;;  %v8795_v16 = vor.u32 %v10871_v3, %v8794_v27  ;;  %v10718_v3 = vld [vmem:[#allocation7 + $0x254] sm:$0xf] }
 0x2a2   :  { %v3020_v57 = vpop.f32.mrf.mxu1  ;;  %3222 = vmatmul.bf16.gmra.mxu0 %v12202_v54 }
 0x2a3   :  { %v3021_v20 = vadd.f32 %v3020_v57, %v2992_v60  ;;  %v8987_v57 = vor.u32 %v10919_v49, %v8986_v56  ;;  %3433 = vmatpush.bf16.msra.mxu0 %v8795_v16  ;;  %v8771_v56 = vor.u32 %v10865_v13, %v8770_v45  ;;  %v8199_v49 = vor.u32 %v10718_v3, %v8196_v24 }
 0x2a5   :  { %3251 = vmatmul.bf16.gmra.mxu1 %v12205_v28  ;;  %v3050_v36 = vadd.f32 %v3049_v33, %v3021_v20  ;;  %v10670_v20 = vld [vmem:[#allocation7 + $0xd4] sm:$0xf]  ;;  %3521 = vmatpush.bf16.msrb.mxu3 %v8199_v49 }
 0x2a6   :  { %3462 = vmatpush.bf16.msra.mxu1 %v8987_v57 }
 0x2a7   :  { %v12484_v12 = vadd.f32 %v3078_v21, %v3050_v36  ;;  %v2993_v6 = vpop.f32.mrf.mxu0  ;;  %v3051_v60 = vpop.f32.mrf.mxu2  ;;  %v12489_v21 = vperm.slane %v12443_v40, 3  ;;  %v8004_v36 = vld [vmem:[#allocation7 + $0xe8] sm:$0xf0]  ;;  %3434 = vmatpush.bf16.msra.mxu0 %v8771_v56 }
 0x2a8   :  { %v2994_v33 = vadd.f32 %v2993_v6, %v12446_v11  ;;  %v3080_v35 = vpop.f32.mrf.mxu3  ;;  %v8007_v27 = vor.u32 %v10670_v20, %v8004_v36  ;;  %v8962_v6 = vld [vmem:[#allocation7 + $0x850] sm:$0xf]  ;;  %v10859_v20 = vld [vmem:[#allocation7 + $0x6b4] sm:$0xf0]  ;;  %v10712_v36 = vld [vmem:[#allocation7 + $0x224] sm:$0xf] }
 0x2aa   :  { %v3022_v30 = vpop.f32.mrf.mxu1  ;;  %3492 = vmatpush.bf16.msrb.mxu2 %v8007_v27  ;;  %v10907_v27 = vld [vmem:[#allocation7 + $0x834] sm:$0xf0] }
 0x2ab   :  { %v3023_v34 = vadd.f32 %v3022_v30, %v2994_v33 }
 0x2ac   :  { %3381 = vmatmul.bf16.vlgmr.msra.gmra.mxu2 %v12091_v8 }
 0x2ad   :  { %v3052_v5 = vadd.f32 %v3051_v60, %v3023_v34  ;;  %3410 = vmatmul.bf16.vlgmr.msra.gmra.mxu3 %v12094_v50  ;;  %v10913_v60 = vld [vmem:[#allocation7 + $0x864] sm:$0xf0] }
 0x2ae   :  { %v8963_v57 = vor.u32 %v10913_v60, %v8962_v6 }
 0x2af   :  { %v12492_v32 = vadd.f32 %v3080_v35, %v3052_v5  ;;  %v3092_v11 = vpop.f32.mrf.mxu0  ;;  %v3150_v2 = vpop.f32.mrf.mxu2  ;;  %v7980_v35 = vld [vmem:[#allocation7 + $0xb8] sm:$0xf0]  ;;  %v8746_v5 = vld [vmem:[#allocation7 + $0x6a0] sm:$0xf] }
 0x2b0   :  { %v3093_v55 = vadd.f32 %v3092_v11, %v12454_v52  ;;  %v3151_v59 = vadd.f32 %v3150_v2, %v12489_v21  ;;  %v3179_v40 = vpop.f32.mrf.mxu3  ;;  %3463 = vmatpush.bf16.msra.mxu1 %v8963_v57  ;;  %v10664_v52 = vld [vmem:[#allocation7 + $0xa4] sm:$0xf]  ;;  %v8747_v45 = vor.u32 %v10859_v20, %v8746_v5  ;;  %v8172_v11 = vld [vmem:[#allocation7 + $0x238] sm:$0xf0]  ;;  %v8938_v2 = vld [vmem:[#allocation7 + $0x820] sm:$0xf] }
 0x2b1   :  { %v7983_v34 = vor.u32 %v10664_v52, %v7980_v35  ;;  %v8175_v24 = vor.u32 %v10712_v36, %v8172_v11  ;;  %v10658_v35 = vld [vmem:[#allocation7 + $0x74] sm:$0xf] }
 0x2b2   :  { %v3121_v16 = vpop.f32.mrf.mxu1  ;;  %v12496_v30 = vadd.f32 %v3179_v40, %v3151_v59  ;;  %3323 = vmatmul.bf16.vlgmr.msrb.gmra.mxu0 %v12099_v9  ;;  %v10706_v11 = vld [vmem:[#allocation7 + $0x1f4] sm:$0xf] }
 0x2b3   :  { %v3122_v33 = vadd.f32 %v3121_v16, %v3093_v55  ;;  %3493 = vmatpush.bf16.msrb.mxu2 %v7983_v34  ;;  %v8939_v55 = vor.u32 %v10907_v27, %v8938_v2  ;;  %3435 = vmatpush.bf16.msra.mxu0 %v8747_v45  ;;  %v8722_v34 = vld [vmem:[#allocation7 + $0x670] sm:$0xf]  ;;  %v10853_v45 = vld [vmem:[#allocation7 + $0x684] sm:$0xf0]  ;;  %v8148_v2 = vld [vmem:[#allocation7 + $0x208] sm:$0xf0] }
 0x2b4   :  { %3522 = vmatpush.bf16.msrb.mxu3 %v8175_v24  ;;  %v8723_v24 = vor.u32 %v10853_v45, %v8722_v34  ;;  %v10847_v34 = vld [vmem:[#allocation7 + $0x654] sm:$0xf0] }
 0x2b5   :  { %3352 = vmatmul.bf16.vlgmr.msrb.gmra.mxu1 %v12106_v14  ;;  %v3665_v60 = vmax.f32 %v3122_v33, 0.0  ;;  %v10895_v45 = vld [vmem:[#allocation7 + $0x7d4] sm:$0xf0] }
 0x2b6   :  { %3464 = vmatpush.bf16.msra.mxu1 %v8939_v55  ;;  %v8151_v55 = vor.u32 %v10706_v11, %v8148_v2 }
 0x2b7   :  { %v3094_v13 = vpop.f32.mrf.mxu0  ;;  %v3152_v3 = vpop.f32.mrf.mxu2  ;;  %3436 = vmatpush.bf16.msra.mxu0 %v8723_v24  ;;  %v10694_v24 = vld [vmem:[#allocation7 + $0x194] sm:$0xf] }
 0x2b8   :  { %v3095_v16 = vadd.f32 %v3094_v13, %v12459_v38  ;;  %v3153_v40 = vadd.f32 %v3152_v3, %v12489_v21  ;;  %v3181_v56 = vpop.f32.mrf.mxu3  ;;  %v7956_v38 = vld [vmem:[#allocation7 + $0x88] sm:$0xf0]  ;;  %3523 = vmatpush.bf16.msrb.mxu3 %v8151_v55 }
 0x2b9   :  { %v7959_v36 = vor.u32 %v10658_v35, %v7956_v38  ;;  %v8698_v38 = vld [vmem:[#allocation7 + $0x640] sm:$0xf] }
 0x2ba   :  { %v3123_v59 = vpop.f32.mrf.mxu1  ;;  %v12502_v6 = vadd.f32 %v3181_v56, %v3153_v40 }
 0x2bb   :  { %v3124_v49 = vadd.f32 %v3123_v59, %v3095_v16  ;;  %v8914_v16 = vld [vmem:[#allocation7 + $0x7f0] sm:$0xf]  ;;  %v10901_v59 = vld [vmem:[#allocation7 + $0x804] sm:$0xf0]  ;;  %3494 = vmatpush.bf16.msrb.mxu2 %v7959_v36  ;;  %v8890_v36 = vld [vmem:[#allocation7 + $0x7c0] sm:$0xf] }
 0x2bc   :  { %3386 = vmatmul.bf16.gmra.mxu2 %v12127_v41  ;;  %v8915_v40 = vor.u32 %v10901_v59, %v8914_v16  ;;  %v8891_v2 = vor.u32 %v10895_v45, %v8890_v36  ;;  %v8866_v36 = vld [vmem:[#allocation7 + $0x790] sm:$0xf] }
 0x2bd   :  { %v3671_v57 = vmax.f32 %v3124_v49, 0.0  ;;  %3415 = vmatmul.bf16.gmra.mxu3 %v12130_v61 }
 0x2be   :  { %3465 = vmatpush.bf16.msra.mxu1 %v8915_v40 }
 0x2bf   :  { %v12506_v52 = vpack.c.bf16 %v3671_v57, %v3665_v60  ;;  %v3097_v5 = vpop.f32.mrf.mxu0  ;;  %v3155_v20 = vpop.f32.mrf.mxu2  ;;  %v7932_v60 = vld [vmem:[#allocation7 + $0x58] sm:$0xf0]  ;;  %v10700_v57 = vld [vmem:[#allocation7 + $0x1c4] sm:$0xf] }
 0x2c0   :  { %v3098_v27 = vadd.f32 %v3097_v5, %v12464_v10  ;;  %v3156_v33 = vadd.f32 %v3155_v20, %v12489_v21  ;;  %v3184_v3 = vpop.f32.mrf.mxu3  ;;  %v10652_v10 = vld [vmem:[#allocation7 + $0x44] sm:$0xf]  ;;  %v8699_v5 = vor.u32 %v10847_v34, %v8698_v38  ;;  %v8124_v20 = vld [vmem:[#allocation7 + $0x1d8] sm:$0xf0] }
 0x2c1   :  { %13635 = vst [vmem:[#allocation48_spill] sm:$0xff] %v12506_v52  ;;  %v7935_v35 = vor.u32 %v10652_v10, %v7932_v60  ;;  %v8127_v11 = vor.u32 %v10700_v57, %v8124_v20  ;;  %v8100_v60 = vld [vmem:[#allocation7 + $0x1a8] sm:$0xf0]  ;;  %v10841_v20 = vld [vmem:[#allocation7 + $0x624] sm:$0xf0] }
 0x2c2   :  { %v3126_v13 = vpop.f32.mrf.mxu1  ;;  %v12510_v49 = vadd.f32 %v3184_v3, %v3156_v33  ;;  %3328 = vmatmul.bf16.gmra.mxu0 %v12135_v37  ;;  %v10646_v33 = vld [vmem:[#allocation7 + $0x14] sm:$0xf]  ;;  %v7908_v3 = vld [vmem:[#allocation7 + $0x28] sm:$0xf0]  ;;  %3466 = vmatpush.bf16.msra.mxu1 %v8891_v2  ;;  %v8103_v38 = vor.u32 %v10694_v24, %v8100_v60  ;;  %v10889_v2 = vld [vmem:[#allocation7 + $0x7a4] sm:$0xf0] }
 0x2c3   :  { %v3127_v56 = vadd.f32 %v3126_v13, %v3098_v27  ;;  %3495 = vmatpush.bf16.msrb.mxu2 %v7935_v35  ;;  %3437 = vmatpush.bf16.msra.mxu0 %v8699_v5  ;;  %v7911_v10 = vor.u32 %v10646_v33, %v7908_v3  ;;  %v8867_v33 = vor.u32 %v10889_v2, %v8866_v36  ;;  %v8460_v36 = vld [vmem:[#allocation7 + $0x478] sm:$0xf0] }
 0x2c4   :  { %3524 = vmatpush.bf16.msrb.mxu3 %v8127_v11  ;;  %v9036_v2 = vld [vmem:[#allocation7 + $0x8f8] sm:$0xf0] }
 0x2c5   :  { %3357 = vmatmul.bf16.gmra.mxu1 %v12142_v51  ;;  %v3677_v34 = vmax.f32 %v3127_v56, 0.0 }
 0x2c6   :  { %3467 = vmatpush.bf16.msra.mxu1 %v8867_v33 }
 0x2c7   :  { %v3099_v27 = vpop.f32.mrf.mxu0  ;;  %v3157_v13 = vpop.f32.mrf.mxu2  ;;  %3496 = vmatpush.bf16.msrb.mxu2 %v7911_v10 }
 0x2c8   :  { %v3100_v55 = vadd.f32 %v3099_v27, %v12469_v4  ;;  %v3158_v59 = vadd.f32 %v3157_v13, %v12489_v21  ;;  %v3186_v40 = vpop.f32.mrf.mxu3  ;;  %3525 = vmatpush.bf16.msrb.mxu3 %v8103_v38  ;;  %v8674_v4 = vld [vmem:[#allocation7 + $0x610] sm:$0xf] }
 0x2c9   :  { %v8675_v11 = vor.u32 %v10841_v20, %v8674_v4  ;;  %v10784_v4 = vld [vmem:[#allocation7 + $0x464] sm:$0xf] }
 0x2ca   :  { %v3128_v16 = vpop.f32.mrf.mxu1  ;;  %v12516_v57 = vadd.f32 %v3186_v40, %v3158_v59  ;;  %v8463_v33 = vor.u32 %v10784_v4, %v8460_v36  ;;  %v8820_v36 = vld [vmem:[#allocation7 + $0x748] sm:$0xf0] }
 0x2cb   :  { %v3129_v35 = vadd.f32 %v3128_v16, %v3100_v55  ;;  %3438 = vmatpush.bf16.msra.mxu0 %v8675_v11  ;;  %v10928_v11 = vld [vmem:[#allocation7 + $0x8e4] sm:$0xf] }
 0x2cc   :  { %3391 = vmatmul.bf16.gmra.mxu2 %v12166_v1 }
 0x2cd   :  { %v3683_v5 = vmax.f32 %v3129_v35, 0.0  ;;  %3420 = vmatmul.bf16.gmra.mxu3 %v12169_v7 }
 0x2cf   :  { %v12520_v45 = vpack.c.bf16 %v3683_v5, %v3677_v34  ;;  %v3102_v27 = vpop.f32.mrf.mxu0  ;;  %v3160_v13 = vpop.f32.mrf.mxu2  ;;  %v10880_v34 = vld [vmem:[#allocation7 + $0x764] sm:$0xf]  ;;  %v8844_v5 = vld [vmem:[#allocation7 + $0x778] sm:$0xf0]  ;;  %3547 = vmatpush.bf16.msrb.mxu0 %v8463_v33  ;;  %v10922_v33 = vld [vmem:[#allocation7 + $0x8b4] sm:$0xf] }
 0x2d0   :  { %v3103_v3 = vadd.f32 %v3102_v27, %v12474_v22  ;;  %v3161_v56 = vadd.f32 %v3160_v13, %v12489_v21  ;;  %v3189_v55 = vpop.f32.mrf.mxu3  ;;  %v8847_v20 = vor.u32 %v10880_v34, %v8844_v5 }
 0x2d2   :  { %v3131_v24 = vpop.f32.mrf.mxu1  ;;  %v12524_v59 = vadd.f32 %v3189_v55, %v3161_v56  ;;  %3333 = vmatmul.bf16.gmra.mxu0 %v12174_v31  ;;  %v8652_v56 = vld [vmem:[#allocation7 + $0x5f8] sm:$0xf0]  ;;  %3605 = vmatpush.bf16.msra.mxu2 %v8847_v20  ;;  %v10874_v20 = vld [vmem:[#allocation7 + $0x734] sm:$0xf] }
 0x2d3   :  { %v3132_v16 = vadd.f32 %v3131_v24, %v3103_v3  ;;  %v9039_v3 = vor.u32 %v10928_v11, %v9036_v2  ;;  %v10832_v24 = vld [vmem:[#allocation7 + $0x5e4] sm:$0xf]  ;;  %v10778_v11 = vld [vmem:[#allocation7 + $0x434] sm:$0xf]  ;;  %v8823_v2 = vor.u32 %v10874_v20, %v8820_v36  ;;  %v8796_v20 = vld [vmem:[#allocation7 + $0x718] sm:$0xf0] }
 0x2d4   :  { %v10772_v36 = vld [vmem:[#allocation7 + $0x404] sm:$0xf] }
 0x2d5   :  { %3362 = vmatmul.bf16.gmra.mxu1 %v12179_v19  ;;  %v3689_v55 = vmax.f32 %v3132_v16, 0.0  ;;  %3634 = vmatpush.bf16.msra.mxu3 %v9039_v3  ;;  %v9012_v3 = vld [vmem:[#allocation7 + $0x8c8] sm:$0xf0] }
 0x2d6   :  { %3606 = vmatpush.bf16.msra.mxu2 %v8823_v2 }
 0x2d7   :  { %v3104_v40 = vpop.f32.mrf.mxu0  ;;  %v3162_v10 = vpop.f32.mrf.mxu2 }
 0x2d8   :  { %v3105_v60 = vadd.f32 %v3104_v40, %v12479_v53  ;;  %v3163_v22 = vadd.f32 %v3162_v10, %v12489_v21  ;;  %v3191_v35 = vpop.f32.mrf.mxu3  ;;  %v8655_v53 = vor.u32 %v10832_v24, %v8652_v56  ;;  %v10826_v56 = vld [vmem:[#allocation7 + $0x5b4] sm:$0xf] }
 0x2da   :  { %v3133_v38 = vpop.f32.mrf.mxu1  ;;  %v12530_v13 = vadd.f32 %v3191_v35, %v3163_v22  ;;  %3576 = vmatpush.bf16.msrb.mxu1 %v8655_v53  ;;  %v8628_v53 = vld [vmem:[#allocation7 + $0x5c8] sm:$0xf0] }
 0x2db   :  { %v3134_v27 = vadd.f32 %v3133_v38, %v3105_v60 }
 0x2dc   :  { %3396 = vmatmul.bf16.gmra.mxu2 %v12202_v54 }
 0x2dd   :  { %v3695_v40 = vmax.f32 %v3134_v27, 0.0  ;;  %3425 = vmatmul.bf16.gmra.mxu3 %v12205_v28  ;;  %v8436_v27 = vld [vmem:[#allocation7 + $0x448] sm:$0xf0] }
 0x2de   :  { %v8439_v24 = vor.u32 %v10778_v11, %v8436_v27  ;;  %v8412_v27 = vld [vmem:[#allocation7 + $0x418] sm:$0xf0] }
 0x2df   :  { %v12534_v10 = vpack.c.bf16 %v3695_v40, %v3689_v55  ;;  %v3107_v60 = vpop.f32.mrf.mxu0  ;;  %v3165_v38 = vpop.f32.mrf.mxu2  ;;  %v8631_v55 = vor.u32 %v10826_v56, %v8628_v53  ;;  %v10820_v53 = vld [vmem:[#allocation7 + $0x584] sm:$0xf] }
 0x2e0   :  { %v3108_v22 = vadd.f32 %v3107_v60, %v12484_v12  ;;  %v3166_v34 = vadd.f32 %v3165_v38, %v12489_v21  ;;  %v3194_v5 = vpop.f32.mrf.mxu3  ;;  %v9015_v12 = vor.u32 %v10922_v33, %v9012_v3  ;;  %3548 = vmatpush.bf16.msrb.mxu0 %v8439_v24  ;;  %v10916_v33 = vld [vmem:[#allocation7 + $0x884] sm:$0xf]  ;;  %v8988_v3 = vld [vmem:[#allocation7 + $0x898] sm:$0xf0]  ;;  %v8415_v24 = vor.u32 %v10772_v36, %v8412_v27  ;;  %v10766_v36 = vld [vmem:[#allocation7 + $0x3d4] sm:$0xf] }
 0x2e1   :  { %3577 = vmatpush.bf16.msrb.mxu1 %v8631_v55  ;;  %v8604_v55 = vld [vmem:[#allocation7 + $0x598] sm:$0xf0] }
 0x2e2   :  { %v3136_v35 = vpop.f32.mrf.mxu1  ;;  %v12538_v16 = vadd.f32 %v3194_v5, %v3166_v34  ;;  %3338 = vmatmul.bf16.gmra.mxu0 %v12210_v62  ;;  %3635 = vmatpush.bf16.msra.mxu3 %v9015_v12  ;;  %v10868_v5 = vld [vmem:[#allocation7 + $0x704] sm:$0xf]  ;;  %v8991_v12 = vor.u32 %v10916_v33, %v8988_v3 }
 0x2e3   :  { %v3137_v4 = vadd.f32 %v3136_v35, %v3108_v22  ;;  %v8799_v11 = vor.u32 %v10868_v5, %v8796_v20  ;;  %v8772_v20 = vld [vmem:[#allocation7 + $0x6e8] sm:$0xf0] }
 0x2e4   :  { %3549 = vmatpush.bf16.msrb.mxu0 %v8415_v24  ;;  %v8580_v24 = vld [vmem:[#allocation7 + $0x568] sm:$0xf0] }
 0x2e5   :  { %3367 = vmatmul.bf16.gmra.mxu1 %v12215_v25  ;;  %3607 = vmatpush.bf16.msra.mxu2 %v8799_v11  ;;  %v10910_v11 = vld [vmem:[#allocation7 + $0x854] sm:$0xf] }
 0x2e6   :  { %3636 = vmatpush.bf16.msra.mxu3 %v8991_v12 }
 0x2e7   :  { %v3109_v40 = vpop.f32.mrf.mxu0  ;;  %v3167_v60 = vpop.f32.mrf.mxu2 }
 0x2e8   :  { %v3110_v38 = vadd.f32 %v3109_v40, %v12492_v32  ;;  %v3168_v35 = vadd.f32 %v3167_v60, %v12489_v21  ;;  %v3196_v34 = vpop.f32.mrf.mxu3  ;;  %v8607_v32 = vor.u32 %v10820_v53, %v8604_v55  ;;  %v3701_v40 = vmax.f32 %v3137_v4, 0.0  ;;  %v10862_v4 = vld [vmem:[#allocation7 + $0x6d4] sm:$0xf] }
 0x2ea   :  { %v3138_v22 = vpop.f32.mrf.mxu1  ;;  %v12544_v56 = vadd.f32 %v3196_v34, %v3168_v35  ;;  %3578 = vmatpush.bf16.msrb.mxu1 %v8607_v32 }
 0x2eb   :  { %v3139_v2 = vadd.f32 %v3138_v22, %v3110_v38 }
 0x2ec   :  { %3497 = vmatmul.bf16.vlgmr.msrb.gmra.mxu2 %v12099_v9  ;;  %v8775_v9 = vor.u32 %v10862_v4, %v8772_v20  ;;  %v10904_v20 = vld [vmem:[#allocation7 + $0x824] sm:$0xf] }
 0x2ed   :  { %v3707_v29 = vmax.f32 %v3139_v2, 0.0  ;;  %3526 = vmatmul.bf16.vlgmr.msrb.gmra.mxu3 %v12106_v14  ;;  %v8388_v14 = vld [vmem:[#allocation7 + $0x3e8] sm:$0xf0]  ;;  %v10814_v2 = vld [vmem:[#allocation7 + $0x554] sm:$0xf] }
 0x2ee   :  { %v8391_v33 = vor.u32 %v10766_v36, %v8388_v14  ;;  %3608 = vmatpush.bf16.msra.mxu2 %v8775_v9  ;;  %v8940_v9 = vld [vmem:[#allocation7 + $0x838] sm:$0xf0] }
 0x2ef   :  { %v12548_v21 = vpack.c.bf16 %v3707_v29, %v3701_v40  ;;  %v3208_v60 = vpop.f32.mrf.mxu0  ;;  %v3266_v38 = vpop.f32.mrf.mxu2  ;;  %v8964_v29 = vld [vmem:[#allocation7 + $0x868] sm:$0xf0] }
 0x2f0   :  { %v3209_v22 = vadd.f32 %v3208_v60, %v12496_v30  ;;  %v3295_v34 = vpop.f32.mrf.mxu3  ;;  %v8967_v3 = vor.u32 %v10910_v11, %v8964_v29  ;;  %v8583_v30 = vor.u32 %v10814_v2, %v8580_v24  ;;  %3550 = vmatpush.bf16.msrb.mxu0 %v8391_v33  ;;  %v10808_v11 = vld [vmem:[#allocation7 + $0x524] sm:$0xf]  ;;  %v8943_v29 = vor.u32 %v10904_v20, %v8940_v9  ;;  %v10850_v24 = vld [vmem:[#allocation7 + $0x674] sm:$0xf]  ;;  %v8340_v20 = vld [vmem:[#allocation7 + $0x388] sm:$0xf0] }
 0x2f1   :  { %v8700_v9 = vld [vmem:[#allocation7 + $0x658] sm:$0xf0] }
 0x2f2   :  { %v3237_v35 = vpop.f32.mrf.mxu1  ;;  %3439 = vmatmul.bf16.vlgmr.msra.gmra.mxu0 %v12242_v39  ;;  %3637 = vmatpush.bf16.msra.mxu3 %v8967_v3 }
 0x2f3   :  { %v3238_v5 = vadd.f32 %v3237_v35, %v3209_v22  ;;  %3579 = vmatpush.bf16.msrb.mxu1 %v8583_v30  ;;  %v10856_v22 = vld [vmem:[#allocation7 + $0x6a4] sm:$0xf]  ;;  %v8748_v35 = vld [vmem:[#allocation7 + $0x6b8] sm:$0xf0]  ;;  %v8724_v30 = vld [vmem:[#allocation7 + $0x688] sm:$0xf0] }
 0x2f4   :  { %v8751_v4 = vor.u32 %v10856_v22, %v8748_v35 }
 0x2f5   :  { %3468 = vmatmul.bf16.vlgmr.msra.gmra.mxu1 %v12244_v18  ;;  %v3267_v27 = vadd.f32 %v3266_v38, %v3238_v5  ;;  %v10760_v38 = vld [vmem:[#allocation7 + $0x3a4] sm:$0xf]  ;;  %v8364_v5 = vld [vmem:[#allocation7 + $0x3b8] sm:$0xf0] }
 0x2f6   :  { %v8367_v14 = vor.u32 %v10760_v38, %v8364_v5  ;;  %3609 = vmatpush.bf16.msra.mxu2 %v8751_v4  ;;  %3638 = vmatpush.bf16.msra.mxu3 %v8943_v29  ;;  %v8916_v38 = vld [vmem:[#allocation7 + $0x808] sm:$0xf0] }
 0x2f7   :  { %v3296_v12 = vadd.f32 %v3295_v34, %v3267_v27  ;;  %v3210_v53 = vpop.f32.mrf.mxu0  ;;  %v3268_v55 = vpop.f32.mrf.mxu2  ;;  %v8556_v34 = vld [vmem:[#allocation7 + $0x538] sm:$0xf0] }
 0x2f8   :  { %v3211_v32 = vadd.f32 %v3210_v53, %v12502_v6  ;;  %v3297_v60 = vpop.f32.mrf.mxu3  ;;  %v8559_v27 = vor.u32 %v10808_v11, %v8556_v34  ;;  %3551 = vmatpush.bf16.msrb.mxu0 %v8367_v14  ;;  %v10898_v53 = vld [vmem:[#allocation7 + $0x7f4] sm:$0xf]  ;;  %v8532_v14 = vld [vmem:[#allocation7 + $0x508] sm:$0xf0] }
 0x2fa   :  { %v3239_v40 = vpop.f32.mrf.mxu1  ;;  %3580 = vmatpush.bf16.msrb.mxu1 %v8559_v27  ;;  %v10892_v27 = vld [vmem:[#allocation7 + $0x7c4] sm:$0xf] }
 0x2fb   :  { %v3240_v36 = vadd.f32 %v3239_v40, %v3211_v32  ;;  %v3666_v32 = vmax.f32 %v3296_v12, 0.0 }
 0x2fc   :  { %3502 = vmatmul.bf16.gmra.mxu2 %v12135_v37  ;;  %v8919_v37 = vor.u32 %v10898_v53, %v8916_v38  ;;  %v10838_v53 = vld [vmem:[#allocation7 + $0x614] sm:$0xf]  ;;  %v8316_v38 = vld [vmem:[#allocation7 + $0x358] sm:$0xf0] }
 0x2fd   :  { %v3269_v33 = vadd.f32 %v3268_v55, %v3240_v36  ;;  %3531 = vmatmul.bf16.gmra.mxu3 %v12142_v51  ;;  %v8727_v55 = vor.u32 %v10850_v24, %v8724_v30  ;;  %v10802_v36 = vld [vmem:[#allocation7 + $0x4f4] sm:$0xf] }
 0x2fe   :  { %3639 = vmatpush.bf16.msra.mxu3 %v8919_v37  ;;  %v8535_v34 = vor.u32 %v10802_v36, %v8532_v14  ;;  %v8868_v36 = vld [vmem:[#allocation7 + $0x7a8] sm:$0xf0] }
 0x2ff   :  { %v3298_v6 = vadd.f32 %v3297_v60, %v3269_v33  ;;  %v3213_v3 = vpop.f32.mrf.mxu0  ;;  %v3271_v2 = vpop.f32.mrf.mxu2  ;;  %3610 = vmatpush.bf16.msra.mxu2 %v8727_v55  ;;  %v10754_v60 = vld [vmem:[#allocation7 + $0x374] sm:$0xf]  ;;  %v8892_v33 = vld [vmem:[#allocation7 + $0x7d8] sm:$0xf0] }
 0x300   :  { %v3214_v22 = vadd.f32 %v3213_v3, %v12510_v49  ;;  %v3300_v4 = vpop.f32.mrf.mxu3  ;;  %v8343_v12 = vor.u32 %v10754_v60, %v8340_v20  ;;  %v10844_v49 = vld [vmem:[#allocation7 + $0x644] sm:$0xf]  ;;  %3581 = vmatpush.bf16.msrb.mxu1 %v8535_v34  ;;  %v8508_v20 = vld [vmem:[#allocation7 + $0x4d8] sm:$0xf0] }
 0x301   :  { %v3672_v40 = vmax.f32 %v3298_v6, 0.0  ;;  %v8703_v29 = vor.u32 %v10844_v49, %v8700_v9  ;;  %v8895_v6 = vor.u32 %v10892_v27, %v8892_v33  ;;  %v10796_v60 = vld [vmem:[#allocation7 + $0x4c4] sm:$0xf]  ;;  %v8292_v9 = vld [vmem:[#allocation7 + $0x328] sm:$0xf0] }
 0x302   :  { %v3242_v35 = vpop.f32.mrf.mxu1  ;;  %3444 = vmatmul.bf16.gmra.mxu0 %v12262_v47  ;;  %v8484_v27 = vld [vmem:[#allocation7 + $0x4a8] sm:$0xf0] }
 0x303   :  { %v12557_v5 = vpack.c.bf16 %v3672_v40, %v3666_v32  ;;  %v3243_v51 = vadd.f32 %v3242_v35, %v3214_v22  ;;  %3552 = vmatpush.bf16.msrb.mxu0 %v8343_v12  ;;  %3611 = vmatpush.bf16.msra.mxu2 %v8703_v29  ;;  %v8676_v32 = vld [vmem:[#allocation7 + $0x628] sm:$0xf0]  ;;  %v10886_v40 = vld [vmem:[#allocation7 + $0x794] sm:$0xf]  ;;  %v8511_v12 = vor.u32 %v10796_v60, %v8508_v20 }
 0x304   :  { %3640 = vmatpush.bf16.msra.mxu3 %v8895_v6  ;;  %v8679_v37 = vor.u32 %v10838_v53, %v8676_v32  ;;  %v8871_v14 = vor.u32 %v10886_v40, %v8868_v36 }
 0x305   :  { %13636 = vst [vmem:[#allocation31_spill] sm:$0xff] %v12557_v5  ;;  %3473 = vmatmul.bf16.gmra.mxu1 %v12264_v0  ;;  %v3272_v11 = vadd.f32 %v3271_v2, %v3243_v51  ;;  %v10748_v2 = vld [vmem:[#allocation7 + $0x344] sm:$0xf] }
 0x306   :  { %v8319_v51 = vor.u32 %v10748_v2, %v8316_v38  ;;  %3582 = vmatpush.bf16.msrb.mxu1 %v8511_v12 }
 0x307   :  { %v3301_v3 = vadd.f32 %v3300_v4, %v3272_v11  ;;  %v3215_v24 = vpop.f32.mrf.mxu0  ;;  %v3273_v30 = vpop.f32.mrf.mxu2  ;;  %3612 = vmatpush.bf16.msra.mxu2 %v8679_v37  ;;  %v10790_v11 = vld [vmem:[#allocation7 + $0x494] sm:$0xf] }
 0x308   :  { %v3216_v22 = vadd.f32 %v3215_v24, %v12516_v57  ;;  %v3302_v55 = vpop.f32.mrf.mxu3  ;;  %3553 = vmatpush.bf16.msrb.mxu0 %v8319_v51  ;;  %v10742_v57 = vld [vmem:[#allocation7 + $0x314] sm:$0xf]  ;;  %3641 = vmatpush.bf16.msra.mxu3 %v8871_v14  ;;  %v8487_v24 = vor.u32 %v10790_v11, %v8484_v27 }
 0x309   :  { %v8295_v29 = vor.u32 %v10742_v57, %v8292_v9  ;;  %v3678_v53 = vmax.f32 %v3301_v3, 0.0  ;;  %v9210_v27 = vld [vmem:[#allocation10 + $0x150] sm:$0xf] }
 0x30a   :  { %v3244_v35 = vpop.f32.mrf.mxu1  ;;  %3583 = vmatpush.bf16.msrb.mxu1 %v8487_v24 }
 0x30b   :  { %v3245_v4 = vadd.f32 %v3244_v35, %v3216_v22 }
 0x30c   :  { %3507 = vmatmul.bf16.gmra.mxu2 %v12174_v31  ;;  %3554 = vmatpush.bf16.msrb.mxu0 %v8295_v29  ;;  %v9594_v29 = vld [vmem:[#allocation10 + $0x450] sm:$0xf] }
 0x30d   :  { %v3274_v49 = vadd.f32 %v3273_v30, %v3245_v4  ;;  %3536 = vmatmul.bf16.gmra.mxu3 %v12179_v19 }
 0x30f   :  { %v3303_v34 = vadd.f32 %v3302_v55, %v3274_v49  ;;  %v3218_v33 = vpop.f32.mrf.mxu0  ;;  %v3276_v6 = vpop.f32.mrf.mxu2 }
 0x310   :  { %v3219_v40 = vadd.f32 %v3218_v33, %v12524_v59  ;;  %v3305_v22 = vpop.f32.mrf.mxu3 }
 0x311   :  { %v3684_v32 = vmax.f32 %v3303_v34, 0.0 }
 0x312   :  { %v3247_v30 = vpop.f32.mrf.mxu1  ;;  %3449 = vmatmul.bf16.gmra.mxu0 %v12282_v26 }
 0x313   :  { %v12565_v31 = vpack.c.bf16 %v3684_v32, %v3678_v53  ;;  %v3248_v19 = vadd.f32 %v3247_v30, %v3219_v40  ;;  %v10977_v53 = vld [vmem:[#allocation10 + $0x164] sm:$0xf0]  ;;  %v9786_v32 = vld [vmem:[#allocation10 + $0x5d0] sm:$0xf] }
 0x315   :  { %3478 = vmatmul.bf16.gmra.mxu1 %v12284_v23  ;;  %v3277_v35 = vadd.f32 %v3276_v6, %v3248_v19  ;;  %v9211_v19 = vor.u32 %v10977_v53, %v9210_v27 }
 0x317   :  { %v3306_v55 = vadd.f32 %v3305_v22, %v3277_v35  ;;  %v3220_v2 = vpop.f32.mrf.mxu0  ;;  %v3278_v38 = vpop.f32.mrf.mxu2  ;;  %5477 = vmatpush.bf16.msra.mxu0 %v9211_v19  ;;  %v11109_v19 = vld [vmem:[#allocation10 + $0x584] sm:$0xf0] }
 0x318   :  { %v3221_v3 = vadd.f32 %v3220_v2, %v12530_v13  ;;  %v3307_v51 = vpop.f32.mrf.mxu3  ;;  %v11025_v2 = vld [vmem:[#allocation10 + $0x2e4] sm:$0xf0] }
 0x319   :  { %v3690_v12 = vmax.f32 %v3306_v55, 0.0  ;;  %v9402_v55 = vld [vmem:[#allocation10 + $0x2d0] sm:$0xf] }
 0x31a   :  { %v3249_v37 = vpop.f32.mrf.mxu1 }
 0x31b   :  { %v3250_v59 = vadd.f32 %v3249_v37, %v3221_v3 }
 0x31c   :  { %3512 = vmatmul.bf16.gmra.mxu2 %v12210_v62 }
 0x31d   :  { %v3279_v60 = vadd.f32 %v3278_v38, %v3250_v59  ;;  %3541 = vmatmul.bf16.gmra.mxu3 %v12215_v25  ;;  %v11073_v25 = vld [vmem:[#allocation10 + $0x464] sm:$0xf0]  ;;  %v9403_v38 = vor.u32 %v11025_v2, %v9402_v55  ;;  %v9162_v2 = vld [vmem:[#allocation10 + $0xf0] sm:$0xf] }
 0x31e   :  { %v9595_v24 = vor.u32 %v11073_v25, %v9594_v29 }
 0x31f   :  { %v3308_v20 = vadd.f32 %v3307_v51, %v3279_v60  ;;  %v3223_v36 = vpop.f32.mrf.mxu0  ;;  %v3281_v4 = vpop.f32.mrf.mxu2  ;;  %5506 = vmatpush.bf16.msra.mxu1 %v9403_v38  ;;  %v12579_v51 = vld [vmem:[#allocation8] sm:$0x3f]  ;;  %v10965_v38 = vld [vmem:[#allocation10 + $0x104] sm:$0xf0] }
 0x320   :  { %v3224_v49 = vadd.f32 %v3223_v36, %v12538_v16  ;;  %v3310_v9 = vpop.f32.mrf.mxu3  ;;  %v11121_v16 = vld [vmem:[#allocation10 + $0x5e4] sm:$0xf0]  ;;  %5535 = vmatpush.bf16.msrb.mxu2 %v9595_v24  ;;  %v12582_v59 = vperm.slane %v12579_v51, 4  ;;  %v11067_v36 = vld [vmem:[#allocation10 + $0x434] sm:$0xf0] }
 0x321   :  { %v3696_v14 = vmax.f32 %v3308_v20, 0.0  ;;  %v9787_v35 = vor.u32 %v11121_v16, %v9786_v32  ;;  %v9570_v20 = vld [vmem:[#allocation10 + $0x420] sm:$0xf]  ;;  %v9546_v32 = vld [vmem:[#allocation10 + $0x3f0] sm:$0xf] }
 0x322   :  { %v3252_v57 = vpop.f32.mrf.mxu1  ;;  %3454 = vmatmul.bf16.gmra.mxu0 %v12302_v44  ;;  %v11061_v16 = vld [vmem:[#allocation10 + $0x404] sm:$0xf0] }
 0x323   :  { %v12573_v11 = vpack.c.bf16 %v3696_v14, %v3690_v12  ;;  %v3253_v13 = vadd.f32 %v3252_v57, %v3224_v49  ;;  %5564 = vmatpush.bf16.msrb.mxu3 %v9787_v35  ;;  %v9571_v49 = vor.u32 %v11067_v36, %v9570_v20  ;;  %v10971_v57 = vld [vmem:[#allocation10 + $0x134] sm:$0xf0] }
 0x324   :  { %v11055_v20 = vld [vmem:[#allocation10 + $0x3d4] sm:$0xf0] }
 0x325   :  { %3483 = vmatmul.bf16.gmra.mxu1 %v12304_v58  ;;  %v3282_v34 = vadd.f32 %v3281_v4, %v3253_v13  ;;  %v9186_v4 = vld [vmem:[#allocation10 + $0x120] sm:$0xf]  ;;  %v11115_v13 = vld [vmem:[#allocation10 + $0x5b4] sm:$0xf0]  ;;  %5536 = vmatpush.bf16.msrb.mxu2 %v9571_v49 }
 0x326   :  { %v9187_v27 = vor.u32 %v10971_v57, %v9186_v4  ;;  %v9714_v57 = vld [vmem:[#allocation10 + $0x540] sm:$0xf] }
 0x327   :  { %v3311_v62 = vadd.f32 %v3310_v9, %v3282_v34  ;;  %v3225_v33 = vpop.f32.mrf.mxu0  ;;  %v3283_v6 = vpop.f32.mrf.mxu2  ;;  %v9762_v9 = vld [vmem:[#allocation10 + $0x5a0] sm:$0xf] }
 0x328   :  { %v3226_v40 = vadd.f32 %v3225_v33, %v12544_v56  ;;  %v3312_v22 = vpop.f32.mrf.mxu3  ;;  %v9763_v33 = vor.u32 %v11115_v13, %v9762_v9  ;;  %5478 = vmatpush.bf16.msra.mxu0 %v9187_v27  ;;  %v11103_v9 = vld [vmem:[#allocation10 + $0x554] sm:$0xf0] }
 0x329   :  { %v3702_v56 = vmax.f32 %v3311_v62, 0.0  ;;  %v9378_v62 = vld [vmem:[#allocation10 + $0x2a0] sm:$0xf]  ;;  %v9715_v13 = vor.u32 %v11103_v9, %v9714_v57  ;;  %v9450_v57 = vld [vmem:[#allocation10 + $0x330] sm:$0xf] }
 0x32a   :  { %v3254_v30 = vpop.f32.mrf.mxu1  ;;  %5565 = vmatpush.bf16.msrb.mxu3 %v9763_v33  ;;  %v11037_v9 = vld [vmem:[#allocation10 + $0x344] sm:$0xf0] }
 0x32b   :  { %v3255_v3 = vadd.f32 %v3254_v30, %v3226_v40  ;;  %v9738_v40 = vld [vmem:[#allocation10 + $0x570] sm:$0xf] }
 0x32c   :  { %3613 = vmatmul.bf16.vlgmr.msra.gmra.mxu2 %v12242_v39  ;;  %v9739_v35 = vor.u32 %v11109_v19, %v9738_v40 }
 0x32d   :  { %v3284_v37 = vadd.f32 %v3283_v6, %v3255_v3  ;;  %3642 = vmatmul.bf16.vlgmr.msra.gmra.mxu3 %v12244_v18  ;;  %v11019_v6 = vld [vmem:[#allocation10 + $0x2b4] sm:$0xf0]  ;;  %v9354_v3 = vld [vmem:[#allocation10 + $0x270] sm:$0xf] }
 0x32e   :  { %v9379_v18 = vor.u32 %v11019_v6, %v9378_v62  ;;  %5566 = vmatpush.bf16.msrb.mxu3 %v9739_v35  ;;  %v11097_v62 = vld [vmem:[#allocation10 + $0x524] sm:$0xf0]  ;;  %v9138_v6 = vld [vmem:[#allocation10 + $0xc0] sm:$0xf] }
 0x32f   :  { %v3313_v60 = vadd.f32 %v3312_v22, %v3284_v37  ;;  %v3324_v12 = vpop.f32.mrf.mxu0  ;;  %v3382_v14 = vpop.f32.mrf.mxu2  ;;  %v9547_v22 = vor.u32 %v11061_v16, %v9546_v32 }
 0x330   :  { %v3325_v39 = vadd.f32 %v3324_v12, %v12582_v59  ;;  %v3411_v25 = vpop.f32.mrf.mxu3  ;;  %5507 = vmatpush.bf16.msra.mxu1 %v9379_v18  ;;  %v10959_v18 = vld [vmem:[#allocation10 + $0xd4] sm:$0xf0] }
 0x331   :  { %v3708_v34 = vmax.f32 %v3313_v60, 0.0  ;;  %5537 = vmatpush.bf16.msrb.mxu2 %v9547_v22  ;;  %v9522_v60 = vld [vmem:[#allocation10 + $0x3c0] sm:$0xf]  ;;  %v9139_v40 = vor.u32 %v10959_v18, %v9138_v6  ;;  %v10995_v18 = vld [vmem:[#allocation10 + $0x1f4] sm:$0xf0] }
 0x332   :  { %v3353_v29 = vpop.f32.mrf.mxu1  ;;  %3555 = vmatmul.bf16.vlgmr.msrb.gmra.mxu0 %v12091_v8  ;;  %v9523_v49 = vor.u32 %v11055_v20, %v9522_v60  ;;  %5567 = vmatpush.bf16.msrb.mxu3 %v9715_v13  ;;  %v9114_v60 = vld [vmem:[#allocation10 + $0x90] sm:$0xf]  ;;  %v10953_v20 = vld [vmem:[#allocation10 + $0xa4] sm:$0xf0] }
 0x333   :  { %v12586_v24 = vpack.c.bf16 %v3708_v34, %v3702_v56  ;;  %v3354_v53 = vadd.f32 %v3353_v29, %v3325_v39  ;;  %v9163_v56 = vor.u32 %v10965_v38, %v9162_v2  ;;  %v9498_v39 = vld [vmem:[#allocation10 + $0x390] sm:$0xf]  ;;  %v11049_v29 = vld [vmem:[#allocation10 + $0x3a4] sm:$0xf0]  ;;  %v9474_v2 = vld [vmem:[#allocation10 + $0x360] sm:$0xf] }
 0x334   :  { %v9499_v33 = vor.u32 %v11049_v29, %v9498_v39  ;;  %v11043_v38 = vld [vmem:[#allocation10 + $0x374] sm:$0xf0]  ;;  %v9642_v13 = vld [vmem:[#allocation10 + $0x4b0] sm:$0xf]  ;;  %v9451_v39 = vor.u32 %v11037_v9, %v9450_v57  ;;  %v11085_v29 = vld [vmem:[#allocation10 + $0x4c4] sm:$0xf0] }
 0x335   :  { %3584 = vmatmul.bf16.vlgmr.msrb.gmra.mxu1 %v12094_v50  ;;  %v3383_v30 = vadd.f32 %v3382_v14, %v3354_v53  ;;  %v11013_v50 = vld [vmem:[#allocation10 + $0x284] sm:$0xf0]  ;;  %5479 = vmatpush.bf16.msra.mxu0 %v9163_v56  ;;  %v9330_v53 = vld [vmem:[#allocation10 + $0x240] sm:$0xf]  ;;  %v11091_v56 = vld [vmem:[#allocation10 + $0x4f4] sm:$0xf0] }
 0x336   :  { %v9355_v14 = vor.u32 %v11013_v50, %v9354_v3  ;;  %5538 = vmatpush.bf16.msrb.mxu2 %v9523_v49  ;;  %v10983_v9 = vld [vmem:[#allocation10 + $0x194] sm:$0xf0] }
 0x337   :  { %v12590_v55 = vadd.f32 %v3411_v25, %v3383_v30  ;;  %v3326_v37 = vpop.f32.mrf.mxu0  ;;  %v3384_v8 = vpop.f32.mrf.mxu2  ;;  %v9690_v25 = vld [vmem:[#allocation10 + $0x510] sm:$0xf]  ;;  %v11007_v30 = vld [vmem:[#allocation10 + $0x254] sm:$0xf0] }
 0x338   :  { %v3327_v36 = vadd.f32 %v3326_v37, %v12582_v59  ;;  %v3413_v12 = vpop.f32.mrf.mxu3  ;;  %5508 = vmatpush.bf16.msra.mxu1 %v9355_v14  ;;  %v9691_v32 = vor.u32 %v11097_v62, %v9690_v25  ;;  %v9331_v35 = vor.u32 %v11007_v30, %v9330_v53  ;;  %v11001_v14 = vld [vmem:[#allocation10 + $0x224] sm:$0xf0]  ;;  %v9643_v25 = vor.u32 %v11085_v29, %v9642_v13  ;;  %v9282_v62 = vld [vmem:[#allocation10 + $0x1e0] sm:$0xf]  ;;  %v11031_v30 = vld [vmem:[#allocation10 + $0x314] sm:$0xf0] }
 0x339   :  { %5480 = vmatpush.bf16.msra.mxu0 %v9139_v40  ;;  %v9426_v40 = vld [vmem:[#allocation10 + $0x300] sm:$0xf] }
 0x33a   :  { %v3355_v4 = vpop.f32.mrf.mxu1  ;;  %5539 = vmatpush.bf16.msrb.mxu2 %v9499_v33  ;;  %5568 = vmatpush.bf16.msrb.mxu3 %v9691_v32  ;;  %v10947_v33 = vld [vmem:[#allocation10 + $0x74] sm:$0xf0]  ;;  %v9283_v32 = vor.u32 %v10995_v18, %v9282_v62 }
 0x33b   :  { %v3356_v34 = vadd.f32 %v3355_v4, %v3327_v36  ;;  %v9306_v36 = vld [vmem:[#allocation10 + $0x210] sm:$0xf] }
 0x33c   :  { %3618 = vmatmul.bf16.gmra.mxu2 %v12262_v47  ;;  %v9666_v47 = vld [vmem:[#allocation10 + $0x4e0] sm:$0xf]  ;;  %5509 = vmatpush.bf16.msra.mxu1 %v9331_v35  ;;  %v9307_v49 = vor.u32 %v11001_v14, %v9306_v36 }
 0x33d   :  { %v3385_v27 = vadd.f32 %v3384_v8, %v3356_v34  ;;  %3647 = vmatmul.bf16.gmra.mxu3 %v12264_v0  ;;  %v9475_v8 = vor.u32 %v11043_v38, %v9474_v2  ;;  %v9667_v50 = vor.u32 %v11091_v56, %v9666_v47  ;;  %v9427_v38 = vor.u32 %v11031_v30, %v9426_v40  ;;  %v11079_v47 = vld [vmem:[#allocation10 + $0x494] sm:$0xf0]  ;;  %v9234_v14 = vld [vmem:[#allocation10 + $0x180] sm:$0xf] }
 0x33f   :  { %v12595_v16 = vadd.f32 %v3413_v12, %v3385_v27  ;;  %v3329_v22 = vpop.f32.mrf.mxu0  ;;  %v3387_v19 = vpop.f32.mrf.mxu2  ;;  %5540 = vmatpush.bf16.msrb.mxu2 %v9475_v8  ;;  %v9115_v12 = vor.u32 %v10953_v20, %v9114_v60  ;;  %5569 = vmatpush.bf16.msrb.mxu3 %v9667_v50  ;;  %v9090_v27 = vld [vmem:[#allocation10 + $0x60] sm:$0xf]  ;;  %v9258_v8 = vld [vmem:[#allocation10 + $0x1b0] sm:$0xf]  ;;  %v10989_v60 = vld [vmem:[#allocation10 + $0x1c4] sm:$0xf0] }
 0x340   :  { %v3330_v3 = vadd.f32 %v3329_v22, %v12582_v59  ;;  %v3416_v0 = vpop.f32.mrf.mxu3  ;;  %5510 = vmatpush.bf16.msra.mxu1 %v9307_v49  ;;  %v9091_v6 = vor.u32 %v10947_v33, %v9090_v27  ;;  %v9618_v22 = vld [vmem:[#allocation10 + $0x480] sm:$0xf]  ;;  %v9259_v20 = vor.u32 %v10989_v60, %v9258_v8  ;;  %v9404_v8 = vld [vmem:[#allocation10 + $0x2e8] sm:$0xf0] }
 0x341   :  { %5481 = vmatpush.bf16.msra.mxu0 %v9115_v12  ;;  %v10935_v12 = vld [vmem:[#allocation10 + $0x14] sm:$0xf0] }
 0x342   :  { %v3358_v37 = vpop.f32.mrf.mxu1  ;;  %3560 = vmatmul.bf16.gmra.mxu0 %v12127_v41 }
 0x343   :  { %v3359_v4 = vadd.f32 %v3358_v37, %v3330_v3  ;;  %5541 = vmatpush.bf16.msrb.mxu2 %v9451_v39  ;;  %5570 = vmatpush.bf16.msrb.mxu3 %v9643_v25  ;;  %v9619_v3 = vor.u32 %v11079_v47, %v9618_v22  ;;  %v9066_v37 = vld [vmem:[#allocation10 + $0x30] sm:$0xf]  ;;  %v9235_v39 = vor.u32 %v10983_v9, %v9234_v14  ;;  %v10974_v47 = vld [vmem:[#allocation10 + $0x154] sm:$0xf] }
 0x344   :  { %5511 = vmatpush.bf16.msra.mxu1 %v9283_v32 }
 0x345   :  { %3589 = vmatmul.bf16.gmra.mxu1 %v12130_v61  ;;  %v3388_v34 = vadd.f32 %v3387_v19, %v3359_v4  ;;  %5482 = vmatpush.bf16.msra.mxu0 %v9091_v6  ;;  %v9042_v4 = vld [vmem:[#allocation10] sm:$0xf] }
 0x346   :  { %v9043_v57 = vor.u32 %v10935_v12, %v9042_v4 }
 0x347   :  { %v12600_v41 = vadd.f32 %v3416_v0, %v3388_v34  ;;  %v3331_v61 = vpop.f32.mrf.mxu0  ;;  %v3389_v53 = vpop.f32.mrf.mxu2  ;;  %v10941_v0 = vld [vmem:[#allocation10 + $0x44] sm:$0xf0]  ;;  %5542 = vmatpush.bf16.msrb.mxu2 %v9427_v38  ;;  %5571 = vmatpush.bf16.msrb.mxu3 %v9619_v3  ;;  %v9212_v3 = vld [vmem:[#allocation10 + $0x168] sm:$0xf0] }
 0x348   :  { %v3332_v19 = vadd.f32 %v3331_v61, %v12582_v59  ;;  %v3418_v2 = vpop.f32.mrf.mxu3  ;;  %v9067_v50 = vor.u32 %v10941_v0, %v9066_v37  ;;  %5512 = vmatpush.bf16.msra.mxu1 %v9259_v20  ;;  %v9978_v37 = vld [vmem:[#allocation10 + $0x750] sm:$0xf]  ;;  %v11169_v0 = vld [vmem:[#allocation10 + $0x764] sm:$0xf0] }
 0x349   :  { %v10170_v20 = vld [vmem:[#allocation10 + $0x8d0] sm:$0xf] }
 0x34a   :  { %v3360_v35 = vpop.f32.mrf.mxu1  ;;  %5483 = vmatpush.bf16.msra.mxu0 %v9067_v50  ;;  %v9979_v50 = vor.u32 %v11169_v0, %v9978_v37  ;;  %v9930_v37 = vld [vmem:[#allocation10 + $0x6f0] sm:$0xf] }
 0x34b   :  { %v3361_v56 = vadd.f32 %v3360_v35, %v3332_v19 }
 0x34c   :  { %3623 = vmatmul.bf16.gmra.mxu2 %v12282_v26  ;;  %5513 = vmatpush.bf16.msra.mxu1 %v9235_v39 }
 0x34d   :  { %v3390_v36 = vadd.f32 %v3389_v53, %v3361_v56  ;;  %3652 = vmatmul.bf16.gmra.mxu3 %v12284_v23 }
 0x34e   :  { %5484 = vmatpush.bf16.msra.mxu0 %v9043_v57 }
 0x34f   :  { %v12605_v49 = vadd.f32 %v3418_v2, %v3390_v36  ;;  %v3334_v13 = vpop.f32.mrf.mxu0  ;;  %v3392_v34 = vpop.f32.mrf.mxu2  ;;  %v11217_v36 = vld [vmem:[#allocation10 + $0x8e4] sm:$0xf0] }
 0x350   :  { %v3335_v29 = vadd.f32 %v3334_v13, %v12582_v59  ;;  %v3421_v27 = vpop.f32.mrf.mxu3 }
 0x352   :  { %v3363_v25 = vpop.f32.mrf.mxu1  ;;  %3565 = vmatmul.bf16.gmra.mxu0 %v12166_v1 }
 0x353   :  { %v3364_v26 = vadd.f32 %v3363_v25, %v3335_v29  ;;  %5593 = vmatpush.bf16.msrb.mxu0 %v9979_v50  ;;  %v10968_v29 = vld [vmem:[#allocation10 + $0x124] sm:$0xf]  ;;  %v9188_v25 = vld [vmem:[#allocation10 + $0x138] sm:$0xf0]  ;;  %v11205_v50 = vld [vmem:[#allocation10 + $0x884] sm:$0xf0] }
 0x355   :  { %3594 = vmatmul.bf16.gmra.mxu1 %v12169_v7  ;;  %v3393_v23 = vadd.f32 %v3392_v34, %v3364_v26  ;;  %v12625_v34 = vperm.slane %v12579_v51, 5 }
 0x357   :  { %v12610_v33 = vadd.f32 %v3421_v27, %v3393_v23  ;;  %v3336_v62 = vpop.f32.mrf.mxu0  ;;  %v3394_v6 = vpop.f32.mrf.mxu2  ;;  %v9954_v27 = vld [vmem:[#allocation10 + $0x720] sm:$0xf]  ;;  %v9191_v23 = vor.u32 %v10968_v29, %v9188_v25  ;;  %v9332_v29 = vld [vmem:[#allocation10 + $0x258] sm:$0xf0] }
 0x358   :  { %v3337_v18 = vadd.f32 %v3336_v62, %v12582_v59  ;;  %v3423_v53 = vpop.f32.mrf.mxu3  ;;  %v11163_v62 = vld [vmem:[#allocation10 + $0x734] sm:$0xf0] }
 0x35a   :  { %v3365_v61 = vpop.f32.mrf.mxu1 }
 0x35b   :  { %v3366_v32 = vadd.f32 %v3365_v61, %v3337_v18  ;;  %v9380_v18 = vld [vmem:[#allocation10 + $0x2b8] sm:$0xf0] }
 0x35c   :  { %3628 = vmatmul.bf16.gmra.mxu2 %v12302_v44  ;;  %v9215_v44 = vor.u32 %v10974_v47, %v9212_v3 }
 0x35d   :  { %v3395_v40 = vadd.f32 %v3394_v6, %v3366_v32  ;;  %3657 = vmatmul.bf16.gmra.mxu3 %v12304_v58  ;;  %v11022_v58 = vld [vmem:[#allocation10 + $0x2d4] sm:$0xf]  ;;  %v11016_v6 = vld [vmem:[#allocation10 + $0x2a4] sm:$0xf] }
 0x35e   :  { %v9407_v60 = vor.u32 %v11022_v58, %v9404_v8  ;;  %5651 = vmatpush.bf16.msra.mxu2 %v9215_v44  ;;  %v9383_v51 = vor.u32 %v11016_v6, %v9380_v18  ;;  %v11157_v44 = vld [vmem:[#allocation10 + $0x704] sm:$0xf0]  ;;  %v9356_v58 = vld [vmem:[#allocation10 + $0x288] sm:$0xf0]  ;;  %v10122_v8 = vld [vmem:[#allocation10 + $0x870] sm:$0xf] }
 0x35f   :  { %v12615_v30 = vadd.f32 %v3423_v53, %v3395_v40  ;;  %v3339_v1 = vpop.f32.mrf.mxu0  ;;  %v3397_v22 = vpop.f32.mrf.mxu2  ;;  %v9955_v40 = vor.u32 %v11163_v62, %v9954_v27  ;;  %v9931_v0 = vor.u32 %v11157_v44, %v9930_v37 }
 0x360   :  { %v3340_v7 = vadd.f32 %v3339_v1, %v12582_v59  ;;  %v3426_v35 = vpop.f32.mrf.mxu3  ;;  %5680 = vmatpush.bf16.msra.mxu3 %v9407_v60  ;;  %v10146_v1 = vld [vmem:[#allocation10 + $0x8a0] sm:$0xf] }
 0x361   :  { %5594 = vmatpush.bf16.msrb.mxu0 %v9955_v40 }
 0x362   :  { %v3368_v19 = vpop.f32.mrf.mxu1  ;;  %3570 = vmatmul.bf16.gmra.mxu0 %v12202_v54  ;;  %v10171_v54 = vor.u32 %v11217_v36, %v10170_v20  ;;  %5652 = vmatpush.bf16.msra.mxu2 %v9191_v23  ;;  %v10123_v20 = vor.u32 %v11205_v50, %v10122_v8  ;;  %v10998_v23 = vld [vmem:[#allocation10 + $0x214] sm:$0xf]  ;;  %v9284_v8 = vld [vmem:[#allocation10 + $0x1f8] sm:$0xf0] }
 0x363   :  { %v3369_v2 = vadd.f32 %v3368_v19, %v3340_v7 }
 0x364   :  { %5622 = vmatpush.bf16.msrb.mxu1 %v10171_v54  ;;  %5681 = vmatpush.bf16.msra.mxu3 %v9383_v51  ;;  %v9140_v54 = vld [vmem:[#allocation10 + $0xd8] sm:$0xf0] }
 0x365   :  { %3599 = vmatmul.bf16.gmra.mxu1 %v12205_v28  ;;  %v3398_v38 = vadd.f32 %v3397_v22, %v3369_v2  ;;  %v11211_v22 = vld [vmem:[#allocation10 + $0x8b4] sm:$0xf0]  ;;  %v9164_v2 = vld [vmem:[#allocation10 + $0x108] sm:$0xf0]  ;;  %5595 = vmatpush.bf16.msrb.mxu0 %v9931_v0 }
 0x366   :  { %v10147_v7 = vor.u32 %v11211_v22, %v10146_v1  ;;  %v10098_v1 = vld [vmem:[#allocation10 + $0x840] sm:$0xf]  ;;  %v11199_v22 = vld [vmem:[#allocation10 + $0x854] sm:$0xf0] }
 0x367   :  { %v12620_v56 = vadd.f32 %v3426_v35, %v3398_v38  ;;  %v3341_v4 = vpop.f32.mrf.mxu0  ;;  %v3399_v12 = vpop.f32.mrf.mxu2  ;;  %v10962_v35 = vld [vmem:[#allocation10 + $0xf4] sm:$0xf] }
 0x368   :  { %v3342_v28 = vadd.f32 %v3341_v4, %v12582_v59  ;;  %v3428_v57 = vpop.f32.mrf.mxu3  ;;  %v11010_v38 = vld [vmem:[#allocation10 + $0x274] sm:$0xf]  ;;  %5623 = vmatpush.bf16.msrb.mxu1 %v10147_v7  ;;  %v9167_v3 = vor.u32 %v10962_v35, %v9164_v2  ;;  %v10099_v2 = vor.u32 %v11199_v22, %v10098_v1 }
 0x369   :  { %v9359_v60 = vor.u32 %v11010_v38, %v9356_v58  ;;  %v10944_v38 = vld [vmem:[#allocation10 + $0x64] sm:$0xf] }
 0x36a   :  { %v3370_v14 = vpop.f32.mrf.mxu1  ;;  %5653 = vmatpush.bf16.msra.mxu2 %v9167_v3  ;;  %v10992_v3 = vld [vmem:[#allocation10 + $0x1e4] sm:$0xf] }
 0x36b   :  { %v3371_v9 = vadd.f32 %v3370_v14, %v3342_v28  ;;  %v11004_v28 = vld [vmem:[#allocation10 + $0x244] sm:$0xf]  ;;  %5682 = vmatpush.bf16.msra.mxu3 %v9359_v60  ;;  %v9287_v50 = vor.u32 %v10992_v3, %v9284_v8  ;;  %v9882_v60 = vld [vmem:[#allocation10 + $0x690] sm:$0xf]  ;;  %v10050_v8 = vld [vmem:[#allocation10 + $0x7e0] sm:$0xf] }
 0x36c   :  { %5543 = vmatmul.bf16.vlgmr.msrb.gmra.mxu2 %v12506_v52  ;;  %5624 = vmatpush.bf16.msrb.mxu1 %v10123_v20  ;;  %v9335_v25 = vor.u32 %v11004_v28, %v9332_v29  ;;  %v11145_v20 = vld [vmem:[#allocation10 + $0x6a4] sm:$0xf0]  ;;  %v9068_v28 = vld [vmem:[#allocation10 + $0x48] sm:$0xf0] }
 0x36d   :  { %v3400_v13 = vadd.f32 %v3399_v12, %v3371_v9  ;;  %5572 = vmatmul.bf16.vlgmr.msrb.gmra.mxu3 %v12557_v5  ;;  %v10956_v12 = vld [vmem:[#allocation10 + $0xc4] sm:$0xf] }
 0x36f   :  { %v12628_v39 = vadd.f32 %v3428_v57, %v3400_v13  ;;  %v3440_v59 = vpop.f32.mrf.mxu0  ;;  %v3498_v26 = vpop.f32.mrf.mxu2  ;;  %v9143_v13 = vor.u32 %v10956_v12, %v9140_v54  ;;  %5683 = vmatpush.bf16.msra.mxu3 %v9335_v25  ;;  %v9883_v12 = vor.u32 %v11145_v20, %v9882_v60  ;;  %v10938_v54 = vld [vmem:[#allocation10 + $0x34] sm:$0xf] }
 0x370   :  { %v3499_v53 = vadd.f32 %v3498_v26, %v12625_v34  ;;  %v3527_v32 = vpop.f32.mrf.mxu3  ;;  %v3441_v47 = vadd.f32 %v3440_v59, %v12590_v55  ;;  %v10950_v59 = vld [vmem:[#allocation10 + $0x94] sm:$0xf]  ;;  %v9116_v26 = vld [vmem:[#allocation10 + $0xa8] sm:$0xf0]  ;;  %5625 = vmatpush.bf16.msrb.mxu1 %v10099_v2  ;;  %v9071_v29 = vor.u32 %v10938_v54, %v9068_v28  ;;  %v9834_v2 = vld [vmem:[#allocation10 + $0x630] sm:$0xf] }
 0x371   :  { %5654 = vmatpush.bf16.msra.mxu2 %v9143_v13  ;;  %v9119_v18 = vor.u32 %v10950_v59, %v9116_v26  ;;  %v11193_v13 = vld [vmem:[#allocation10 + $0x824] sm:$0xf0]  ;;  %v9858_v59 = vld [vmem:[#allocation10 + $0x660] sm:$0xf]  ;;  %v11139_v26 = vld [vmem:[#allocation10 + $0x674] sm:$0xf0] }
 0x372   :  { %v3469_v61 = vpop.f32.mrf.mxu1  ;;  %v12631_v19 = vadd.f32 %v3527_v32, %v3499_v53  ;;  %5485 = vmatmul.bf16.vlgmr.msra.gmra.mxu0 %v12370_v48  ;;  %v11151_v53 = vld [vmem:[#allocation10 + $0x6d4] sm:$0xf0] }
 0x373   :  { %v3470_v14 = vadd.f32 %v3469_v61, %v3441_v47  ;;  %v9906_v61 = vld [vmem:[#allocation10 + $0x6c0] sm:$0xf]  ;;  %v9092_v47 = vld [vmem:[#allocation10 + $0x78] sm:$0xf0] }
 0x374   :  { %v9907_v51 = vor.u32 %v11151_v53, %v9906_v61  ;;  %v9095_v58 = vor.u32 %v10944_v38, %v9092_v47  ;;  %v9044_v61 = vld [vmem:[#allocation10 + $0x18] sm:$0xf0]  ;;  %v10980_v53 = vld [vmem:[#allocation10 + $0x184] sm:$0xf]  ;;  %v11133_v38 = vld [vmem:[#allocation10 + $0x644] sm:$0xf0] }
 0x375   :  { %5514 = vmatmul.bf16.vlgmr.msra.gmra.mxu1 %v12421_v63  ;;  %v3667_v62 = vmax.f32 %v3470_v14, 0.0  ;;  %5655 = vmatpush.bf16.msra.mxu2 %v9119_v18  ;;  %v10986_v14 = vld [vmem:[#allocation10 + $0x1b4] sm:$0xf]  ;;  %v9835_v3 = vor.u32 %v11133_v38, %v9834_v2 }
 0x376   :  { %5596 = vmatpush.bf16.msrb.mxu0 %v9907_v51 }
 0x377   :  { %v3442_v36 = vpop.f32.mrf.mxu0  ;;  %v12636_v4 = vpop.f32.mrf.mxu2 }
 0x378   :  { %v3443_v55 = vadd.f32 %v3442_v36, %v12595_v16  ;;  %v12639_v9 = vpop.f32.mrf.mxu3  ;;  %v9308_v16 = vld [vmem:[#allocation10 + $0x228] sm:$0xf0] }
 0x379   :  { %v9311_v32 = vor.u32 %v10998_v23, %v9308_v16  ;;  %5656 = vmatpush.bf16.msra.mxu2 %v9095_v58  ;;  %v10932_v16 = vld [vmem:[#allocation10 + $0x4] sm:$0xf] }
 0x37a   :  { %v3471_v57 = vpop.f32.mrf.mxu1  ;;  %5597 = vmatpush.bf16.msrb.mxu0 %v9883_v12  ;;  %v9047_v22 = vor.u32 %v10932_v16, %v9044_v61 }
 0x37b   :  { %v3472_v27 = vadd.f32 %v3471_v57, %v3443_v55  ;;  %5684 = vmatpush.bf16.msra.mxu3 %v9311_v32  ;;  %v10074_v57 = vld [vmem:[#allocation10 + $0x810] sm:$0xf] }
 0x37c   :  { %5548 = vmatmul.bf16.gmra.mxu2 %v12520_v45  ;;  %v10075_v25 = vor.u32 %v11193_v13, %v10074_v57 }
 0x37d   :  { %v3673_v6 = vmax.f32 %v3472_v27, 0.0  ;;  %5577 = vmatmul.bf16.gmra.mxu3 %v12565_v31  ;;  %v9260_v27 = vld [vmem:[#allocation10 + $0x1c8] sm:$0xf0]  ;;  %5657 = vmatpush.bf16.msra.mxu2 %v9071_v29 }
 0x37e   :  { %v9263_v23 = vor.u32 %v10986_v14, %v9260_v27  ;;  %5626 = vmatpush.bf16.msrb.mxu1 %v10075_v25 }
 0x37f   :  { %v12643_v40 = vpack.c.bf16 %v3673_v6, %v3667_v62  ;;  %v3445_v7 = vpop.f32.mrf.mxu0  ;;  %v3503_v35 = vpop.f32.mrf.mxu2  ;;  %5685 = vmatpush.bf16.msra.mxu3 %v9287_v50  ;;  %v9859_v62 = vor.u32 %v11139_v26, %v9858_v59  ;;  %v11187_v50 = vld [vmem:[#allocation10 + $0x7f4] sm:$0xf0] }
 0x380   :  { %v3504_v44 = vadd.f32 %v3503_v35, %v12625_v34  ;;  %v3532_v0 = vpop.f32.mrf.mxu3  ;;  %v3446_v55 = vadd.f32 %v3445_v7, %v12600_v41  ;;  %v9236_v7 = vld [vmem:[#allocation10 + $0x198] sm:$0xf0]  ;;  %v10051_v54 = vor.u32 %v11187_v50, %v10050_v8 }
 0x381   :  { %5598 = vmatpush.bf16.msrb.mxu0 %v9859_v62  ;;  %v9239_v35 = vor.u32 %v10980_v53, %v9236_v7  ;;  %5658 = vmatpush.bf16.msra.mxu2 %v9047_v22  ;;  %v10026_v62 = vld [vmem:[#allocation10 + $0x7b0] sm:$0xf]  ;;  %v10002_v22 = vld [vmem:[#allocation10 + $0x780] sm:$0xf] }
 0x382   :  { %v3474_v37 = vpop.f32.mrf.mxu1  ;;  %v12646_v36 = vadd.f32 %v3532_v0, %v3504_v44  ;;  %5490 = vmatmul.bf16.gmra.mxu0 %v12384_v43  ;;  %5627 = vmatpush.bf16.msrb.mxu1 %v10051_v54  ;;  %v11070_v54 = vld [vmem:[#allocation10 + $0x454] sm:$0xf] }
 0x383   :  { %v3475_v41 = vadd.f32 %v3474_v37, %v3446_v55  ;;  %5686 = vmatpush.bf16.msra.mxu3 %v9263_v23  ;;  %v11127_v37 = vld [vmem:[#allocation10 + $0x614] sm:$0xf0] }
 0x385   :  { %5519 = vmatmul.bf16.gmra.mxu1 %v12429_v42  ;;  %v3679_v44 = vmax.f32 %v3475_v41, 0.0  ;;  %5599 = vmatpush.bf16.msrb.mxu0 %v9835_v3  ;;  %v13637_v3 = vld [vmem:[#allocation47_spill] sm:$0xff] }
 0x387   :  { %v3447_v6 = vpop.f32.mrf.mxu0  ;;  %v12651_v18 = vpop.f32.mrf.mxu2  ;;  %5687 = vmatpush.bf16.msra.mxu3 %v9239_v35 }
 0x388   :  { %v3448_v32 = vadd.f32 %v3447_v6, %v12605_v49  ;;  %v12654_v1 = vpop.f32.mrf.mxu3  ;;  %v9810_v49 = vld [vmem:[#allocation10 + $0x600] sm:$0xf]  ;;  %v11181_v6 = vld [vmem:[#allocation10 + $0x7c4] sm:$0xf0] }
 0x389   :  { %v9811_v60 = vor.u32 %v11127_v37, %v9810_v49  ;;  %v10027_v16 = vor.u32 %v11181_v6, %v10026_v62 }
 0x38a   :  { %v3476_v51 = vpop.f32.mrf.mxu1 }
 0x38b   :  { %v3477_v47 = vadd.f32 %v3476_v51, %v3448_v32  ;;  %5600 = vmatpush.bf16.msrb.mxu0 %v9811_v60  ;;  %5628 = vmatpush.bf16.msrb.mxu1 %v10027_v16 }
 0x38c   :  { %5553 = vmatmul.bf16.gmra.mxu2 %v12534_v10 }
 0x38d   :  { %v3685_v0 = vmax.f32 %v3477_v47, 0.0  ;;  %5582 = vmatmul.bf16.gmra.mxu3 %v12573_v11 }
 0x38f   :  { %v12658_v58 = vpack.c.bf16 %v3685_v0, %v3679_v44  ;;  %v3450_v20 = vpop.f32.mrf.mxu0  ;;  %v3508_v12 = vpop.f32.mrf.mxu2 }
 0x390   :  { %v3509_v14 = vadd.f32 %v3508_v12, %v12625_v34  ;;  %v3537_v55 = vpop.f32.mrf.mxu3  ;;  %v3451_v13 = vadd.f32 %v3450_v20, %v12610_v33  ;;  %v11166_v20 = vld [vmem:[#allocation10 + $0x754] sm:$0xf]  ;;  %v9980_v12 = vld [vmem:[#allocation10 + $0x768] sm:$0xf0] }
 0x392   :  { %v3479_v28 = vpop.f32.mrf.mxu1  ;;  %v12661_v57 = vadd.f32 %v3537_v55, %v3509_v14  ;;  %5495 = vmatmul.bf16.gmra.mxu0 %v12398_v46  ;;  %v9596_v14 = vld [vmem:[#allocation10 + $0x468] sm:$0xf0]  ;;  %v11214_v55 = vld [vmem:[#allocation10 + $0x8d4] sm:$0xf] }
 0x393   :  { %v3480_v27 = vadd.f32 %v3479_v28, %v3451_v13  ;;  %v9983_v28 = vor.u32 %v11166_v20, %v9980_v12  ;;  %v10172_v13 = vld [vmem:[#allocation10 + $0x8e8] sm:$0xf0]  ;;  %v9764_v20 = vld [vmem:[#allocation10 + $0x5b8] sm:$0xf0]  ;;  %v11154_v12 = vld [vmem:[#allocation10 + $0x6f4] sm:$0xf] }
 0x395   :  { %5524 = vmatmul.bf16.gmra.mxu1 %v12437_v15  ;;  %v3691_v53 = vmax.f32 %v3480_v27, 0.0  ;;  %v9599_v27 = vor.u32 %v11070_v54, %v9596_v14  ;;  %5767 = vmatpush.bf16.msrb.mxu2 %v9983_v28  ;;  %v9932_v54 = vld [vmem:[#allocation10 + $0x708] sm:$0xf0] }
 0x396   :  { %v9935_v14 = vor.u32 %v11154_v12, %v9932_v54  ;;  %v10076_v54 = vld [vmem:[#allocation10 + $0x828] sm:$0xf0] }
 0x397   :  { %v3452_v29 = vpop.f32.mrf.mxu0  ;;  %v12666_v25 = vpop.f32.mrf.mxu2  ;;  %5709 = vmatpush.bf16.msra.mxu0 %v9599_v27 }
 0x398   :  { %v3453_v59 = vadd.f32 %v3452_v29, %v12615_v30  ;;  %v12669_v23 = vpop.f32.mrf.mxu3  ;;  %v11175_v30 = vld [vmem:[#allocation10 + $0x794] sm:$0xf0] }
 0x399   :  { %v10003_v38 = vor.u32 %v11175_v30, %v10002_v22 }
 0x39a   :  { %v3481_v26 = vpop.f32.mrf.mxu1 }
 0x39b   :  { %v3482_v61 = vadd.f32 %v3481_v26, %v3453_v59  ;;  %5629 = vmatpush.bf16.msrb.mxu1 %v10003_v38  ;;  %v10175_v59 = vor.u32 %v11214_v55, %v10172_v13  ;;  %v9788_v26 = vld [vmem:[#allocation10 + $0x5e8] sm:$0xf0]  ;;  %v11202_v55 = vld [vmem:[#allocation10 + $0x874] sm:$0xf] }
 0x39c   :  { %5558 = vmatmul.bf16.gmra.mxu2 %v12548_v21  ;;  %v10124_v13 = vld [vmem:[#allocation10 + $0x888] sm:$0xf0] }
 0x39d   :  { %v3697_v41 = vmax.f32 %v3482_v61, 0.0  ;;  %5587 = vmatmul.bf16.gmra.mxu3 %v12586_v24 }
 0x39e   :  { %5796 = vmatpush.bf16.msrb.mxu3 %v10175_v59 }
 0x39f   :  { %v12673_v33 = vpack.c.bf16 %v3697_v41, %v3691_v53  ;;  %v3455_v32 = vpop.f32.mrf.mxu0  ;;  %v3513_v51 = vpop.f32.mrf.mxu2  ;;  %v11160_v41 = vld [vmem:[#allocation10 + $0x724] sm:$0xf] }
 0x3a0   :  { %v3514_v35 = vadd.f32 %v3513_v51, %v12625_v34  ;;  %v3542_v2 = vpop.f32.mrf.mxu3  ;;  %v3456_v44 = vadd.f32 %v3455_v32, %v12620_v56  ;;  %v11118_v56 = vld [vmem:[#allocation10 + $0x5d4] sm:$0xf]  ;;  %v9956_v32 = vld [vmem:[#allocation10 + $0x738] sm:$0xf0]  ;;  %v11208_v51 = vld [vmem:[#allocation10 + $0x8a4] sm:$0xf] }
 0x3a1   :  { %v9791_v62 = vor.u32 %v11118_v56, %v9788_v26  ;;  %v11148_v56 = vld [vmem:[#allocation10 + $0x6c4] sm:$0xf]  ;;  %v9908_v26 = vld [vmem:[#allocation10 + $0x6d8] sm:$0xf0] }
 0x3a2   :  { %v3484_v7 = vpop.f32.mrf.mxu1  ;;  %v12676_v47 = vadd.f32 %v3542_v2, %v3514_v35  ;;  %5500 = vmatmul.bf16.gmra.mxu0 %v12412_v17  ;;  %v9959_v35 = vor.u32 %v11160_v41, %v9956_v32  ;;  %v10148_v2 = vld [vmem:[#allocation10 + $0x8b8] sm:$0xf0]  ;;  %v11058_v32 = vld [vmem:[#allocation10 + $0x3f4] sm:$0xf] }
 0x3a3   :  { %v3485_v37 = vadd.f32 %v3484_v7, %v3456_v44  ;;  %5738 = vmatpush.bf16.msra.mxu1 %v9791_v62  ;;  %v10151_v38 = vor.u32 %v11208_v51, %v10148_v2  ;;  %v3501_v44 = vadd.f32 %v12636_v4, %v12625_v34  ;;  %v11196_v62 = vld [vmem:[#allocation10 + $0x844] sm:$0xf]  ;;  %v9548_v51 = vld [vmem:[#allocation10 + $0x408] sm:$0xf0] }
 0x3a4   :  { %5768 = vmatpush.bf16.msrb.mxu2 %v9959_v35  ;;  %v11106_v35 = vld [vmem:[#allocation10 + $0x574] sm:$0xf]  ;;  %v9740_v2 = vld [vmem:[#allocation10 + $0x588] sm:$0xf0] }
 0x3a5   :  { %5529 = vmatmul.bf16.gmra.mxu1 %v13637_v3  ;;  %v3703_v6 = vmax.f32 %v3485_v37, 0.0  ;;  %v9572_v37 = vld [vmem:[#allocation10 + $0x438] sm:$0xf0]  ;;  %5797 = vmatpush.bf16.msrb.mxu3 %v10151_v38  ;;  %v3530_v4 = vadd.f32 %v12639_v9, %v3501_v44  ;;  %v9743_v44 = vor.u32 %v11106_v35, %v9740_v2  ;;  %v11100_v35 = vld [vmem:[#allocation10 + $0x544] sm:$0xf] }
 0x3a6   :  { %v10100_v38 = vld [vmem:[#allocation10 + $0x858] sm:$0xf0] }
 0x3a7   :  { %v3457_v0 = vpop.f32.mrf.mxu0  ;;  %v12681_v49 = vpop.f32.mrf.mxu2  ;;  %v9716_v2 = vld [vmem:[#allocation10 + $0x558] sm:$0xf0] }
 0x3a8   :  { %v3458_v8 = vadd.f32 %v3457_v0, %v12628_v39  ;;  %v12684_v60 = vpop.f32.mrf.mxu3  ;;  %v11064_v0 = vld [vmem:[#allocation10 + $0x424] sm:$0xf]  ;;  %5769 = vmatpush.bf16.msrb.mxu2 %v9935_v14 }
 0x3aa   :  { %v3486_v50 = vpop.f32.mrf.mxu1 }
 0x3ab   :  { %v3487_v29 = vadd.f32 %v3486_v50, %v3458_v8  ;;  %v11112_v8 = vld [vmem:[#allocation10 + $0x5a4] sm:$0xf]  ;;  %v9575_v50 = vor.u32 %v11064_v0, %v9572_v37  ;;  %v10103_v0 = vor.u32 %v11196_v62, %v10100_v38  ;;  %v11142_v37 = vld [vmem:[#allocation10 + $0x694] sm:$0xf] }
 0x3ac   :  { %5659 = vmatmul.bf16.vlgmr.msra.gmra.mxu2 %v12370_v48  ;;  %v9767_v28 = vor.u32 %v11112_v8, %v9764_v20  ;;  %v9884_v8 = vld [vmem:[#allocation10 + $0x6a8] sm:$0xf0] }
 0x3ad   :  { %v3709_v16 = vmax.f32 %v3487_v29, 0.0  ;;  %5688 = vmatmul.bf16.vlgmr.msra.gmra.mxu3 %v12421_v63  ;;  %5710 = vmatpush.bf16.msra.mxu0 %v9575_v50  ;;  %v10127_v29 = vor.u32 %v11202_v55, %v10124_v13  ;;  %v11190_v50 = vld [vmem:[#allocation10 + $0x814] sm:$0xf]  ;;  %v9887_v12 = vor.u32 %v11142_v37, %v9884_v8 }
 0x3ae   :  { %5739 = vmatpush.bf16.msra.mxu1 %v9767_v28  ;;  %v9524_v28 = vld [vmem:[#allocation10 + $0x3d8] sm:$0xf0]  ;;  %v10079_v13 = vor.u32 %v11190_v50, %v10076_v54  ;;  %v11178_v37 = vld [vmem:[#allocation10 + $0x7b4] sm:$0xf]  ;;  %v10028_v50 = vld [vmem:[#allocation10 + $0x7c8] sm:$0xf0] }
 0x3af   :  { %v12688_v39 = vpack.c.bf16 %v3709_v16, %v3703_v6  ;;  %v3556_v61 = vpop.f32.mrf.mxu0  ;;  %v3614_v53 = vpop.f32.mrf.mxu2  ;;  %5798 = vmatpush.bf16.msrb.mxu3 %v10127_v29  ;;  %v10031_v54 = vor.u32 %v11178_v37, %v10028_v50 }
 0x3b0   :  { %v3557_v22 = vadd.f32 %v3556_v61, %v12631_v19  ;;  %v3643_v7 = vpop.f32.mrf.mxu3 }
 0x3b2   :  { %v3585_v30 = vpop.f32.mrf.mxu1  ;;  %5601 = vmatmul.bf16.vlgmr.msrb.gmra.mxu0 %v12643_v40  ;;  %5740 = vmatpush.bf16.msra.mxu1 %v9743_v44  ;;  %v11130_v44 = vld [vmem:[#allocation10 + $0x634] sm:$0xf] }
 0x3b3   :  { %v3586_v19 = vadd.f32 %v3585_v30, %v3557_v22  ;;  %v9911_v22 = vor.u32 %v11148_v56, %v9908_v26  ;;  %v9551_v30 = vor.u32 %v11058_v32, %v9548_v51  ;;  %5799 = vmatpush.bf16.msrb.mxu3 %v10103_v0  ;;  %v9860_v56 = vld [vmem:[#allocation10 + $0x678] sm:$0xf0]  ;;  %v11046_v51 = vld [vmem:[#allocation10 + $0x394] sm:$0xf]  ;;  %v9836_v0 = vld [vmem:[#allocation10 + $0x648] sm:$0xf0] }
 0x3b4   :  { %v10052_v32 = vld [vmem:[#allocation10 + $0x7f8] sm:$0xf0] }
 0x3b5   :  { %v3615_v6 = vadd.f32 %v3614_v53, %v3586_v19  ;;  %5770 = vmatpush.bf16.msrb.mxu2 %v9911_v22  ;;  %5711 = vmatpush.bf16.msra.mxu0 %v9551_v30  ;;  %v11052_v19 = vld [vmem:[#allocation10 + $0x3c4] sm:$0xf]  ;;  %v9500_v22 = vld [vmem:[#allocation10 + $0x3a8] sm:$0xf0] }
 0x3b6   :  { %v9527_v55 = vor.u32 %v11052_v19, %v9524_v28 }
 0x3b7   :  { %v3558_v27 = vpop.f32.mrf.mxu0  ;;  %v3616_v59 = vpop.f32.mrf.mxu2  ;;  %v3644_v20 = vadd.f32 %v3643_v7, %v3615_v6  ;;  %v11184_v7 = vld [vmem:[#allocation10 + $0x7e4] sm:$0xf]  ;;  %5800 = vmatpush.bf16.msrb.mxu3 %v10079_v13  ;;  %v9812_v13 = vld [vmem:[#allocation10 + $0x618] sm:$0xf0] }
 0x3b8   :  { %v3559_v16 = vadd.f32 %v3558_v27, %v3530_v4  ;;  %v3645_v41 = vpop.f32.mrf.mxu3  ;;  %v11136_v27 = vld [vmem:[#allocation10 + $0x664] sm:$0xf]  ;;  %v10055_v38 = vor.u32 %v11184_v7, %v10052_v32  ;;  %v10004_v32 = vld [vmem:[#allocation10 + $0x798] sm:$0xf0] }
 0x3b9   :  { %5771 = vmatpush.bf16.msrb.mxu2 %v9887_v12  ;;  %5712 = vmatpush.bf16.msra.mxu0 %v9527_v55  ;;  %v11124_v55 = vld [vmem:[#allocation10 + $0x604] sm:$0xf] }
 0x3ba   :  { %v3587_v61 = vpop.f32.mrf.mxu1 }
 0x3bb   :  { %v3588_v9 = vadd.f32 %v3587_v61, %v3559_v16  ;;  %v9863_v61 = vor.u32 %v11136_v27, %v9860_v56  ;;  %5801 = vmatpush.bf16.msrb.mxu3 %v10055_v38 }
 0x3bc   :  { %5664 = vmatmul.bf16.gmra.mxu2 %v12384_v43 }
 0x3bd   :  { %v3617_v53 = vadd.f32 %v3616_v59, %v3588_v9  ;;  %5693 = vmatmul.bf16.gmra.mxu3 %v12429_v42  ;;  %v3668_v59 = vmax.f32 %v3644_v20, 0.0  ;;  %v9503_v9 = vor.u32 %v11046_v51, %v9500_v22  ;;  %5772 = vmatpush.bf16.msrb.mxu2 %v9863_v61  ;;  %v11040_v20 = vld [vmem:[#allocation10 + $0x364] sm:$0xf] }
 0x3bf   :  { %v3646_v14 = vadd.f32 %v3645_v41, %v3617_v53  ;;  %v3561_v29 = vpop.f32.mrf.mxu0  ;;  %v3619_v4 = vpop.f32.mrf.mxu2  ;;  %v3506_v41 = vadd.f32 %v12651_v18, %v12625_v34  ;;  %5713 = vmatpush.bf16.msra.mxu0 %v9503_v9  ;;  %v9839_v18 = vor.u32 %v11130_v44, %v9836_v0  ;;  %v9476_v53 = vld [vmem:[#allocation10 + $0x378] sm:$0xf0]  ;;  %5802 = vmatpush.bf16.msrb.mxu3 %v10031_v54  ;;  %v11088_v54 = vld [vmem:[#allocation10 + $0x4e4] sm:$0xf] }
 0x3c0   :  { %v3562_v62 = vadd.f32 %v3561_v29, %v12646_v36  ;;  %v3648_v16 = vpop.f32.mrf.mxu3  ;;  %v9719_v36 = vor.u32 %v11100_v35, %v9716_v2  ;;  %v9479_v19 = vor.u32 %v11040_v20, %v9476_v53  ;;  %v11172_v29 = vld [vmem:[#allocation10 + $0x784] sm:$0xf]  ;;  %v9428_v9 = vld [vmem:[#allocation10 + $0x318] sm:$0xf0] }
 0x3c1   :  { %v3674_v26 = vmax.f32 %v3646_v14, 0.0  ;;  %v3535_v12 = vadd.f32 %v12654_v1, %v3506_v41  ;;  %5773 = vmatpush.bf16.msrb.mxu2 %v9839_v18  ;;  %v11034_v1 = vld [vmem:[#allocation10 + $0x334] sm:$0xf]  ;;  %v9452_v41 = vld [vmem:[#allocation10 + $0x348] sm:$0xf0]  ;;  %v10007_v22 = vor.u32 %v11172_v29, %v10004_v32 }
 0x3c2   :  { %v3590_v6 = vpop.f32.mrf.mxu1  ;;  %5606 = vmatmul.bf16.gmra.mxu0 %v12658_v58  ;;  %5741 = vmatpush.bf16.msra.mxu1 %v9719_v36  ;;  %v9455_v35 = vor.u32 %v11034_v1, %v9452_v41  ;;  %v11076_v1 = vld [vmem:[#allocation10 + $0x484] sm:$0xf] }
 0x3c3   :  { %v12700_v30 = vpack.c.bf16 %v3674_v26, %v3668_v59  ;;  %v3591_v8 = vadd.f32 %v3590_v6, %v3562_v62  ;;  %v11094_v26 = vld [vmem:[#allocation10 + $0x514] sm:$0xf]  ;;  %v9692_v62 = vld [vmem:[#allocation10 + $0x528] sm:$0xf0]  ;;  %5714 = vmatpush.bf16.msra.mxu0 %v9479_v19  ;;  %v9815_v6 = vor.u32 %v11124_v55, %v9812_v13  ;;  %5803 = vmatpush.bf16.msrb.mxu3 %v10007_v22  ;;  %v9668_v19 = vld [vmem:[#allocation10 + $0x4f8] sm:$0xf0] }
 0x3c4   :  { %v9695_v61 = vor.u32 %v11094_v26, %v9692_v62  ;;  %v9644_v13 = vld [vmem:[#allocation10 + $0x4c8] sm:$0xf0] }
 0x3c5   :  { %5630 = vmatmul.bf16.vlgmr.msrb.gmra.mxu1 %v12700_v30  ;;  %v3620_v27 = vadd.f32 %v3619_v4, %v3591_v8  ;;  %5774 = vmatpush.bf16.msrb.mxu2 %v9815_v6  ;;  %v11028_v4 = vld [vmem:[#allocation10 + $0x304] sm:$0xf] }
 0x3c6   :  { %5742 = vmatpush.bf16.msra.mxu1 %v9695_v61  ;;  %v9431_v44 = vor.u32 %v11028_v4, %v9428_v9 }
 0x3c7   :  { %v3563_v28 = vpop.f32.mrf.mxu0  ;;  %v3621_v14 = vpop.f32.mrf.mxu2  ;;  %v3649_v2 = vadd.f32 %v3648_v16, %v3620_v27  ;;  %5715 = vmatpush.bf16.msra.mxu0 %v9455_v35  ;;  %v3511_v16 = vadd.f32 %v12666_v25, %v12625_v34 }
 0x3c8   :  { %v3564_v56 = vadd.f32 %v3563_v28, %v3535_v12  ;;  %v3650_v59 = vpop.f32.mrf.mxu3  ;;  %v9671_v28 = vor.u32 %v11088_v54, %v9668_v19  ;;  %v10978_v54 = vld [vmem:[#allocation10 + $0x16c] sm:$0xf0]  ;;  %v9794_v19 = vld [vmem:[#allocation10 + $0x5d8] sm:$0xf] }
 0x3c9   :  { %v3680_v8 = vmax.f32 %v3649_v2, 0.0  ;;  %v3540_v55 = vadd.f32 %v12669_v23, %v3511_v16  ;;  %v9620_v23 = vld [vmem:[#allocation10 + $0x498] sm:$0xf0] }
 0x3ca   :  { %v3592_v7 = vpop.f32.mrf.mxu1  ;;  %5743 = vmatpush.bf16.msra.mxu1 %v9671_v28  ;;  %v9623_v22 = vor.u32 %v11076_v1, %v9620_v23  ;;  %v11122_v28 = vld [vmem:[#allocation10 + $0x5ec] sm:$0xf0] }
 0x3cb   :  { %v3593_v51 = vadd.f32 %v3592_v7, %v3564_v56  ;;  %5716 = vmatpush.bf16.msra.mxu0 %v9431_v44 }
 0x3cc   :  { %5669 = vmatmul.bf16.gmra.mxu2 %v12398_v46 }
 0x3cd   :  { %v3622_v38 = vadd.f32 %v3621_v14, %v3593_v51  ;;  %5698 = vmatmul.bf16.gmra.mxu3 %v12437_v15 }
 0x3cf   :  { %v3651_v36 = vadd.f32 %v3650_v59, %v3622_v38  ;;  %v3566_v0 = vpop.f32.mrf.mxu0  ;;  %v3624_v37 = vpop.f32.mrf.mxu2 }
 0x3d0   :  { %v3567_v50 = vadd.f32 %v3566_v0, %v12661_v57  ;;  %v3653_v53 = vpop.f32.mrf.mxu3  ;;  %v11082_v57 = vld [vmem:[#allocation10 + $0x4b4] sm:$0xf] }
 0x3d1   :  { %v3686_v18 = vmax.f32 %v3651_v36, 0.0  ;;  %v9647_v56 = vor.u32 %v11082_v57, %v9644_v13  ;;  %v3516_v36 = vadd.f32 %v12681_v49, %v12625_v34  ;;  %v9795_v57 = vor.u32 %v11122_v28, %v9794_v19  ;;  %v9410_v13 = vld [vmem:[#allocation10 + $0x2d8] sm:$0xf]  ;;  %v11110_v28 = vld [vmem:[#allocation10 + $0x58c] sm:$0xf0] }
 0x3d2   :  { %v3595_v20 = vpop.f32.mrf.mxu1  ;;  %5611 = vmatmul.bf16.gmra.mxu0 %v12673_v33 }
 0x3d3   :  { %v12710_v12 = vpack.c.bf16 %v3686_v18, %v3680_v8  ;;  %v3596_v14 = vadd.f32 %v3595_v20, %v3567_v50  ;;  %5744 = vmatpush.bf16.msra.mxu1 %v9647_v56  ;;  %v3545_v8 = vadd.f32 %v12684_v60, %v3516_v36  ;;  %v9602_v18 = vld [vmem:[#allocation10 + $0x458] sm:$0xf]  ;;  %v11074_v50 = vld [vmem:[#allocation10 + $0x46c] sm:$0xf0]  ;;  %v12725_v56 = vld [vmem:[#allocation11] sm:$0x3f]  ;;  %5912 = vmatpush.bf16.msra.mxu3 %v9795_v57 }
 0x3d4   :  { %v9218_v20 = vld [vmem:[#allocation10 + $0x158] sm:$0xf]  ;;  %v9603_v16 = vor.u32 %v11074_v50, %v9602_v18 }
 0x3d5   :  { %5635 = vmatmul.bf16.gmra.mxu1 %v12710_v12  ;;  %v3625_v7 = vadd.f32 %v3624_v37, %v3596_v14  ;;  %v9362_v57 = vld [vmem:[#allocation10 + $0x278] sm:$0xf] }
 0x3d6   :  { %5883 = vmatpush.bf16.msra.mxu2 %v9603_v16  ;;  %v9746_v16 = vld [vmem:[#allocation10 + $0x578] sm:$0xf] }
 0x3d7   :  { %v3568_v29 = vpop.f32.mrf.mxu0  ;;  %v3626_v27 = vpop.f32.mrf.mxu2  ;;  %v3654_v6 = vadd.f32 %v3653_v53, %v3625_v7  ;;  %5745 = vmatpush.bf16.msra.mxu1 %v9623_v22  ;;  %v9770_v22 = vld [vmem:[#allocation10 + $0x5a8] sm:$0xf] }
 0x3d8   :  { %v3569_v25 = vadd.f32 %v3568_v29, %v3540_v55  ;;  %v3655_v26 = vpop.f32.mrf.mxu3  ;;  %v9219_v55 = vor.u32 %v10978_v54, %v9218_v20  ;;  %v11026_v29 = vld [vmem:[#allocation10 + $0x2ec] sm:$0xf0] }
 0x3d9   :  { %v3692_v35 = vmax.f32 %v3654_v6, 0.0  ;;  %v9411_v60 = vor.u32 %v11026_v29, %v9410_v13  ;;  %v9578_v6 = vld [vmem:[#allocation10 + $0x428] sm:$0xf] }
 0x3da   :  { %v3597_v59 = vpop.f32.mrf.mxu1  ;;  %5825 = vmatpush.bf16.msrb.mxu0 %v9219_v55  ;;  %v10966_v55 = vld [vmem:[#allocation10 + $0x10c] sm:$0xf0] }
 0x3db   :  { %v3598_v62 = vadd.f32 %v3597_v59, %v3569_v25  ;;  %5854 = vmatpush.bf16.msrb.mxu1 %v9411_v60  ;;  %v12729_v59 = vperm.slane %v12725_v56, 0  ;;  %v11014_v60 = vld [vmem:[#allocation10 + $0x28c] sm:$0xf0] }
 0x3dc   :  { %5674 = vmatmul.bf16.gmra.mxu2 %v12412_v17 }
 0x3dd   :  { %v3627_v61 = vadd.f32 %v3626_v27, %v3598_v62  ;;  %5703 = vmatmul.bf16.gmra.mxu3 %v13637_v3 }
 0x3df   :  { %v3656_v32 = vadd.f32 %v3655_v26, %v3627_v61  ;;  %v3571_v41 = vpop.f32.mrf.mxu0  ;;  %v3629_v51 = vpop.f32.mrf.mxu2  ;;  %v11068_v61 = vld [vmem:[#allocation10 + $0x43c] sm:$0xf0] }
 0x3e0   :  { %v3572_v38 = vadd.f32 %v3571_v41, %v12676_v47  ;;  %v3658_v9 = vpop.f32.mrf.mxu3  ;;  %v9579_v41 = vor.u32 %v11068_v61, %v9578_v6  ;;  %v9363_v61 = vor.u32 %v11014_v60, %v9362_v57  ;;  %v9122_v60 = vld [vmem:[#allocation10 + $0x98] sm:$0xf] }
 0x3e1   :  { %v3698_v2 = vmax.f32 %v3656_v32, 0.0  ;;  %v9194_v32 = vld [vmem:[#allocation10 + $0x128] sm:$0xf] }
 0x3e2   :  { %v3600_v4 = vpop.f32.mrf.mxu1  ;;  %5616 = vmatmul.bf16.gmra.mxu0 %v12688_v39  ;;  %5884 = vmatpush.bf16.msra.mxu2 %v9579_v41 }
 0x3e3   :  { %v12720_v44 = vpack.c.bf16 %v3698_v2, %v3692_v35  ;;  %v3601_v0 = vadd.f32 %v3600_v4, %v3572_v38  ;;  %v11116_v35 = vld [vmem:[#allocation10 + $0x5bc] sm:$0xf0] }
 0x3e5   :  { %13638 = vst [vmem:[#allocation33_spill] sm:$0xff] %v12720_v44  ;;  %5640 = vmatmul.bf16.gmra.mxu1 %v12720_v44  ;;  %v3630_v37 = vadd.f32 %v3629_v51, %v3601_v0  ;;  %v10972_v51 = vld [vmem:[#allocation10 + $0x13c] sm:$0xf0]  ;;  %v9771_v0 = vor.u32 %v11116_v35, %v9770_v22  ;;  %v9506_v22 = vld [vmem:[#allocation10 + $0x398] sm:$0xf] }
 0x3e6   :  { %v9195_v36 = vor.u32 %v10972_v51, %v9194_v32  ;;  %v11050_v35 = vld [vmem:[#allocation10 + $0x3ac] sm:$0xf0] }
 0x3e7   :  { %v3573_v47 = vpop.f32.mrf.mxu0  ;;  %v3631_v53 = vpop.f32.mrf.mxu2  ;;  %v3659_v27 = vadd.f32 %v3658_v9, %v3630_v37  ;;  %v9386_v37 = vld [vmem:[#allocation10 + $0x2a8] sm:$0xf]  ;;  %5913 = vmatpush.bf16.msra.mxu3 %v9771_v0  ;;  %v10960_v0 = vld [vmem:[#allocation10 + $0xdc] sm:$0xf0] }
 0x3e8   :  { %v3574_v34 = vadd.f32 %v3573_v47, %v3545_v8  ;;  %v3660_v14 = vpop.f32.mrf.mxu3  ;;  %v11020_v8 = vld [vmem:[#allocation10 + $0x2bc] sm:$0xf0]  ;;  %5826 = vmatpush.bf16.msrb.mxu0 %v9195_v36  ;;  %v9554_v47 = vld [vmem:[#allocation10 + $0x3f8] sm:$0xf]  ;;  %v9146_v36 = vld [vmem:[#allocation10 + $0xc8] sm:$0xf] }
 0x3e9   :  { %v3704_v26 = vmax.f32 %v3659_v27, 0.0  ;;  %v9387_v18 = vor.u32 %v11020_v8, %v9386_v37 }
 0x3ea   :  { %v3602_v49 = vpop.f32.mrf.mxu1 }
 0x3eb   :  { %v3603_v7 = vadd.f32 %v3602_v49, %v3574_v34  ;;  %5855 = vmatpush.bf16.msrb.mxu1 %v9387_v18  ;;  %v9747_v34 = vor.u32 %v11110_v28, %v9746_v16  ;;  %v9147_v18 = vor.u32 %v10960_v0, %v9146_v36  ;;  %v11044_v28 = vld [vmem:[#allocation10 + $0x37c] sm:$0xf0] }
 0x3ec   :  { %5775 = vmatmul.bf16.vlgmr.msrb.gmra.mxu2 %v12643_v40 }
 0x3ed   :  { %v3632_v25 = vadd.f32 %v3631_v53, %v3603_v7  ;;  %5804 = vmatmul.bf16.vlgmr.msrb.gmra.mxu3 %v12700_v30  ;;  %v11062_v53 = vld [vmem:[#allocation10 + $0x40c] sm:$0xf0]  ;;  %v9530_v7 = vld [vmem:[#allocation10 + $0x3c8] sm:$0xf] }
 0x3ee   :  { %v9555_v19 = vor.u32 %v11062_v53, %v9554_v47  ;;  %5914 = vmatpush.bf16.msra.mxu3 %v9747_v34  ;;  %v11008_v47 = vld [vmem:[#allocation10 + $0x25c] sm:$0xf0]  ;;  %v9674_v34 = vld [vmem:[#allocation10 + $0x4e8] sm:$0xf] }
 0x3ef   :  { %v3661_v62 = vadd.f32 %v3660_v14, %v3632_v25  ;;  %v5486_v1 = vpop.f32.mrf.mxu0  ;;  %v5544_v23 = vpop.f32.mrf.mxu2  ;;  %v9170_v14 = vld [vmem:[#allocation10 + $0xf8] sm:$0xf]  ;;  %v11056_v25 = vld [vmem:[#allocation10 + $0x3dc] sm:$0xf0]  ;;  %5856 = vmatpush.bf16.msrb.mxu1 %v9363_v61 }
 0x3f0   :  { %v5487_v38 = vadd.f32 %v5486_v1, %v12729_v59  ;;  %v5573_v9 = vpop.f32.mrf.mxu3  ;;  %5885 = vmatpush.bf16.msra.mxu2 %v9555_v19  ;;  %v9171_v27 = vor.u32 %v10966_v55, %v9170_v14  ;;  %v9531_v32 = vor.u32 %v11056_v25, %v9530_v7  ;;  %v9722_v1 = vld [vmem:[#allocation10 + $0x548] sm:$0xf]  ;;  %v10954_v7 = vld [vmem:[#allocation10 + $0xac] sm:$0xf0]  ;;  %v9650_v61 = vld [vmem:[#allocation10 + $0x4b8] sm:$0xf] }
 0x3f1   :  { %v3710_v2 = vmax.f32 %v3661_v62, 0.0  ;;  %v9482_v19 = vld [vmem:[#allocation10 + $0x368] sm:$0xf] }
 0x3f2   :  { %v5515_v4 = vpop.f32.mrf.mxu1  ;;  %5717 = vmatmul.bf16.vlgmr.msra.gmra.mxu0 %v12506_v52 }
 0x3f3   :  { %v12733_v50 = vpack.c.bf16 %v3710_v2, %v3704_v26  ;;  %v5516_v20 = vadd.f32 %v5515_v4, %v5487_v38  ;;  %5827 = vmatpush.bf16.msrb.mxu0 %v9171_v27  ;;  %v9698_v2 = vld [vmem:[#allocation10 + $0x518] sm:$0xf]  ;;  %v9507_v4 = vor.u32 %v11050_v35, %v9506_v22  ;;  %v10948_v22 = vld [vmem:[#allocation10 + $0x7c] sm:$0xf0] }
 0x3f4   :  { %5886 = vmatpush.bf16.msra.mxu2 %v9531_v32 }
 0x3f5   :  { %13639 = vst [vmem:[#allocation32_spill] sm:$0xff] %v12733_v50  ;;  %v5545_v54 = vadd.f32 %v5544_v23, %v5516_v20  ;;  %5645 = vmatmul.bf16.gmra.mxu1 %v12733_v50  ;;  %v11104_v23 = vld [vmem:[#allocation10 + $0x55c] sm:$0xf0]  ;;  %v9338_v20 = vld [vmem:[#allocation10 + $0x248] sm:$0xf] }
 0x3f6   :  { %v9723_v41 = vor.u32 %v11104_v23, %v9722_v1  ;;  %v11086_v23 = vld [vmem:[#allocation10 + $0x4cc] sm:$0xf0] }
 0x3f7   :  { %v12737_v49 = vadd.f32 %v5573_v9, %v5545_v54  ;;  %v5488_v13 = vpop.f32.mrf.mxu0  ;;  %v5546_v29 = vpop.f32.mrf.mxu2  ;;  %v11098_v9 = vld [vmem:[#allocation10 + $0x52c] sm:$0xf0]  ;;  %v9339_v54 = vor.u32 %v11008_v47, %v9338_v20  ;;  %5828 = vmatpush.bf16.msrb.mxu0 %v9147_v18  ;;  %v11032_v18 = vld [vmem:[#allocation10 + $0x31c] sm:$0xf0]  ;;  %v9626_v20 = vld [vmem:[#allocation10 + $0x488] sm:$0xf] }
 0x3f8   :  { %v5489_v26 = vadd.f32 %v5488_v13, %v12729_v59  ;;  %v5575_v6 = vpop.f32.mrf.mxu3  ;;  %5915 = vmatpush.bf16.msra.mxu3 %v9723_v41  ;;  %v9699_v37 = vor.u32 %v11098_v9, %v9698_v2  ;;  %5887 = vmatpush.bf16.msra.mxu2 %v9507_v4  ;;  %v9483_v13 = vor.u32 %v11044_v28, %v9482_v19  ;;  %v9314_v2 = vld [vmem:[#allocation10 + $0x218] sm:$0xf]  ;;  %v11080_v19 = vld [vmem:[#allocation10 + $0x49c] sm:$0xf0] }
 0x3f9   :  { %5857 = vmatpush.bf16.msrb.mxu1 %v9339_v54  ;;  %v9651_v41 = vor.u32 %v11086_v23, %v9650_v61  ;;  %v9627_v28 = vor.u32 %v11080_v19, %v9626_v20 }
 0x3fa   :  { %v5517_v62 = vpop.f32.mrf.mxu1 }
 0x3fb   :  { %v5518_v51 = vadd.f32 %v5517_v62, %v5489_v26  ;;  %v9123_v26 = vor.u32 %v10954_v7, %v9122_v60  ;;  %v9458_v62 = vld [vmem:[#allocation10 + $0x338] sm:$0xf]  ;;  %v9290_v7 = vld [vmem:[#allocation10 + $0x1e8] sm:$0xf] }
 0x3fc   :  { %5780 = vmatmul.bf16.gmra.mxu2 %v12658_v58  ;;  %5916 = vmatpush.bf16.msra.mxu3 %v9699_v37  ;;  %v9434_v37 = vld [vmem:[#allocation10 + $0x308] sm:$0xf] }
 0x3fd   :  { %v5547_v38 = vadd.f32 %v5546_v29, %v5518_v51  ;;  %5809 = vmatmul.bf16.gmra.mxu3 %v12710_v12  ;;  %v11092_v29 = vld [vmem:[#allocation10 + $0x4fc] sm:$0xf0]  ;;  %5888 = vmatpush.bf16.msra.mxu2 %v9483_v13  ;;  %v9098_v51 = vld [vmem:[#allocation10 + $0x68] sm:$0xf]  ;;  %v9435_v54 = vor.u32 %v11032_v18, %v9434_v37 }
 0x3fe   :  { %v9675_v27 = vor.u32 %v11092_v29, %v9674_v34  ;;  %5829 = vmatpush.bf16.msrb.mxu0 %v9123_v26  ;;  %v9099_v4 = vor.u32 %v10948_v22, %v9098_v51  ;;  %v9074_v34 = vld [vmem:[#allocation10 + $0x38] sm:$0xf]  ;;  %v9050_v29 = vld [vmem:[#allocation10 + $0x8] sm:$0xf] }
 0x3ff   :  { %v12742_v8 = vadd.f32 %v5575_v6, %v5547_v38  ;;  %v5491_v53 = vpop.f32.mrf.mxu0  ;;  %v5549_v16 = vpop.f32.mrf.mxu2  ;;  %v11038_v6 = vld [vmem:[#allocation10 + $0x34c] sm:$0xf0]  ;;  %v9266_v22 = vld [vmem:[#allocation10 + $0x1b8] sm:$0xf] }
 0x400   :  { %v5492_v14 = vadd.f32 %v5491_v53, %v12729_v59  ;;  %v5578_v57 = vpop.f32.mrf.mxu3  ;;  %5917 = vmatpush.bf16.msra.mxu3 %v9675_v27  ;;  %v9459_v1 = vor.u32 %v11038_v6, %v9458_v62  ;;  %v11002_v38 = vld [vmem:[#allocation10 + $0x22c] sm:$0xf0]  ;;  %v10936_v27 = vld [vmem:[#allocation10 + $0x1c] sm:$0xf0] }
 0x401   :  { %v9315_v0 = vor.u32 %v11002_v38, %v9314_v2  ;;  %v9051_v26 = vor.u32 %v10936_v27, %v9050_v29  ;;  %v10990_v2 = vld [vmem:[#allocation10 + $0x1cc] sm:$0xf0]  ;;  %v10975_v29 = vld [vmem:[#allocation10 + $0x15c] sm:$0xf]  ;;  %v9220_v27 = vld [vmem:[#allocation10 + $0x170] sm:$0xf0] }
 0x402   :  { %v5520_v55 = vpop.f32.mrf.mxu1  ;;  %5722 = vmatmul.bf16.gmra.mxu0 %v12520_v45  ;;  %5889 = vmatpush.bf16.msra.mxu2 %v9459_v1  ;;  %v9267_v38 = vor.u32 %v10990_v2, %v9266_v22 }
 0x403   :  { %v5521_v25 = vadd.f32 %v5520_v55, %v5492_v14  ;;  %5830 = vmatpush.bf16.msrb.mxu0 %v9099_v4  ;;  %5858 = vmatpush.bf16.msrb.mxu1 %v9315_v0  ;;  %v10942_v14 = vld [vmem:[#allocation10 + $0x4c] sm:$0xf0] }
 0x404   :  { %5918 = vmatpush.bf16.msra.mxu3 %v9651_v41 }
 0x405   :  { %v5550_v32 = vadd.f32 %v5549_v16, %v5521_v25  ;;  %5746 = vmatmul.bf16.vlgmr.msra.gmra.mxu1 %v12557_v5  ;;  %v10996_v25 = vld [vmem:[#allocation10 + $0x1fc] sm:$0xf0] }
 0x406   :  { %5890 = vmatpush.bf16.msra.mxu2 %v9435_v54  ;;  %v9291_v61 = vor.u32 %v10996_v25, %v9290_v7  ;;  %v9223_v7 = vor.u32 %v10975_v29, %v9220_v27 }
 0x407   :  { %v12747_v35 = vadd.f32 %v5578_v57, %v5550_v32  ;;  %v5493_v9 = vpop.f32.mrf.mxu0  ;;  %v5551_v36 = vpop.f32.mrf.mxu2  ;;  %v9075_v57 = vor.u32 %v10942_v14, %v9074_v34 }
 0x408   :  { %v5494_v47 = vadd.f32 %v5493_v9, %v12729_v59  ;;  %v5580_v16 = vpop.f32.mrf.mxu3  ;;  %5919 = vmatpush.bf16.msra.mxu3 %v9627_v28  ;;  %5859 = vmatpush.bf16.msrb.mxu1 %v9291_v61 }
 0x409   :  { %5831 = vmatpush.bf16.msrb.mxu0 %v9075_v57 }
 0x40a   :  { %v5522_v53 = vpop.f32.mrf.mxu1  ;;  %5999 = vmatpush.bf16.msrb.mxu2 %v9223_v7 }
 0x40b   :  { %v5523_v55 = vadd.f32 %v5522_v53, %v5494_v47  ;;  %v9242_v47 = vld [vmem:[#allocation10 + $0x188] sm:$0xf]  ;;  %v10984_v53 = vld [vmem:[#allocation10 + $0x19c] sm:$0xf0] }
 0x40c   :  { %5785 = vmatmul.bf16.gmra.mxu2 %v12673_v33  ;;  %5860 = vmatpush.bf16.msrb.mxu1 %v9267_v38 }
 0x40d   :  { %v5552_v13 = vadd.f32 %v5551_v36, %v5523_v55  ;;  %5814 = vmatmul.bf16.gmra.mxu3 %v12720_v44  ;;  %5832 = vmatpush.bf16.msrb.mxu0 %v9051_v26  ;;  %v9986_v26 = vld [vmem:[#allocation10 + $0x758] sm:$0xf] }
 0x40f   :  { %v12752_v60 = vadd.f32 %v5580_v16, %v5552_v13  ;;  %v5496_v62 = vpop.f32.mrf.mxu0  ;;  %v5554_v6 = vpop.f32.mrf.mxu2  ;;  %v9243_v16 = vor.u32 %v10984_v53, %v9242_v47  ;;  %v12771_v47 = vperm.slane %v12725_v56, 1 }
 0x410   :  { %v5497_v32 = vadd.f32 %v5496_v62, %v12729_v59  ;;  %v5583_v23 = vpop.f32.mrf.mxu3  ;;  %v11170_v62 = vld [vmem:[#allocation10 + $0x76c] sm:$0xf0] }
 0x411   :  { %5861 = vmatpush.bf16.msrb.mxu1 %v9243_v16  ;;  %v9987_v61 = vor.u32 %v11170_v62, %v9986_v26 }
 0x412   :  { %v5525_v1 = vpop.f32.mrf.mxu1  ;;  %5727 = vmatmul.bf16.gmra.mxu0 %v12534_v10 }
 0x413   :  { %v5526_v41 = vadd.f32 %v5525_v1, %v5497_v32  ;;  %v9412_v32 = vld [vmem:[#allocation10 + $0x2f0] sm:$0xf0]  ;;  %v10178_v1 = vld [vmem:[#allocation10 + $0x8d8] sm:$0xf]  ;;  %5941 = vmatpush.bf16.msra.mxu0 %v9987_v61  ;;  %v10963_v61 = vld [vmem:[#allocation10 + $0xfc] sm:$0xf] }
 0x415   :  { %v5555_v51 = vadd.f32 %v5554_v6, %v5526_v41  ;;  %5751 = vmatmul.bf16.gmra.mxu1 %v12565_v31  ;;  %v11023_v6 = vld [vmem:[#allocation10 + $0x2dc] sm:$0xf] }
 0x417   :  { %v12757_v4 = vadd.f32 %v5583_v23, %v5555_v51  ;;  %v5498_v9 = vpop.f32.mrf.mxu0  ;;  %v5556_v36 = vpop.f32.mrf.mxu2  ;;  %v11218_v23 = vld [vmem:[#allocation10 + $0x8ec] sm:$0xf0]  ;;  %v9415_v51 = vor.u32 %v11023_v6, %v9412_v32  ;;  %v9172_v32 = vld [vmem:[#allocation10 + $0x110] sm:$0xf0] }
 0x418   :  { %v5499_v0 = vadd.f32 %v5498_v9, %v12729_v59  ;;  %v5585_v18 = vpop.f32.mrf.mxu3  ;;  %v10179_v22 = vor.u32 %v11218_v23, %v10178_v1  ;;  %v9175_v1 = vor.u32 %v10963_v61, %v9172_v32  ;;  %v11011_v23 = vld [vmem:[#allocation10 + $0x27c] sm:$0xf]  ;;  %v10106_v32 = vld [vmem:[#allocation10 + $0x848] sm:$0xf] }
 0x419   :  { %6028 = vmatpush.bf16.msrb.mxu3 %v9415_v51  ;;  %v9364_v51 = vld [vmem:[#allocation10 + $0x290] sm:$0xf0] }
 0x41a   :  { %v5527_v37 = vpop.f32.mrf.mxu1  ;;  %5970 = vmatpush.bf16.msra.mxu1 %v10179_v22  ;;  %v9938_v22 = vld [vmem:[#allocation10 + $0x6f8] sm:$0xf] }
 0x41b   :  { %v5528_v20 = vadd.f32 %v5527_v37, %v5499_v0 }
 0x41c   :  { %5790 = vmatmul.bf16.gmra.mxu2 %v12688_v39 }
 0x41d   :  { %v5557_v54 = vadd.f32 %v5556_v36, %v5528_v20  ;;  %5819 = vmatmul.bf16.gmra.mxu3 %v12733_v50  ;;  %v9196_v20 = vld [vmem:[#allocation10 + $0x140] sm:$0xf0] }
 0x41f   :  { %v12762_v19 = vadd.f32 %v5585_v18, %v5557_v54  ;;  %v5501_v28 = vpop.f32.mrf.mxu0  ;;  %v5559_v34 = vpop.f32.mrf.mxu2  ;;  %v10969_v18 = vld [vmem:[#allocation10 + $0x12c] sm:$0xf]  ;;  %v9962_v54 = vld [vmem:[#allocation10 + $0x728] sm:$0xf] }
 0x420   :  { %v5502_v14 = vadd.f32 %v5501_v28, %v12729_v59  ;;  %v5588_v57 = vpop.f32.mrf.mxu3  ;;  %v9199_v53 = vor.u32 %v10969_v18, %v9196_v20  ;;  %v11164_v28 = vld [vmem:[#allocation10 + $0x73c] sm:$0xf0]  ;;  %v10957_v20 = vld [vmem:[#allocation10 + $0xcc] sm:$0xf] }
 0x422   :  { %v5530_v55 = vpop.f32.mrf.mxu1  ;;  %5732 = vmatmul.bf16.gmra.mxu0 %v12548_v21  ;;  %6000 = vmatpush.bf16.msrb.mxu2 %v9199_v53  ;;  %v9148_v53 = vld [vmem:[#allocation10 + $0xe0] sm:$0xf0] }
 0x423   :  { %v5531_v13 = vadd.f32 %v5530_v55, %v5502_v14  ;;  %v9388_v14 = vld [vmem:[#allocation10 + $0x2c0] sm:$0xf0]  ;;  %v10154_v55 = vld [vmem:[#allocation10 + $0x8a8] sm:$0xf] }
 0x425   :  { %v5560_v25 = vadd.f32 %v5559_v34, %v5531_v13  ;;  %5756 = vmatmul.bf16.gmra.mxu1 %v12573_v11  ;;  %v11017_v34 = vld [vmem:[#allocation10 + $0x2ac] sm:$0xf] }
 0x426   :  { %v9391_v29 = vor.u32 %v11017_v34, %v9388_v14  ;;  %6001 = vmatpush.bf16.msrb.mxu2 %v9175_v1  ;;  %v9340_v14 = vld [vmem:[#allocation10 + $0x260] sm:$0xf0]  ;;  %v11200_v1 = vld [vmem:[#allocation10 + $0x85c] sm:$0xf0] }
 0x427   :  { %v12767_v41 = vadd.f32 %v5588_v57, %v5560_v25  ;;  %v5503_v2 = vpop.f32.mrf.mxu0  ;;  %v5561_v38 = vpop.f32.mrf.mxu2  ;;  %v11212_v57 = vld [vmem:[#allocation10 + $0x8bc] sm:$0xf0] }
 0x428   :  { %v5504_v9 = vadd.f32 %v5503_v2, %v12729_v59  ;;  %v5590_v36 = vpop.f32.mrf.mxu3  ;;  %v9963_v59 = vor.u32 %v11164_v28, %v9962_v54  ;;  %v10155_v27 = vor.u32 %v11212_v57, %v10154_v55  ;;  %6029 = vmatpush.bf16.msrb.mxu3 %v9391_v29  ;;  %v11158_v2 = vld [vmem:[#allocation10 + $0x70c] sm:$0xf0]  ;;  %v10951_v29 = vld [vmem:[#allocation10 + $0x9c] sm:$0xf] }
 0x42a   :  { %v5532_v0 = vpop.f32.mrf.mxu1  ;;  %5942 = vmatpush.bf16.msra.mxu0 %v9963_v59  ;;  %5971 = vmatpush.bf16.msra.mxu1 %v10155_v27  ;;  %v9151_v59 = vor.u32 %v10957_v20, %v9148_v53  ;;  %v9124_v27 = vld [vmem:[#allocation10 + $0xb0] sm:$0xf0]  ;;  %v9292_v20 = vld [vmem:[#allocation10 + $0x200] sm:$0xf0] }
 0x42b   :  { %v5533_v37 = vadd.f32 %v5532_v0, %v5504_v9  ;;  %v9939_v9 = vor.u32 %v11158_v2, %v9938_v22 }
 0x42c   :  { %5891 = vmatmul.bf16.vlgmr.msra.gmra.mxu2 %v12506_v52 }
 0x42d   :  { %v5562_v16 = vadd.f32 %v5561_v38, %v5533_v37  ;;  %5920 = vmatmul.bf16.vlgmr.msra.gmra.mxu3 %v12557_v5  ;;  %v10130_v38 = vld [vmem:[#allocation10 + $0x878] sm:$0xf]  ;;  %6002 = vmatpush.bf16.msrb.mxu2 %v9151_v59 }
 0x42e   :  { %5943 = vmatpush.bf16.msra.mxu0 %v9939_v9  ;;  %v10993_v9 = vld [vmem:[#allocation10 + $0x1ec] sm:$0xf] }
 0x42f   :  { %v12775_v13 = vadd.f32 %v5590_v36, %v5562_v16  ;;  %v5602_v56 = vpop.f32.mrf.mxu0  ;;  %v5660_v7 = vpop.f32.mrf.mxu2  ;;  %v11206_v36 = vld [vmem:[#allocation10 + $0x88c] sm:$0xf0]  ;;  %v11005_v16 = vld [vmem:[#allocation10 + $0x24c] sm:$0xf] }
 0x430   :  { %v12778_v25 = vadd.f32 %v5602_v56, %v12737_v49  ;;  %v5661_v26 = vadd.f32 %v5660_v7, %v12771_v47  ;;  %v5689_v62 = vpop.f32.mrf.mxu3  ;;  %v9367_v49 = vor.u32 %v11011_v23, %v9364_v51  ;;  %v10131_v0 = vor.u32 %v11206_v36, %v10130_v38  ;;  %v10999_v56 = vld [vmem:[#allocation10 + $0x21c] sm:$0xf]  ;;  %v9914_v7 = vld [vmem:[#allocation10 + $0x6c8] sm:$0xf]  ;;  %v9100_v38 = vld [vmem:[#allocation10 + $0x80] sm:$0xf0] }
 0x431   :  { %v9343_v55 = vor.u32 %v11005_v16, %v9340_v14  ;;  %v10107_v51 = vor.u32 %v11200_v1, %v10106_v32  ;;  %v9295_v16 = vor.u32 %v10993_v9, %v9292_v20  ;;  %v11140_v32 = vld [vmem:[#allocation10 + $0x67c] sm:$0xf0] }
 0x432   :  { %v12781_v6 = vadd.f32 %v5689_v62, %v5661_v26  ;;  %5833 = vmatmul.bf16.vlgmr.msrb.gmra.mxu0 %v12370_v48  ;;  %6030 = vmatpush.bf16.msrb.mxu3 %v9367_v49  ;;  %v11152_v26 = vld [vmem:[#allocation10 + $0x6dc] sm:$0xf0]  ;;  %v9316_v62 = vld [vmem:[#allocation10 + $0x230] sm:$0xf0]  ;;  %v10945_v49 = vld [vmem:[#allocation10 + $0x6c] sm:$0xf] }
 0x433   :  { %5972 = vmatpush.bf16.msra.mxu1 %v10131_v0  ;;  %v9915_v61 = vor.u32 %v11152_v26, %v9914_v7  ;;  %v9319_v23 = vor.u32 %v10999_v56, %v9316_v62  ;;  %v10082_v56 = vld [vmem:[#allocation10 + $0x818] sm:$0xf]  ;;  %v11194_v7 = vld [vmem:[#allocation10 + $0x82c] sm:$0xf0]  ;;  %v9268_v62 = vld [vmem:[#allocation10 + $0x1d0] sm:$0xf0] }
 0x435   :  { %5761 = vmatmul.bf16.gmra.mxu1 %v12586_v24  ;;  %5944 = vmatpush.bf16.msra.mxu0 %v9915_v61  ;;  %v9866_v61 = vld [vmem:[#allocation10 + $0x668] sm:$0xf] }
 0x436   :  { %6031 = vmatpush.bf16.msrb.mxu3 %v9343_v55  ;;  %v10939_v55 = vld [vmem:[#allocation10 + $0x3c] sm:$0xf]  ;;  %v9867_v1 = vor.u32 %v11140_v32, %v9866_v61 }
 0x437   :  { %v5604_v37 = vpop.f32.mrf.mxu0  ;;  %v5662_v18 = vpop.f32.mrf.mxu2  ;;  %5973 = vmatpush.bf16.msra.mxu1 %v10107_v51 }
 0x438   :  { %v12786_v54 = vadd.f32 %v5604_v37, %v12742_v8  ;;  %v5663_v28 = vadd.f32 %v5662_v18, %v12771_v47  ;;  %v5691_v34 = vpop.f32.mrf.mxu3  ;;  %v9127_v8 = vor.u32 %v10951_v29, %v9124_v27  ;;  %v9103_v18 = vor.u32 %v10945_v49, %v9100_v38  ;;  %v9076_v29 = vld [vmem:[#allocation10 + $0x50] sm:$0xf0]  ;;  %v10987_v27 = vld [vmem:[#allocation10 + $0x1bc] sm:$0xf]  ;;  %v10981_v49 = vld [vmem:[#allocation10 + $0x18c] sm:$0xf] }
 0x439   :  { %v9079_v26 = vor.u32 %v10939_v55, %v9076_v29  ;;  %v11188_v29 = vld [vmem:[#allocation10 + $0x7fc] sm:$0xf0] }
 0x43a   :  { %v12789_v57 = vadd.f32 %v5691_v34, %v5663_v28  ;;  %6003 = vmatpush.bf16.msrb.mxu2 %v9127_v8  ;;  %6032 = vmatpush.bf16.msrb.mxu3 %v9319_v23  ;;  %v9890_v28 = vld [vmem:[#allocation10 + $0x698] sm:$0xf]  ;;  %v11146_v34 = vld [vmem:[#allocation10 + $0x6ac] sm:$0xf0]  ;;  %v10083_v8 = vor.u32 %v11194_v7, %v10082_v56  ;;  %v9818_v56 = vld [vmem:[#allocation10 + $0x608] sm:$0xf] }
 0x43b   :  { %v11128_v7 = vld [vmem:[#allocation10 + $0x61c] sm:$0xf0] }
 0x43c   :  { %5896 = vmatmul.bf16.gmra.mxu2 %v12520_v45  ;;  %5974 = vmatpush.bf16.msra.mxu1 %v10083_v8 }
 0x43d   :  { %5925 = vmatmul.bf16.gmra.mxu3 %v12565_v31 }
 0x43e   :  { %6004 = vmatpush.bf16.msrb.mxu2 %v9103_v18  ;;  %6033 = vmatpush.bf16.msrb.mxu3 %v9295_v16  ;;  %v9244_v18 = vld [vmem:[#allocation10 + $0x1a0] sm:$0xf0]  ;;  %v9842_v16 = vld [vmem:[#allocation10 + $0x638] sm:$0xf] }
 0x43f   :  { %v5607_v22 = vpop.f32.mrf.mxu0  ;;  %v5665_v2 = vpop.f32.mrf.mxu2 }
 0x440   :  { %v12794_v36 = vadd.f32 %v5607_v22, %v12747_v35  ;;  %v5666_v0 = vadd.f32 %v5665_v2, %v12771_v47  ;;  %v5694_v37 = vpop.f32.mrf.mxu3  ;;  %v9891_v35 = vor.u32 %v11146_v34, %v9890_v28  ;;  %v10933_v22 = vld [vmem:[#allocation10 + $0xc] sm:$0xf]  ;;  %v9052_v2 = vld [vmem:[#allocation10 + $0x20] sm:$0xf0]  ;;  %v11134_v28 = vld [vmem:[#allocation10 + $0x64c] sm:$0xf0] }
 0x441   :  { %v9843_v55 = vor.u32 %v11134_v28, %v9842_v16  ;;  %v11176_v16 = vld [vmem:[#allocation10 + $0x79c] sm:$0xf0] }
 0x442   :  { %v5631_v53 = vpop.f32.mrf.mxu1  ;;  %v12797_v59 = vadd.f32 %v5694_v37, %v5666_v0  ;;  %5838 = vmatmul.bf16.gmra.mxu0 %v12384_v43  ;;  %6005 = vmatpush.bf16.msrb.mxu2 %v9079_v26  ;;  %v9055_v37 = vor.u32 %v10933_v22, %v9052_v2  ;;  %v9819_v26 = vor.u32 %v11128_v7, %v9818_v56  ;;  %v11182_v22 = vld [vmem:[#allocation10 + $0x7cc] sm:$0xf0]  ;;  %v11167_v56 = vld [vmem:[#allocation10 + $0x75c] sm:$0xf]  ;;  %v9988_v7 = vld [vmem:[#allocation10 + $0x770] sm:$0xf0] }
 0x443   :  { %v12800_v14 = vadd.f32 %v5631_v53, %v12778_v25  ;;  %5945 = vmatpush.bf16.msra.mxu0 %v9891_v35  ;;  %v9271_v25 = vor.u32 %v10987_v27, %v9268_v62  ;;  %v9247_v53 = vor.u32 %v10981_v49, %v9244_v18 }
 0x445   :  { %5862 = vmatmul.bf16.vlgmr.msrb.gmra.mxu1 %v12421_v63  ;;  %6034 = vmatpush.bf16.msrb.mxu3 %v9271_v25 }
 0x446   :  { %6006 = vmatpush.bf16.msrb.mxu2 %v9055_v37 }
 0x447   :  { %v5609_v23 = vpop.f32.mrf.mxu0  ;;  %v5667_v51 = vpop.f32.mrf.mxu2  ;;  %5946 = vmatpush.bf16.msra.mxu0 %v9867_v1 }
 0x448   :  { %v5610_v38 = vadd.f32 %v5609_v23, %v12752_v60  ;;  %v5668_v9 = vadd.f32 %v5667_v51, %v12771_v47  ;;  %v5696_v0 = vpop.f32.mrf.mxu3  ;;  %v10058_v60 = vld [vmem:[#allocation10 + $0x7e8] sm:$0xf]  ;;  %v10034_v51 = vld [vmem:[#allocation10 + $0x7b8] sm:$0xf] }
 0x449   :  { %6035 = vmatpush.bf16.msrb.mxu3 %v9247_v53  ;;  %v10059_v27 = vor.u32 %v11188_v29, %v10058_v60  ;;  %v10035_v2 = vor.u32 %v11182_v22, %v10034_v51  ;;  %v10010_v53 = vld [vmem:[#allocation10 + $0x788] sm:$0xf]  ;;  %v11071_v22 = vld [vmem:[#allocation10 + $0x45c] sm:$0xf] }
 0x44a   :  { %v5633_v20 = vpop.f32.mrf.mxu1  ;;  %v12806_v34 = vadd.f32 %v5696_v0, %v5668_v9  ;;  %v10011_v28 = vor.u32 %v11176_v16, %v10010_v53 }
 0x44b   :  { %v12809_v35 = vadd.f32 %v5633_v20, %v12786_v54  ;;  %5947 = vmatpush.bf16.msra.mxu0 %v9843_v55  ;;  %5975 = vmatpush.bf16.msra.mxu1 %v10059_v27 }
 0x44c   :  { %5901 = vmatmul.bf16.gmra.mxu2 %v12534_v10 }
 0x44d   :  { %5930 = vmatmul.bf16.gmra.mxu3 %v12573_v11 }
 0x44f   :  { %v5612_v8 = vpop.f32.mrf.mxu0  ;;  %v5670_v62 = vpop.f32.mrf.mxu2  ;;  %5948 = vmatpush.bf16.msra.mxu0 %v9819_v26  ;;  %5976 = vmatpush.bf16.msra.mxu1 %v10035_v2  ;;  %v9604_v2 = vld [vmem:[#allocation10 + $0x470] sm:$0xf0] }
 0x450   :  { %v5613_v54 = vadd.f32 %v5612_v8, %v12757_v4  ;;  %v5671_v61 = vadd.f32 %v5670_v62, %v12771_v47  ;;  %v5699_v32 = vpop.f32.mrf.mxu3 }
 0x452   :  { %v5636_v25 = vpop.f32.mrf.mxu1  ;;  %v12815_v1 = vadd.f32 %v5699_v32, %v5671_v61  ;;  %5843 = vmatmul.bf16.gmra.mxu0 %v12398_v46 }
 0x453   :  { %v12818_v23 = vadd.f32 %v5636_v25, %v12794_v36  ;;  %5977 = vmatpush.bf16.msra.mxu1 %v10011_v28 }
 0x455   :  { %5867 = vmatmul.bf16.gmra.mxu1 %v12429_v42 }
 0x457   :  { %v5614_v49 = vpop.f32.mrf.mxu0  ;;  %v5672_v9 = vpop.f32.mrf.mxu2 }
 0x458   :  { %v5615_v4 = vadd.f32 %v5614_v49, %v12762_v19  ;;  %v5673_v0 = vadd.f32 %v5672_v9, %v12771_v47  ;;  %v5701_v37 = vpop.f32.mrf.mxu3  ;;  %v11215_v49 = vld [vmem:[#allocation10 + $0x8dc] sm:$0xf] }
 0x45a   :  { %v5638_v18 = vpop.f32.mrf.mxu1  ;;  %v12824_v20 = vadd.f32 %v5701_v37, %v5673_v0  ;;  %v9607_v0 = vor.u32 %v11071_v22, %v9604_v2  ;;  %v11119_v37 = vld [vmem:[#allocation10 + $0x5dc] sm:$0xf]  ;;  %v9772_v2 = vld [vmem:[#allocation10 + $0x5c0] sm:$0xf0] }
 0x45b   :  { %v12826_v36 = vadd.f32 %v5638_v18, %v5610_v38  ;;  %v9991_v38 = vor.u32 %v11167_v56, %v9988_v7  ;;  %v9796_v18 = vld [vmem:[#allocation10 + $0x5f0] sm:$0xf0]  ;;  %v11209_v56 = vld [vmem:[#allocation10 + $0x8ac] sm:$0xf]  ;;  %v10156_v7 = vld [vmem:[#allocation10 + $0x8c0] sm:$0xf0] }
 0x45c   :  { %5906 = vmatmul.bf16.gmra.mxu2 %v12548_v21  ;;  %6057 = vmatpush.bf16.msrb.mxu0 %v9607_v0 }
 0x45d   :  { %5935 = vmatmul.bf16.gmra.mxu3 %v12586_v24  ;;  %6115 = vmatpush.bf16.msra.mxu2 %v9991_v38  ;;  %v11065_v38 = vld [vmem:[#allocation10 + $0x42c] sm:$0xf] }
 0x45f   :  { %v5617_v55 = vpop.f32.mrf.mxu0  ;;  %v5675_v60 = vpop.f32.mrf.mxu2 }
 0x460   :  { %v5618_v19 = vadd.f32 %v5617_v55, %v12767_v41  ;;  %v5676_v29 = vadd.f32 %v5675_v60, %v12771_v47  ;;  %v5704_v27 = vpop.f32.mrf.mxu3  ;;  %v9799_v55 = vor.u32 %v11119_v37, %v9796_v18  ;;  %v11161_v60 = vld [vmem:[#allocation10 + $0x72c] sm:$0xf]  ;;  %v10132_v18 = vld [vmem:[#allocation10 + $0x890] sm:$0xf0] }
 0x462   :  { %v5641_v26 = vpop.f32.mrf.mxu1  ;;  %v12832_v8 = vadd.f32 %v5704_v27, %v5676_v29  ;;  %5848 = vmatmul.bf16.gmra.mxu0 %v12412_v17  ;;  %6086 = vmatpush.bf16.msrb.mxu1 %v9799_v55 }
 0x463   :  { %v12834_v62 = vadd.f32 %v5641_v26, %v5613_v54  ;;  %v10180_v54 = vld [vmem:[#allocation10 + $0x8f0] sm:$0xf0] }
 0x464   :  { %v10183_v28 = vor.u32 %v11215_v49, %v10180_v54  ;;  %v11155_v49 = vld [vmem:[#allocation10 + $0x6fc] sm:$0xf] }
 0x465   :  { %5872 = vmatmul.bf16.gmra.mxu1 %v12437_v15 }
 0x466   :  { %6144 = vmatpush.bf16.msra.mxu3 %v10183_v28 }
 0x467   :  { %v5619_v61 = vpop.f32.mrf.mxu0  ;;  %v5677_v32 = vpop.f32.mrf.mxu2 }
 0x468   :  { %v12839_v41 = vadd.f32 %v5619_v61, %v12775_v13  ;;  %v5678_v25 = vadd.f32 %v5677_v32, %v12771_v47  ;;  %v5706_v51 = vpop.f32.mrf.mxu3  ;;  %v9964_v13 = vld [vmem:[#allocation10 + $0x740] sm:$0xf0]  ;;  %v10159_v32 = vor.u32 %v11209_v56, %v10156_v7  ;;  %v11059_v7 = vld [vmem:[#allocation10 + $0x3fc] sm:$0xf] }
 0x469   :  { %v9967_v29 = vor.u32 %v11161_v60, %v9964_v13  ;;  %v9580_v61 = vld [vmem:[#allocation10 + $0x440] sm:$0xf0]  ;;  %v11149_v13 = vld [vmem:[#allocation10 + $0x6cc] sm:$0xf] }
 0x46a   :  { %v5643_v9 = vpop.f32.mrf.mxu1  ;;  %v12842_v53 = vadd.f32 %v5706_v51, %v5678_v25  ;;  %v11113_v25 = vld [vmem:[#allocation10 + $0x5ac] sm:$0xf]  ;;  %v9583_v22 = vor.u32 %v11065_v38, %v9580_v61  ;;  %6145 = vmatpush.bf16.msra.mxu3 %v10159_v32  ;;  %v9556_v38 = vld [vmem:[#allocation10 + $0x410] sm:$0xf0]  ;;  %v11107_v61 = vld [vmem:[#allocation10 + $0x57c] sm:$0xf] }
 0x46b   :  { %v12844_v16 = vadd.f32 %v5643_v9, %v5615_v4  ;;  %6116 = vmatpush.bf16.msra.mxu2 %v9967_v29  ;;  %v9940_v9 = vld [vmem:[#allocation10 + $0x710] sm:$0xf0]  ;;  %v9775_v54 = vor.u32 %v11113_v25, %v9772_v2  ;;  %v11197_v29 = vld [vmem:[#allocation10 + $0x84c] sm:$0xf]  ;;  %v10108_v2 = vld [vmem:[#allocation10 + $0x860] sm:$0xf0] }
 0x46c   :  { %6007 = vmatmul.bf16.vlgmr.msrb.gmra.mxu2 %v12370_v48  ;;  %v9943_v37 = vor.u32 %v11155_v49, %v9940_v9  ;;  %6058 = vmatpush.bf16.msrb.mxu0 %v9583_v22  ;;  %v9748_v22 = vld [vmem:[#allocation10 + $0x590] sm:$0xf0] }
 0x46d   :  { %6036 = vmatmul.bf16.vlgmr.msrb.gmra.mxu3 %v12421_v63  ;;  %6087 = vmatpush.bf16.msrb.mxu1 %v9775_v54  ;;  %v9751_v9 = vor.u32 %v11107_v61, %v9748_v22  ;;  %v10111_v54 = vor.u32 %v11197_v29, %v10108_v2  ;;  %v11137_v29 = vld [vmem:[#allocation10 + $0x66c] sm:$0xf]  ;;  %v9868_v61 = vld [vmem:[#allocation10 + $0x680] sm:$0xf0] }
 0x46e   :  { %v11101_v22 = vld [vmem:[#allocation10 + $0x54c] sm:$0xf]  ;;  %v9724_v2 = vld [vmem:[#allocation10 + $0x560] sm:$0xf0] }
 0x46f   :  { %v5718_v47 = vpop.f32.mrf.mxu0  ;;  %v12848_v27 = vpop.f32.mrf.mxu2  ;;  %6117 = vmatpush.bf16.msra.mxu2 %v9943_v37  ;;  %v11143_v37 = vld [vmem:[#allocation10 + $0x69c] sm:$0xf] }
 0x470   :  { %v12851_v4 = vadd.f32 %v5718_v47, %v12781_v6  ;;  %v12853_v26 = vpop.f32.mrf.mxu3  ;;  %v11203_v6 = vld [vmem:[#allocation10 + $0x87c] sm:$0xf] }
 0x471   :  { %v10135_v28 = vor.u32 %v11203_v6, %v10132_v18  ;;  %v11191_v6 = vld [vmem:[#allocation10 + $0x81c] sm:$0xf]  ;;  %6088 = vmatpush.bf16.msrb.mxu1 %v9751_v9  ;;  %v9871_v9 = vor.u32 %v11137_v29, %v9868_v61  ;;  %v10036_v61 = vld [vmem:[#allocation10 + $0x7d0] sm:$0xf0] }
 0x472   :  { %v5646_v51 = vpop.f32.mrf.mxu1  ;;  %5949 = vmatmul.bf16.vlgmr.msra.gmra.mxu0 %v12643_v40 }
 0x473   :  { %v12855_v0 = vadd.f32 %v5646_v51, %v5618_v19  ;;  %6146 = vmatpush.bf16.msra.mxu3 %v10135_v28  ;;  %v9916_v19 = vld [vmem:[#allocation10 + $0x6e0] sm:$0xf0]  ;;  %v9559_v51 = vor.u32 %v11059_v7, %v9556_v38  ;;  %v10084_v28 = vld [vmem:[#allocation10 + $0x830] sm:$0xf0] }
 0x474   :  { %v9919_v32 = vor.u32 %v11149_v13, %v9916_v19  ;;  %v9532_v13 = vld [vmem:[#allocation10 + $0x3e0] sm:$0xf0] }
 0x475   :  { %13640 = vst [vmem:[#allocation34_spill] sm:$0xff] %v12855_v0  ;;  %5877 = vmatmul.bf16.gmra.mxu1 %v13637_v3  ;;  %6059 = vmatpush.bf16.msrb.mxu0 %v9559_v51 }
 0x476   :  { %6118 = vmatpush.bf16.msra.mxu2 %v9919_v32  ;;  %v11185_v32 = vld [vmem:[#allocation10 + $0x7ec] sm:$0xf] }
 0x477   :  { %v5720_v55 = vpop.f32.mrf.mxu0  ;;  %v12859_v60 = vpop.f32.mrf.mxu2  ;;  %6147 = vmatpush.bf16.msra.mxu3 %v10111_v54 }
 0x478   :  { %v12862_v47 = vadd.f32 %v5720_v55, %v12789_v57  ;;  %v12864_v56 = vpop.f32.mrf.mxu3  ;;  %v9892_v57 = vld [vmem:[#allocation10 + $0x6b0] sm:$0xf0]  ;;  %v11053_v55 = vld [vmem:[#allocation10 + $0x3cc] sm:$0xf] }
 0x479   :  { %v9895_v18 = vor.u32 %v11143_v37, %v9892_v57  ;;  %v9535_v19 = vor.u32 %v11053_v55, %v9532_v13  ;;  %v10060_v37 = vld [vmem:[#allocation10 + $0x800] sm:$0xf0]  ;;  %v9727_v57 = vor.u32 %v11101_v22, %v9724_v2  ;;  %v11041_v22 = vld [vmem:[#allocation10 + $0x36c] sm:$0xf] }
 0x47a   :  { %v5648_v25 = vpop.f32.mrf.mxu1  ;;  %v10063_v55 = vor.u32 %v11185_v32, %v10060_v37  ;;  %v9484_v2 = vld [vmem:[#allocation10 + $0x380] sm:$0xf0] }
 0x47b   :  { %v12867_v49 = vadd.f32 %v5648_v25, %v12839_v41  ;;  %6119 = vmatpush.bf16.msra.mxu2 %v9895_v18  ;;  %v10087_v41 = vor.u32 %v11191_v6, %v10084_v28  ;;  %6060 = vmatpush.bf16.msrb.mxu0 %v9535_v19  ;;  %v11047_v18 = vld [vmem:[#allocation10 + $0x39c] sm:$0xf]  ;;  %v9508_v6 = vld [vmem:[#allocation10 + $0x3b0] sm:$0xf0]  ;;  %v9487_v32 = vor.u32 %v11041_v22, %v9484_v2  ;;  %v9436_v2 = vld [vmem:[#allocation10 + $0x320] sm:$0xf0] }
 0x47c   :  { %6012 = vmatmul.bf16.gmra.mxu2 %v12384_v43  ;;  %v9511_v13 = vor.u32 %v11047_v18, %v9508_v6  ;;  %6089 = vmatpush.bf16.msrb.mxu1 %v9727_v57  ;;  %v11179_v19 = vld [vmem:[#allocation10 + $0x7bc] sm:$0xf]  ;;  %v9820_v57 = vld [vmem:[#allocation10 + $0x620] sm:$0xf0]  ;;  %v11173_v18 = vld [vmem:[#allocation10 + $0x78c] sm:$0xf] }
 0x47d   :  { %13641 = vst [vmem:[#allocation35_spill] sm:$0xff] %v12867_v49  ;;  %6041 = vmatmul.bf16.gmra.mxu3 %v12429_v42 }
 0x47e   :  { %6148 = vmatpush.bf16.msra.mxu3 %v10087_v41  ;;  %v10039_v41 = vor.u32 %v11179_v19, %v10036_v61 }
 0x47f   :  { %v5723_v7 = vpop.f32.mrf.mxu0  ;;  %v12871_v38 = vpop.f32.mrf.mxu2  ;;  %6120 = vmatpush.bf16.msra.mxu2 %v9871_v9  ;;  %6061 = vmatpush.bf16.msrb.mxu0 %v9511_v13  ;;  %v9700_v13 = vld [vmem:[#allocation10 + $0x530] sm:$0xf0] }
 0x480   :  { %v12874_v25 = vadd.f32 %v5723_v7, %v12797_v59  ;;  %v12876_v51 = vpop.f32.mrf.mxu3  ;;  %v11131_v59 = vld [vmem:[#allocation10 + $0x63c] sm:$0xf]  ;;  %v9844_v7 = vld [vmem:[#allocation10 + $0x650] sm:$0xf0] }
 0x481   :  { %v9847_v29 = vor.u32 %v11131_v59, %v9844_v7 }
 0x482   :  { %v5747_v54 = vpop.f32.mrf.mxu1  ;;  %5954 = vmatmul.bf16.gmra.mxu0 %v12658_v58  ;;  %6149 = vmatpush.bf16.msra.mxu3 %v10063_v55  ;;  %v9460_v55 = vld [vmem:[#allocation10 + $0x350] sm:$0xf0] }
 0x483   :  { %v5748_v28 = vadd.f32 %v5747_v54, %v12851_v4  ;;  %6121 = vmatpush.bf16.msra.mxu2 %v9847_v29  ;;  %v11125_v54 = vld [vmem:[#allocation10 + $0x60c] sm:$0xf]  ;;  %6062 = vmatpush.bf16.msrb.mxu0 %v9487_v32 }
 0x484   :  { %v9823_v59 = vor.u32 %v11125_v54, %v9820_v57  ;;  %v11089_v57 = vld [vmem:[#allocation10 + $0x4ec] sm:$0xf] }
 0x485   :  { %v5777_v49 = vadd.f32 %v12848_v27, %v5748_v28  ;;  %5978 = vmatmul.bf16.vlgmr.msra.gmra.mxu1 %v12700_v30  ;;  %v11095_v28 = vld [vmem:[#allocation10 + $0x51c] sm:$0xf] }
 0x486   :  { %v9703_v0 = vor.u32 %v11095_v28, %v9700_v13  ;;  %6150 = vmatpush.bf16.msra.mxu3 %v10039_v41 }
 0x487   :  { %v12883_v4 = vadd.f32 %v12853_v26, %v5777_v49  ;;  %v5725_v37 = vpop.f32.mrf.mxu0  ;;  %v5783_v9 = vpop.f32.mrf.mxu2  ;;  %v10012_v26 = vld [vmem:[#allocation10 + $0x7a0] sm:$0xf0]  ;;  %v11035_v49 = vld [vmem:[#allocation10 + $0x33c] sm:$0xf]  ;;  %6122 = vmatpush.bf16.msra.mxu2 %v9823_v59 }
 0x488   :  { %v5726_v27 = vadd.f32 %v5725_v37, %v12806_v34  ;;  %v5812_v6 = vpop.f32.mrf.mxu3  ;;  %v10015_v61 = vor.u32 %v11173_v18, %v10012_v26  ;;  %v9463_v29 = vor.u32 %v11035_v49, %v9460_v55  ;;  %6090 = vmatpush.bf16.msrb.mxu1 %v9703_v0  ;;  %v11029_v34 = vld [vmem:[#allocation10 + $0x30c] sm:$0xf]  ;;  %v9676_v18 = vld [vmem:[#allocation10 + $0x500] sm:$0xf0]  ;;  %v11083_v55 = vld [vmem:[#allocation10 + $0x4bc] sm:$0xf] }
 0x489   :  { %v9439_v37 = vor.u32 %v11029_v34, %v9436_v2  ;;  %v9679_v28 = vor.u32 %v11089_v57, %v9676_v18  ;;  %v11077_v2 = vld [vmem:[#allocation10 + $0x48c] sm:$0xf]  ;;  %v9610_v18 = vld [vmem:[#allocation10 + $0x460] sm:$0xf] }
 0x48a   :  { %v5749_v7 = vpop.f32.mrf.mxu1  ;;  %6063 = vmatpush.bf16.msrb.mxu0 %v9463_v29  ;;  %6151 = vmatpush.bf16.msra.mxu3 %v10015_v61 }
 0x48b   :  { %v5750_v19 = vadd.f32 %v5749_v7, %v12862_v47 }
 0x48c   :  { %6017 = vmatmul.bf16.gmra.mxu2 %v12398_v46  ;;  %6091 = vmatpush.bf16.msrb.mxu1 %v9679_v28 }
 0x48d   :  { %v5779_v22 = vadd.f32 %v12859_v60, %v5750_v19  ;;  %6046 = vmatmul.bf16.gmra.mxu3 %v12437_v15  ;;  %v9652_v19 = vld [vmem:[#allocation10 + $0x4d0] sm:$0xf0] }
 0x48e   :  { %6064 = vmatpush.bf16.msrb.mxu0 %v9439_v37  ;;  %v9655_v29 = vor.u32 %v11083_v55, %v9652_v19  ;;  %v9628_v37 = vld [vmem:[#allocation10 + $0x4a0] sm:$0xf0]  ;;  %v9418_v19 = vld [vmem:[#allocation10 + $0x2e0] sm:$0xf] }
 0x48f   :  { %v12891_v32 = vadd.f32 %v12864_v56, %v5779_v22  ;;  %v5728_v47 = vpop.f32.mrf.mxu0  ;;  %v5786_v41 = vpop.f32.mrf.mxu2  ;;  %v9631_v57 = vor.u32 %v11077_v2, %v9628_v37  ;;  %v9586_v37 = vld [vmem:[#allocation10 + $0x430] sm:$0xf] }
 0x490   :  { %v5729_v54 = vadd.f32 %v5728_v47, %v12815_v1  ;;  %v5815_v0 = vpop.f32.mrf.mxu3  ;;  %6092 = vmatpush.bf16.msrb.mxu1 %v9655_v29 }
 0x492   :  { %v5752_v60 = vpop.f32.mrf.mxu1  ;;  %5959 = vmatmul.bf16.gmra.mxu0 %v12673_v33 }
 0x493   :  { %v5753_v13 = vadd.f32 %v5752_v60, %v12874_v25 }
 0x494   :  { %6093 = vmatpush.bf16.msrb.mxu1 %v9631_v57  ;;  %v11069_v57 = vld [vmem:[#allocation10 + $0x444] sm:$0xf0] }
 0x495   :  { %v5782_v56 = vadd.f32 %v12871_v38, %v5753_v13  ;;  %5983 = vmatmul.bf16.gmra.mxu1 %v12710_v12  ;;  %v9226_v13 = vld [vmem:[#allocation10 + $0x160] sm:$0xf] }
 0x497   :  { %v12899_v59 = vadd.f32 %v12876_v51, %v5782_v56  ;;  %v5730_v7 = vpop.f32.mrf.mxu0  ;;  %v5788_v1 = vpop.f32.mrf.mxu2  ;;  %v10979_v56 = vld [vmem:[#allocation10 + $0x174] sm:$0xf0] }
 0x498   :  { %v5731_v26 = vadd.f32 %v5730_v7, %v12824_v20  ;;  %v5817_v49 = vpop.f32.mrf.mxu3  ;;  %v9802_v7 = vld [vmem:[#allocation10 + $0x5e0] sm:$0xf]  ;;  %v9227_v55 = vor.u32 %v10979_v56, %v9226_v13  ;;  %v11117_v13 = vld [vmem:[#allocation10 + $0x5c4] sm:$0xf0]  ;;  %v9394_v56 = vld [vmem:[#allocation10 + $0x2b0] sm:$0xf] }
 0x49a   :  { %v5754_v61 = vpop.f32.mrf.mxu1  ;;  %6173 = vmatpush.bf16.msra.mxu0 %v9227_v55 }
 0x49b   :  { %v5755_v25 = vadd.f32 %v5754_v61, %v5726_v27  ;;  %v11075_v27 = vld [vmem:[#allocation10 + $0x474] sm:$0xf0] }
 0x49c   :  { %6022 = vmatmul.bf16.gmra.mxu2 %v12412_v17  ;;  %v11027_v61 = vld [vmem:[#allocation10 + $0x2f4] sm:$0xf0] }
 0x49d   :  { %v5784_v22 = vadd.f32 %v5783_v9, %v5755_v25  ;;  %6051 = vmatmul.bf16.gmra.mxu3 %v13637_v3  ;;  %v9611_v9 = vor.u32 %v11075_v27, %v9610_v18  ;;  %v9587_v27 = vor.u32 %v11069_v57, %v9586_v37 }
 0x49f   :  { %v12904_v38 = vadd.f32 %v5812_v6, %v5784_v22  ;;  %v5733_v51 = vpop.f32.mrf.mxu0  ;;  %v12906_v34 = vpop.f32.mrf.mxu2  ;;  %6231 = vmatpush.bf16.msrb.mxu2 %v9611_v9  ;;  %v9419_v22 = vor.u32 %v11027_v61, %v9418_v19  ;;  %v9202_v9 = vld [vmem:[#allocation10 + $0x130] sm:$0xf] }
 0x4a0   :  { %v5734_v20 = vadd.f32 %v5733_v51, %v12832_v8  ;;  %v12909_v47 = vpop.f32.mrf.mxu3  ;;  %v11123_v8 = vld [vmem:[#allocation10 + $0x5f4] sm:$0xf0] }
 0x4a1   :  { %v9803_v25 = vor.u32 %v11123_v8, %v9802_v7  ;;  %6202 = vmatpush.bf16.msra.mxu1 %v9419_v22  ;;  %v11021_v7 = vld [vmem:[#allocation10 + $0x2c4] sm:$0xf0]  ;;  %v11063_v22 = vld [vmem:[#allocation10 + $0x414] sm:$0xf0] }
 0x4a2   :  { %v5757_v60 = vpop.f32.mrf.mxu1  ;;  %5964 = vmatmul.bf16.gmra.mxu0 %v12688_v39  ;;  %v9395_v19 = vor.u32 %v11021_v7, %v9394_v56 }
 0x4a3   :  { %v5758_v28 = vadd.f32 %v5757_v60, %v5729_v54  ;;  %6260 = vmatpush.bf16.msrb.mxu3 %v9803_v25  ;;  %6232 = vmatpush.bf16.msrb.mxu2 %v9587_v27  ;;  %v9562_v25 = vld [vmem:[#allocation10 + $0x400] sm:$0xf] }
 0x4a4   :  { %v9563_v37 = vor.u32 %v11063_v22, %v9562_v25 }
 0x4a5   :  { %v5787_v6 = vadd.f32 %v5786_v41, %v5758_v28  ;;  %5988 = vmatmul.bf16.gmra.mxu1 %v12720_v44  ;;  %v10973_v28 = vld [vmem:[#allocation10 + $0x144] sm:$0xf0] }
 0x4a6   :  { %6203 = vmatpush.bf16.msra.mxu1 %v9395_v19  ;;  %v9730_v19 = vld [vmem:[#allocation10 + $0x550] sm:$0xf] }
 0x4a7   :  { %v12913_v29 = vadd.f32 %v5815_v0, %v5787_v6  ;;  %v5735_v51 = vpop.f32.mrf.mxu0  ;;  %v12915_v54 = vpop.f32.mrf.mxu2  ;;  %v9778_v6 = vld [vmem:[#allocation10 + $0x5b0] sm:$0xf]  ;;  %6233 = vmatpush.bf16.msrb.mxu2 %v9563_v37 }
 0x4a8   :  { %v12918_v2 = vadd.f32 %v5735_v51, %v12842_v53  ;;  %v12920_v41 = vpop.f32.mrf.mxu3  ;;  %v9203_v53 = vor.u32 %v10973_v28, %v9202_v9  ;;  %v9779_v8 = vor.u32 %v11117_v13, %v9778_v6  ;;  %v9370_v28 = vld [vmem:[#allocation10 + $0x280] sm:$0xf] }
 0x4a9   :  { %13642 = vst [vmem:[#allocation37_spill] sm:$0xff] %v12913_v29 }
 0x4aa   :  { %v5759_v18 = vpop.f32.mrf.mxu1  ;;  %6174 = vmatpush.bf16.msra.mxu0 %v9203_v53  ;;  %6261 = vmatpush.bf16.msrb.mxu3 %v9779_v8  ;;  %v11015_v53 = vld [vmem:[#allocation10 + $0x294] sm:$0xf0]  ;;  %v9538_v8 = vld [vmem:[#allocation10 + $0x3d0] sm:$0xf] }
 0x4ab   :  { %v5760_v60 = vadd.f32 %v5759_v18, %v5731_v26  ;;  %v11111_v18 = vld [vmem:[#allocation10 + $0x594] sm:$0xf0] }
 0x4ac   :  { %6123 = vmatmul.bf16.vlgmr.msra.gmra.mxu2 %v12643_v40 }
 0x4ad   :  { %v5789_v0 = vadd.f32 %v5788_v1, %v5760_v60  ;;  %6152 = vmatmul.bf16.vlgmr.msra.gmra.mxu3 %v12700_v30  ;;  %v9178_v60 = vld [vmem:[#allocation10 + $0x100] sm:$0xf] }
 0x4af   :  { %v12924_v55 = vadd.f32 %v5817_v49, %v5789_v0  ;;  %v12926_v61 = vpop.f32.mrf.mxu0  ;;  %v12928_v26 = vpop.f32.mrf.mxu2  ;;  %v9754_v49 = vld [vmem:[#allocation10 + $0x580] sm:$0xf]  ;;  %v10967_v0 = vld [vmem:[#allocation10 + $0x114] sm:$0xf0] }
 0x4b0   :  { %v12930_v1 = vpop.f32.mrf.mxu3  ;;  %v9755_v9 = vor.u32 %v11111_v18, %v9754_v49  ;;  %v9179_v6 = vor.u32 %v10967_v0, %v9178_v60  ;;  %v12944_v49 = vld [vmem:[#allocation11] sm:$0x3f]  ;;  %v11051_v60 = vld [vmem:[#allocation10 + $0x3b4] sm:$0xf0] }
 0x4b1   :  { %13643 = vst [vmem:[#allocation36_spill] sm:$0xff] %v12924_v55  ;;  %v9706_v0 = vld [vmem:[#allocation10 + $0x520] sm:$0xf] }
 0x4b2   :  { %v5762_v51 = vpop.f32.mrf.mxu1  ;;  %6065 = vmatmul.bf16.vlgmr.msrb.gmra.mxu0 %v12506_v52  ;;  %6262 = vmatpush.bf16.msrb.mxu3 %v9755_v9 }
 0x4b3   :  { %v5763_v57 = vadd.f32 %v5762_v51, %v5734_v20  ;;  %v9371_v20 = vor.u32 %v11015_v53, %v9370_v28  ;;  %6175 = vmatpush.bf16.msra.mxu0 %v9179_v6  ;;  %v11105_v51 = vld [vmem:[#allocation10 + $0x564] sm:$0xf0]  ;;  %v9154_v28 = vld [vmem:[#allocation10 + $0xd0] sm:$0xf] }
 0x4b4   :  { %v10961_v6 = vld [vmem:[#allocation10 + $0xe4] sm:$0xf0] }
 0x4b5   :  { %v5792_v27 = vadd.f32 %v12906_v34, %v5763_v57  ;;  %5993 = vmatmul.bf16.gmra.mxu1 %v12733_v50  ;;  %v11057_v34 = vld [vmem:[#allocation10 + $0x3e4] sm:$0xf0]  ;;  %v9731_v57 = vor.u32 %v11105_v51, %v9730_v19 }
 0x4b6   :  { %6204 = vmatpush.bf16.msra.mxu1 %v9371_v20  ;;  %v9539_v22 = vor.u32 %v11057_v34, %v9538_v8  ;;  %v11099_v20 = vld [vmem:[#allocation10 + $0x534] sm:$0xf0]  ;;  %v9155_v8 = vor.u32 %v10961_v6, %v9154_v28  ;;  %v9346_v34 = vld [vmem:[#allocation10 + $0x250] sm:$0xf]  ;;  %v11009_v19 = vld [vmem:[#allocation10 + $0x264] sm:$0xf0] }
 0x4b7   :  { %v12936_v13 = vadd.f32 %v12909_v47, %v5792_v27  ;;  %v12938_v56 = vpop.f32.mrf.mxu0  ;;  %v12940_v7 = vpop.f32.mrf.mxu2  ;;  %v12947_v47 = vperm.slane %v12944_v49, 2  ;;  %6263 = vmatpush.bf16.msrb.mxu3 %v9731_v57  ;;  %v9514_v27 = vld [vmem:[#allocation10 + $0x3a0] sm:$0xf]  ;;  %v9707_v51 = vor.u32 %v11099_v20, %v9706_v0  ;;  %v9490_v57 = vld [vmem:[#allocation10 + $0x370] sm:$0xf] }
 0x4b8   :  { %v12942_v25 = vpop.f32.mrf.mxu3  ;;  %6234 = vmatpush.bf16.msrb.mxu2 %v9539_v22  ;;  %v9515_v53 = vor.u32 %v11051_v60, %v9514_v27  ;;  %v9347_v22 = vor.u32 %v11009_v19, %v9346_v34  ;;  %6176 = vmatpush.bf16.msra.mxu0 %v9155_v8  ;;  %v9682_v27 = vld [vmem:[#allocation10 + $0x4f0] sm:$0xf]  ;;  %v10955_v20 = vld [vmem:[#allocation10 + $0xb4] sm:$0xf0]  ;;  %v9466_v19 = vld [vmem:[#allocation10 + $0x340] sm:$0xf] }
 0x4b9   :  { %13644 = vst [vmem:[#allocation38_spill] sm:$0xff] %v12936_v13  ;;  %v5835_v60 = vadd.f32 %v12926_v61, %v12947_v47 }
 0x4ba   :  { %v5764_v37 = vpop.f32.mrf.mxu1  ;;  %6205 = vmatpush.bf16.msra.mxu1 %v9347_v22  ;;  %v9322_v22 = vld [vmem:[#allocation10 + $0x220] sm:$0xf] }
 0x4bb   :  { %v5765_v18 = vadd.f32 %v5764_v37, %v12918_v2  ;;  %6264 = vmatpush.bf16.msrb.mxu3 %v9707_v51  ;;  %v11039_v51 = vld [vmem:[#allocation10 + $0x354] sm:$0xf0] }
 0x4bc   :  { %6128 = vmatmul.bf16.gmra.mxu2 %v12658_v58 }
 0x4bd   :  { %v5794_v9 = vadd.f32 %v12915_v54, %v5765_v18  ;;  %6157 = vmatmul.bf16.gmra.mxu3 %v12710_v12  ;;  %6235 = vmatpush.bf16.msrb.mxu2 %v9515_v53  ;;  %v11045_v18 = vld [vmem:[#allocation10 + $0x384] sm:$0xf0]  ;;  %v9130_v53 = vld [vmem:[#allocation10 + $0xa0] sm:$0xf] }
 0x4be   :  { %v9491_v0 = vor.u32 %v11045_v18, %v9490_v57  ;;  %v9131_v8 = vor.u32 %v10955_v20, %v9130_v53  ;;  %v11003_v57 = vld [vmem:[#allocation10 + $0x234] sm:$0xf0]  ;;  %v9467_v18 = vor.u32 %v11039_v51, %v9466_v19  ;;  %v5837_v19 = vadd.f32 %v12938_v56, %v12947_v47 }
 0x4bf   :  { %v12954_v2 = vadd.f32 %v12920_v41, %v5794_v9  ;;  %v12956_v37 = vpop.f32.mrf.mxu0  ;;  %v12958_v54 = vpop.f32.mrf.mxu2  ;;  %v11093_v41 = vld [vmem:[#allocation10 + $0x504] sm:$0xf0] }
 0x4c0   :  { %v12962_v28 = vpop.f32.mrf.mxu3  ;;  %v9683_v6 = vor.u32 %v11093_v41, %v9682_v27  ;;  %6177 = vmatpush.bf16.msra.mxu0 %v9131_v8  ;;  %v11087_v27 = vld [vmem:[#allocation10 + $0x4d4] sm:$0xf0]  ;;  %v9323_v41 = vor.u32 %v11003_v57, %v9322_v22  ;;  %v9634_v8 = vld [vmem:[#allocation10 + $0x490] sm:$0xf]  ;;  %v11081_v22 = vld [vmem:[#allocation10 + $0x4a4] sm:$0xf0] }
 0x4c1   :  { %13645 = vst [vmem:[#allocation39_spill] sm:$0xff] %v12954_v2  ;;  %6236 = vmatpush.bf16.msrb.mxu2 %v9491_v0  ;;  %v9658_v2 = vld [vmem:[#allocation10 + $0x4c0] sm:$0xf] }
 0x4c2   :  { %v5863_v9 = vpop.f32.mrf.mxu1  ;;  %6070 = vmatmul.bf16.gmra.mxu0 %v12520_v45  ;;  %6265 = vmatpush.bf16.msrb.mxu3 %v9683_v6  ;;  %v9659_v13 = vor.u32 %v11087_v27, %v9658_v2  ;;  %v9082_v27 = vld [vmem:[#allocation10 + $0x40] sm:$0xf] }
 0x4c3   :  { %v5864_v34 = vadd.f32 %v5863_v9, %v5835_v60  ;;  %v9106_v60 = vld [vmem:[#allocation10 + $0x70] sm:$0xf]  ;;  %v10949_v9 = vld [vmem:[#allocation10 + $0x84] sm:$0xf0]  ;;  %6206 = vmatpush.bf16.msra.mxu1 %v9323_v41 }
 0x4c4   :  { %v9107_v0 = vor.u32 %v10949_v9, %v9106_v60  ;;  %v10943_v60 = vld [vmem:[#allocation10 + $0x54] sm:$0xf0]  ;;  %v9298_v41 = vld [vmem:[#allocation10 + $0x1f0] sm:$0xf]  ;;  %v10997_v9 = vld [vmem:[#allocation10 + $0x204] sm:$0xf0] }
 0x4c5   :  { %v5893_v61 = vadd.f32 %v12928_v26, %v5864_v34  ;;  %6094 = vmatmul.bf16.vlgmr.msrb.gmra.mxu1 %v12557_v5  ;;  %6237 = vmatpush.bf16.msrb.mxu2 %v9467_v18  ;;  %v9442_v26 = vld [vmem:[#allocation10 + $0x310] sm:$0xf]  ;;  %v11033_v34 = vld [vmem:[#allocation10 + $0x324] sm:$0xf0]  ;;  %v9635_v18 = vor.u32 %v11081_v22, %v9634_v8  ;;  %v9299_v56 = vor.u32 %v10997_v9, %v9298_v41 }
 0x4c6   :  { %6266 = vmatpush.bf16.msrb.mxu3 %v9659_v13  ;;  %6178 = vmatpush.bf16.msra.mxu0 %v9107_v0  ;;  %v9443_v2 = vor.u32 %v11033_v34, %v9442_v26  ;;  %v9058_v0 = vld [vmem:[#allocation10 + $0x10] sm:$0xf]  ;;  %v10937_v26 = vld [vmem:[#allocation10 + $0x24] sm:$0xf0] }
 0x4c7   :  { %v12968_v6 = vadd.f32 %v12930_v1, %v5893_v61  ;;  %v5841_v53 = vpop.f32.mrf.mxu0  ;;  %v5899_v20 = vpop.f32.mrf.mxu2  ;;  %v9083_v61 = vor.u32 %v10943_v60, %v9082_v27  ;;  %v9059_v34 = vor.u32 %v10937_v26, %v9058_v0  ;;  %6207 = vmatpush.bf16.msra.mxu1 %v9299_v56  ;;  %v9274_v60 = vld [vmem:[#allocation10 + $0x1c0] sm:$0xf] }
 0x4c8   :  { %v5928_v51 = vpop.f32.mrf.mxu3 }
 0x4c9   :  { %6238 = vmatpush.bf16.msrb.mxu2 %v9443_v2 }
 0x4ca   :  { %v5865_v57 = vpop.f32.mrf.mxu1  ;;  %6267 = vmatpush.bf16.msrb.mxu3 %v9635_v18  ;;  %6179 = vmatpush.bf16.msra.mxu0 %v9083_v61 }
 0x4cb   :  { %v5866_v1 = vadd.f32 %v5865_v57, %v5837_v19 }
 0x4cc   :  { %6133 = vmatmul.bf16.gmra.mxu2 %v12673_v33 }
 0x4cd   :  { %v5895_v13 = vadd.f32 %v12940_v7, %v5866_v1  ;;  %6162 = vmatmul.bf16.gmra.mxu3 %v12720_v44  ;;  %v5840_v7 = vadd.f32 %v12956_v37, %v12947_v47  ;;  %v10991_v1 = vld [vmem:[#allocation10 + $0x1d4] sm:$0xf0]  ;;  %v5842_v37 = vadd.f32 %v5841_v53, %v12947_v47 }
 0x4ce   :  { %6180 = vmatpush.bf16.msra.mxu0 %v9059_v34  ;;  %v10985_v34 = vld [vmem:[#allocation10 + $0x1a4] sm:$0xf0] }
 0x4cf   :  { %v12976_v8 = vadd.f32 %v12942_v25, %v5895_v13  ;;  %v5844_v19 = vpop.f32.mrf.mxu0  ;;  %v5902_v2 = vpop.f32.mrf.mxu2  ;;  %v9275_v25 = vor.u32 %v10991_v1, %v9274_v60 }
 0x4d0   :  { %v5931_v22 = vpop.f32.mrf.mxu3 }
 0x4d1   :  { %6208 = vmatpush.bf16.msra.mxu1 %v9275_v25  ;;  %v9228_v25 = vld [vmem:[#allocation10 + $0x178] sm:$0xf0] }
 0x4d2   :  { %v5868_v57 = vpop.f32.mrf.mxu1  ;;  %6075 = vmatmul.bf16.gmra.mxu0 %v12534_v10 }
 0x4d3   :  { %v5869_v18 = vadd.f32 %v5868_v57, %v5840_v7 }
 0x4d5   :  { %v5898_v27 = vadd.f32 %v12958_v54, %v5869_v18  ;;  %6099 = vmatmul.bf16.gmra.mxu1 %v12565_v31  ;;  %v9250_v54 = vld [vmem:[#allocation10 + $0x190] sm:$0xf] }
 0x4d6   :  { %v9251_v7 = vor.u32 %v10985_v34, %v9250_v54 }
 0x4d7   :  { %v12984_v61 = vadd.f32 %v12962_v28, %v5898_v27  ;;  %v5846_v13 = vpop.f32.mrf.mxu0  ;;  %v5904_v41 = vpop.f32.mrf.mxu2  ;;  %v5845_v27 = vadd.f32 %v5844_v19, %v12947_v47 }
 0x4d8   :  { %v5933_v9 = vpop.f32.mrf.mxu3  ;;  %6209 = vmatpush.bf16.msra.mxu1 %v9251_v7  ;;  %v5847_v55 = vadd.f32 %v5846_v13, %v12947_v47 }
 0x4da   :  { %v5870_v56 = vpop.f32.mrf.mxu1 }
 0x4db   :  { %v5871_v0 = vadd.f32 %v5870_v56, %v5842_v37 }
 0x4dc   :  { %6138 = vmatmul.bf16.gmra.mxu2 %v12688_v39 }
 0x4dd   :  { %v5900_v26 = vadd.f32 %v5899_v20, %v5871_v0  ;;  %6167 = vmatmul.bf16.gmra.mxu3 %v12733_v50  ;;  %v10976_v20 = vld [vmem:[#allocation10 + $0x164] sm:$0xf]  ;;  %v11171_v0 = vld [vmem:[#allocation10 + $0x774] sm:$0xf0]  ;;  %v9420_v50 = vld [vmem:[#allocation10 + $0x2f8] sm:$0xf0] }
 0x4de   :  { %v9231_v37 = vor.u32 %v10976_v20, %v9228_v25 }
 0x4df   :  { %v12989_v57 = vadd.f32 %v5928_v51, %v5900_v26  ;;  %v5849_v28 = vpop.f32.mrf.mxu0  ;;  %v12991_v18 = vpop.f32.mrf.mxu2  ;;  %v9994_v51 = vld [vmem:[#allocation10 + $0x760] sm:$0xf]  ;;  %v11024_v26 = vld [vmem:[#allocation10 + $0x2e4] sm:$0xf] }
 0x4e0   :  { %v12994_v53 = vpop.f32.mrf.mxu3  ;;  %6347 = vmatpush.bf16.msra.mxu2 %v9231_v37  ;;  %v9995_v7 = vor.u32 %v11171_v0, %v9994_v51  ;;  %v9204_v37 = vld [vmem:[#allocation10 + $0x148] sm:$0xf0]  ;;  %v13007_v51 = vperm.slane %v12944_v49, 3  ;;  %v11165_v49 = vld [vmem:[#allocation10 + $0x744] sm:$0xf0] }
 0x4e2   :  { %v5873_v60 = vpop.f32.mrf.mxu1  ;;  %6080 = vmatmul.bf16.gmra.mxu0 %v12548_v21 }
 0x4e3   :  { %v5874_v1 = vadd.f32 %v5873_v60, %v5845_v27  ;;  %v10186_v27 = vld [vmem:[#allocation10 + $0x8e0] sm:$0xf]  ;;  %v11219_v60 = vld [vmem:[#allocation10 + $0x8f4] sm:$0xf0]  ;;  %6289 = vmatpush.bf16.msrb.mxu0 %v9995_v7  ;;  %v5850_v7 = vadd.f32 %v5849_v28, %v12947_v47 }
 0x4e5   :  { %v5903_v56 = vadd.f32 %v5902_v2, %v5874_v1  ;;  %6104 = vmatmul.bf16.gmra.mxu1 %v12573_v11  ;;  %v9423_v2 = vor.u32 %v11024_v26, %v9420_v50  ;;  %v10187_v1 = vor.u32 %v11219_v60, %v10186_v27  ;;  %v11018_v26 = vld [vmem:[#allocation10 + $0x2b4] sm:$0xf] }
 0x4e7   :  { %v12998_v54 = vadd.f32 %v5931_v22, %v5903_v56  ;;  %v5851_v34 = vpop.f32.mrf.mxu0  ;;  %v13000_v19 = vpop.f32.mrf.mxu2  ;;  %6376 = vmatpush.bf16.msra.mxu3 %v9423_v2  ;;  %6318 = vmatpush.bf16.msrb.mxu1 %v10187_v1  ;;  %v10970_v22 = vld [vmem:[#allocation10 + $0x134] sm:$0xf]  ;;  %v9970_v2 = vld [vmem:[#allocation10 + $0x730] sm:$0xf] }
 0x4e8   :  { %v13003_v29 = vpop.f32.mrf.mxu3  ;;  %v9207_v56 = vor.u32 %v10970_v22, %v9204_v37  ;;  %v9971_v22 = vor.u32 %v11165_v49, %v9970_v2  ;;  %v5852_v2 = vadd.f32 %v5851_v34, %v12947_v47 }
 0x4ea   :  { %v5875_v20 = vpop.f32.mrf.mxu1  ;;  %6348 = vmatpush.bf16.msra.mxu2 %v9207_v56  ;;  %v10964_v56 = vld [vmem:[#allocation10 + $0x104] sm:$0xf]  ;;  %6290 = vmatpush.bf16.msrb.mxu0 %v9971_v22  ;;  %v10958_v22 = vld [vmem:[#allocation10 + $0xd4] sm:$0xf] }
 0x4eb   :  { %v5876_v25 = vadd.f32 %v5875_v20, %v5847_v55  ;;  %v9396_v55 = vld [vmem:[#allocation10 + $0x2c8] sm:$0xf0]  ;;  %v10162_v20 = vld [vmem:[#allocation10 + $0x8b0] sm:$0xf] }
 0x4ec   :  { %6239 = vmatmul.bf16.vlgmr.msrb.gmra.mxu2 %v12506_v52  ;;  %v9399_v1 = vor.u32 %v11018_v26, %v9396_v55  ;;  %v9946_v55 = vld [vmem:[#allocation10 + $0x700] sm:$0xf] }
 0x4ed   :  { %v5905_v44 = vadd.f32 %v5904_v41, %v5876_v25  ;;  %6268 = vmatmul.bf16.vlgmr.msrb.gmra.mxu3 %v12557_v5  ;;  %v9372_v5 = vld [vmem:[#allocation10 + $0x298] sm:$0xf0] }
 0x4ee   :  { %6377 = vmatpush.bf16.msra.mxu3 %v9399_v1 }
 0x4ef   :  { %v13010_v13 = vadd.f32 %v5933_v9, %v5905_v44  ;;  %v5950_v50 = vpop.f32.mrf.mxu0  ;;  %v6008_v0 = vpop.f32.mrf.mxu2  ;;  %v11213_v44 = vld [vmem:[#allocation10 + $0x8c4] sm:$0xf0] }
 0x4f0   :  { %v13014_v27 = vadd.f32 %v5950_v50, %v12968_v6  ;;  %v6009_v41 = vadd.f32 %v6008_v0, %v13007_v51  ;;  %v6037_v60 = vpop.f32.mrf.mxu3  ;;  %v10163_v28 = vor.u32 %v11213_v44, %v10162_v20  ;;  %v9180_v6 = vld [vmem:[#allocation10 + $0x118] sm:$0xf0]  ;;  %v11012_v0 = vld [vmem:[#allocation10 + $0x284] sm:$0xf] }
 0x4f1   :  { %v9183_v50 = vor.u32 %v10964_v56, %v9180_v6  ;;  %v9375_v26 = vor.u32 %v11012_v0, %v9372_v5  ;;  %v11006_v6 = vld [vmem:[#allocation10 + $0x254] sm:$0xf]  ;;  %v10952_v0 = vld [vmem:[#allocation10 + $0xa4] sm:$0xf] }
 0x4f2   :  { %v5878_v25 = vpop.f32.mrf.mxu1  ;;  %v13017_v9 = vadd.f32 %v6037_v60, %v6009_v41  ;;  %6181 = vmatmul.bf16.vlgmr.msra.gmra.mxu0 %v12370_v48  ;;  %6319 = vmatpush.bf16.msrb.mxu1 %v10163_v28  ;;  %v11159_v41 = vld [vmem:[#allocation10 + $0x714] sm:$0xf0] }
 0x4f3   :  { %v5879_v37 = vadd.f32 %v5878_v25, %v5850_v7  ;;  %6349 = vmatpush.bf16.msra.mxu2 %v9183_v50  ;;  %6378 = vmatpush.bf16.msra.mxu3 %v9375_v26  ;;  %v10138_v7 = vld [vmem:[#allocation10 + $0x880] sm:$0xf]  ;;  %v9947_v20 = vor.u32 %v11159_v41, %v9946_v55  ;;  %v11207_v25 = vld [vmem:[#allocation10 + $0x894] sm:$0xf0]  ;;  %v9348_v50 = vld [vmem:[#allocation10 + $0x268] sm:$0xf0] }
 0x4f4   :  { %v10139_v28 = vor.u32 %v11207_v25, %v10138_v7  ;;  %v9132_v26 = vld [vmem:[#allocation10 + $0xb8] sm:$0xf0] }
 0x4f5   :  { %v5908_v52 = vadd.f32 %v12991_v18, %v5879_v37  ;;  %6109 = vmatmul.bf16.gmra.mxu1 %v12586_v24  ;;  %v9156_v18 = vld [vmem:[#allocation10 + $0xe8] sm:$0xf0]  ;;  %6291 = vmatpush.bf16.msrb.mxu0 %v9947_v20  ;;  %v9135_v41 = vor.u32 %v10952_v0, %v9132_v26  ;;  %v9324_v7 = vld [vmem:[#allocation10 + $0x238] sm:$0xf0] }
 0x4f6   :  { %v9159_v56 = vor.u32 %v10958_v22, %v9156_v18  ;;  %6320 = vmatpush.bf16.msrb.mxu1 %v10139_v28  ;;  %v10114_v22 = vld [vmem:[#allocation10 + $0x850] sm:$0xf]  ;;  %v9300_v0 = vld [vmem:[#allocation10 + $0x208] sm:$0xf0] }
 0x4f7   :  { %v13023_v60 = vadd.f32 %v12994_v53, %v5908_v52  ;;  %v5952_v49 = vpop.f32.mrf.mxu0  ;;  %v6010_v1 = vpop.f32.mrf.mxu2  ;;  %v9351_v53 = vor.u32 %v11006_v6, %v9348_v50  ;;  %v10994_v6 = vld [vmem:[#allocation10 + $0x1f4] sm:$0xf] }
 0x4f8   :  { %v13027_v44 = vadd.f32 %v5952_v49, %v12976_v8  ;;  %v6011_v5 = vadd.f32 %v6010_v1, %v13007_v51  ;;  %v6039_v37 = vpop.f32.mrf.mxu3  ;;  %6350 = vmatpush.bf16.msra.mxu2 %v9159_v56  ;;  %v11000_v8 = vld [vmem:[#allocation10 + $0x224] sm:$0xf]  ;;  %v9922_v49 = vld [vmem:[#allocation10 + $0x6d0] sm:$0xf]  ;;  %v11153_v1 = vld [vmem:[#allocation10 + $0x6e4] sm:$0xf0] }
 0x4f9   :  { %6379 = vmatpush.bf16.msra.mxu3 %v9351_v53  ;;  %v9327_v20 = vor.u32 %v11000_v8, %v9324_v7  ;;  %v9923_v25 = vor.u32 %v11153_v1, %v9922_v49  ;;  %v9108_v56 = vld [vmem:[#allocation10 + $0x88] sm:$0xf0]  ;;  %v9898_v8 = vld [vmem:[#allocation10 + $0x6a0] sm:$0xf]  ;;  %v10940_v49 = vld [vmem:[#allocation10 + $0x44] sm:$0xf] }
 0x4fa   :  { %v5880_v52 = vpop.f32.mrf.mxu1  ;;  %v13030_v47 = vadd.f32 %v6039_v37, %v6011_v5  ;;  %v9084_v1 = vld [vmem:[#allocation10 + $0x58] sm:$0xf0] }
 0x4fb   :  { %v5881_v34 = vadd.f32 %v5880_v52, %v5852_v2  ;;  %v11201_v2 = vld [vmem:[#allocation10 + $0x864] sm:$0xf0]  ;;  %6292 = vmatpush.bf16.msrb.mxu0 %v9923_v25  ;;  %v6521_v25 = vmax.f32 %v12800_v14, 0.0 }
 0x4fc   :  { %6244 = vmatmul.bf16.gmra.mxu2 %v12520_v45  ;;  %v10115_v28 = vor.u32 %v11201_v2, %v10114_v22  ;;  %v9087_v2 = vor.u32 %v10940_v49, %v9084_v1  ;;  %v9252_v1 = vld [vmem:[#allocation10 + $0x1a8] sm:$0xf0] }
 0x4fd   :  { %v5910_v55 = vadd.f32 %v13000_v19, %v5881_v34  ;;  %6273 = vmatmul.bf16.gmra.mxu3 %v12565_v31  ;;  %6351 = vmatpush.bf16.msra.mxu2 %v9135_v41  ;;  %v10946_v19 = vld [vmem:[#allocation10 + $0x74] sm:$0xf] }
 0x4fe   :  { %6380 = vmatpush.bf16.msra.mxu3 %v9327_v20  ;;  %v9111_v34 = vor.u32 %v10946_v19, %v9108_v56  ;;  %6321 = vmatpush.bf16.msrb.mxu1 %v10115_v28  ;;  %v10988_v20 = vld [vmem:[#allocation10 + $0x1c4] sm:$0xf]  ;;  %v11141_v28 = vld [vmem:[#allocation10 + $0x684] sm:$0xf0]  ;;  %v10090_v56 = vld [vmem:[#allocation10 + $0x820] sm:$0xf] }
 0x4ff   :  { %v13036_v18 = vadd.f32 %v13003_v29, %v5910_v55  ;;  %v5955_v5 = vpop.f32.mrf.mxu0  ;;  %v6013_v37 = vpop.f32.mrf.mxu2  ;;  %v9303_v29 = vor.u32 %v10994_v6, %v9300_v0  ;;  %v11147_v55 = vld [vmem:[#allocation10 + $0x6b4] sm:$0xf0]  ;;  %v10934_v0 = vld [vmem:[#allocation10 + $0x14] sm:$0xf] }
 0x500   :  { %v13039_v50 = vadd.f32 %v5955_v5, %v12984_v61  ;;  %v6014_v52 = vadd.f32 %v6013_v37, %v13007_v51  ;;  %v6042_v53 = vpop.f32.mrf.mxu3  ;;  %v9899_v61 = vor.u32 %v11147_v55, %v9898_v8  ;;  %v9276_v5 = vld [vmem:[#allocation10 + $0x1d8] sm:$0xf0]  ;;  %v11195_v6 = vld [vmem:[#allocation10 + $0x834] sm:$0xf0] }
 0x501   :  { %6352 = vmatpush.bf16.msra.mxu2 %v9111_v34  ;;  %v9279_v37 = vor.u32 %v10988_v20, %v9276_v5  ;;  %v10091_v14 = vor.u32 %v11195_v6, %v10090_v56  ;;  %v11135_v5 = vld [vmem:[#allocation10 + $0x654] sm:$0xf0]  ;;  %v9826_v6 = vld [vmem:[#allocation10 + $0x610] sm:$0xf] }
 0x502   :  { %v5979_v26 = vpop.f32.mrf.mxu1  ;;  %v13042_v41 = vadd.f32 %v6042_v53, %v6014_v52  ;;  %6186 = vmatmul.bf16.gmra.mxu0 %v12384_v43  ;;  %6381 = vmatpush.bf16.msra.mxu3 %v9303_v29  ;;  %v10982_v29 = vld [vmem:[#allocation10 + $0x194] sm:$0xf] }
 0x503   :  { %v13045_v7 = vadd.f32 %v5979_v26, %v13014_v27  ;;  %6293 = vmatpush.bf16.msrb.mxu0 %v9899_v61  ;;  %v9874_v27 = vld [vmem:[#allocation10 + $0x670] sm:$0xf]  ;;  %v9060_v26 = vld [vmem:[#allocation10 + $0x28] sm:$0xf0]  ;;  %6322 = vmatpush.bf16.msrb.mxu1 %v10091_v14 }
 0x504   :  { %v9875_v52 = vor.u32 %v11141_v28, %v9874_v27  ;;  %v9063_v49 = vor.u32 %v10934_v0, %v9060_v26 }
 0x505   :  { %v13583_v22 = vmax.f32 %v13045_v7, 0.0  ;;  %6210 = vmatmul.bf16.vlgmr.msra.gmra.mxu1 %v12421_v63  ;;  %6353 = vmatpush.bf16.msra.mxu2 %v9087_v2  ;;  %v9850_v2 = vld [vmem:[#allocation10 + $0x640] sm:$0xf] }
 0x506   :  { %6382 = vmatpush.bf16.msra.mxu3 %v9279_v37  ;;  %v9851_v28 = vor.u32 %v11135_v5, %v9850_v2  ;;  %v6533_v2 = vmax.f32 %v12818_v23, 0.0  ;;  %v10042_v5 = vld [vmem:[#allocation10 + $0x7c0] sm:$0xf] }
 0x507   :  { %v6569_v19 = vmax.f32 %v6521_v25, %v13583_v22  ;;  %v5957_v53 = vpop.f32.mrf.mxu0  ;;  %v6015_v34 = vpop.f32.mrf.mxu2  ;;  %6294 = vmatpush.bf16.msrb.mxu0 %v9875_v52  ;;  %v9255_v25 = vor.u32 %v10982_v29, %v9252_v1  ;;  %v11129_v52 = vld [vmem:[#allocation10 + $0x624] sm:$0xf0] }
 0x508   :  { %v5958_v8 = vadd.f32 %v5957_v53, %v12989_v57  ;;  %v6016_v55 = vadd.f32 %v6015_v34, %v13007_v51  ;;  %v6044_v61 = vpop.f32.mrf.mxu3  ;;  %v6527_v57 = vmax.f32 %v12809_v35, 0.0  ;;  %v10066_v34 = vld [vmem:[#allocation10 + $0x7f0] sm:$0xf]  ;;  %v9827_v14 = vor.u32 %v11129_v52, %v9826_v6 }
 0x509   :  { %6354 = vmatpush.bf16.msra.mxu2 %v9063_v49 }
 0x50a   :  { %v5981_v20 = vpop.f32.mrf.mxu1  ;;  %v13055_v27 = vadd.f32 %v6044_v61, %v6016_v55  ;;  %6383 = vmatpush.bf16.msra.mxu3 %v9255_v25 }
 0x50b   :  { %v13058_v37 = vadd.f32 %v5981_v20, %v13027_v44  ;;  %6295 = vmatpush.bf16.msrb.mxu0 %v9851_v28  ;;  %v11189_v44 = vld [vmem:[#allocation10 + $0x804] sm:$0xf0]  ;;  %v11183_v28 = vld [vmem:[#allocation10 + $0x7d4] sm:$0xf0] }
 0x50c   :  { %6249 = vmatmul.bf16.gmra.mxu2 %v12534_v10  ;;  %v10067_v29 = vor.u32 %v11189_v44, %v10066_v34  ;;  %v10043_v52 = vor.u32 %v11183_v28, %v10042_v5 }
 0x50d   :  { %v13582_v56 = vmax.f32 %v13058_v37, 0.0  ;;  %6278 = vmatmul.bf16.gmra.mxu3 %v12573_v11 }
 0x50e   :  { %6323 = vmatpush.bf16.msrb.mxu1 %v10067_v29  ;;  %v10018_v29 = vld [vmem:[#allocation10 + $0x790] sm:$0xf] }
 0x50f   :  { %v6573_v53 = vmax.f32 %v6527_v57, %v13582_v56  ;;  %v5960_v0 = vpop.f32.mrf.mxu0  ;;  %v6018_v26 = vpop.f32.mrf.mxu2  ;;  %6296 = vmatpush.bf16.msrb.mxu0 %v9827_v14  ;;  %v11198_v56 = vld [vmem:[#allocation10 + $0x854] sm:$0xf] }
 0x510   :  { %v5961_v35 = vadd.f32 %v5960_v0, %v12998_v54  ;;  %v6019_v61 = vadd.f32 %v6018_v26, %v13007_v51  ;;  %v6047_v49 = vpop.f32.mrf.mxu3  ;;  %v6539_v0 = vmax.f32 %v12826_v36, 0.0  ;;  %v11168_v36 = vld [vmem:[#allocation10 + $0x764] sm:$0xf] }
 0x511   :  { %v13066_v55 = vpack.c.bf16 %v6573_v53, %v6569_v19 }
 0x512   :  { %v5984_v1 = vpop.f32.mrf.mxu1  ;;  %v13070_v20 = vadd.f32 %v6047_v49, %v6019_v61  ;;  %6191 = vmatmul.bf16.gmra.mxu0 %v12398_v46  ;;  %6324 = vmatpush.bf16.msrb.mxu1 %v10043_v52  ;;  %v11177_v61 = vld [vmem:[#allocation10 + $0x7a4] sm:$0xf0] }
 0x513   :  { %v13073_v25 = vadd.f32 %v5984_v1, %v13039_v50 }
 0x515   :  { %v13581_v19 = vmax.f32 %v13073_v25, 0.0  ;;  %6215 = vmatmul.bf16.gmra.mxu1 %v12429_v42 }
 0x517   :  { %v6577_v54 = vmax.f32 %v6533_v2, %v13581_v19  ;;  %v5962_v57 = vpop.f32.mrf.mxu0  ;;  %v6020_v6 = vpop.f32.mrf.mxu2  ;;  %v10019_v2 = vor.u32 %v11177_v61, %v10018_v29  ;;  %v9924_v19 = vld [vmem:[#allocation10 + $0x6e8] sm:$0xf0] }
 0x518   :  { %v5963_v53 = vadd.f32 %v5962_v57, %v13010_v13  ;;  %v6021_v50 = vadd.f32 %v6020_v6, %v13007_v51  ;;  %v6049_v34 = vpop.f32.mrf.mxu3  ;;  %v9996_v57 = vld [vmem:[#allocation10 + $0x778] sm:$0xf0] }
 0x519   :  { %6325 = vmatpush.bf16.msrb.mxu1 %v10019_v2 }
 0x51a   :  { %v5986_v44 = vpop.f32.mrf.mxu1  ;;  %v13083_v23 = vadd.f32 %v6049_v34, %v6021_v50  ;;  %v9999_v50 = vor.u32 %v11168_v36, %v9996_v57  ;;  %v11216_v36 = vld [vmem:[#allocation10 + $0x8e4] sm:$0xf] }
 0x51b   :  { %v13085_v14 = vadd.f32 %v5986_v44, %v5958_v8 }
 0x51c   :  { %6254 = vmatmul.bf16.gmra.mxu2 %v12548_v21 }
 0x51d   :  { %v13580_v26 = vmax.f32 %v13085_v14, 0.0  ;;  %6283 = vmatmul.bf16.gmra.mxu3 %v12586_v24  ;;  %6463 = vmatpush.bf16.msrb.mxu2 %v9999_v50  ;;  %v11120_v50 = vld [vmem:[#allocation10 + $0x5e4] sm:$0xf] }
 0x51f   :  { %v6581_v13 = vmax.f32 %v6539_v0, %v13580_v26  ;;  %v5965_v49 = vpop.f32.mrf.mxu0  ;;  %v6023_v1 = vpop.f32.mrf.mxu2  ;;  %v6545_v0 = vmax.f32 %v12834_v62, 0.0  ;;  %v11072_v62 = vld [vmem:[#allocation10 + $0x464] sm:$0xf] }
 0x520   :  { %v5966_v5 = vadd.f32 %v5965_v49, %v13023_v60  ;;  %v6024_v8 = vadd.f32 %v6023_v1, %v13007_v51  ;;  %v6052_v28 = vpop.f32.mrf.mxu3 }
 0x521   :  { %v13095_v6 = vpack.c.bf16 %v6581_v13, %v6577_v54 }
 0x522   :  { %v5989_v52 = vpop.f32.mrf.mxu1  ;;  %v13097_v34 = vadd.f32 %v6052_v28, %v6024_v8  ;;  %6196 = vmatmul.bf16.gmra.mxu0 %v12412_v17  ;;  %v9612_v28 = vld [vmem:[#allocation10 + $0x478] sm:$0xf0] }
 0x523   :  { %v13099_v44 = vadd.f32 %v5989_v52, %v5961_v35  ;;  %v9615_v57 = vor.u32 %v11072_v62, %v9612_v28  ;;  %v10188_v52 = vld [vmem:[#allocation10 + $0x8f8] sm:$0xf0]  ;;  %v10164_v28 = vld [vmem:[#allocation10 + $0x8c8] sm:$0xf0] }
 0x525   :  { %v13578_v60 = vmax.f32 %v13099_v44, 0.0  ;;  %6220 = vmatmul.bf16.gmra.mxu1 %v12437_v15  ;;  %6405 = vmatpush.bf16.msra.mxu0 %v9615_v57 }
 0x527   :  { %v6585_v54 = vmax.f32 %v6545_v0, %v13578_v60  ;;  %v5967_v13 = vpop.f32.mrf.mxu0  ;;  %v6025_v29 = vpop.f32.mrf.mxu2  ;;  %v9804_v0 = vld [vmem:[#allocation10 + $0x5f8] sm:$0xf0]  ;;  %v6551_v60 = vmax.f32 %v12844_v16, 0.0  ;;  %v11210_v16 = vld [vmem:[#allocation10 + $0x8b4] sm:$0xf] }
 0x528   :  { %v13108_v61 = vadd.f32 %v5967_v13, %v13036_v18  ;;  %v6026_v35 = vadd.f32 %v6025_v29, %v13007_v51  ;;  %v6054_v49 = vpop.f32.mrf.mxu3  ;;  %v10191_v51 = vor.u32 %v11216_v36, %v10188_v52  ;;  %v9807_v13 = vor.u32 %v11120_v50, %v9804_v0  ;;  %v11162_v29 = vld [vmem:[#allocation10 + $0x734] sm:$0xf]  ;;  %v9948_v0 = vld [vmem:[#allocation10 + $0x718] sm:$0xf0] }
 0x529   :  { %v10167_v52 = vor.u32 %v11210_v16, %v10164_v28  ;;  %v9780_v16 = vld [vmem:[#allocation10 + $0x5c8] sm:$0xf0] }
 0x52a   :  { %v5991_v1 = vpop.f32.mrf.mxu1  ;;  %v13111_v2 = vadd.f32 %v6054_v49, %v6026_v35  ;;  %v9972_v35 = vld [vmem:[#allocation10 + $0x748] sm:$0xf0]  ;;  %6492 = vmatpush.bf16.msrb.mxu3 %v10191_v51  ;;  %6434 = vmatpush.bf16.msra.mxu1 %v9807_v13  ;;  %v11204_v51 = vld [vmem:[#allocation10 + $0x884] sm:$0xf] }
 0x52b   :  { %v13113_v8 = vadd.f32 %v5991_v1, %v5963_v53  ;;  %v9975_v53 = vor.u32 %v11162_v29, %v9972_v35  ;;  %v13648_v13 = vld [vmem:[#allocation34_spill] sm:$0xff] }
 0x52c   :  { %6355 = vmatmul.bf16.vlgmr.msra.gmra.mxu2 %v12370_v48  ;;  %v6557_v29 = vmax.f32 %v13648_v13, 0.0  ;;  %v11150_v13 = vld [vmem:[#allocation10 + $0x6d4] sm:$0xf] }
 0x52d   :  { %13646 = vst [vmem:[#allocation41_spill] sm:$0xff] %v13113_v8  ;;  %v13579_v18 = vmax.f32 %v13113_v8, 0.0  ;;  %6384 = vmatmul.bf16.vlgmr.msra.gmra.mxu3 %v12421_v63  ;;  %6464 = vmatpush.bf16.msrb.mxu2 %v9975_v53  ;;  %v9588_v53 = vld [vmem:[#allocation10 + $0x448] sm:$0xf0] }
 0x52e   :  { %6493 = vmatpush.bf16.msrb.mxu3 %v10167_v52 }
 0x52f   :  { %v6589_v49 = vmax.f32 %v6551_v60, %v13579_v18  ;;  %v6066_v1 = vpop.f32.mrf.mxu0  ;;  %v13121_v62 = vpop.f32.mrf.mxu2  ;;  %v11156_v60 = vld [vmem:[#allocation10 + $0x704] sm:$0xf] }
 0x530   :  { %v13124_v48 = vadd.f32 %v6066_v1, %v13017_v9  ;;  %v13126_v36 = vpop.f32.mrf.mxu3  ;;  %v11066_v9 = vld [vmem:[#allocation10 + $0x434] sm:$0xf]  ;;  %v9951_v1 = vor.u32 %v11156_v60, %v9948_v0  ;;  %v11060_v0 = vld [vmem:[#allocation10 + $0x404] sm:$0xf] }
 0x531   :  { %v13128_v63 = vpack.c.bf16 %v6589_v49, %v6585_v54  ;;  %v9591_v54 = vor.u32 %v11066_v9, %v9588_v53  ;;  %v11114_v49 = vld [vmem:[#allocation10 + $0x5b4] sm:$0xf]  ;;  %v9564_v9 = vld [vmem:[#allocation10 + $0x418] sm:$0xf0]  ;;  %v9927_v53 = vor.u32 %v11150_v13, %v9924_v19 }
 0x532   :  { %v5994_v57 = vpop.f32.mrf.mxu1  ;;  %6297 = vmatmul.bf16.vlgmr.msrb.gmra.mxu0 %v12643_v40  ;;  %v9783_v52 = vor.u32 %v11114_v49, %v9780_v16  ;;  %6465 = vmatpush.bf16.msrb.mxu2 %v9951_v1  ;;  %v9756_v49 = vld [vmem:[#allocation10 + $0x598] sm:$0xf0]  ;;  %v10116_v16 = vld [vmem:[#allocation10 + $0x868] sm:$0xf0] }
 0x533   :  { %v13130_v50 = vadd.f32 %v5994_v57, %v5966_v5  ;;  %v10140_v5 = vld [vmem:[#allocation10 + $0x898] sm:$0xf0]  ;;  %6406 = vmatpush.bf16.msra.mxu0 %v9591_v54 }
 0x534   :  { %v10143_v57 = vor.u32 %v11204_v51, %v10140_v5  ;;  %6435 = vmatpush.bf16.msra.mxu1 %v9783_v52  ;;  %v9567_v51 = vor.u32 %v11060_v0, %v9564_v9  ;;  %v13649_v52 = vld [vmem:[#allocation35_spill] sm:$0xff]  ;;  %v10092_v13 = vld [vmem:[#allocation10 + $0x838] sm:$0xf0] }
 0x535   :  { %13647 = vst [vmem:[#allocation40_spill] sm:$0xff] %v13130_v50  ;;  %v13584_v35 = vmax.f32 %v13130_v50, 0.0  ;;  %6225 = vmatmul.bf16.gmra.mxu1 %v13637_v3  ;;  %v11192_v50 = vld [vmem:[#allocation10 + $0x824] sm:$0xf]  ;;  %v6563_v8 = vmax.f32 %v13649_v52, 0.0 }
 0x536   :  { %6494 = vmatpush.bf16.msrb.mxu3 %v10143_v57  ;;  %6466 = vmatpush.bf16.msrb.mxu2 %v9927_v53  ;;  %v9540_v0 = vld [vmem:[#allocation10 + $0x3e8] sm:$0xf0] }
 0x537   :  { %v6593_v28 = vmax.f32 %v6557_v29, %v13584_v35  ;;  %v6068_v18 = vpop.f32.mrf.mxu0  ;;  %v13138_v26 = vpop.f32.mrf.mxu2  ;;  %v11108_v29 = vld [vmem:[#allocation10 + $0x584] sm:$0xf]  ;;  %v10119_v35 = vor.u32 %v11198_v56, %v10116_v16  ;;  %6407 = vmatpush.bf16.msra.mxu0 %v9567_v51  ;;  %v11138_v51 = vld [vmem:[#allocation10 + $0x674] sm:$0xf] }
 0x538   :  { %v13141_v22 = vadd.f32 %v6068_v18, %v13030_v47  ;;  %v13143_v60 = vpop.f32.mrf.mxu3  ;;  %v9759_v5 = vor.u32 %v11108_v29, %v9756_v49  ;;  %v11144_v47 = vld [vmem:[#allocation10 + $0x6a4] sm:$0xf]  ;;  %v9900_v18 = vld [vmem:[#allocation10 + $0x6b8] sm:$0xf0]  ;;  %v10095_v29 = vor.u32 %v11192_v50, %v10092_v13  ;;  %v9876_v49 = vld [vmem:[#allocation10 + $0x688] sm:$0xf0] }
 0x539   :  { %v9903_v19 = vor.u32 %v11144_v47, %v9900_v18  ;;  %v9732_v47 = vld [vmem:[#allocation10 + $0x568] sm:$0xf0]  ;;  %v9879_v18 = vor.u32 %v11138_v51, %v9876_v49  ;;  %v9516_v13 = vld [vmem:[#allocation10 + $0x3b8] sm:$0xf0]  ;;  %v11042_v49 = vld [vmem:[#allocation10 + $0x374] sm:$0xf] }
 0x53a   :  { %v5996_v1 = vpop.f32.mrf.mxu1  ;;  %6436 = vmatpush.bf16.msra.mxu1 %v9759_v5  ;;  %6495 = vmatpush.bf16.msrb.mxu3 %v10119_v35 }
 0x53b   :  { %v13146_v54 = vadd.f32 %v5996_v1, %v13108_v61  ;;  %v11054_v61 = vld [vmem:[#allocation10 + $0x3d4] sm:$0xf]  ;;  %6467 = vmatpush.bf16.msrb.mxu2 %v9903_v19  ;;  %v11048_v19 = vld [vmem:[#allocation10 + $0x3a4] sm:$0xf] }
 0x53c   :  { %6360 = vmatmul.bf16.gmra.mxu2 %v12384_v43  ;;  %v9543_v9 = vor.u32 %v11054_v61, %v9540_v0  ;;  %v11186_v43 = vld [vmem:[#allocation10 + $0x7f4] sm:$0xf]  ;;  %v9519_v0 = vor.u32 %v11048_v19, %v9516_v13  ;;  %v11096_v13 = vld [vmem:[#allocation10 + $0x524] sm:$0xf] }
 0x53d   :  { %v13587_v57 = vmax.f32 %v13146_v54, 0.0  ;;  %6389 = vmatmul.bf16.gmra.mxu3 %v12429_v42  ;;  %v11102_v42 = vld [vmem:[#allocation10 + $0x554] sm:$0xf] }
 0x53e   :  { %6408 = vmatpush.bf16.msra.mxu0 %v9543_v9  ;;  %v9735_v50 = vor.u32 %v11102_v42, %v9732_v47  ;;  %6496 = vmatpush.bf16.msrb.mxu3 %v10095_v29  ;;  %v11132_v9 = vld [vmem:[#allocation10 + $0x644] sm:$0xf]  ;;  %v9492_v42 = vld [vmem:[#allocation10 + $0x388] sm:$0xf0] }
 0x53f   :  { %v6597_v56 = vmax.f32 %v6563_v8, %v13587_v57  ;;  %v6071_v53 = vpop.f32.mrf.mxu0  ;;  %v13154_v1 = vpop.f32.mrf.mxu2  ;;  %v10068_v8 = vld [vmem:[#allocation10 + $0x808] sm:$0xf0]  ;;  %6468 = vmatpush.bf16.msrb.mxu2 %v9879_v18  ;;  %v11180_v57 = vld [vmem:[#allocation10 + $0x7c4] sm:$0xf] }
 0x540   :  { %v13157_v16 = vadd.f32 %v6071_v53, %v13042_v41  ;;  %v13159_v5 = vpop.f32.mrf.mxu3  ;;  %v10071_v41 = vor.u32 %v11186_v43, %v10068_v8  ;;  %6437 = vmatpush.bf16.msra.mxu1 %v9735_v50  ;;  %v9852_v53 = vld [vmem:[#allocation10 + $0x658] sm:$0xf0]  ;;  %v9495_v43 = vor.u32 %v11042_v49, %v9492_v42  ;;  %v11126_v8 = vld [vmem:[#allocation10 + $0x614] sm:$0xf]  ;;  %v9444_v42 = vld [vmem:[#allocation10 + $0x328] sm:$0xf0] }
 0x541   :  { %v13161_v35 = vpack.c.bf16 %v6597_v56, %v6593_v28  ;;  %v9855_v28 = vor.u32 %v11132_v9, %v9852_v53  ;;  %v10044_v56 = vld [vmem:[#allocation10 + $0x7d8] sm:$0xf0]  ;;  %v10020_v53 = vld [vmem:[#allocation10 + $0x7a8] sm:$0xf0] }
 0x542   :  { %v6095_v52 = vpop.f32.mrf.mxu1  ;;  %6302 = vmatmul.bf16.gmra.mxu0 %v12658_v58  ;;  %6497 = vmatpush.bf16.msrb.mxu3 %v10071_v41  ;;  %v10047_v29 = vor.u32 %v11180_v57, %v10044_v56  ;;  %v11036_v41 = vld [vmem:[#allocation10 + $0x344] sm:$0xf]  ;;  %v9468_v57 = vld [vmem:[#allocation10 + $0x358] sm:$0xf0] }
 0x543   :  { %v6096_v61 = vadd.f32 %v6095_v52, %v13124_v48  ;;  %6409 = vmatpush.bf16.msra.mxu0 %v9519_v0  ;;  %6469 = vmatpush.bf16.msrb.mxu2 %v9855_v28  ;;  %v9828_v52 = vld [vmem:[#allocation10 + $0x628] sm:$0xf0]  ;;  %v9471_v28 = vor.u32 %v11036_v41, %v9468_v57 }
 0x544   :  { %v9831_v0 = vor.u32 %v11126_v8, %v9828_v52 }
 0x545   :  { %v6125_v51 = vadd.f32 %v13121_v62, %v6096_v61  ;;  %6326 = vmatmul.bf16.vlgmr.msrb.gmra.mxu1 %v12700_v30  ;;  %v11174_v62 = vld [vmem:[#allocation10 + $0x794] sm:$0xf]  ;;  %v9708_v61 = vld [vmem:[#allocation10 + $0x538] sm:$0xf0] }
 0x546   :  { %6498 = vmatpush.bf16.msrb.mxu3 %v10047_v29  ;;  %v10023_v56 = vor.u32 %v11174_v62, %v10020_v53  ;;  %v6522_v29 = vmax.f32 %v12883_v4, 0.0 }
 0x547   :  { %v13168_v48 = vadd.f32 %v13126_v36, %v6125_v51  ;;  %v6073_v47 = vpop.f32.mrf.mxu0  ;;  %v13170_v18 = vpop.f32.mrf.mxu2  ;;  %6410 = vmatpush.bf16.msra.mxu0 %v9495_v43  ;;  %v9711_v36 = vor.u32 %v11096_v13, %v9708_v61  ;;  %6470 = vmatpush.bf16.msrb.mxu2 %v9831_v0  ;;  %v11090_v13 = vld [vmem:[#allocation10 + $0x4f4] sm:$0xf]  ;;  %v9684_v61 = vld [vmem:[#allocation10 + $0x508] sm:$0xf0] }
 0x548   :  { %v6074_v50 = vadd.f32 %v6073_v47, %v13055_v27  ;;  %v6160_v19 = vpop.f32.mrf.mxu3  ;;  %v11030_v27 = vld [vmem:[#allocation10 + $0x314] sm:$0xf] }
 0x549   :  { %6438 = vmatpush.bf16.msra.mxu1 %v9711_v36  ;;  %v13595_v43 = vmax.f32 %v13168_v48, 0.0 }
 0x54a   :  { %v6097_v9 = vpop.f32.mrf.mxu1  ;;  %6499 = vmatpush.bf16.msrb.mxu3 %v10023_v56 }
 0x54b   :  { %v6098_v51 = vadd.f32 %v6097_v9, %v13141_v22  ;;  %6411 = vmatpush.bf16.msra.mxu0 %v9471_v28  ;;  %v9447_v22 = vor.u32 %v11030_v27, %v9444_v42  ;;  %v9687_v9 = vor.u32 %v11090_v13, %v9684_v61  ;;  %v11084_v28 = vld [vmem:[#allocation10 + $0x4c4] sm:$0xf]  ;;  %v9636_v13 = vld [vmem:[#allocation10 + $0x4a8] sm:$0xf0]  ;;  %v6540_v61 = vmax.f32 %v12904_v38, 0.0 }
 0x54c   :  { %6365 = vmatmul.bf16.gmra.mxu2 %v12398_v46 }
 0x54d   :  { %v6127_v49 = vadd.f32 %v13138_v26, %v6098_v51  ;;  %6394 = vmatmul.bf16.gmra.mxu3 %v12437_v15  ;;  %v6528_v26 = vmax.f32 %v12891_v32, 0.0  ;;  %6439 = vmatpush.bf16.msra.mxu1 %v9687_v9 }
 0x54f   :  { %v13179_v47 = vadd.f32 %v13143_v60, %v6127_v49  ;;  %v6076_v8 = vpop.f32.mrf.mxu0  ;;  %v6134_v52 = vpop.f32.mrf.mxu2  ;;  %6412 = vmatpush.bf16.msra.mxu0 %v9447_v22  ;;  %v6570_v60 = vmax.f32 %v6522_v29, %v13595_v43  ;;  %v9660_v49 = vld [vmem:[#allocation10 + $0x4d8] sm:$0xf0]  ;;  %v6534_v29 = vmax.f32 %v12899_v59, 0.0 }
 0x550   :  { %v6077_v62 = vadd.f32 %v6076_v8, %v13070_v20  ;;  %v6163_v15 = vpop.f32.mrf.mxu3  ;;  %v9663_v27 = vor.u32 %v11084_v28, %v9660_v49 }
 0x551   :  { %v13594_v46 = vmax.f32 %v13179_v47, 0.0 }
 0x552   :  { %v6100_v0 = vpop.f32.mrf.mxu1  ;;  %6307 = vmatmul.bf16.gmra.mxu0 %v12673_v33  ;;  %6440 = vmatpush.bf16.msra.mxu1 %v9663_v27 }
 0x553   :  { %v6574_v4 = vmax.f32 %v6528_v26, %v13594_v46  ;;  %v6101_v36 = vadd.f32 %v6100_v0, %v13157_v16  ;;  %v11078_v26 = vld [vmem:[#allocation10 + $0x494] sm:$0xf] }
 0x555   :  { %v13191_v32 = vpack.c.bf16 %v6574_v4, %v6570_v60  ;;  %v6130_v20 = vadd.f32 %v13154_v1, %v6101_v36  ;;  %6331 = vmatmul.bf16.gmra.mxu1 %v12710_v12  ;;  %v13650_v4 = vld [vmem:[#allocation33_spill] sm:$0xff] }
 0x557   :  { %v13196_v53 = vadd.f32 %v13159_v5, %v6130_v20  ;;  %v6078_v41 = vpop.f32.mrf.mxu0  ;;  %v6136_v57 = vpop.f32.mrf.mxu2 }
 0x558   :  { %v6079_v51 = vadd.f32 %v6078_v41, %v13083_v23  ;;  %v6165_v56 = vpop.f32.mrf.mxu3 }
 0x559   :  { %v13593_v1 = vmax.f32 %v13196_v53, 0.0 }
 0x55a   :  { %v6102_v16 = vpop.f32.mrf.mxu1 }
 0x55b   :  { %v6103_v42 = vadd.f32 %v6102_v16, %v6074_v50  ;;  %v6578_v59 = vmax.f32 %v6534_v29, %v13593_v1 }
 0x55c   :  { %6370 = vmatmul.bf16.gmra.mxu2 %v12412_v17  ;;  %v9639_v17 = vor.u32 %v11078_v26, %v9636_v13 }
 0x55d   :  { %v6132_v22 = vadd.f32 %v13170_v18, %v6103_v42  ;;  %6399 = vmatmul.bf16.gmra.mxu3 %v13637_v3 }
 0x55e   :  { %6441 = vmatpush.bf16.msra.mxu1 %v9639_v17  ;;  %v13653_v17 = vld [vmem:[#allocation48_spill] sm:$0xff] }
 0x55f   :  { %v13203_v5 = vadd.f32 %v6160_v19, %v6132_v22  ;;  %v6081_v23 = vpop.f32.mrf.mxu0  ;;  %v6139_v8 = vpop.f32.mrf.mxu2 }
 0x560   :  { %v6082_v18 = vadd.f32 %v6081_v23, %v13097_v34  ;;  %v6168_v0 = vpop.f32.mrf.mxu3  ;;  %v13652_v23 = vld [vmem:[#allocation36_spill] sm:$0xff] }
 0x561   :  { %v13592_v50 = vmax.f32 %v13203_v5, 0.0  ;;  %v6552_v26 = vmax.f32 %v13652_v23, 0.0  ;;  %v10234_v23 = vld [vmem:[#allocation13 + $0x50] sm:$0xf] }
 0x562   :  { %v6105_v9 = vpop.f32.mrf.mxu1  ;;  %6312 = vmatmul.bf16.gmra.mxu0 %v12688_v39 }
 0x563   :  { %v6106_v3 = vadd.f32 %v6105_v9, %v6077_v62  ;;  %v6582_v19 = vmax.f32 %v6540_v61, %v13592_v50  ;;  %v11235_v61 = vld [vmem:[#allocation13 + $0x74] sm:$0xf0]  ;;  %v10346_v50 = vld [vmem:[#allocation13 + $0x130] sm:$0xf] }
 0x565   :  { %v6135_v60 = vadd.f32 %v6134_v52, %v6106_v3  ;;  %6336 = vmatmul.bf16.gmra.mxu1 %v13650_v4  ;;  %v13215_v38 = vpack.c.bf16 %v6582_v19, %v6578_v59  ;;  %v13654_v59 = vld [vmem:[#allocation32_spill] sm:$0xff] }
 0x567   :  { %v13217_v36 = vadd.f32 %v6163_v15, %v6135_v60  ;;  %v6083_v34 = vpop.f32.mrf.mxu0  ;;  %v6141_v20 = vpop.f32.mrf.mxu2  ;;  %v13651_v15 = vld [vmem:[#allocation37_spill] sm:$0xff]  ;;  %v10242_v60 = vld [vmem:[#allocation13 + $0x60] sm:$0xf] }
 0x568   :  { %v6084_v62 = vadd.f32 %v6083_v34, %v13111_v2  ;;  %v6170_v41 = vpop.f32.mrf.mxu3  ;;  %v6546_v29 = vmax.f32 %v13651_v15, 0.0  ;;  %v11233_v34 = vld [vmem:[#allocation13 + $0x64] sm:$0xf0] }
 0x569   :  { %v13589_v52 = vmax.f32 %v13217_v36, 0.0 }
 0x56a   :  { %v6107_v28 = vpop.f32.mrf.mxu1 }
 0x56b   :  { %v6108_v49 = vadd.f32 %v6107_v28, %v6079_v51 }
 0x56c   :  { %6471 = vmatmul.bf16.vlgmr.msrb.gmra.mxu2 %v12643_v40 }
 0x56d   :  { %v6137_v16 = vadd.f32 %v6136_v57, %v6108_v49  ;;  %6500 = vmatmul.bf16.vlgmr.msrb.gmra.mxu3 %v12700_v30  ;;  %v10250_v57 = vld [vmem:[#allocation13 + $0x70] sm:$0xf] }
 0x56e   :  { %v10251_v30 = vor.u32 %v11235_v61, %v10250_v57  ;;  %v13246_v57 = vld [vmem:[#allocation11] sm:$0x3f] }
 0x56f   :  { %v13223_v27 = vadd.f32 %v6165_v56, %v6137_v16  ;;  %v6182_v42 = vpop.f32.mrf.mxu0  ;;  %v6240_v22 = vpop.f32.mrf.mxu2  ;;  %v6586_v56 = vmax.f32 %v6546_v29, %v13589_v52  ;;  %v13249_v61 = vperm.slane %v13246_v57, 4  ;;  %v10210_v52 = vld [vmem:[#allocation13 + $0x20] sm:$0xf] }
 0x570   :  { %v13228_v13 = vpop.f32.mrf.mxu3  ;;  %7007 = vmatpush.bf16.msrb.mxu0 %v10251_v30 }
 0x571   :  { %v13588_v2 = vmax.f32 %v13223_v27, 0.0 }
 0x572   :  { %v6110_v51 = vpop.f32.mrf.mxu1  ;;  %6413 = vmatmul.bf16.vlgmr.msra.gmra.mxu0 %v13653_v17  ;;  %v11229_v17 = vld [vmem:[#allocation13 + $0x44] sm:$0xf0] }
 0x573   :  { %v6111_v40 = vadd.f32 %v6110_v51, %v6082_v18  ;;  %v6590_v9 = vmax.f32 %v6552_v26, %v13588_v2  ;;  %v10243_v18 = vor.u32 %v11233_v34, %v10242_v60  ;;  %v13657_v60 = vld [vmem:[#allocation38_spill] sm:$0xff] }
 0x574   :  { %v6558_v34 = vmax.f32 %v13657_v60, 0.0 }
 0x575   :  { %v6140_v3 = vadd.f32 %v6139_v8, %v6111_v40  ;;  %6341 = vmatmul.bf16.gmra.mxu1 %v13654_v59  ;;  %v13236_v19 = vpack.c.bf16 %v6590_v9, %v6586_v56  ;;  %7008 = vmatpush.bf16.msrb.mxu0 %v10243_v18  ;;  %v11231_v8 = vld [vmem:[#allocation13 + $0x54] sm:$0xf0]  ;;  %v10226_v40 = vld [vmem:[#allocation13 + $0x40] sm:$0xf]  ;;  %v13658_v18 = vld [vmem:[#allocation39_spill] sm:$0xff] }
 0x576   :  { %v10235_v51 = vor.u32 %v11231_v8, %v10234_v23  ;;  %v10227_v9 = vor.u32 %v11229_v17, %v10226_v40  ;;  %v10218_v8 = vld [vmem:[#allocation13 + $0x30] sm:$0xf] }
 0x577   :  { %v13238_v28 = vadd.f32 %v6168_v0, %v6140_v3  ;;  %v13240_v49 = vpop.f32.mrf.mxu0  ;;  %v13242_v16 = vpop.f32.mrf.mxu2  ;;  %v10314_v17 = vld [vmem:[#allocation13 + $0xf0] sm:$0xf] }
 0x578   :  { %v13244_v15 = vpop.f32.mrf.mxu3 }
 0x579   :  { %13655 = vst [vmem:[#allocation42_spill] sm:$0xff] %v13238_v28  ;;  %7009 = vmatpush.bf16.msrb.mxu0 %v10235_v51  ;;  %v13591_v30 = vmax.f32 %v13238_v28, 0.0  ;;  %v10292_v28 = vld [vmem:[#allocation13 + $0xc8] sm:$0xf0] }
 0x57a   :  { %v6112_v29 = vpop.f32.mrf.mxu1 }
 0x57b   :  { %v6113_v26 = vadd.f32 %v6112_v29, %v6084_v62  ;;  %v6564_v29 = vmax.f32 %v13658_v18, 0.0  ;;  %v13659_v18 = vld [vmem:[#allocation31_spill] sm:$0xff] }
 0x57c   :  { %6476 = vmatmul.bf16.gmra.mxu2 %v12658_v58 }
 0x57d   :  { %v6142_v0 = vadd.f32 %v6141_v20, %v6113_v26  ;;  %6505 = vmatmul.bf16.gmra.mxu3 %v12710_v12  ;;  %v6183_v20 = vadd.f32 %v6182_v42, %v13249_v61  ;;  %7010 = vmatpush.bf16.msrb.mxu0 %v10227_v9  ;;  %v11227_v26 = vld [vmem:[#allocation13 + $0x34] sm:$0xf0] }
 0x57e   :  { %v10219_v51 = vor.u32 %v11227_v26, %v10218_v8  ;;  %v11251_v42 = vld [vmem:[#allocation13 + $0xf4] sm:$0xf0]  ;;  %v11249_v26 = vld [vmem:[#allocation13 + $0xe4] sm:$0xf0] }
 0x57f   :  { %v13254_v56 = vadd.f32 %v6170_v41, %v6142_v0  ;;  %v6187_v62 = vpop.f32.mrf.mxu0  ;;  %v13256_v3 = vpop.f32.mrf.mxu2  ;;  %v6594_v0 = vmax.f32 %v6558_v34, %v13591_v30  ;;  %v10315_v9 = vor.u32 %v11251_v42, %v10314_v17  ;;  %v11247_v42 = vld [vmem:[#allocation13 + $0xd4] sm:$0xf0]  ;;  %v11265_v30 = vld [vmem:[#allocation13 + $0x164] sm:$0xf0] }
 0x580   :  { %v13262_v23 = vpop.f32.mrf.mxu3 }
 0x581   :  { %13656 = vst [vmem:[#allocation43_spill] sm:$0xff] %v13254_v56  ;;  %v13590_v58 = vmax.f32 %v13254_v56, 0.0  ;;  %7011 = vmatpush.bf16.msrb.mxu0 %v10219_v51  ;;  %7036 = vmatpush.bf16.msrb.mxu1 %v10315_v9 }
 0x582   :  { %v6211_v12 = vpop.f32.mrf.mxu1  ;;  %6418 = vmatmul.bf16.gmra.mxu0 %v12520_v45 }
 0x583   :  { %v6212_v41 = vadd.f32 %v6211_v12, %v6183_v20  ;;  %v6598_v40 = vmax.f32 %v6564_v29, %v13590_v58  ;;  %v11225_v20 = vld [vmem:[#allocation13 + $0x24] sm:$0xf0]  ;;  %v10306_v29 = vld [vmem:[#allocation13 + $0xe0] sm:$0xf]  ;;  %v6188_v58 = vadd.f32 %v6187_v62, %v13249_v61 }
 0x584   :  { %v10211_v45 = vor.u32 %v11225_v20, %v10210_v52  ;;  %v10298_v52 = vld [vmem:[#allocation13 + $0xd0] sm:$0xf] }
 0x585   :  { %v6241_v60 = vadd.f32 %v6240_v22, %v6212_v41  ;;  %6442 = vmatmul.bf16.vlgmr.msra.gmra.mxu1 %v13659_v18  ;;  %v13270_v2 = vpack.c.bf16 %v6598_v40, %v6594_v0  ;;  %v10307_v41 = vor.u32 %v11249_v26, %v10306_v29  ;;  %v10202_v0 = vld [vmem:[#allocation13 + $0x10] sm:$0xf]  ;;  %v11223_v40 = vld [vmem:[#allocation13 + $0x14] sm:$0xf0]  ;;  %v11221_v18 = vld [vmem:[#allocation13 + $0x4] sm:$0xf0] }
 0x586   :  { %7012 = vmatpush.bf16.msrb.mxu0 %v10211_v45  ;;  %v10203_v17 = vor.u32 %v11223_v40, %v10202_v0  ;;  %v10290_v29 = vld [vmem:[#allocation13 + $0xc0] sm:$0xf]  ;;  %v11245_v26 = vld [vmem:[#allocation13 + $0xc4] sm:$0xf0] }
 0x587   :  { %v13273_v12 = vadd.f32 %v13228_v13, %v6241_v60  ;;  %v13275_v34 = vpop.f32.mrf.mxu0  ;;  %v13277_v8 = vpop.f32.mrf.mxu2  ;;  %7037 = vmatpush.bf16.msrb.mxu1 %v10307_v41  ;;  %v10299_v13 = vor.u32 %v11247_v42, %v10298_v52  ;;  %v10194_v60 = vld [vmem:[#allocation13] sm:$0xf]  ;;  %v10291_v0 = vor.u32 %v11245_v26, %v10290_v29  ;;  %v10282_v42 = vld [vmem:[#allocation13 + $0xb0] sm:$0xf] }
 0x588   :  { %v13279_v22 = vpop.f32.mrf.mxu3  ;;  %v10195_v9 = vor.u32 %v11221_v18, %v10194_v60  ;;  %v10370_v18 = vld [vmem:[#allocation13 + $0x160] sm:$0xf] }
 0x589   :  { %v10274_v26 = vld [vmem:[#allocation13 + $0xa0] sm:$0xf] }
 0x58a   :  { %v13281_v51 = vpop.f32.mrf.mxu1  ;;  %7013 = vmatpush.bf16.msrb.mxu0 %v10203_v17  ;;  %v11267_v17 = vld [vmem:[#allocation13 + $0x174] sm:$0xf0] }
 0x58b   :  { %7038 = vmatpush.bf16.msrb.mxu1 %v10299_v13  ;;  %v11243_v13 = vld [vmem:[#allocation13 + $0xb4] sm:$0xf0] }
 0x58c   :  { %6481 = vmatmul.bf16.gmra.mxu2 %v12673_v33  ;;  %v10378_v33 = vld [vmem:[#allocation13 + $0x170] sm:$0xf]  ;;  %v10283_v62 = vor.u32 %v11243_v13, %v10282_v42  ;;  %v10354_v42 = vld [vmem:[#allocation13 + $0x140] sm:$0xf]  ;;  %v11261_v13 = vld [vmem:[#allocation13 + $0x144] sm:$0xf0] }
 0x58d   :  { %6510 = vmatmul.bf16.gmra.mxu3 %v13650_v4  ;;  %v10379_v4 = vor.u32 %v11267_v17, %v10378_v33  ;;  %v10362_v33 = vld [vmem:[#allocation13 + $0x150] sm:$0xf]  ;;  %v11263_v17 = vld [vmem:[#allocation13 + $0x154] sm:$0xf0] }
 0x58e   :  { %7014 = vmatpush.bf16.msrb.mxu0 %v10195_v9  ;;  %v10371_v9 = vor.u32 %v11265_v30, %v10370_v18  ;;  %v10266_v30 = vld [vmem:[#allocation13 + $0x90] sm:$0xf] }
 0x58f   :  { %v6192_v20 = vpop.f32.mrf.mxu0  ;;  %v6250_v45 = vpop.f32.mrf.mxu2  ;;  %7039 = vmatpush.bf16.msrb.mxu1 %v10291_v0  ;;  %7065 = vmatpush.bf16.msra.mxu2 %v10379_v4  ;;  %v11241_v0 = vld [vmem:[#allocation13 + $0xa4] sm:$0xf0]  ;;  %v11239_v4 = vld [vmem:[#allocation13 + $0x94] sm:$0xf0] }
 0x590   :  { %v13286_v41 = vpop.f32.mrf.mxu3 }
 0x592   :  { %v6216_v40 = vpop.f32.mrf.mxu1  ;;  %6423 = vmatmul.bf16.gmra.mxu0 %v12534_v10 }
 0x593   :  { %v6217_v52 = vadd.f32 %v6216_v40, %v6188_v58  ;;  %7040 = vmatpush.bf16.msrb.mxu1 %v10283_v62  ;;  %7066 = vmatpush.bf16.msra.mxu2 %v10371_v9  ;;  %v10258_v9 = vld [vmem:[#allocation13 + $0x80] sm:$0xf] }
 0x595   :  { %v6246_v60 = vadd.f32 %v13256_v3, %v6217_v52  ;;  %6447 = vmatmul.bf16.gmra.mxu1 %v12565_v31  ;;  %v10275_v3 = vor.u32 %v11241_v0, %v10274_v26  ;;  %v10363_v52 = vor.u32 %v11263_v17, %v10362_v33  ;;  %v11237_v26 = vld [vmem:[#allocation13 + $0x84] sm:$0xf0]  ;;  %v6193_v0 = vadd.f32 %v6192_v20, %v13249_v61 }
 0x596   :  { %v10259_v33 = vor.u32 %v11237_v26, %v10258_v9 }
 0x597   :  { %v13292_v29 = vadd.f32 %v13262_v23, %v6246_v60  ;;  %v13294_v58 = vpop.f32.mrf.mxu0  ;;  %v13296_v10 = vpop.f32.mrf.mxu2  ;;  %7041 = vmatpush.bf16.msrb.mxu1 %v10275_v3  ;;  %v10267_v23 = vor.u32 %v11239_v4, %v10266_v30  ;;  %7067 = vmatpush.bf16.msra.mxu2 %v10363_v52  ;;  %v10355_v60 = vor.u32 %v11261_v13, %v10354_v42  ;;  %v10338_v4 = vld [vmem:[#allocation13 + $0x120] sm:$0xf] }
 0x598   :  { %v13298_v40 = vpop.f32.mrf.mxu3 }
 0x59a   :  { %v13300_v31 = vpop.f32.mrf.mxu1 }
 0x59b   :  { %7042 = vmatpush.bf16.msrb.mxu1 %v10267_v23  ;;  %7068 = vmatpush.bf16.msra.mxu2 %v10355_v60  ;;  %v11257_v23 = vld [vmem:[#allocation13 + $0x124] sm:$0xf0] }
 0x59c   :  { %6486 = vmatmul.bf16.gmra.mxu2 %v12688_v39  ;;  %v11259_v39 = vld [vmem:[#allocation13 + $0x134] sm:$0xf0]  ;;  %v10339_v42 = vor.u32 %v11257_v23, %v10338_v4  ;;  %v11234_v23 = vld [vmem:[#allocation13 + $0x74] sm:$0xf] }
 0x59d   :  { %6515 = vmatmul.bf16.gmra.mxu3 %v13654_v59  ;;  %v10347_v59 = vor.u32 %v11259_v39, %v10346_v50  ;;  %v11255_v50 = vld [vmem:[#allocation13 + $0x114] sm:$0xf0] }
 0x59f   :  { %v6197_v62 = vpop.f32.mrf.mxu0  ;;  %v6255_v18 = vpop.f32.mrf.mxu2  ;;  %7043 = vmatpush.bf16.msrb.mxu1 %v10259_v33  ;;  %7069 = vmatpush.bf16.msra.mxu2 %v10347_v59  ;;  %v11253_v33 = vld [vmem:[#allocation13 + $0x104] sm:$0xf0] }
 0x5a0   :  { %v6284_v3 = vpop.f32.mrf.mxu3 }
 0x5a2   :  { %v6221_v17 = vpop.f32.mrf.mxu1  ;;  %6428 = vmatmul.bf16.gmra.mxu0 %v12548_v21  ;;  %v10330_v21 = vld [vmem:[#allocation13 + $0x110] sm:$0xf] }
 0x5a3   :  { %v6222_v30 = vadd.f32 %v6221_v17, %v6193_v0  ;;  %7070 = vmatpush.bf16.msra.mxu2 %v10339_v42  ;;  %v10322_v0 = vld [vmem:[#allocation13 + $0x100] sm:$0xf]  ;;  %v10252_v42 = vld [vmem:[#allocation13 + $0x78] sm:$0xf0] }
 0x5a5   :  { %v6251_v52 = vadd.f32 %v6250_v45, %v6222_v30  ;;  %6452 = vmatmul.bf16.gmra.mxu1 %v12573_v11  ;;  %v10331_v45 = vor.u32 %v11255_v50, %v10330_v21  ;;  %v13319_v11 = vperm.slane %v13246_v57, 5  ;;  %v6198_v30 = vadd.f32 %v6197_v62, %v13249_v61  ;;  %v10442_v62 = vld [vmem:[#allocation13 + $0x1f0] sm:$0xf] }
 0x5a6   :  { %v10255_v57 = vor.u32 %v11234_v23, %v10252_v42  ;;  %v6185_v23 = vadd.f32 %v13240_v49, %v13249_v61  ;;  %v11228_v42 = vld [vmem:[#allocation13 + $0x44] sm:$0xf]  ;;  %v11226_v49 = vld [vmem:[#allocation13 + $0x34] sm:$0xf] }
 0x5a7   :  { %v13308_v20 = vadd.f32 %v13286_v41, %v6251_v52  ;;  %v13310_v13 = vpop.f32.mrf.mxu0  ;;  %v13312_v60 = vpop.f32.mrf.mxu2  ;;  %7071 = vmatpush.bf16.msra.mxu2 %v10331_v45  ;;  %v10323_v41 = vor.u32 %v11253_v33, %v10322_v0  ;;  %v11232_v45 = vld [vmem:[#allocation13 + $0x64] sm:$0xf]  ;;  %v10244_v0 = vld [vmem:[#allocation13 + $0x68] sm:$0xf0]  ;;  %v11283_v33 = vld [vmem:[#allocation13 + $0x1f4] sm:$0xf0] }
 0x5a8   :  { %v13314_v9 = vpop.f32.mrf.mxu3  ;;  %7123 = vmatpush.bf16.msra.mxu0 %v10255_v57  ;;  %v10434_v57 = vld [vmem:[#allocation13 + $0x1e0] sm:$0xf] }
 0x5aa   :  { %v13316_v26 = vpop.f32.mrf.mxu1 }
 0x5ab   :  { %7072 = vmatpush.bf16.msra.mxu2 %v10323_v41 }
 0x5af   :  { %v6298_v17 = vpop.f32.mrf.mxu0  ;;  %v6356_v39 = vpop.f32.mrf.mxu2 }
 0x5b0   :  { %v6357_v59 = vadd.f32 %v6356_v39, %v13319_v11  ;;  %v6385_v52 = vpop.f32.mrf.mxu3  ;;  %v10247_v39 = vor.u32 %v11232_v45, %v10244_v0 }
 0x5b2   :  { %v6226_v4 = vpop.f32.mrf.mxu1  ;;  %v13323_v1 = vadd.f32 %v6385_v52, %v6357_v59  ;;  %7015 = vmatmul.bf16.vlgmr.msrb.gmra.mxu0 %v13066_v55  ;;  %v10443_v59 = vor.u32 %v11283_v33, %v10442_v62 }
 0x5b3   :  { %v6227_v21 = vadd.f32 %v6226_v4, %v6198_v30  ;;  %7124 = vmatpush.bf16.msra.mxu0 %v10247_v39  ;;  %v6299_v39 = vadd.f32 %v6298_v17, %v13273_v12  ;;  %v11224_v17 = vld [vmem:[#allocation13 + $0x24] sm:$0xf] }
 0x5b4   :  { %7094 = vmatpush.bf16.msra.mxu3 %v10443_v59 }
 0x5b5   :  { %v6256_v50 = vadd.f32 %v6255_v18, %v6227_v21  ;;  %6457 = vmatmul.bf16.gmra.mxu1 %v12586_v24  ;;  %v11230_v18 = vld [vmem:[#allocation13 + $0x54] sm:$0xf]  ;;  %v10236_v24 = vld [vmem:[#allocation13 + $0x58] sm:$0xf0]  ;;  %v6214_v21 = vadd.f32 %v13281_v51, %v6185_v23 }
 0x5b6   :  { %v10239_v4 = vor.u32 %v11230_v18, %v10236_v24 }
 0x5b7   :  { %v13327_v46 = vadd.f32 %v6284_v3, %v6256_v50  ;;  %v6300_v41 = vpop.f32.mrf.mxu0  ;;  %v13329_v43 = vpop.f32.mrf.mxu2  ;;  %v10228_v3 = vld [vmem:[#allocation13 + $0x48] sm:$0xf0]  ;;  %v11281_v50 = vld [vmem:[#allocation13 + $0x1e4] sm:$0xf0]  ;;  %v6243_v56 = vadd.f32 %v13242_v16, %v6214_v21  ;;  %v10426_v21 = vld [vmem:[#allocation13 + $0x1d0] sm:$0xf] }
 0x5b8   :  { %v13331_v52 = vpop.f32.mrf.mxu3  ;;  %7125 = vmatpush.bf16.msra.mxu0 %v10239_v4  ;;  %v10231_v45 = vor.u32 %v11228_v42, %v10228_v3  ;;  %v10435_v33 = vor.u32 %v11281_v50, %v10434_v57  ;;  %v10220_v4 = vld [vmem:[#allocation13 + $0x38] sm:$0xf0]  ;;  %v11250_v3 = vld [vmem:[#allocation13 + $0xf4] sm:$0xf] }
 0x5b9   :  { %v10223_v42 = vor.u32 %v11226_v49, %v10220_v4  ;;  %v10316_v57 = vld [vmem:[#allocation13 + $0xf8] sm:$0xf0]  ;;  %v11248_v4 = vld [vmem:[#allocation13 + $0xe4] sm:$0xf] }
 0x5ba   :  { %v13333_v30 = vpop.f32.mrf.mxu1  ;;  %7095 = vmatpush.bf16.msra.mxu3 %v10435_v33  ;;  %v10319_v12 = vor.u32 %v11250_v3, %v10316_v57  ;;  %v13660_v33 = vmax.f32 %v13045_v7, 0.0  ;;  %v11222_v7 = vld [vmem:[#allocation13 + $0x14] sm:$0xf] }
 0x5bc   :  { %7126 = vmatpush.bf16.msra.mxu0 %v10231_v45  ;;  %v10212_v45 = vld [vmem:[#allocation13 + $0x28] sm:$0xf0]  ;;  %7152 = vmatpush.bf16.msra.mxu1 %v10319_v12 }
 0x5bf   :  { %v13338_v0 = vpop.f32.mrf.mxu0  ;;  %v6361_v62 = vpop.f32.mrf.mxu2 }
 0x5c0   :  { %v6362_v59 = vadd.f32 %v6361_v62, %v13319_v11  ;;  %v6390_v18 = vpop.f32.mrf.mxu3  ;;  %7127 = vmatpush.bf16.msra.mxu0 %v10223_v42  ;;  %v6272_v62 = vadd.f32 %v13244_v15, %v6243_v56  ;;  %v10204_v56 = vld [vmem:[#allocation13 + $0x18] sm:$0xf0] }
 0x5c1   :  { %v10207_v12 = vor.u32 %v11222_v7, %v10204_v56  ;;  %v11244_v56 = vld [vmem:[#allocation13 + $0xc4] sm:$0xf] }
 0x5c2   :  { %v6327_v24 = vpop.f32.mrf.mxu1  ;;  %v13343_v51 = vadd.f32 %v6390_v18, %v6362_v59  ;;  %7020 = vmatmul.bf16.gmra.mxu0 %v13095_v6  ;;  %v10215_v59 = vor.u32 %v11224_v17, %v10212_v45  ;;  %v6301_v42 = vadd.f32 %v6300_v41, %v6272_v62  ;;  %v6190_v17 = vadd.f32 %v13275_v34, %v13249_v61  ;;  %v11246_v45 = vld [vmem:[#allocation13 + $0xd4] sm:$0xf]  ;;  %v11220_v62 = vld [vmem:[#allocation13 + $0x4] sm:$0xf] }
 0x5c3   :  { %v6328_v23 = vadd.f32 %v6327_v24, %v6299_v39  ;;  %v11279_v39 = vld [vmem:[#allocation13 + $0x1d4] sm:$0xf0] }
 0x5c4   :  { %v10427_v49 = vor.u32 %v11279_v39, %v10426_v21  ;;  %7128 = vmatpush.bf16.msra.mxu0 %v10215_v59  ;;  %v6219_v41 = vadd.f32 %v13300_v31, %v6190_v17  ;;  %v10196_v59 = vld [vmem:[#allocation13 + $0x8] sm:$0xf0] }
 0x5c5   :  { %v6525_v50 = vmax.f32 %v6328_v23, 0.0  ;;  %7044 = vmatmul.bf16.vlgmr.msrb.gmra.mxu1 %v13191_v32  ;;  %v10308_v23 = vld [vmem:[#allocation13 + $0xe8] sm:$0xf0] }
 0x5c6   :  { %v10311_v57 = vor.u32 %v11248_v4, %v10308_v23  ;;  %7096 = vmatpush.bf16.msra.mxu3 %v10427_v49  ;;  %v13661_v4 = vmax.f32 %v13058_v37, 0.0  ;;  %v10418_v23 = vld [vmem:[#allocation13 + $0x1c0] sm:$0xf]  ;;  %v10295_v37 = vor.u32 %v11244_v56, %v10292_v28 }
 0x5c7   :  { %v6571_v16 = vmax.f32 %v13660_v33, %v6525_v50  ;;  %v13350_v18 = vpop.f32.mrf.mxu0  ;;  %v13352_v24 = vpop.f32.mrf.mxu2  ;;  %v10300_v33 = vld [vmem:[#allocation13 + $0xd8] sm:$0xf0] }
 0x5c8   :  { %v13354_v3 = vpop.f32.mrf.mxu3  ;;  %7153 = vmatpush.bf16.msra.mxu1 %v10311_v57  ;;  %7129 = vmatpush.bf16.msra.mxu0 %v10207_v12  ;;  %v10303_v39 = vor.u32 %v11246_v45, %v10300_v33  ;;  %v10199_v57 = vor.u32 %v11220_v62, %v10196_v59  ;;  %v6248_v45 = vadd.f32 %v13277_v8, %v6219_v41  ;;  %v11264_v8 = vld [vmem:[#allocation13 + $0x164] sm:$0xf]  ;;  %v10372_v41 = vld [vmem:[#allocation13 + $0x168] sm:$0xf0] }
 0x5ca   :  { %v6329_v15 = vpop.f32.mrf.mxu1 }
 0x5cb   :  { %v6330_v50 = vadd.f32 %v6329_v15, %v6301_v42  ;;  %v11277_v42 = vld [vmem:[#allocation13 + $0x1c4] sm:$0xf0] }
 0x5cc   :  { %7154 = vmatpush.bf16.msra.mxu1 %v10303_v39  ;;  %v10419_v34 = vor.u32 %v11277_v42, %v10418_v23  ;;  %7130 = vmatpush.bf16.msra.mxu0 %v10199_v57  ;;  %v10380_v39 = vld [vmem:[#allocation13 + $0x178] sm:$0xf0]  ;;  %v13662_v23 = vmax.f32 %v13073_v25, 0.0  ;;  %v10410_v57 = vld [vmem:[#allocation13 + $0x1b0] sm:$0xf] }
 0x5cd   :  { %v6531_v21 = vmax.f32 %v6330_v50, 0.0  ;;  %v6304_v50 = vadd.f32 %v13338_v0, %v13292_v29  ;;  %v11242_v0 = vld [vmem:[#allocation13 + $0xb4] sm:$0xf] }
 0x5ce   :  { %7097 = vmatpush.bf16.msra.mxu3 %v10419_v34  ;;  %v10375_v34 = vor.u32 %v11264_v8, %v10372_v41  ;;  %v11262_v25 = vld [vmem:[#allocation13 + $0x154] sm:$0xf]  ;;  %v11260_v41 = vld [vmem:[#allocation13 + $0x144] sm:$0xf] }
 0x5cf   :  { %v6575_v49 = vmax.f32 %v13661_v4, %v6531_v21  ;;  %v13361_v15 = vpop.f32.mrf.mxu0  ;;  %v6366_v7 = vpop.f32.mrf.mxu2  ;;  %v11266_v21 = vld [vmem:[#allocation13 + $0x174] sm:$0xf] }
 0x5d0   :  { %v6367_v31 = vadd.f32 %v6366_v7, %v13319_v11  ;;  %v6395_v17 = vpop.f32.mrf.mxu3  ;;  %v10383_v29 = vor.u32 %v11266_v21, %v10380_v39  ;;  %7155 = vmatpush.bf16.msra.mxu1 %v10295_v37  ;;  %v11275_v7 = vld [vmem:[#allocation13 + $0x1b4] sm:$0xf0]  ;;  %v10276_v37 = vld [vmem:[#allocation13 + $0xa8] sm:$0xf0] }
 0x5d1   :  { %v13365_v12 = vpack.c.bf16 %v6575_v49, %v6571_v16  ;;  %v10284_v16 = vld [vmem:[#allocation13 + $0xb8] sm:$0xf0]  ;;  %v6277_v49 = vadd.f32 %v13279_v22, %v6248_v45 }
 0x5d2   :  { %v6332_v33 = vpop.f32.mrf.mxu1  ;;  %v13369_v62 = vadd.f32 %v6395_v17, %v6367_v31  ;;  %7025 = vmatmul.bf16.gmra.mxu0 %v13128_v63  ;;  %7181 = vmatpush.bf16.msrb.mxu2 %v10383_v29  ;;  %v10287_v28 = vor.u32 %v11242_v0, %v10284_v16  ;;  %v10411_v31 = vor.u32 %v11275_v7, %v10410_v57  ;;  %v11240_v17 = vld [vmem:[#allocation13 + $0xa4] sm:$0xf]  ;;  %v10364_v45 = vld [vmem:[#allocation13 + $0x158] sm:$0xf0]  ;;  %v11238_v16 = vld [vmem:[#allocation13 + $0x94] sm:$0xf] }
 0x5d3   :  { %v6333_v59 = vadd.f32 %v6332_v33, %v6304_v50  ;;  %7073 = vmatmul.bf16.vlgmr.msra.gmra.mxu2 %v13365_v12  ;;  %v6306_v33 = vadd.f32 %v13350_v18, %v6277_v49  ;;  %v10279_v39 = vor.u32 %v11240_v17, %v10276_v37  ;;  %v10367_v29 = vor.u32 %v11262_v25, %v10364_v45  ;;  %v10356_v49 = vld [vmem:[#allocation13 + $0x148] sm:$0xf0]  ;;  %v10402_v7 = vld [vmem:[#allocation13 + $0x1a0] sm:$0xf] }
 0x5d4   :  { %7156 = vmatpush.bf16.msra.mxu1 %v10287_v28  ;;  %7098 = vmatpush.bf16.msra.mxu3 %v10411_v31  ;;  %v6195_v0 = vadd.f32 %v13294_v58, %v13249_v61  ;;  %v10359_v31 = vor.u32 %v11260_v41, %v10356_v49 }
 0x5d5   :  { %v6537_v4 = vmax.f32 %v6333_v59, 0.0  ;;  %7049 = vmatmul.bf16.gmra.mxu1 %v13215_v38 }
 0x5d6   :  { %7182 = vmatpush.bf16.msrb.mxu2 %v10375_v34  ;;  %v6224_v18 = vadd.f32 %v13316_v26, %v6195_v0  ;;  %v11273_v34 = vld [vmem:[#allocation13 + $0x1a4] sm:$0xf0]  ;;  %v11258_v0 = vld [vmem:[#allocation13 + $0x134] sm:$0xf] }
 0x5d7   :  { %v6579_v42 = vmax.f32 %v13662_v23, %v6537_v4  ;;  %v6310_v56 = vpop.f32.mrf.mxu0  ;;  %v13377_v50 = vpop.f32.mrf.mxu2  ;;  %v10268_v4 = vld [vmem:[#allocation13 + $0x98] sm:$0xf0]  ;;  %v13663_v23 = vmax.f32 %v13085_v14, 0.0  ;;  %v10403_v58 = vor.u32 %v11273_v34, %v10402_v7  ;;  %v11254_v34 = vld [vmem:[#allocation13 + $0x114] sm:$0xf] }
 0x5d8   :  { %v13380_v21 = vpop.f32.mrf.mxu3  ;;  %7157 = vmatpush.bf16.msra.mxu1 %v10279_v39  ;;  %v10271_v8 = vor.u32 %v11238_v16, %v10268_v4  ;;  %v10260_v39 = vld [vmem:[#allocation13 + $0x88] sm:$0xf0]  ;;  %v6253_v14 = vadd.f32 %v13296_v10, %v6224_v18  ;;  %v10348_v16 = vld [vmem:[#allocation13 + $0x138] sm:$0xf0]  ;;  %v13664_v18 = vmax.f32 %v13099_v44, 0.0 }
 0x5d9   :  { %7099 = vmatpush.bf16.msra.mxu3 %v10403_v58  ;;  %v10340_v10 = vld [vmem:[#allocation13 + $0x128] sm:$0xf0]  ;;  %v10394_v58 = vld [vmem:[#allocation13 + $0x190] sm:$0xf] }
 0x5da   :  { %v6334_v22 = vpop.f32.mrf.mxu1  ;;  %7183 = vmatpush.bf16.msrb.mxu2 %v10367_v29 }
 0x5db   :  { %v6335_v59 = vadd.f32 %v6334_v22, %v6306_v33  ;;  %v11236_v33 = vld [vmem:[#allocation13 + $0x84] sm:$0xf]  ;;  %v6309_v22 = vadd.f32 %v13361_v15, %v13308_v20  ;;  %v10351_v20 = vor.u32 %v11258_v0, %v10348_v16 }
 0x5dc   :  { %7158 = vmatpush.bf16.msra.mxu1 %v10271_v8  ;;  %v10263_v45 = vor.u32 %v11236_v33, %v10260_v39  ;;  %v6282_v8 = vadd.f32 %v13298_v40, %v6253_v14  ;;  %v11271_v33 = vld [vmem:[#allocation13 + $0x194] sm:$0xf0]  ;;  %v6200_v40 = vadd.f32 %v13310_v13, %v13249_v61  ;;  %v10324_v14 = vld [vmem:[#allocation13 + $0x108] sm:$0xf0]  ;;  %v10386_v13 = vld [vmem:[#allocation13 + $0x180] sm:$0xf] }
 0x5dd   :  { %v6543_v28 = vmax.f32 %v6335_v59, 0.0 }
 0x5de   :  { %7184 = vmatpush.bf16.msrb.mxu2 %v10359_v31  ;;  %v10332_v31 = vld [vmem:[#allocation13 + $0x118] sm:$0xf0] }
 0x5df   :  { %v6583_v57 = vmax.f32 %v13663_v23, %v6543_v28  ;;  %v6313_v17 = vpop.f32.mrf.mxu0  ;;  %v6371_v37 = vpop.f32.mrf.mxu2  ;;  %v10335_v39 = vor.u32 %v11254_v34, %v10332_v31 }
 0x5e0   :  { %v6372_v25 = vadd.f32 %v6371_v37, %v13319_v11  ;;  %v6400_v59 = vpop.f32.mrf.mxu3  ;;  %7159 = vmatpush.bf16.msra.mxu1 %v10263_v45 }
 0x5e1   :  { %v13390_v26 = vpack.c.bf16 %v6583_v57, %v6579_v42  ;;  %v11256_v42 = vld [vmem:[#allocation13 + $0x124] sm:$0xf]  ;;  %v6311_v57 = vadd.f32 %v6310_v56, %v6282_v8 }
 0x5e2   :  { %v6337_v29 = vpop.f32.mrf.mxu1  ;;  %v13393_v4 = vadd.f32 %v6400_v59, %v6372_v25  ;;  %7030 = vmatmul.bf16.gmra.mxu0 %v13161_v35  ;;  %7185 = vmatpush.bf16.msrb.mxu2 %v10351_v20  ;;  %v10343_v49 = vor.u32 %v11256_v42, %v10340_v10  ;;  %v10395_v25 = vor.u32 %v11271_v33, %v10394_v58  ;;  %v11252_v56 = vld [vmem:[#allocation13 + $0x104] sm:$0xf]  ;;  %v11269_v10 = vld [vmem:[#allocation13 + $0x184] sm:$0xf0] }
 0x5e3   :  { %v6338_v28 = vadd.f32 %v6337_v29, %v6309_v22  ;;  %7078 = vmatmul.bf16.gmra.mxu2 %v13390_v26  ;;  %v6229_v59 = vadd.f32 %v13333_v30, %v6200_v40  ;;  %v13665_v29 = vld [vmem:[#allocation41_spill] sm:$0xff]  ;;  %v10387_v30 = vor.u32 %v11269_v10, %v10386_v13  ;;  %v13669_v40 = vmax.f32 %v13146_v54, 0.0 }
 0x5e4   :  { %7100 = vmatpush.bf16.msra.mxu3 %v10395_v25  ;;  %v13666_v0 = vmax.f32 %v13665_v29, 0.0  ;;  %v10436_v29 = vld [vmem:[#allocation13 + $0x1e8] sm:$0xf0]  ;;  %v11278_v13 = vld [vmem:[#allocation13 + $0x1d4] sm:$0xf] }
 0x5e5   :  { %v6549_v15 = vmax.f32 %v6338_v28, 0.0  ;;  %7054 = vmatmul.bf16.gmra.mxu1 %v13236_v19  ;;  %v10327_v28 = vor.u32 %v11252_v56, %v10324_v14  ;;  %v6258_v8 = vadd.f32 %v13312_v60, %v6229_v59  ;;  %v10444_v60 = vld [vmem:[#allocation13 + $0x1f8] sm:$0xf0]  ;;  %v11280_v59 = vld [vmem:[#allocation13 + $0x1e4] sm:$0xf] }
 0x5e6   :  { %7186 = vmatpush.bf16.msrb.mxu2 %v10343_v49  ;;  %v10428_v10 = vld [vmem:[#allocation13 + $0x1d8] sm:$0xf0] }
 0x5e7   :  { %v6587_v41 = vmax.f32 %v13664_v18, %v6549_v15  ;;  %v6315_v23 = vpop.f32.mrf.mxu0  ;;  %v13401_v22 = vpop.f32.mrf.mxu2  ;;  %v6314_v15 = vadd.f32 %v6313_v17, %v13327_v46  ;;  %v6287_v46 = vadd.f32 %v13314_v9, %v6258_v8  ;;  %v13667_v17 = vld [vmem:[#allocation40_spill] sm:$0xff] }
 0x5e8   :  { %v13405_v44 = vpop.f32.mrf.mxu3  ;;  %7101 = vmatpush.bf16.msra.mxu3 %v10387_v30  ;;  %v10431_v30 = vor.u32 %v11278_v13, %v10428_v10 }
 0x5e9   :  { %v6316_v31 = vadd.f32 %v6315_v23, %v6287_v46 }
 0x5ea   :  { %v6339_v7 = vpop.f32.mrf.mxu1  ;;  %7187 = vmatpush.bf16.msrb.mxu2 %v10335_v39 }
 0x5eb   :  { %v6340_v37 = vadd.f32 %v6339_v7, %v6311_v57 }
 0x5ed   :  { %v6555_v45 = vmax.f32 %v6340_v37, 0.0  ;;  %v11282_v37 = vld [vmem:[#allocation13 + $0x1f4] sm:$0xf] }
 0x5ee   :  { %7188 = vmatpush.bf16.msrb.mxu2 %v10327_v28  ;;  %v10447_v39 = vor.u32 %v11282_v37, %v10444_v60  ;;  %v6359_v28 = vadd.f32 %v13329_v43, %v13319_v11  ;;  %v11276_v37 = vld [vmem:[#allocation13 + $0x1c4] sm:$0xf] }
 0x5ef   :  { %v6591_v16 = vmax.f32 %v13666_v0, %v6555_v45  ;;  %v6414_v20 = vpop.f32.mrf.mxu0  ;;  %v6472_v57 = vpop.f32.mrf.mxu2 }
 0x5f0   :  { %v6501_v34 = vpop.f32.mrf.mxu3  ;;  %7210 = vmatpush.bf16.msrb.mxu3 %v10447_v39  ;;  %v6415_v14 = vadd.f32 %v6414_v20, %v13323_v1  ;;  %v6388_v1 = vadd.f32 %v13331_v52, %v6359_v28  ;;  %v10420_v52 = vld [vmem:[#allocation13 + $0x1c8] sm:$0xf0]  ;;  %v13671_v39 = vmax.f32 %v13179_v47, 0.0 }
 0x5f1   :  { %v13411_v42 = vpack.c.bf16 %v6591_v16, %v6587_v41  ;;  %v13668_v41 = vmax.f32 %v13667_v17, 0.0  ;;  %v10439_v16 = vor.u32 %v11280_v59, %v10436_v29  ;;  %v10412_v59 = vld [vmem:[#allocation13 + $0x1b8] sm:$0xf0] }
 0x5f2   :  { %v6342_v61 = vpop.f32.mrf.mxu1  ;;  %7131 = vmatmul.bf16.vlgmr.msra.gmra.mxu0 %v13066_v55 }
 0x5f3   :  { %v6343_v18 = vadd.f32 %v6342_v61, %v6314_v15  ;;  %7083 = vmatmul.bf16.gmra.mxu2 %v13411_v42 }
 0x5f4   :  { %7211 = vmatpush.bf16.msrb.mxu3 %v10439_v16 }
 0x5f5   :  { %v6561_v49 = vmax.f32 %v6343_v18, 0.0  ;;  %7059 = vmatmul.bf16.gmra.mxu1 %v13270_v2 }
 0x5f7   :  { %v6595_v7 = vmax.f32 %v13668_v41, %v6561_v49  ;;  %v6416_v58 = vpop.f32.mrf.mxu0  ;;  %v6474_v56 = vpop.f32.mrf.mxu2 }
 0x5f8   :  { %v6503_v0 = vpop.f32.mrf.mxu3  ;;  %v6417_v61 = vadd.f32 %v6416_v58, %v6388_v1  ;;  %7212 = vmatpush.bf16.msrb.mxu3 %v10431_v30  ;;  %v10423_v58 = vor.u32 %v11276_v37, %v10420_v52  ;;  %v11272_v1 = vld [vmem:[#allocation13 + $0x1a4] sm:$0xf]  ;;  %v13672_v30 = vmax.f32 %v13196_v53, 0.0  ;;  %v10388_v52 = vld [vmem:[#allocation13 + $0x188] sm:$0xf0] }
 0x5fa   :  { %v6344_v33 = vpop.f32.mrf.mxu1 }
 0x5fb   :  { %v6345_v25 = vadd.f32 %v6344_v33, %v6316_v31  ;;  %v13670_v33 = vmax.f32 %v13168_v48, 0.0 }
 0x5fc   :  { %7213 = vmatpush.bf16.msrb.mxu3 %v10423_v58 }
 0x5fd   :  { %v6567_v55 = vmax.f32 %v6345_v25, 0.0 }
 0x5ff   :  { %v6599_v45 = vmax.f32 %v13669_v40, %v6567_v55  ;;  %v6419_v54 = vpop.f32.mrf.mxu0  ;;  %v6477_v8 = vpop.f32.mrf.mxu2 }
 0x600   :  { %v6506_v46 = vpop.f32.mrf.mxu3  ;;  %v6420_v31 = vadd.f32 %v6419_v54, %v13343_v51 }
 0x601   :  { %v13423_v9 = vpack.c.bf16 %v6599_v45, %v6595_v7 }
 0x602   :  { %v6443_v23 = vpop.f32.mrf.mxu1  ;;  %7136 = vmatmul.bf16.gmra.mxu0 %v13095_v6 }
 0x603   :  { %v6444_v15 = vadd.f32 %v6443_v23, %v6415_v14  ;;  %7088 = vmatmul.bf16.gmra.mxu2 %v13423_v9  ;;  %v11274_v14 = vld [vmem:[#allocation13 + $0x1b4] sm:$0xf] }
 0x605   :  { %7160 = vmatmul.bf16.vlgmr.msra.gmra.mxu1 %v13191_v32  ;;  %v6473_v20 = vadd.f32 %v6472_v57, %v6444_v15  ;;  %v6364_v57 = vadd.f32 %v13352_v24, %v13319_v11 }
 0x607   :  { %v6502_v49 = vadd.f32 %v6501_v34, %v6473_v20  ;;  %v6421_v41 = vpop.f32.mrf.mxu0  ;;  %v6479_v51 = vpop.f32.mrf.mxu2  ;;  %v6393_v45 = vadd.f32 %v13354_v3, %v6364_v57  ;;  %v10404_v20 = vld [vmem:[#allocation13 + $0x1a8] sm:$0xf0] }
 0x608   :  { %v6508_v24 = vpop.f32.mrf.mxu3 }
 0x609   :  { %v6526_v6 = vmax.f32 %v6502_v49, 0.0  ;;  %v6422_v47 = vadd.f32 %v6421_v41, %v6393_v45  ;;  %v11270_v41 = vld [vmem:[#allocation13 + $0x194] sm:$0xf] }
 0x60a   :  { %v6445_v18 = vpop.f32.mrf.mxu1 }
 0x60b   :  { %v6446_v43 = vadd.f32 %v6445_v18, %v6417_v61  ;;  %v6572_v34 = vmax.f32 %v13670_v33, %v6526_v6  ;;  %v6369_v61 = vadd.f32 %v13377_v50, %v13319_v11  ;;  %v10396_v6 = vld [vmem:[#allocation13 + $0x198] sm:$0xf0] }
 0x60d   :  { %v6475_v17 = vadd.f32 %v6474_v56, %v6446_v43  ;;  %v13673_v43 = vmax.f32 %v13203_v5, 0.0  ;;  %v6398_v50 = vadd.f32 %v13380_v21, %v6369_v61  ;;  %v11268_v5 = vld [vmem:[#allocation13 + $0x184] sm:$0xf]  ;;  %v11298_v61 = vld [vmem:[#allocation16 + $0x74] sm:$0xf] }
 0x60f   :  { %v6504_v7 = vadd.f32 %v6503_v0, %v6475_v17  ;;  %v6424_v48 = vpop.f32.mrf.mxu0  ;;  %v6482_v16 = vpop.f32.mrf.mxu2 }
 0x610   :  { %v6425_v54 = vadd.f32 %v6424_v48, %v13369_v62 }
 0x611   :  { %v6532_v32 = vmax.f32 %v6504_v7, 0.0 }
 0x612   :  { %v6448_v60 = vpop.f32.mrf.mxu1  ;;  %7141 = vmatmul.bf16.gmra.mxu0 %v13128_v63  ;;  %v10415_v63 = vor.u32 %v11274_v14, %v10412_v59 }
 0x613   :  { %v6576_v25 = vmax.f32 %v13671_v39, %v6532_v32  ;;  %v6449_v55 = vadd.f32 %v6448_v60, %v6420_v31  ;;  %7189 = vmatmul.bf16.vlgmr.msrb.gmra.mxu2 %v13365_v12  ;;  %v10391_v60 = vor.u32 %v11268_v5, %v10388_v52 }
 0x614   :  { %7214 = vmatpush.bf16.msrb.mxu3 %v10415_v63 }
 0x615   :  { %v13440_v40 = vpack.c.bf16 %v6576_v25, %v6572_v34  ;;  %7165 = vmatmul.bf16.gmra.mxu1 %v13215_v38  ;;  %v6478_v56 = vadd.f32 %v6477_v8, %v6449_v55  ;;  %v6511_v38 = vpop.f32.mrf.mxu3  ;;  %v10407_v8 = vor.u32 %v11272_v1, %v10404_v20  ;;  %v6374_v55 = vadd.f32 %v13401_v22, %v13319_v11  ;;  %v10506_v1 = vld [vmem:[#allocation16 + $0x70] sm:$0xf]  ;;  %v11299_v20 = vld [vmem:[#allocation16 + $0x74] sm:$0xf0] }
 0x617   :  { %7102 = vmatmul.bf16.vlgmr.msra.gmra.mxu3 %v13440_v40  ;;  %v6507_v0 = vadd.f32 %v6506_v46, %v6478_v56  ;;  %v6426_v13 = vpop.f32.mrf.mxu0  ;;  %v6484_v7 = vpop.f32.mrf.mxu2  ;;  %v13675_v56 = vmax.f32 %v13223_v27, 0.0  ;;  %v6403_v59 = vadd.f32 %v13405_v44, %v6374_v55 }
 0x618   :  { %7215 = vmatpush.bf16.msrb.mxu3 %v10407_v8  ;;  %v6427_v31 = vadd.f32 %v6426_v13, %v6398_v50  ;;  %v10507_v13 = vor.u32 %v11299_v20, %v10506_v1  ;;  %v10490_v50 = vld [vmem:[#allocation16 + $0x50] sm:$0xf]  ;;  %v11312_v1 = vld [vmem:[#allocation16 + $0xe4] sm:$0xf]  ;;  %v10564_v20 = vld [vmem:[#allocation16 + $0xe8] sm:$0xf0] }
 0x619   :  { %v6538_v28 = vmax.f32 %v6507_v0, 0.0 }
 0x61a   :  { %v6450_v29 = vpop.f32.mrf.mxu1  ;;  %7461 = vmatpush.bf16.msrb.mxu0 %v10507_v13  ;;  %v13488_v13 = vld [vmem:[#allocation14] sm:$0x3] }
 0x61b   :  { %v6451_v12 = vadd.f32 %v6450_v29, %v6422_v47  ;;  %v6580_v49 = vmax.f32 %v13672_v30, %v6538_v28  ;;  %v13676_v28 = vld [vmem:[#allocation42_spill] sm:$0xff]  ;;  %v11296_v30 = vld [vmem:[#allocation16 + $0x64] sm:$0xf] }
 0x61d   :  { %v6480_v23 = vadd.f32 %v6479_v51, %v6451_v12 }
 0x61f   :  { %v6509_v15 = vadd.f32 %v6508_v24, %v6480_v23  ;;  %v6429_v57 = vpop.f32.mrf.mxu0  ;;  %v6487_v39 = vpop.f32.mrf.mxu2  ;;  %v13674_v24 = vmax.f32 %v13217_v36, 0.0 }
 0x620   :  { %v6430_v33 = vadd.f32 %v6429_v57, %v13393_v4  ;;  %v10474_v57 = vld [vmem:[#allocation16 + $0x30] sm:$0xf] }
 0x621   :  { %v6544_v3 = vmax.f32 %v6509_v15, 0.0 }
 0x622   :  { %v6453_v10 = vpop.f32.mrf.mxu1  ;;  %7146 = vmatmul.bf16.gmra.mxu0 %v13161_v35  ;;  %v10399_v35 = vor.u32 %v11270_v41, %v10396_v6  ;;  %v10492_v41 = vld [vmem:[#allocation16 + $0x58] sm:$0xf0] }
 0x623   :  { %v6454_v18 = vadd.f32 %v6453_v10, %v6425_v54  ;;  %7194 = vmatmul.bf16.gmra.mxu2 %v13390_v26  ;;  %v6584_v62 = vmax.f32 %v13673_v43, %v6544_v3  ;;  %v6513_v26 = vpop.f32.mrf.mxu3  ;;  %v10508_v10 = vld [vmem:[#allocation16 + $0x78] sm:$0xf0]  ;;  %v10500_v43 = vld [vmem:[#allocation16 + $0x68] sm:$0xf0] }
 0x624   :  { %7216 = vmatpush.bf16.msrb.mxu3 %v10399_v35  ;;  %v10511_v8 = vor.u32 %v11298_v61, %v10508_v10  ;;  %v10482_v35 = vld [vmem:[#allocation16 + $0x40] sm:$0xf]  ;;  %v10567_v61 = vor.u32 %v11312_v1, %v10564_v20 }
 0x625   :  { %7170 = vmatmul.bf16.gmra.mxu1 %v13236_v19  ;;  %v6608_v46 = vpack.c.bf16 %v6584_v62, %v6580_v49  ;;  %v6483_v17 = vadd.f32 %v6482_v16, %v6454_v18  ;;  %v11297_v18 = vld [vmem:[#allocation16 + $0x64] sm:$0xf0]  ;;  %v10503_v62 = vor.u32 %v11296_v30, %v10500_v43  ;;  %v11310_v43 = vld [vmem:[#allocation16 + $0xd4] sm:$0xf] }
 0x626   :  { %7519 = vmatpush.bf16.msra.mxu2 %v10511_v8  ;;  %v11313_v30 = vld [vmem:[#allocation16 + $0xe4] sm:$0xf0] }
 0x627   :  { %7107 = vmatmul.bf16.gmra.mxu3 %v6608_v46  ;;  %v6512_v53 = vadd.f32 %v6511_v38, %v6483_v17  ;;  %v6431_v4 = vpop.f32.mrf.mxu0  ;;  %v13678_v38 = vld [vmem:[#allocation43_spill] sm:$0xff]  ;;  %v11295_v17 = vld [vmem:[#allocation16 + $0x54] sm:$0xf0] }
 0x628   :  { %7217 = vmatpush.bf16.msrb.mxu3 %v10391_v60  ;;  %v6432_v63 = vadd.f32 %v6431_v4, %v6403_v59  ;;  %v13679_v54 = vmax.f32 %v13678_v38, 0.0  ;;  %v11291_v60 = vld [vmem:[#allocation16 + $0x34] sm:$0xf0]  ;;  %v10460_v59 = vld [vmem:[#allocation16 + $0x18] sm:$0xf0] }
 0x629   :  { %v6550_v58 = vmax.f32 %v6512_v53, 0.0  ;;  %v10484_v53 = vld [vmem:[#allocation16 + $0x48] sm:$0xf0]  ;;  %v10570_v38 = vld [vmem:[#allocation16 + $0xf0] sm:$0xf] }
 0x62a   :  { %v6455_v32 = vpop.f32.mrf.mxu1  ;;  %7520 = vmatpush.bf16.msra.mxu2 %v10503_v62  ;;  %v10556_v62 = vld [vmem:[#allocation16 + $0xd8] sm:$0xf0] }
 0x62b   :  { %v6456_v37 = vadd.f32 %v6455_v32, %v6427_v31  ;;  %v6588_v45 = vmax.f32 %v13674_v24, %v6550_v58  ;;  %v6516_v47 = vpop.f32.mrf.mxu3  ;;  %v11293_v31 = vld [vmem:[#allocation16 + $0x44] sm:$0xf0]  ;;  %v10475_v58 = vor.u32 %v11291_v60, %v10474_v57  ;;  %v11308_v57 = vld [vmem:[#allocation16 + $0xc4] sm:$0xf]  ;;  %v10548_v60 = vld [vmem:[#allocation16 + $0xc8] sm:$0xf0] }
 0x62c   :  { %v10483_v32 = vor.u32 %v11293_v31, %v10482_v35  ;;  %v10554_v35 = vld [vmem:[#allocation16 + $0xd0] sm:$0xf]  ;;  %v11311_v31 = vld [vmem:[#allocation16 + $0xd4] sm:$0xf0] }
 0x62d   :  { %v6485_v19 = vadd.f32 %v6484_v7, %v6456_v37 }
 0x62f   :  { %v6514_v21 = vadd.f32 %v6513_v26, %v6485_v19  ;;  %v13475_v7 = vpop.f32.mrf.mxu0  ;;  %v11292_v26 = vld [vmem:[#allocation16 + $0x44] sm:$0xf]  ;;  %v11290_v19 = vld [vmem:[#allocation16 + $0x34] sm:$0xf] }
 0x630   :  { %v10487_v5 = vor.u32 %v11292_v26, %v10484_v53 }
 0x631   :  { %v6556_v34 = vmax.f32 %v6514_v21, 0.0  ;;  %v10476_v21 = vld [vmem:[#allocation16 + $0x38] sm:$0xf0] }
 0x632   :  { %v6458_v25 = vpop.f32.mrf.mxu1 }
 0x633   :  { %v6459_v51 = vadd.f32 %v6458_v25, %v6430_v33  ;;  %7199 = vmatmul.bf16.gmra.mxu2 %v13411_v42  ;;  %v6592_v48 = vmax.f32 %v13675_v56, %v6556_v34  ;;  %v6489_v42 = vpop.f32.mrf.mxu2  ;;  %v6518_v36 = vpop.f32.mrf.mxu3  ;;  %v10479_v33 = vor.u32 %v11290_v19, %v10476_v21  ;;  %v10466_v34 = vld [vmem:[#allocation16 + $0x20] sm:$0xf]  ;;  %v11288_v25 = vld [vmem:[#allocation16 + $0x24] sm:$0xf] }
 0x635   :  { %7175 = vmatmul.bf16.gmra.mxu1 %v13270_v2  ;;  %v6612_v14 = vpack.c.bf16 %v6592_v48, %v6588_v45  ;;  %v6488_v29 = vadd.f32 %v6487_v39, %v6459_v51  ;;  %v13677_v2 = vmax.f32 %v13676_v28, 0.0  ;;  %v11289_v39 = vld [vmem:[#allocation16 + $0x24] sm:$0xf0]  ;;  %v10468_v51 = vld [vmem:[#allocation16 + $0x28] sm:$0xf0] }
 0x636   :  { %v10467_v55 = vor.u32 %v11289_v39, %v10466_v34  ;;  %v10471_v45 = vor.u32 %v11288_v25, %v10468_v51  ;;  %v10458_v48 = vld [vmem:[#allocation16 + $0x10] sm:$0xf]  ;;  %v10546_v51 = vld [vmem:[#allocation16 + $0xc0] sm:$0xf] }
 0x637   :  { %7112 = vmatmul.bf16.gmra.mxu3 %v6612_v14  ;;  %v6517_v22 = vadd.f32 %v6516_v47, %v6488_v29  ;;  %v7018_v24 = vpop.f32.mrf.mxu0  ;;  %v11287_v47 = vld [vmem:[#allocation16 + $0x14] sm:$0xf0] }
 0x638   :  { %v10459_v4 = vor.u32 %v11287_v47, %v10458_v48  ;;  %v10540_v48 = vld [vmem:[#allocation16 + $0xb8] sm:$0xf0] }
 0x639   :  { %v6562_v23 = vmax.f32 %v6517_v22, 0.0  ;;  %v11285_v22 = vld [vmem:[#allocation16 + $0x4] sm:$0xf0] }
 0x63a   :  { %v6460_v11 = vpop.f32.mrf.mxu1 }
 0x63b   :  { %v6461_v0 = vadd.f32 %v6460_v11, %v6432_v63  ;;  %v6596_v15 = vmax.f32 %v13677_v2, %v6562_v23  ;;  %v10450_v11 = vld [vmem:[#allocation16] sm:$0xf] }
 0x63d   :  { %v6490_v12 = vadd.f32 %v6489_v42, %v6461_v0  ;;  %v11284_v0 = vld [vmem:[#allocation16 + $0x4] sm:$0xf]  ;;  %v10451_v42 = vor.u32 %v11285_v22, %v10450_v11  ;;  %v10538_v11 = vld [vmem:[#allocation16 + $0xb0] sm:$0xf]  ;;  %v11307_v22 = vld [vmem:[#allocation16 + $0xb4] sm:$0xf0] }
 0x63f   :  { %v6519_v16 = vadd.f32 %v6518_v36, %v6490_v12  ;;  %v10452_v12 = vld [vmem:[#allocation16 + $0x8] sm:$0xf0]  ;;  %v13482_v23 = vpop.f32.mrf.mxu0 }
 0x640   :  { %v10455_v36 = vor.u32 %v11284_v0, %v10452_v12  ;;  %v10539_v0 = vor.u32 %v11307_v22, %v10538_v11 }
 0x641   :  { %v6568_v27 = vmax.f32 %v6519_v16, 0.0  ;;  %v11314_v16 = vld [vmem:[#allocation16 + $0xf4] sm:$0xf] }
 0x642   :  { %v13477_v37 = vpop.f32.mrf.mxu1 }
 0x643   :  { %7204 = vmatmul.bf16.gmra.mxu2 %v13423_v9  ;;  %v6600_v44 = vmax.f32 %v13679_v54, %v6568_v27  ;;  %v10498_v9 = vld [vmem:[#allocation16 + $0x60] sm:$0xf]  ;;  %v10572_v27 = vld [vmem:[#allocation16 + $0xf8] sm:$0xf0]  ;;  %v11315_v54 = vld [vmem:[#allocation16 + $0xf4] sm:$0xf0] }
 0x644   :  { %v10499_v49 = vor.u32 %v11297_v18, %v10498_v9  ;;  %v10575_v2 = vor.u32 %v11314_v16, %v10572_v27  ;;  %v13491_v9 = vperm.slane %v13488_v13, 0  ;;  %v10562_v18 = vld [vmem:[#allocation16 + $0xe0] sm:$0xf]  ;;  %v10532_v16 = vld [vmem:[#allocation16 + $0xa8] sm:$0xf0] }
 0x645   :  { %v13471_v3 = vpack.c.bf16 %v6600_v44, %v6596_v15  ;;  %v10571_v44 = vor.u32 %v11315_v54, %v10570_v38 }
 0x646   :  { %7462 = vmatpush.bf16.msrb.mxu0 %v10499_v49  ;;  %7548 = vmatpush.bf16.msra.mxu3 %v10575_v2  ;;  %v10563_v49 = vor.u32 %v11313_v30, %v10562_v18  ;;  %v10530_v18 = vld [vmem:[#allocation16 + $0xa0] sm:$0xf]  ;;  %v11305_v30 = vld [vmem:[#allocation16 + $0xa4] sm:$0xf0] }
 0x647   :  { %7117 = vmatmul.bf16.gmra.mxu3 %v13471_v3  ;;  %7490 = vmatpush.bf16.msrb.mxu1 %v10571_v44 }
 0x64a   :  { %v7047_v56 = vpop.f32.mrf.mxu1  ;;  %7549 = vmatpush.bf16.msra.mxu3 %v10567_v61 }
 0x64b   :  { %7491 = vmatpush.bf16.msrb.mxu1 %v10563_v49  ;;  %v10524_v49 = vld [vmem:[#allocation16 + $0x98] sm:$0xf0] }
 0x652   :  { %v13484_v28 = vpop.f32.mrf.mxu1 }
 0x656   :  { %v13479_v52 = vpop.f32.mrf.mxu2 }
 0x657   :  { %7218 = vmatmul.bf16.vlgmr.msrb.gmra.mxu3 %v13440_v40  ;;  %v11294_v40 = vld [vmem:[#allocation16 + $0x54] sm:$0xf] }
 0x658   :  { %v10495_v6 = vor.u32 %v11294_v40, %v10492_v41  ;;  %v7017_v40 = vadd.f32 %v13475_v7, %v13491_v9  ;;  %v7019_v41 = vadd.f32 %v7018_v24, %v13491_v9  ;;  %v10551_v7 = vor.u32 %v11308_v57, %v10548_v60  ;;  %v11309_v24 = vld [vmem:[#allocation16 + $0xc4] sm:$0xf0] }
 0x65a   :  { %7521 = vmatpush.bf16.msra.mxu2 %v10495_v6  ;;  %v7052_v10 = vpop.f32.mrf.mxu1  ;;  %v7046_v6 = vadd.f32 %v13477_v37, %v7017_v40  ;;  %v7048_v53 = vadd.f32 %v7047_v56, %v7019_v41  ;;  %v10547_v56 = vor.u32 %v11309_v24, %v10546_v51 }
 0x65e   :  { %7522 = vmatpush.bf16.msra.mxu2 %v10487_v5  ;;  %v7076_v29 = vpop.f32.mrf.mxu2  ;;  %v7075_v5 = vadd.f32 %v13479_v52, %v7046_v6  ;;  %v11306_v52 = vld [vmem:[#allocation16 + $0xb4] sm:$0xf]  ;;  %v10522_v6 = vld [vmem:[#allocation16 + $0x90] sm:$0xf] }
 0x662   :  { %7523 = vmatpush.bf16.msra.mxu2 %v10479_v33  ;;  %v13499_v26 = vpop.f32.mrf.mxu1 }
 0x666   :  { %7524 = vmatpush.bf16.msra.mxu2 %v10471_v45  ;;  %v13486_v15 = vpop.f32.mrf.mxu2 }
 0x667   :  { %7223 = vmatmul.bf16.gmra.mxu3 %v6608_v46  ;;  %v10491_v46 = vor.u32 %v11295_v17, %v10490_v50  ;;  %v10559_v17 = vor.u32 %v11310_v43, %v10556_v62 }
 0x669   :  { %7463 = vmatpush.bf16.msrb.mxu0 %v10491_v46  ;;  %7550 = vmatpush.bf16.msra.mxu3 %v10559_v17 }
 0x66a   :  { %v7057_v45 = vpop.f32.mrf.mxu1 }
 0x66d   :  { %7464 = vmatpush.bf16.msrb.mxu0 %v10483_v32  ;;  %v10555_v32 = vor.u32 %v11311_v31, %v10554_v35  ;;  %7551 = vmatpush.bf16.msra.mxu3 %v10551_v7  ;;  %v11303_v35 = vld [vmem:[#allocation16 + $0x94] sm:$0xf0] }
 0x66e   :  { %v7081_v8 = vpop.f32.mrf.mxu2 }
 0x66f   :  { %7492 = vmatpush.bf16.msrb.mxu1 %v10555_v32  ;;  %v10523_v32 = vor.u32 %v11303_v35, %v10522_v6 }
 0x671   :  { %7465 = vmatpush.bf16.msrb.mxu0 %v10475_v58  ;;  %v7077_v58 = vadd.f32 %v7076_v29, %v7048_v53  ;;  %v11300_v53 = vld [vmem:[#allocation16 + $0x84] sm:$0xf] }
 0x672   :  { %v7060_v44 = vpop.f32.mrf.mxu1 }
 0x673   :  { %7493 = vmatpush.bf16.msrb.mxu1 %v10547_v56 }
 0x675   :  { %7466 = vmatpush.bf16.msrb.mxu0 %v10467_v55 }
 0x676   :  { %v13502_v19 = vpop.f32.mrf.mxu2 }
 0x677   :  { %7228 = vmatmul.bf16.gmra.mxu3 %v6612_v14  ;;  %v11286_v14 = vld [vmem:[#allocation16 + $0x14] sm:$0xf]  ;;  %7494 = vmatpush.bf16.msrb.mxu1 %v10539_v0 }
 0x678   :  { %v10463_v63 = vor.u32 %v11286_v14, %v10460_v59  ;;  %v7022_v59 = vadd.f32 %v13482_v23, %v13491_v9 }
 0x679   :  { %7467 = vmatpush.bf16.msrb.mxu0 %v10459_v4  ;;  %v10543_v4 = vor.u32 %v11306_v52, %v10540_v48 }
 0x67a   :  { %7525 = vmatpush.bf16.msra.mxu2 %v10463_v63  ;;  %v7051_v63 = vadd.f32 %v13484_v28, %v7022_v59  ;;  %v7062_v17 = vpop.f32.mrf.mxu1 }
 0x67b   :  { %7552 = vmatpush.bf16.msra.mxu3 %v10543_v4 }
 0x67c   :  { %v7080_v12 = vadd.f32 %v13486_v15, %v7051_v63  ;;  %v11302_v15 = vld [vmem:[#allocation16 + $0x94] sm:$0xf] }
 0x67d   :  { %7468 = vmatpush.bf16.msrb.mxu0 %v10451_v42 }
 0x67e   :  { %7526 = vmatpush.bf16.msra.mxu2 %v10455_v36  ;;  %v7086_v47 = vpop.f32.mrf.mxu2  ;;  %v11304_v36 = vld [vmem:[#allocation16 + $0xa4] sm:$0xf] }
 0x67f   :  { %v10535_v2 = vor.u32 %v11304_v36, %v10532_v16  ;;  %v13517_v36 = vperm.slane %v13488_v13, 1 }
 0x681   :  { %7553 = vmatpush.bf16.msra.mxu3 %v10535_v2 }
 0x682   :  { %v7161_v51 = vpop.f32.mrf.mxu1 }
 0x686   :  { %v7089_v20 = vpop.f32.mrf.mxu2 }
 0x687   :  { %7233 = vmatmul.bf16.gmra.mxu3 %v13471_v3  ;;  %v7023_v3 = vpop.f32.mrf.mxu0 }
 0x688   :  { %v7024_v29 = vadd.f32 %v7023_v3, %v13491_v9 }
 0x68a   :  { %v7053_v42 = vadd.f32 %v7052_v10, %v7024_v29  ;;  %v10531_v10 = vor.u32 %v11305_v30, %v10530_v18  ;;  %v7163_v59 = vpop.f32.mrf.mxu1 }
 0x68c   :  { %v7082_v38 = vadd.f32 %v7081_v8, %v7053_v42  ;;  %7495 = vmatpush.bf16.msrb.mxu1 %v10531_v10  ;;  %v10527_v8 = vor.u32 %v11302_v15, %v10524_v49 }
 0x68e   :  { %7554 = vmatpush.bf16.msra.mxu3 %v10527_v8  ;;  %v7091_v31 = vpop.f32.mrf.mxu2 }
 0x68f   :  { %v13495_v46 = vpop.f32.mrf.mxu0 }
 0x690   :  { %7496 = vmatpush.bf16.msrb.mxu1 %v10523_v32 }
 0x696   :  { %v7190_v56 = vpop.f32.mrf.mxu2 }
 0x697   :  { %v7028_v25 = vpop.f32.mrf.mxu0 }
 0x698   :  { %v7029_v40 = vadd.f32 %v7028_v25, %v13491_v9 }
 0x69a   :  { %v7103_v50 = vpop.f32.mrf.mxu3  ;;  %v7058_v57 = vadd.f32 %v7057_v45, %v7029_v40 }
 0x69b   :  { %v7104_v21 = vadd.f32 %v7103_v50, %v7075_v5  ;;  %v7027_v50 = vadd.f32 %v13495_v46, %v13491_v9  ;;  %v10516_v5 = vld [vmem:[#allocation16 + $0x88] sm:$0xf0] }
 0x69c   :  { %v10519_v7 = vor.u32 %v11300_v53, %v10516_v5 }
 0x69d   :  { %v7239_v37 = vmax.f32 %v7104_v21, 0.0  ;;  %v7056_v41 = vadd.f32 %v13499_v26, %v7027_v50 }
 0x69e   :  { %7555 = vmatpush.bf16.msra.mxu3 %v10519_v7  ;;  %v7192_v11 = vpop.f32.mrf.mxu2 }
 0x69f   :  { %v7031_v27 = vpop.f32.mrf.mxu0  ;;  %v7085_v60 = vadd.f32 %v13502_v19, %v7056_v41 }
 0x6a0   :  { %v7032_v45 = vadd.f32 %v7031_v27, %v13491_v9 }
 0x6a2   :  { %v7105_v33 = vpop.f32.mrf.mxu3  ;;  %v7061_v48 = vadd.f32 %v7060_v44, %v7032_v45 }
 0x6a3   :  { %v7106_v34 = vadd.f32 %v7105_v33, %v7077_v58  ;;  %v7087_v58 = vadd.f32 %v7086_v47, %v7058_v57 }
 0x6a4   :  { %v7090_v4 = vadd.f32 %v7089_v20, %v7061_v48 }
 0x6a5   :  { %v7241_v39 = vmax.f32 %v7106_v34, 0.0 }
 0x6a7   :  { %v7255_v55 = vpack.c.bf16 %v7241_v39, %v7239_v37  ;;  %v7033_v43 = vpop.f32.mrf.mxu0  ;;  %v10514_v37 = vld [vmem:[#allocation16 + $0x80] sm:$0xf]  ;;  %v11301_v39 = vld [vmem:[#allocation16 + $0x84] sm:$0xf0] }
 0x6a8   :  { %v7034_v52 = vadd.f32 %v7033_v43, %v13491_v9  ;;  %v7166_v9 = vpop.f32.mrf.mxu1 }
 0x6a9   :  { %7469 = vmatmul.bf16.vlgmr.msrb.gmra.mxu0 %v7255_v55  ;;  %7527 = vmatmul.bf16.vlgmr.msra.gmra.mxu2 %v7255_v55  ;;  %v10515_v55 = vor.u32 %v11301_v39, %v10514_v37 }
 0x6aa   :  { %v7108_v14 = vpop.f32.mrf.mxu3 }
 0x6ab   :  { %v7109_v54 = vadd.f32 %v7108_v14, %v7080_v12  ;;  %7497 = vmatpush.bf16.msrb.mxu1 %v10515_v55  ;;  %v7063_v14 = vadd.f32 %v7062_v17, %v7034_v52 }
 0x6ad   :  { %v7243_v61 = vmax.f32 %v7109_v54, 0.0  ;;  %v7092_v29 = vadd.f32 %v7091_v31, %v7063_v14  ;;  %v7195_v54 = vpop.f32.mrf.mxu2 }
 0x6af   :  { %v7132_v34 = vpop.f32.mrf.mxu0 }
 0x6b0   :  { %v7168_v30 = vpop.f32.mrf.mxu1 }
 0x6b2   :  { %v7110_v23 = vpop.f32.mrf.mxu3 }
 0x6b3   :  { %v7111_v1 = vadd.f32 %v7110_v23, %v7082_v38  ;;  %v7133_v38 = vadd.f32 %v7132_v34, %v13517_v36 }
 0x6b5   :  { %v7245_v28 = vmax.f32 %v7111_v1, 0.0  ;;  %v7162_v23 = vadd.f32 %v7161_v51, %v7133_v38  ;;  %v7197_v49 = vpop.f32.mrf.mxu2 }
 0x6b7   :  { %v7257_v3 = vpack.c.bf16 %v7245_v28, %v7243_v61  ;;  %v7134_v47 = vpop.f32.mrf.mxu0  ;;  %v7191_v20 = vadd.f32 %v7190_v56, %v7162_v23 }
 0x6b8   :  { %v7135_v44 = vadd.f32 %v7134_v47, %v13517_v36  ;;  %v7171_v41 = vpop.f32.mrf.mxu1 }
 0x6b9   :  { %7474 = vmatmul.bf16.gmra.mxu0 %v7257_v3  ;;  %7532 = vmatmul.bf16.gmra.mxu2 %v7257_v3 }
 0x6ba   :  { %v7113_v62 = vpop.f32.mrf.mxu3  ;;  %v7164_v1 = vadd.f32 %v7163_v59, %v7135_v44 }
 0x6bb   :  { %v7114_v21 = vadd.f32 %v7113_v62, %v7085_v60 }
 0x6bc   :  { %v7193_v61 = vadd.f32 %v7192_v11, %v7164_v1  ;;  %v11323_v1 = vld [vmem:[#allocation19 + $0x38] sm:$0xff] }
 0x6bd   :  { %v7247_v26 = vmax.f32 %v7114_v21, 0.0  ;;  %v7200_v31 = vpop.f32.mrf.mxu2  ;;  %7733 = vmatpush.bf16.msra.mxu0 %v11323_v1 }
 0x6bf   :  { %v7137_v2 = vpop.f32.mrf.mxu0 }
 0x6c0   :  { %v7138_v8 = vadd.f32 %v7137_v2, %v13517_v36 }
 0x6c2   :  { %v7115_v46 = vpop.f32.mrf.mxu3  ;;  %v7167_v40 = vadd.f32 %v7166_v9, %v7138_v8  ;;  %v11316_v8 = vld [vmem:[#allocation19] sm:$0xff] }
 0x6c3   :  { %v7116_v33 = vadd.f32 %v7115_v46, %v7087_v58  ;;  %v7173_v46 = vpop.f32.mrf.mxu1 }
 0x6c4   :  { %v7196_v35 = vadd.f32 %v7195_v54, %v7167_v40 }
 0x6c5   :  { %v7249_v25 = vmax.f32 %v7116_v33, 0.0  ;;  %v7202_v33 = vpop.f32.mrf.mxu2 }
 0x6c7   :  { %v7259_v24 = vpack.c.bf16 %v7249_v25, %v7247_v26  ;;  %v7139_v3 = vpop.f32.mrf.mxu0 }
 0x6c8   :  { %v7140_v17 = vadd.f32 %v7139_v3, %v13517_v36  ;;  %v11329_v3 = vld [vmem:[#allocation19 + $0x68] sm:$0xff] }
 0x6c9   :  { %7479 = vmatmul.bf16.gmra.mxu0 %v7259_v24  ;;  %7537 = vmatmul.bf16.gmra.mxu2 %v7259_v24 }
 0x6ca   :  { %v7118_v19 = vpop.f32.mrf.mxu3  ;;  %v7169_v6 = vadd.f32 %v7168_v30, %v7140_v17  ;;  %v11319_v30 = vld [vmem:[#allocation19 + $0x18] sm:$0xff] }
 0x6cb   :  { %v7119_v63 = vadd.f32 %v7118_v19, %v7090_v4  ;;  %v7176_v19 = vpop.f32.mrf.mxu1 }
 0x6cc   :  { %v7198_v32 = vadd.f32 %v7197_v49, %v7169_v6  ;;  %v11326_v49 = vld [vmem:[#allocation19 + $0x50] sm:$0xff]  ;;  %v7295_v6 = vld [vmem:[#allocation17] sm:$0x3] }
 0x6cd   :  { %v7251_v42 = vmax.f32 %v7119_v63, 0.0  ;;  %v7205_v48 = vpop.f32.mrf.mxu2 }
 0x6cf   :  { %v7142_v50 = vpop.f32.mrf.mxu0 }
 0x6d0   :  { %v7143_v37 = vadd.f32 %v7142_v50, %v13517_v36  ;;  %v11324_v50 = vld [vmem:[#allocation19 + $0x40] sm:$0xff] }
 0x6d2   :  { %v7120_v22 = vpop.f32.mrf.mxu3  ;;  %v7172_v26 = vadd.f32 %v7171_v41, %v7143_v37 }
 0x6d3   :  { %v7121_v0 = vadd.f32 %v7120_v22, %v7092_v29  ;;  %v7178_v11 = vpop.f32.mrf.mxu1 }
 0x6d4   :  { %v7201_v55 = vadd.f32 %v7200_v31, %v7172_v26 }
 0x6d5   :  { %v7253_v12 = vmax.f32 %v7121_v0, 0.0 }
 0x6d7   :  { %v7261_v16 = vpack.c.bf16 %v7253_v12, %v7251_v42  ;;  %v7144_v58 = vpop.f32.mrf.mxu0  ;;  %v7207_v42 = vpop.f32.mrf.mxu2 }
 0x6d8   :  { %v7145_v39 = vadd.f32 %v7144_v58, %v13517_v36 }
 0x6d9   :  { %7484 = vmatmul.bf16.gmra.mxu0 %v7261_v16  ;;  %7542 = vmatmul.bf16.gmra.mxu2 %v7261_v16 }
 0x6da   :  { %v7219_v27 = vpop.f32.mrf.mxu3  ;;  %v7174_v25 = vadd.f32 %v7173_v46, %v7145_v39 }
 0x6db   :  { %v7220_v28 = vadd.f32 %v7219_v27, %v7191_v20  ;;  %v11331_v20 = vld [vmem:[#allocation19 + $0x78] sm:$0xff] }
 0x6dc   :  { %v7203_v24 = vadd.f32 %v7202_v33, %v7174_v25  ;;  %7762 = vmatpush.bf16.msra.mxu1 %v11331_v20 }
 0x6dd   :  { %v7240_v10 = vmax.f32 %v7220_v28, 0.0  ;;  %v11330_v28 = vld [vmem:[#allocation19 + $0x70] sm:$0xff] }
 0x6df   :  { %v7147_v51 = vpop.f32.mrf.mxu0 }
 0x6e0   :  { %v7148_v63 = vadd.f32 %v7147_v51, %v13517_v36  ;;  %7763 = vmatpush.bf16.msra.mxu1 %v11330_v28 }
 0x6e2   :  { %v7221_v18 = vpop.f32.mrf.mxu3  ;;  %v7177_v0 = vadd.f32 %v7176_v19, %v7148_v63 }
 0x6e3   :  { %v7222_v13 = vadd.f32 %v7221_v18, %v7193_v61  ;;  %v11322_v61 = vld [vmem:[#allocation19 + $0x30] sm:$0xff]  ;;  %v11320_v18 = vld [vmem:[#allocation19 + $0x20] sm:$0xff] }
 0x6e4   :  { %v7206_v16 = vadd.f32 %v7205_v48, %v7177_v0  ;;  %7734 = vmatpush.bf16.msra.mxu0 %v11322_v61  ;;  %7764 = vmatpush.bf16.msra.mxu1 %v11329_v3 }
 0x6e5   :  { %v7242_v15 = vmax.f32 %v7222_v13, 0.0  ;;  %v11328_v13 = vld [vmem:[#allocation19 + $0x60] sm:$0xff] }
 0x6e7   :  { %v7256_v43 = vpack.c.bf16 %v7242_v15, %v7240_v10  ;;  %v7149_v59 = vpop.f32.mrf.mxu0  ;;  %v11327_v10 = vld [vmem:[#allocation19 + $0x58] sm:$0xff]  ;;  %v11318_v15 = vld [vmem:[#allocation19 + $0x10] sm:$0xff] }
 0x6e8   :  { %v7150_v22 = vadd.f32 %v7149_v59, %v13517_v36  ;;  %v11321_v36 = vld [vmem:[#allocation19 + $0x28] sm:$0xff]  ;;  %7765 = vmatpush.bf16.msra.mxu1 %v11328_v13 }
 0x6e9   :  { %7498 = vmatmul.bf16.vlgmr.msrb.gmra.mxu1 %v7256_v43  ;;  %7556 = vmatmul.bf16.vlgmr.msra.gmra.mxu3 %v7256_v43  ;;  %v11317_v43 = vld [vmem:[#allocation19 + $0x8] sm:$0xff] }
 0x6ea   :  { %v7224_v62 = vpop.f32.mrf.mxu3  ;;  %v7179_v12 = vadd.f32 %v7178_v11, %v7150_v22  ;;  %7735 = vmatpush.bf16.msra.mxu0 %v11321_v36 }
 0x6eb   :  { %v7225_v53 = vadd.f32 %v7224_v62, %v7196_v35  ;;  %v11325_v62 = vld [vmem:[#allocation19 + $0x48] sm:$0xff] }
 0x6ec   :  { %v7208_v2 = vadd.f32 %v7207_v42, %v7179_v12  ;;  %7766 = vmatpush.bf16.msra.mxu1 %v11327_v10 }
 0x6ed   :  { %v7244_v60 = vmax.f32 %v7225_v53, 0.0 }
 0x6ee   :  { %7736 = vmatpush.bf16.msra.mxu0 %v11320_v18 }
 0x6f0   :  { %7767 = vmatpush.bf16.msra.mxu1 %v11326_v49 }
 0x6f2   :  { %v7226_v5 = vpop.f32.mrf.mxu3  ;;  %7737 = vmatpush.bf16.msra.mxu0 %v11319_v30 }
 0x6f3   :  { %v7227_v57 = vadd.f32 %v7226_v5, %v7198_v32  ;;  %v13527_v32 = vperm.slane %v7295_v6, 0 }
 0x6f4   :  { %7768 = vmatpush.bf16.msra.mxu1 %v11325_v62 }
 0x6f5   :  { %v7246_v7 = vmax.f32 %v7227_v57, 0.0 }
 0x6f6   :  { %7738 = vmatpush.bf16.msra.mxu0 %v11318_v15 }
 0x6f7   :  { %v7258_v21 = vpack.c.bf16 %v7246_v7, %v7244_v60  ;;  %v13530_v60 = vperm.slane %v7295_v6, 1 }
 0x6f8   :  { %7769 = vmatpush.bf16.msra.mxu1 %v11324_v50 }
 0x6f9   :  { %7503 = vmatmul.bf16.gmra.mxu1 %v7258_v21  ;;  %7561 = vmatmul.bf16.gmra.mxu3 %v7258_v21 }
 0x6fa   :  { %v7229_v34 = vpop.f32.mrf.mxu3  ;;  %7739 = vmatpush.bf16.msra.mxu0 %v11317_v43 }
 0x6fb   :  { %v7230_v56 = vadd.f32 %v7229_v34, %v7201_v55 }
 0x6fd   :  { %v7248_v47 = vmax.f32 %v7230_v56, 0.0 }
 0x6fe   :  { %7740 = vmatpush.bf16.msra.mxu0 %v11316_v8 }
 0x702   :  { %v7231_v45 = vpop.f32.mrf.mxu3 }
 0x703   :  { %v7232_v52 = vadd.f32 %v7231_v45, %v7203_v24 }
 0x705   :  { %v7250_v14 = vmax.f32 %v7232_v52, 0.0 }
 0x707   :  { %v7260_v4 = vpack.c.bf16 %v7250_v14, %v7248_v47 }
 0x709   :  { %7508 = vmatmul.bf16.gmra.mxu1 %v7260_v4  ;;  %7566 = vmatmul.bf16.gmra.mxu3 %v7260_v4 }
 0x70a   :  { %v7234_v29 = vpop.f32.mrf.mxu3 }
 0x70b   :  { %v7235_v9 = vadd.f32 %v7234_v29, %v7206_v16 }
 0x70d   :  { %v7252_v54 = vmax.f32 %v7235_v9, 0.0 }
 0x712   :  { %v7236_v27 = vpop.f32.mrf.mxu3 }
 0x713   :  { %v7237_v38 = vadd.f32 %v7236_v27, %v7208_v2 }
 0x715   :  { %v7254_v44 = vmax.f32 %v7237_v38, 0.0 }
 0x717   :  { %v7262_v23 = vpack.c.bf16 %v7254_v44, %v7252_v54 }
 0x719   :  { %7513 = vmatmul.bf16.gmra.mxu1 %v7262_v23  ;;  %7571 = vmatmul.bf16.gmra.mxu3 %v7262_v23 }
 0x726   :  { %v7470_v17 = vpop.f32.mrf.mxu0 }
 0x727   :  { %v7471_v5 = vadd.f32 %v7470_v17, %v13527_v32 }
 0x72c   :  { %v7528_v40 = vpop.f32.mrf.mxu2 }
 0x72d   :  { %v7529_v34 = vadd.f32 %v7528_v40, %v13530_v60 }
 0x72e   :  { %v7472_v41 = vpop.f32.mrf.mxu0 }
 0x72f   :  { %v7473_v7 = vadd.f32 %v7472_v41, %v13527_v32 }
 0x734   :  { %v7530_v35 = vpop.f32.mrf.mxu2 }
 0x735   :  { %v7531_v25 = vadd.f32 %v7530_v35, %v13530_v60 }
 0x736   :  { %v7475_v53 = vpop.f32.mrf.mxu0 }
 0x737   :  { %v7476_v14 = vadd.f32 %v7475_v53, %v13527_v32 }
 0x73c   :  { %v7533_v21 = vpop.f32.mrf.mxu2 }
 0x73d   :  { %v7534_v0 = vadd.f32 %v7533_v21, %v13530_v60 }
 0x73e   :  { %v7477_v26 = vpop.f32.mrf.mxu0 }
 0x73f   :  { %v7478_v29 = vadd.f32 %v7477_v26, %v13527_v32 }
 0x744   :  { %v7535_v48 = vpop.f32.mrf.mxu2 }
 0x745   :  { %v7536_v2 = vadd.f32 %v7535_v48, %v13530_v60 }
 0x746   :  { %v7480_v4 = vpop.f32.mrf.mxu0 }
 0x747   :  { %v7481_v28 = vadd.f32 %v7480_v4, %v13527_v32 }
 0x74c   :  { %v7538_v16 = vpop.f32.mrf.mxu2 }
 0x74d   :  { %v7539_v49 = vadd.f32 %v7538_v16, %v13530_v60 }
 0x74e   :  { %v7482_v44 = vpop.f32.mrf.mxu0 }
 0x74f   :  { %v7483_v18 = vadd.f32 %v7482_v44, %v13527_v32 }
 0x754   :  { %v7540_v36 = vpop.f32.mrf.mxu2 }
 0x755   :  { %v7541_v8 = vadd.f32 %v7540_v36, %v13530_v60 }
 0x756   :  { %v7485_v15 = vpop.f32.mrf.mxu0 }
 0x75c   :  { %v7543_v6 = vpop.f32.mrf.mxu2 }
 0x766   :  { %v7499_v31 = vpop.f32.mrf.mxu1 }
 0x767   :  { %v7500_v58 = vadd.f32 %v7499_v31, %v7471_v5 }
 0x769   :  { %v7577_v37 = vmax.f32 %v7500_v58, 0.0 }
 0x76c   :  { %v7557_v57 = vpop.f32.mrf.mxu3 }
 0x76d   :  { %v7558_v55 = vadd.f32 %v7557_v57, %v7529_v34  ;;  %v7487_v57 = vpop.f32.mrf.mxu0 }
 0x76e   :  { %v7501_v46 = vpop.f32.mrf.mxu1  ;;  %v7488_v21 = vadd.f32 %v7487_v57, %v13527_v32 }
 0x76f   :  { %v7502_v33 = vadd.f32 %v7501_v46, %v7473_v7  ;;  %v7578_v45 = vmax.f32 %v7558_v55, 0.0  ;;  %v7486_v7 = vadd.f32 %v7485_v15, %v13527_v32 }
 0x771   :  { %v7579_v39 = vmax.f32 %v7502_v33, 0.0 }
 0x773   :  { %v7593_v51 = vpack.c.bf16 %v7579_v39, %v7577_v37  ;;  %v7545_v37 = vpop.f32.mrf.mxu2  ;;  %v7544_v39 = vadd.f32 %v7543_v6, %v13530_v60 }
 0x774   :  { %v7559_v24 = vpop.f32.mrf.mxu3  ;;  %v7546_v55 = vadd.f32 %v7545_v37, %v13530_v60 }
 0x775   :  { %v7560_v56 = vadd.f32 %v7559_v24, %v7531_v25  ;;  %7741 = vmatmul.bf16.vlgmr.msra.gmra.mxu0 %v7593_v51 }
 0x776   :  { %v7504_v19 = vpop.f32.mrf.mxu1 }
 0x777   :  { %v7580_v52 = vmax.f32 %v7560_v56, 0.0  ;;  %v7505_v63 = vadd.f32 %v7504_v19, %v7476_v14 }
 0x779   :  { %v7594_v47 = vpack.c.bf16 %v7580_v52, %v7578_v45  ;;  %v7581_v42 = vmax.f32 %v7505_v63, 0.0 }
 0x77b   :  { %7770 = vmatmul.bf16.vlgmr.msra.gmra.mxu1 %v7594_v47  ;;  %v11353_v47 = vld [vmem:[#allocation20] ss:$0 sm:$0xff] }
 0x77c   :  { %v7562_v59 = vpop.f32.mrf.mxu3 }
 0x77d   :  { %v7563_v9 = vadd.f32 %v7562_v59, %v7534_v0 }
 0x77e   :  { %v7506_v11 = vpop.f32.mrf.mxu1 }
 0x77f   :  { %v7507_v22 = vadd.f32 %v7506_v11, %v7478_v29  ;;  %v7582_v1 = vmax.f32 %v7563_v9, 0.0 }
 0x781   :  { %v7583_v12 = vmax.f32 %v7507_v22, 0.0 }
 0x783   :  { %v7595_v27 = vpack.c.bf16 %v7583_v12, %v7581_v42 }
 0x784   :  { %v7564_v38 = vpop.f32.mrf.mxu3 }
 0x785   :  { %v7565_v54 = vadd.f32 %v7564_v38, %v7536_v2  ;;  %7746 = vmatmul.bf16.gmra.mxu0 %v7595_v27 }
 0x786   :  { %v7509_v23 = vpop.f32.mrf.mxu1 }
 0x787   :  { %v7584_v20 = vmax.f32 %v7565_v54, 0.0  ;;  %v7510_v13 = vadd.f32 %v7509_v23, %v7481_v28 }
 0x789   :  { %v7596_v61 = vpack.c.bf16 %v7584_v20, %v7582_v1  ;;  %v7585_v43 = vmax.f32 %v7510_v13, 0.0 }
 0x78b   :  { %7775 = vmatmul.bf16.gmra.mxu1 %v7596_v61 }
 0x78c   :  { %v7567_v3 = vpop.f32.mrf.mxu3 }
 0x78d   :  { %v7568_v50 = vadd.f32 %v7567_v3, %v7539_v49 }
 0x78e   :  { %v7511_v30 = vpop.f32.mrf.mxu1 }
 0x78f   :  { %v7512_v10 = vadd.f32 %v7511_v30, %v7483_v18  ;;  %v7586_v31 = vmax.f32 %v7568_v50, 0.0 }
 0x791   :  { %v7587_v62 = vmax.f32 %v7512_v10, 0.0 }
 0x793   :  { %v7597_v17 = vpack.c.bf16 %v7587_v62, %v7585_v43 }
 0x794   :  { %v7569_v40 = vpop.f32.mrf.mxu3 }
 0x795   :  { %v7570_v41 = vadd.f32 %v7569_v40, %v7541_v8  ;;  %7751 = vmatmul.bf16.gmra.mxu0 %v7597_v17 }
 0x796   :  { %v7514_v35 = vpop.f32.mrf.mxu1 }
 0x797   :  { %v7588_v53 = vmax.f32 %v7570_v41, 0.0  ;;  %v7515_v46 = vadd.f32 %v7514_v35, %v7486_v7 }
 0x799   :  { %v7598_v5 = vpack.c.bf16 %v7588_v53, %v7586_v31  ;;  %v7589_v26 = vmax.f32 %v7515_v46, 0.0 }
 0x79b   :  { %7780 = vmatmul.bf16.gmra.mxu1 %v7598_v5 }
 0x79c   :  { %v7572_v58 = vpop.f32.mrf.mxu3 }
 0x79d   :  { %v7573_v51 = vadd.f32 %v7572_v58, %v7544_v39 }
 0x79e   :  { %v7516_v33 = vpop.f32.mrf.mxu1 }
 0x79f   :  { %v7517_v34 = vadd.f32 %v7516_v33, %v7488_v21  ;;  %v7590_v45 = vmax.f32 %v7573_v51, 0.0 }
 0x7a1   :  { %v7591_v25 = vmax.f32 %v7517_v34, 0.0 }
 0x7a3   :  { %v7599_v24 = vpack.c.bf16 %v7591_v25, %v7589_v26 }
 0x7a4   :  { %v7574_v56 = vpop.f32.mrf.mxu3 }
 0x7a5   :  { %v7575_v19 = vadd.f32 %v7574_v56, %v7546_v55  ;;  %7756 = vmatmul.bf16.gmra.mxu0 %v7599_v24 }
 0x7a7   :  { %v7592_v52 = vmax.f32 %v7575_v19, 0.0 }
 0x7a9   :  { %v7600_v48 = vpack.c.bf16 %v7592_v52, %v7590_v45 }
 0x7ab   :  { %7785 = vmatmul.bf16.gmra.mxu1 %v7600_v48 }
 0x7f2   :  { %v7742_v32 = vpop.f32.mrf.mxu0 }
 0x7f3   :  { %v7743_v14 = vadd.f32 %v11353_v47, %v7742_v32 }
 0x7f8   :  { %v7771_v4 = vpop.f32.mrf.mxu1 }
 0x7f9   :  { %v7772_v59 = vadd.f32 %v7771_v4, %v7743_v14 }
 0x7fa   :  { %v7744_v29 = vpop.f32.mrf.mxu0 }
 0x7fb   :  { %7791 = vst [vmem:[#allocation22] sm:$0xff] %v7772_v59  ;;  %v7745_v63 = vadd.f32 %v11353_v47, %v7744_v29 }
 0x800   :  { %v7773_v11 = vpop.f32.mrf.mxu1 }
 0x801   :  { %v7774_v22 = vadd.f32 %v7773_v11, %v7745_v63 }
 0x802   :  { %v7747_v60 = vpop.f32.mrf.mxu0 }
 0x803   :  { %7792 = vst [vmem:[#allocation22 + $0x8] sm:$0xff] %v7774_v22  ;;  %v7748_v0 = vadd.f32 %v11353_v47, %v7747_v60 }
 0x808   :  { %v7776_v42 = vpop.f32.mrf.mxu1 }
 0x809   :  { %v7777_v12 = vadd.f32 %v7776_v42, %v7748_v0 }
 0x80a   :  { %v7749_v16 = vpop.f32.mrf.mxu0 }
 0x80b   :  { %7793 = vst [vmem:[#allocation22 + $0x10] sm:$0xff] %v7777_v12  ;;  %v7750_v2 = vadd.f32 %v11353_v47, %v7749_v16 }
 0x810   :  { %v7778_v9 = vpop.f32.mrf.mxu1 }
 0x811   :  { %v7779_v27 = vadd.f32 %v7778_v9, %v7750_v2 }
 0x812   :  { %v7752_v38 = vpop.f32.mrf.mxu0 }
 0x813   :  { %7794 = vst [vmem:[#allocation22 + $0x18] sm:$0xff] %v7779_v27  ;;  %v7753_v54 = vadd.f32 %v11353_v47, %v7752_v38 }
 0x818   :  { %v7781_v44 = vpop.f32.mrf.mxu1 }
 0x819   :  { %v7782_v23 = vadd.f32 %v7781_v44, %v7753_v54 }
 0x81a   :  { %v7754_v1 = vpop.f32.mrf.mxu0 }
 0x81b   :  { %7795 = vst [vmem:[#allocation22 + $0x20] sm:$0xff] %v7782_v23  ;;  %v7755_v20 = vadd.f32 %v11353_v47, %v7754_v1 }
 0x820   :  { %v7783_v61 = vpop.f32.mrf.mxu1 }
 0x821   :  { %v7784_v28 = vadd.f32 %v7783_v61, %v7755_v20 }
 0x822   :  { %v7757_v36 = vpop.f32.mrf.mxu0 }
 0x823   :  { %7796 = vst [vmem:[#allocation22 + $0x28] sm:$0xff] %v7784_v28  ;;  %v7758_v3 = vadd.f32 %v11353_v47, %v7757_v36 }
 0x828   :  { %v7786_v18 = vpop.f32.mrf.mxu1 }
 0x829   :  { %v7787_v13 = vadd.f32 %v7786_v18, %v7758_v3 }
 0x82a   :  { %v7759_v30 = vpop.f32.mrf.mxu0 }
 0x82b   :  { %7797 = vst [vmem:[#allocation22 + $0x30] sm:$0xff] %v7787_v13  ;;  %v7760_v10 = vadd.f32 %v11353_v47, %v7759_v30 }
 0x830   :  { %v7788_v15 = vpop.f32.mrf.mxu1 }
 0x831   :  { %v7789_v49 = vadd.f32 %v7788_v15, %v7760_v10 }
 0x833   :  { %7798 = vst [vmem:[#allocation22 + $0x38] sm:$0xff] %v7789_v49 }
 0x834   :  { %7811 = dma.vmem_to_hbm [thread:$0]  %s7804_s27, 1024, %s7806_s29, [#allocation4], %s11697_s30, %s11697_s30, %s11698_s14  }
 0x835   :  { %11684 = dma.done.wait [#allocation4], 1024  }
 0x836   :  { %11685 = vsyncadd [#allocation4], 4294966272 }
 0x837   :  { %7816 = vsyncpa [#allocation3], 1 }
 0x838   :  { %7817 = vsyncpa [#allocation6], 1 }
 0x839   :  { %7818 = vsyncpa [#allocation9], 1 }
 0x83a   :  { %7819 = vsyncpa [#allocation12], 1 }
 0x83b   :  { %7820 = vsyncpa [#allocation15], 1 }
 0x83c   :  { %7821 = vsyncpa [#allocation18], 1 }
 0x83d   :  { %7822 = vsyncpa [#allocation21], 1 }
 0x83e   :  { %7823 = vsyncpa [#allocation4], 1 }

</bundles_post_ra>
